<compile_context>
chip_gen: v6e
topology: v6e:2x2x1
jax: 0.10.0
libtpu: 0.0.40
codegen_flags: <defaults>
</compile_context>

<pallas_src>
import functools
import math

import jax
import jax.numpy as jnp
from jax.experimental import pallas as pl
from jax.experimental.pallas import tpu as pltpu

# ----------------------------- configuration (small, synthetic) ---------------------------
IMG_SIZE = 64                      # ChannelTransformer img_size
CHANNEL_NUM = (8, 16, 24)          # channel_num (orig [96,96,96])
PATCH_SIZE = (4, 2, 1)             # patchSize
KV_SIZE = sum(CHANNEL_NUM)         # config.KV_size = sum(channel_num) = 48
NUM_HEADS = 2                      # config.transformer['num_heads']
NUM_LAYERS = 2                     # config.transformer['num_layers'] (>=2 so probs exist)
EXPAND_RATIO = 2                   # config.expand_ratio
BATCH = 2
N_PATCHES = (IMG_SIZE // 16) ** 2  # same n_patches for all three scales (= 16)
PROBS_LAYER = 1                    # the M_return Block_ViT (layer index 1)

OFFS = (0, CHANNEL_NUM[0], CHANNEL_NUM[0] + CHANNEL_NUM[1])    # channel offsets in concat
HOFFS = tuple(EXPAND_RATIO * o for o in OFFS)                  # hidden offsets (2*C)
HID_TOTAL = EXPAND_RATIO * KV_SIZE                             # 96

F32 = jnp.float32


# --------------------------------- small dot helpers (kernel-side) ------------------------
def _mm_nt(a, b):
    # a:(M,K) @ b:(N,K)^T -> (M,N)
    return jax.lax.dot_general(a, b, (((1,), (1,)), ((), ())),
                               preferred_element_type=jnp.float32)


def _mm_tn(a, b):
    # a:(K,M)^T @ b:(K,N) -> (M,N)
    return jax.lax.dot_general(a, b, (((0,), (0,)), ((), ())),
                               preferred_element_type=jnp.float32)


def _block_ln(x, ablk, g, b, eps):
    # Per-scale LayerNorm on the channel-concatenated layout.  `ablk` is the symmetric
    # block-averaging matrix (ablk[c,c'] = 1/C_blk if c, c' in the same scale block).
    m = jnp.dot(x, ablk, preferred_element_type=jnp.float32)
    d = x - m
    v = jnp.dot(d * d, ablk, preferred_element_type=jnp.float32)
    return d * jax.lax.rsqrt(v + eps) * g + b


def _full_ln(x, g, b, eps):
    # Standard LayerNorm over the full KV_size lane dimension.
    m = jnp.mean(x, axis=-1, keepdims=True)
    d = x - m
    v = jnp.mean(d * d, axis=-1, keepdims=True)
    return d * jax.lax.rsqrt(v + eps) * g + b


def _erf_approx(x):
    # Abramowitz & Stegun 7.1.26, |error| <= 1.5e-7.  (lax.erf lowering in Mosaic is
    # not guaranteed, so exact-GELU's erf is evaluated with exp, which always lowers.)
    p = 0.3275911
    a1, a2, a3, a4, a5 = 0.254829592, -0.284496736, 1.421413741, -1.453152027, 1.061405429
    s = jnp.where(x >= 0.0, 1.0, -1.0)
    ax = jnp.abs(x)
    t = 1.0 / (1.0 + p * ax)
    poly = ((((a5 * t + a4) * t + a3) * t + a2) * t + a1) * t
    return s * (1.0 - poly * jnp.exp(-ax * ax))


def _gelu(x):
    # matches torch.nn.GELU() (exact erf form) to ~1e-7
    return 0.5 * x * (1.0 + _erf_approx(x * 0.7071067811865476))


# ----------------------------------- the fused kernel --------------------------------------
def _ct_fused_kernel(
        # ---- inputs ---------------------------------------------------------------------
        xp1_ref, xp2_ref, xp3_ref,                  # im2col patches per scale (B*n, Cin*P*P)
        we1_ref, we2_ref, we3_ref,                  # packed patch-embed weights (KV, Cin*P*P)
        bp_ref,                                     # conv bias + position embeddings (B*n, KV)
        ablk_ref,                                   # block-averaging matrix (KV, KV)
        ln_ag_ref, ln_ab_ref,                       # per-scale attn LN gamma/beta (L,1,KV)
        ln_Ag_ref, ln_Ab_ref,                       # KV-size attn LN gamma/beta   (L,1,KV)
        wq_ref, wk_ref, wv_ref,                     # (L,H,KV,KV) (wq block-diag over scales)
        wo_ref,                                     # (L,KV,KV) block-diag out-proj
        ffn_g_ref, ffn_b_ref,                       # per-scale ffn LN gamma/beta  (L,1,KV)
        w1_ref, b1_ref, w2_ref, b2_ref,             # block-diag MLP (L,2KV,KV)/(L,1,2KV)/...
        enc_g_ref, enc_b_ref,                       # encoder norms (1,KV)
        wr1_ref, wr2_ref, wr3_ref,                  # packed 1x1 recon conv weights (C_i, KV)
        bns1_ref, bns2_ref, bns3_ref,               # folded BN scale (1, C_i)
        bsh1_ref, bsh2_ref, bsh3_ref,               # folded BN shift (conv bias included)
        ut1_ref, ut2_ref, ut3_ref,                  # nearest-upsample 0/1 matrices (n, H*W)
        res1_ref, res2_ref, res3_ref,               # skip connections (B, C_i, H*W)
        # ---- outputs --------------------------------------------------------------------
        o1_ref, o2_ref, o3_ref, probs_ref,
        # ---- scratch --------------------------------------------------------------------
        ctx_scr):
    n = N_PATCHES
    batch = bp_ref.shape[0] // n
    ablk = ablk_ref[...]
    inv_kv = 1.0 / KV_SIZE
    inv_sqrt_kv = 1.0 / math.sqrt(KV_SIZE)

    # ---- patch embeddings, all scales written straight into the channel-concat layout ----
    emb = (_mm_nt(xp1_ref[...], we1_ref[...]) +
           _mm_nt(xp2_ref[...], we2_ref[...]) +
           _mm_nt(xp3_ref[...], we3_ref[...]) + bp_ref[...])          # (B*n, KV)

    # ---- transformer layers (fully unrolled) ---------------------------------------------
    for l in range(NUM_LAYERS):
        # per-scale LayerNorms (block LN) and the KV-size LayerNorm
        cx = _block_ln(emb, ablk, ln_ag_ref[l], ln_ab_ref[l], 1e-6)
        ea = _full_ln(emb, ln_Ag_ref[l], ln_Ab_ref[l], 1e-6)
        # per-head projections with all three scales folded into one 48-wide matmul
        qs = [_mm_nt(cx, wq_ref[l, h]) for h in range(NUM_HEADS)]     # (B*n, KV)
        ks = [_mm_nt(ea, wk_ref[l, h]) for h in range(NUM_HEADS)]
        vs = [_mm_nt(ea, wv_ref[l, h]) for h in range(NUM_HEADS)]

        for b in range(batch):
            r0 = b * n
            acc = jnp.zeros((n, KV_SIZE), jnp.float32)
            for h in range(NUM_HEADS):
                q = qs[h][r0:r0 + n, :]
                k = ks[h][r0:r0 + n, :]
                v = vs[h][r0:r0 + n, :]
                scores = _mm_tn(q, k) * inv_sqrt_kv                   # (KV_channels, KV)
                # InstanceNorm2d(num_heads): per (batch, head), per-scale (C_i, KV) block
                bm = jnp.dot(ablk, scores, preferred_element_type=jnp.float32)
                mu = jnp.sum(bm, axis=-1, keepdims=True) * inv_kv
                d = scores - mu
                bv = jnp.dot(ablk, d * d, preferred_element_type=jnp.float32)
                var = jnp.sum(bv, axis=-1, keepdims=True) * inv_kv
                sn = d * jax.lax.rsqrt(var + 1e-5)
                # softmax over KV
                mx = jnp.max(sn, axis=-1, keepdims=True)
                e = jnp.exp(sn - mx)
                p = e / jnp.sum(e, axis=-1, keepdims=True)
                if l == PROBS_LAYER:                                  # only M_return layer
                    probs_ref[b, h] = p.astype(probs_ref.dtype)
                acc = acc + _mm_nt(v, p)                              # (n, KV_channels)
            ctx_scr[r0:r0 + n, :] = acc * (1.0 / NUM_HEADS)           # head mean

        emb = emb + _mm_nt(ctx_scr[...], wo_ref[l])                   # out-proj + residual

        # per-scale MLP (block-diagonal fc1/fc2), GELU + residual fused
        xn = _block_ln(emb, ablk, ffn_g_ref[l], ffn_b_ref[l], 1e-6)
        hdn = _gelu(_mm_nt(xn, w1_ref[l]) + b1_ref[l])
        emb = emb + (_mm_nt(hdn, w2_ref[l]) + b2_ref[l])

    # ---- encoder norms + Reconstruct (1x1 conv + BN(eval) + ReLU, NN upsample, + skip) ----
    enc = _block_ln(emb, ablk, enc_g_ref[...], enc_b_ref[...], 1e-6)

    recon = ((wr1_ref, bns1_ref, bsh1_ref, ut1_ref, res1_ref, o1_ref),
             (wr2_ref, bns2_ref, bsh2_ref, ut2_ref, res2_ref, o2_ref),
             (wr3_ref, bns3_ref, bsh3_ref, ut3_ref, res3_ref, o3_ref))
    for wr, bns, bsh, ut, res, out in recon:
        a = _mm_nt(enc, wr[...]) * bns[...] + bsh[...]                # (B*n, C_i)
        a = jnp.maximum(a, 0.0)
        ut_v = ut[...]                                                # (n, H*W)
        for b in range(batch):
            ab = a[b * n:(b + 1) * n, :]                              # (n, C_i)
            out[b] = (_mm_tn(ab, ut_v) + res[b]).astype(out.dtype)    # (C_i, H*W)


# ---------------------------------- parameter packing (plain JAX) --------------------------
def _place_block(shape, block, r0, c0):
    return jnp.zeros(shape, F32).at[r0:r0 + block.shape[0], c0:c0 + block.shape[1]].set(block)


def _upsample_matrix(h_img, w_img, patch):
    hp, wp = h_img // patch, w_img // patch
    yy, xx = jnp.meshgrid(jnp.arange(h_img), jnp.arange(w_img), indexing='ij')
    tok = (yy // patch) * wp + (xx // patch)                          # (H, W) token id per pixel
    return (jnp.arange(hp * wp)[:, None] == tok.reshape(1, -1)).astype(F32)   # (n, H*W)


def _pack_params(params, batch):
    C, KV, L, H = CHANNEL_NUM, KV_SIZE, NUM_LAYERS, NUM_HEADS
    pk = {}

    # patch embeddings: conv weight rows placed at the scale's channel offset
    pk['we'] = []
    for i in range(3):
        w = params['embed'][i]['w'].reshape(C[i], -1)                 # (Cout, Cin*P*P)
        pk['we'].append(_place_block((KV, w.shape[1]), w, OFFS[i], 0))
    bias_cat = jnp.concatenate([params['embed'][i]['b'] for i in range(3)])
    pos_cat = jnp.concatenate([params['embed'][i]['pos'] for i in range(3)], axis=1)
    pk['bp'] = jnp.tile(pos_cat + bias_cat[None, :], (batch, 1))      # (B*n, KV)

    # block-averaging matrix for per-scale LayerNorm / InstanceNorm block statistics
    blk_id = jnp.concatenate([jnp.full((C[i],), i, jnp.int32) for i in range(3)])
    inv_c = jnp.concatenate([jnp.full((C[i],), 1.0 / C[i], F32) for i in range(3)])
    pk['ablk'] = (blk_id[:, None] == blk_id[None, :]).astype(F32) * inv_c[None, :]

    def cat3(vs):
        return jnp.concatenate(list(vs))

    layers = params['layers']
    pk['ln_ag'] = jnp.stack([cat3(lp['attn_norm'][i][0] for i in range(3)) for lp in layers]).reshape(L, 1, KV)
    pk['ln_ab'] = jnp.stack([cat3(lp['attn_norm'][i][1] for i in range(3)) for lp in layers]).reshape(L, 1, KV)
    pk['ln_Ag'] = jnp.stack([lp['attn_norm_all'][0] for lp in layers]).reshape(L, 1, KV)
    pk['ln_Ab'] = jnp.stack([lp['attn_norm_all'][1] for lp in layers]).reshape(L, 1, KV)
    pk['wq'] = jnp.stack([
        jnp.stack([sum(_place_block((KV, KV), lp['wq'][i][h], OFFS[i], OFFS[i]) for i in range(3))
                   for h in range(H)])
        for lp in layers])                                            # (L,H,KV,KV) block-diag
    pk['wk'] = jnp.stack([lp['wk'] for lp in layers])                 # (L,H,KV,KV)
    pk['wv'] = jnp.stack([lp['wv'] for lp in layers])
    pk['wo'] = jnp.stack([
        sum(_place_block((KV, KV), lp['wout'][i], OFFS[i], OFFS[i]) for i in range(3))
        for lp in layers])                                            # (L,KV,KV)
    pk['ffn_g'] = jnp.stack([cat3(lp['ffn_norm'][i][0] for i in range(3)) for lp in layers]).reshape(L, 1, KV)
    pk['ffn_b'] = jnp.stack([cat3(lp['ffn_norm'][i][1] for i in range(3)) for lp in layers]).reshape(L, 1, KV)
    pk['w1'] = jnp.stack([
        sum(_place_block((HID_TOTAL, KV), lp['fc1_w'][i], HOFFS[i], OFFS[i]) for i in range(3))
        for lp in layers])                                            # (L,2KV,KV)
    pk['b1'] = jnp.stack([cat3(lp['fc1_b'][i] for i in range(3)) for lp in layers]).reshape(L, 1, HID_TOTAL)
    pk['w2'] = jnp.stack([
        sum(_place_block((KV, HID_TOTAL), lp['fc2_w'][i], OFFS[i], HOFFS[i]) for i in range(3))
        for lp in layers])                                            # (L,KV,2KV)
    pk['b2'] = jnp.stack([cat3(lp['fc2_b'][i] for i in range(3)) for lp in layers]).reshape(L, 1, KV)

    pk['enc_g'] = cat3(params['enc_norm'][i][0] for i in range(3)).reshape(1, KV)
    pk['enc_b'] = cat3(params['enc_norm'][i][1] for i in range(3)).reshape(1, KV)

    # Reconstruct: 1x1 conv packed to (C_i, KV); BN(eval) folded (conv bias included)
    pk['wr'], pk['bns'], pk['bsh'] = [], [], []
    for i in range(3):
        rp = params['recon'][i]
        w = rp['w'].reshape(C[i], C[i])
        pk['wr'].append(_place_block((C[i], KV), w, 0, OFFS[i]))
        s = rp['gamma'] * jax.lax.rsqrt(rp['rv'] + 1e-5)
        pk['bns'].append(s.reshape(1, C[i]))
        pk['bsh'].append((rp['b'] * s + rp['beta'] - rp['rm'] * s).reshape(1, C[i]))
    return pk


# ------------------------------------- forward ---------------------------------------------
def channel_transformer_forward(params, en1, en2, en3):
    B = en1.shape[0]
    C, KV = CHANNEL_NUM, KV_SIZE
    pk = _pack_params(params, B)

    ens = (en1, en2, en3)
    xps, ress, uts, hw = [], [], [], []
    for i in range(3):
        P = PATCH_SIZE[i]
        b_, c_, H_, W_ = ens[i].shape
        hp, wp = H_ // P, W_ // P
        # im2col for the kernel=stride=P conv (pure layout glue)
        xp = ens[i].reshape(b_, c_, hp, P, wp, P)
        xp = jnp.transpose(xp, (0, 2, 4, 1, 3, 5)).reshape(b_ * hp * wp, c_ * P * P)
        xps.append(xp)
        ress.append(ens[i].reshape(b_, c_, H_ * W_))                  # channel-major skip
        uts.append(_upsample_matrix(H_, W_, P))
        hw.append(H_ * W_)

    out_shapes = (
        jax.ShapeDtypeStruct((B, C[0], hw[0]), F32),
        jax.ShapeDtypeStruct((B, C[1], hw[1]), F32),
        jax.ShapeDtypeStruct((B, C[2], hw[2]), F32),
        jax.ShapeDtypeStruct((B, NUM_HEADS, KV, KV), F32),            # concatenated probs
    )
    # Single fused kernel: no grid, every operand lives fully in VMEM (<2 MiB total).
    o1, o2, o3, probs_cat = pl.pallas_call(
        _ct_fused_kernel,
        out_shape=out_shapes,
        scratch_shapes=[pltpu.VMEM((B * N_PATCHES, KV), jnp.float32)],
    )(xps[0], xps[1], xps[2],
      pk['we'][0], pk['we'][1], pk['we'][2], pk['bp'], pk['ablk'],
      pk['ln_ag'], pk['ln_ab'], pk['ln_Ag'], pk['ln_Ab'],
      pk['wq'], pk['wk'], pk['wv'], pk['wo'],
      pk['ffn_g'], pk['ffn_b'], pk['w1'], pk['b1'], pk['w2'], pk['b2'],
      pk['enc_g'], pk['enc_b'],
      pk['wr'][0], pk['wr'][1], pk['wr'][2],
      pk['bns'][0], pk['bns'][1], pk['bns'][2],
      pk['bsh'][0], pk['bsh'][1], pk['bsh'][2],
      uts[0], uts[1], uts[2],
      ress[0], ress[1], ress[2])

    x1 = o1.reshape(en1.shape)
    x2 = o2.reshape(en2.shape)
    x3 = o3.reshape(en3.shape)
    probs1 = probs_cat[:, :, OFFS[0]:OFFS[0] + C[0], :]
    probs2 = probs_cat[:, :, OFFS[1]:OFFS[1] + C[1], :]
    probs3 = probs_cat[:, :, OFFS[2]:OFFS[2] + C[2], :]
    return x1, x2, x3, probs1, probs2, probs3


# ------------------------------------- parameter init --------------------------------------
def init_params(key):
    state = {'key': key}

    def nxt():
        state['key'], sub = jax.random.split(state['key'])
        return sub

    def w_init(shape, scale=0.05):
        return jax.random.normal(nxt(), shape, F32) * scale

    params = {'embed': [], 'layers': [], 'enc_norm': [], 'recon': []}
    for i in range(3):
        C, P = CHANNEL_NUM[i], PATCH_SIZE[i]
        params['embed'].append({'w': w_init((C, C, P, P)),
                                'b': w_init((C,), 0.01),
                                'pos': w_init((N_PATCHES, C), 0.02)})
    for _ in range(NUM_LAYERS):
        lp = {
            'attn_norm': [(jnp.ones((C,), F32), jnp.zeros((C,), F32)) for C in CHANNEL_NUM],
            'attn_norm_all': (jnp.ones((KV_SIZE,), F32), jnp.zeros((KV_SIZE,), F32)),
            'wq': [w_init((NUM_HEADS, C, C)) for C in CHANNEL_NUM],
            'wk': w_init((NUM_HEADS, KV_SIZE, KV_SIZE)),
            'wv': w_init((NUM_HEADS, KV_SIZE, KV_SIZE)),
            'wout': [w_init((C, C)) for C in CHANNEL_NUM],
            'ffn_norm': [(jnp.ones((C,), F32), jnp.zeros((C,), F32)) for C in CHANNEL_NUM],
            'fc1_w': [w_init((C * EXPAND_RATIO, C)) for C in CHANNEL_NUM],
            'fc1_b': [w_init((C * EXPAND_RATIO,), 0.001) for C in CHANNEL_NUM],
            'fc2_w': [w_init((C, C * EXPAND_RATIO)) for C in CHANNEL_NUM],
            'fc2_b': [w_init((C,), 0.001) for C in CHANNEL_NUM],
        }
        params['layers'].append(lp)
    params['enc_norm'] = [(jnp.ones((C,), F32), jnp.zeros((C,), F32)) for C in CHANNEL_NUM]
    for C in CHANNEL_NUM:
        params['recon'].append({'w': w_init((C, C, 1, 1)),
                                'b': w_init((C,), 0.01),
                                'gamma': jnp.ones((C,), F32),
                                'beta': jnp.zeros((C,), F32),
                                'rm': jnp.zeros((C,), F32),
                                'rv': jnp.ones((C,), F32)})
    return params


# ----------------------------------------- main --------------------------------------------
if __name__ == "__main__":
    root = jax.random.PRNGKey(0)
    kp, k1, k2, k3 = jax.random.split(root, 4)
    params = init_params(kp)

    en1 = jax.random.normal(k1, (BATCH, CHANNEL_NUM[0], IMG_SIZE // 4, IMG_SIZE // 4), F32)
    en2 = jax.random.normal(k2, (BATCH, CHANNEL_NUM[1], IMG_SIZE // 8, IMG_SIZE // 8), F32)
    en3 = jax.random.normal(k3, (BATCH, CHANNEL_NUM[2], IMG_SIZE // 16, IMG_SIZE // 16), F32)

    fwd = jax.jit(channel_transformer_forward)
    x1, x2, x3, p1, p2, p3 = jax.block_until_ready(fwd(params, en1, en2, en3))

    assert x1.shape == en1.shape and x2.shape == en2.shape and x3.shape == en3.shape
    assert p1.shape == (BATCH, NUM_HEADS, CHANNEL_NUM[0], KV_SIZE)
    assert p2.shape == (BATCH, NUM_HEADS, CHANNEL_NUM[1], KV_SIZE)
    assert p3.shape == (BATCH, NUM_HEADS, CHANNEL_NUM[2], KV_SIZE)
    print("KERNEL_OK")
</pallas_src>

<mosaic_0001>
module attributes {stable_mosaic.version = 11 : i64} {
  func.func @_ct_fused_kernel(%arg0: memref<32x128xf32, #tpu.memory_space<vmem>>, %arg1: memref<32x64xf32, #tpu.memory_space<vmem>>, %arg2: memref<32x24xf32, #tpu.memory_space<vmem>>, %arg3: memref<48x128xf32, #tpu.memory_space<vmem>>, %arg4: memref<48x64xf32, #tpu.memory_space<vmem>>, %arg5: memref<48x24xf32, #tpu.memory_space<vmem>>, %arg6: memref<32x48xf32, #tpu.memory_space<vmem>>, %arg7: memref<48x48xf32, #tpu.memory_space<vmem>>, %arg8: memref<2x1x48xf32, #tpu.memory_space<vmem>>, %arg9: memref<2x1x48xf32, #tpu.memory_space<vmem>>, %arg10: memref<2x1x48xf32, #tpu.memory_space<vmem>>, %arg11: memref<2x1x48xf32, #tpu.memory_space<vmem>>, %arg12: memref<2x2x48x48xf32, #tpu.memory_space<vmem>>, %arg13: memref<2x2x48x48xf32, #tpu.memory_space<vmem>>, %arg14: memref<2x2x48x48xf32, #tpu.memory_space<vmem>>, %arg15: memref<2x48x48xf32, #tpu.memory_space<vmem>>, %arg16: memref<2x1x48xf32, #tpu.memory_space<vmem>>, %arg17: memref<2x1x48xf32, #tpu.memory_space<vmem>>, %arg18: memref<2x96x48xf32, #tpu.memory_space<vmem>>, %arg19: memref<2x1x96xf32, #tpu.memory_space<vmem>>, %arg20: memref<2x48x96xf32, #tpu.memory_space<vmem>>, %arg21: memref<2x1x48xf32, #tpu.memory_space<vmem>>, %arg22: memref<1x48xf32, #tpu.memory_space<vmem>>, %arg23: memref<1x48xf32, #tpu.memory_space<vmem>>, %arg24: memref<8x48xf32, #tpu.memory_space<vmem>>, %arg25: memref<16x48xf32, #tpu.memory_space<vmem>>, %arg26: memref<24x48xf32, #tpu.memory_space<vmem>>, %arg27: memref<1x8xf32, #tpu.memory_space<vmem>>, %arg28: memref<1x16xf32, #tpu.memory_space<vmem>>, %arg29: memref<1x24xf32, #tpu.memory_space<vmem>>, %arg30: memref<1x8xf32, #tpu.memory_space<vmem>>, %arg31: memref<1x16xf32, #tpu.memory_space<vmem>>, %arg32: memref<1x24xf32, #tpu.memory_space<vmem>>, %arg33: memref<16x256xf32, #tpu.memory_space<vmem>>, %arg34: memref<16x64xf32, #tpu.memory_space<vmem>>, %arg35: memref<16x16xf32, #tpu.memory_space<vmem>>, %arg36: memref<2x8x256xf32, #tpu.memory_space<vmem>>, %arg37: memref<2x16x64xf32, #tpu.memory_space<vmem>>, %arg38: memref<2x24x16xf32, #tpu.memory_space<vmem>>, %arg39: memref<2x8x256xf32, #tpu.memory_space<vmem>>, %arg40: memref<2x16x64xf32, #tpu.memory_space<vmem>>, %arg41: memref<2x24x16xf32, #tpu.memory_space<vmem>>, %arg42: memref<2x2x48x48xf32, #tpu.memory_space<vmem>>, %arg43: memref<32x48xf32, #tpu.memory_space<vmem>>) attributes {dimension_semantics = [], scalar_prefetch = 0 : i64, scratch_operands = 1 : i64, tpu.core_type = #tpu.core_type<tc>} {
    %c0 = arith.constant 0 : index
    %c0_0 = arith.constant 0 : index
    %0 = vector.load %arg7[%c0, %c0_0] : memref<48x48xf32, #tpu.memory_space<vmem>>, vector<48x48xf32>
    %c0_1 = arith.constant 0 : index
    %c0_2 = arith.constant 0 : index
    %1 = vector.load %arg0[%c0_1, %c0_2] : memref<32x128xf32, #tpu.memory_space<vmem>>, vector<32x128xf32>
    %c0_3 = arith.constant 0 : index
    %c0_4 = arith.constant 0 : index
    %2 = vector.load %arg3[%c0_3, %c0_4] : memref<48x128xf32, #tpu.memory_space<vmem>>, vector<48x128xf32>
    %cst = arith.constant dense<0.000000e+00> : vector<32x48xf32>
    %3 = tpu.matmul %1, %2, %cst {dimension_numbers = #tpu.dot_dimension_numbers<[1], [1], [0], [0], [0, 0, 1, 0], [], []>} : vector<32x128xf32>, vector<48x128xf32>, vector<32x48xf32> -> vector<32x48xf32>
    %c0_5 = arith.constant 0 : index
    %c0_6 = arith.constant 0 : index
    %4 = vector.load %arg1[%c0_5, %c0_6] : memref<32x64xf32, #tpu.memory_space<vmem>>, vector<32x64xf32>
    %c0_7 = arith.constant 0 : index
    %c0_8 = arith.constant 0 : index
    %5 = vector.load %arg4[%c0_7, %c0_8] : memref<48x64xf32, #tpu.memory_space<vmem>>, vector<48x64xf32>
    %cst_9 = arith.constant dense<0.000000e+00> : vector<32x48xf32>
    %6 = tpu.matmul %4, %5, %cst_9 {dimension_numbers = #tpu.dot_dimension_numbers<[1], [1], [0], [0], [0, 0, 1, 0], [], []>} : vector<32x64xf32>, vector<48x64xf32>, vector<32x48xf32> -> vector<32x48xf32>
    %7 = arith.addf %3, %6 : vector<32x48xf32>
    %c0_10 = arith.constant 0 : index
    %c0_11 = arith.constant 0 : index
    %8 = vector.load %arg2[%c0_10, %c0_11] : memref<32x24xf32, #tpu.memory_space<vmem>>, vector<32x24xf32>
    %c0_12 = arith.constant 0 : index
    %c0_13 = arith.constant 0 : index
    %9 = vector.load %arg5[%c0_12, %c0_13] : memref<48x24xf32, #tpu.memory_space<vmem>>, vector<48x24xf32>
    %cst_14 = arith.constant dense<0.000000e+00> : vector<32x48xf32>
    %10 = tpu.matmul %8, %9, %cst_14 {dimension_numbers = #tpu.dot_dimension_numbers<[1], [1], [0], [0], [0, 0, 1, 0], [], []>} : vector<32x24xf32>, vector<48x24xf32>, vector<32x48xf32> -> vector<32x48xf32>
    %11 = arith.addf %7, %10 : vector<32x48xf32>
    %c0_15 = arith.constant 0 : index
    %c0_16 = arith.constant 0 : index
    %12 = vector.load %arg6[%c0_15, %c0_16] : memref<32x48xf32, #tpu.memory_space<vmem>>, vector<32x48xf32>
    %13 = arith.addf %11, %12 : vector<32x48xf32>
    %c0_17 = arith.constant 0 : index
    %c0_18 = arith.constant 0 : index
    %c0_19 = arith.constant 0 : index
    %14 = vector.load %arg8[%c0_17, %c0_18, %c0_19] : memref<2x1x48xf32, #tpu.memory_space<vmem>>, vector<1x1x48xf32>
    %15 = vector.shape_cast %14 : vector<1x1x48xf32> to vector<1x48xf32>
    %c0_20 = arith.constant 0 : index
    %c0_21 = arith.constant 0 : index
    %c0_22 = arith.constant 0 : index
    %16 = vector.load %arg9[%c0_20, %c0_21, %c0_22] : memref<2x1x48xf32, #tpu.memory_space<vmem>>, vector<1x1x48xf32>
    %17 = vector.shape_cast %16 : vector<1x1x48xf32> to vector<1x48xf32>
    %cst_23 = arith.constant dense<0.000000e+00> : vector<32x48xf32>
    %18 = tpu.matmul %13, %0, %cst_23 {dimension_numbers = #tpu.dot_dimension_numbers<[1], [0], [0], [1], [0, 0, 1, 1], [], []>} : vector<32x48xf32>, vector<48x48xf32>, vector<32x48xf32> -> vector<32x48xf32>
    %19 = arith.subf %13, %18 : vector<32x48xf32>
    %20 = arith.mulf %19, %19 : vector<32x48xf32>
    %cst_24 = arith.constant dense<0.000000e+00> : vector<32x48xf32>
    %21 = tpu.matmul %20, %0, %cst_24 {dimension_numbers = #tpu.dot_dimension_numbers<[1], [0], [0], [1], [0, 0, 1, 1], [], []>} : vector<32x48xf32>, vector<48x48xf32>, vector<32x48xf32> -> vector<32x48xf32>
    %cst_25 = arith.constant 9.99999997E-7 : f32
    %22 = vector.broadcast %cst_25 : f32 to vector<32x48xf32>
    %23 = arith.addf %21, %22 : vector<32x48xf32>
    %24 = math.rsqrt %23 : vector<32x48xf32>
    %25 = arith.mulf %19, %24 : vector<32x48xf32>
    %26 = vector.broadcast %15 : vector<1x48xf32> to vector<32x48xf32>
    %27 = arith.mulf %25, %26 : vector<32x48xf32>
    %28 = vector.broadcast %17 : vector<1x48xf32> to vector<32x48xf32>
    %29 = arith.addf %27, %28 : vector<32x48xf32>
    %c0_26 = arith.constant 0 : index
    %c0_27 = arith.constant 0 : index
    %c0_28 = arith.constant 0 : index
    %30 = vector.load %arg10[%c0_26, %c0_27, %c0_28] : memref<2x1x48xf32, #tpu.memory_space<vmem>>, vector<1x1x48xf32>
    %31 = vector.shape_cast %30 : vector<1x1x48xf32> to vector<1x48xf32>
    %c0_29 = arith.constant 0 : index
    %c0_30 = arith.constant 0 : index
    %c0_31 = arith.constant 0 : index
    %32 = vector.load %arg11[%c0_29, %c0_30, %c0_31] : memref<2x1x48xf32, #tpu.memory_space<vmem>>, vector<1x1x48xf32>
    %33 = vector.shape_cast %32 : vector<1x1x48xf32> to vector<1x48xf32>
    %cst_32 = arith.constant dense<0.000000e+00> : vector<32xf32>
    %34 = vector.multi_reduction <add>, %13, %cst_32 [1] : vector<32x48xf32> to vector<32xf32>
    %35 = vector.shape_cast %34 : vector<32xf32> to vector<32x1xf32>
    %cst_33 = arith.constant 4.800000e+01 : f32
    %36 = vector.broadcast %cst_33 : f32 to vector<32x1xf32>
    %37 = arith.divf %35, %36 : vector<32x1xf32>
    %38 = vector.broadcast %37 : vector<32x1xf32> to vector<32x48xf32>
    %39 = arith.subf %13, %38 : vector<32x48xf32>
    %40 = arith.mulf %39, %39 : vector<32x48xf32>
    %cst_34 = arith.constant dense<0.000000e+00> : vector<32xf32>
    %41 = vector.multi_reduction <add>, %40, %cst_34 [1] : vector<32x48xf32> to vector<32xf32>
    %42 = vector.shape_cast %41 : vector<32xf32> to vector<32x1xf32>
    %cst_35 = arith.constant 4.800000e+01 : f32
    %43 = vector.broadcast %cst_35 : f32 to vector<32x1xf32>
    %44 = arith.divf %42, %43 : vector<32x1xf32>
    %cst_36 = arith.constant 9.99999997E-7 : f32
    %45 = vector.broadcast %cst_36 : f32 to vector<32x1xf32>
    %46 = arith.addf %44, %45 : vector<32x1xf32>
    %47 = math.rsqrt %46 : vector<32x1xf32>
    %48 = vector.broadcast %47 : vector<32x1xf32> to vector<32x48xf32>
    %49 = arith.mulf %39, %48 : vector<32x48xf32>
    %50 = vector.broadcast %31 : vector<1x48xf32> to vector<32x48xf32>
    %51 = arith.mulf %49, %50 : vector<32x48xf32>
    %52 = vector.broadcast %33 : vector<1x48xf32> to vector<32x48xf32>
    %53 = arith.addf %51, %52 : vector<32x48xf32>
    %c0_37 = arith.constant 0 : index
    %c0_38 = arith.constant 0 : index
    %c0_39 = arith.constant 0 : index
    %c0_40 = arith.constant 0 : index
    %54 = vector.load %arg12[%c0_37, %c0_38, %c0_39, %c0_40] : memref<2x2x48x48xf32, #tpu.memory_space<vmem>>, vector<1x1x48x48xf32>
    %55 = vector.shape_cast %54 : vector<1x1x48x48xf32> to vector<48x48xf32>
    %cst_41 = arith.constant dense<0.000000e+00> : vector<32x48xf32>
    %56 = tpu.matmul %29, %55, %cst_41 {dimension_numbers = #tpu.dot_dimension_numbers<[1], [1], [0], [0], [0, 0, 1, 0], [], []>} : vector<32x48xf32>, vector<48x48xf32>, vector<32x48xf32> -> vector<32x48xf32>
    %c0_42 = arith.constant 0 : index
    %c1 = arith.constant 1 : index
    %c0_43 = arith.constant 0 : index
    %c0_44 = arith.constant 0 : index
    %57 = vector.load %arg12[%c0_42, %c1, %c0_43, %c0_44] : memref<2x2x48x48xf32, #tpu.memory_space<vmem>>, vector<1x1x48x48xf32>
    %58 = vector.shape_cast %57 : vector<1x1x48x48xf32> to vector<48x48xf32>
    %cst_45 = arith.constant dense<0.000000e+00> : vector<32x48xf32>
    %59 = tpu.matmul %29, %58, %cst_45 {dimension_numbers = #tpu.dot_dimension_numbers<[1], [1], [0], [0], [0, 0, 1, 0], [], []>} : vector<32x48xf32>, vector<48x48xf32>, vector<32x48xf32> -> vector<32x48xf32>
    %c0_46 = arith.constant 0 : index
    %c0_47 = arith.constant 0 : index
    %c0_48 = arith.constant 0 : index
    %c0_49 = arith.constant 0 : index
    %60 = vector.load %arg13[%c0_46, %c0_47, %c0_48, %c0_49] : memref<2x2x48x48xf32, #tpu.memory_space<vmem>>, vector<1x1x48x48xf32>
    %61 = vector.shape_cast %60 : vector<1x1x48x48xf32> to vector<48x48xf32>
    %cst_50 = arith.constant dense<0.000000e+00> : vector<32x48xf32>
    %62 = tpu.matmul %53, %61, %cst_50 {dimension_numbers = #tpu.dot_dimension_numbers<[1], [1], [0], [0], [0, 0, 1, 0], [], []>} : vector<32x48xf32>, vector<48x48xf32>, vector<32x48xf32> -> vector<32x48xf32>
    %c0_51 = arith.constant 0 : index
    %c1_52 = arith.constant 1 : index
    %c0_53 = arith.constant 0 : index
    %c0_54 = arith.constant 0 : index
    %63 = vector.load %arg13[%c0_51, %c1_52, %c0_53, %c0_54] : memref<2x2x48x48xf32, #tpu.memory_space<vmem>>, vector<1x1x48x48xf32>
    %64 = vector.shape_cast %63 : vector<1x1x48x48xf32> to vector<48x48xf32>
    %cst_55 = arith.constant dense<0.000000e+00> : vector<32x48xf32>
    %65 = tpu.matmul %53, %64, %cst_55 {dimension_numbers = #tpu.dot_dimension_numbers<[1], [1], [0], [0], [0, 0, 1, 0], [], []>} : vector<32x48xf32>, vector<48x48xf32>, vector<32x48xf32> -> vector<32x48xf32>
    %c0_56 = arith.constant 0 : index
    %c0_57 = arith.constant 0 : index
    %c0_58 = arith.constant 0 : index
    %c0_59 = arith.constant 0 : index
    %66 = vector.load %arg14[%c0_56, %c0_57, %c0_58, %c0_59] : memref<2x2x48x48xf32, #tpu.memory_space<vmem>>, vector<1x1x48x48xf32>
    %67 = vector.shape_cast %66 : vector<1x1x48x48xf32> to vector<48x48xf32>
    %cst_60 = arith.constant dense<0.000000e+00> : vector<32x48xf32>
    %68 = tpu.matmul %53, %67, %cst_60 {dimension_numbers = #tpu.dot_dimension_numbers<[1], [1], [0], [0], [0, 0, 1, 0], [], []>} : vector<32x48xf32>, vector<48x48xf32>, vector<32x48xf32> -> vector<32x48xf32>
    %c0_61 = arith.constant 0 : index
    %c1_62 = arith.constant 1 : index
    %c0_63 = arith.constant 0 : index
    %c0_64 = arith.constant 0 : index
    %69 = vector.load %arg14[%c0_61, %c1_62, %c0_63, %c0_64] : memref<2x2x48x48xf32, #tpu.memory_space<vmem>>, vector<1x1x48x48xf32>
    %70 = vector.shape_cast %69 : vector<1x1x48x48xf32> to vector<48x48xf32>
    %cst_65 = arith.constant dense<0.000000e+00> : vector<32x48xf32>
    %71 = tpu.matmul %53, %70, %cst_65 {dimension_numbers = #tpu.dot_dimension_numbers<[1], [1], [0], [0], [0, 0, 1, 0], [], []>} : vector<32x48xf32>, vector<48x48xf32>, vector<32x48xf32> -> vector<32x48xf32>
    %cst_66 = arith.constant 0.000000e+00 : f32
    %72 = vector.broadcast %cst_66 : f32 to vector<16x48xf32>
    %73 = vector.extract_strided_slice %56 {offsets = [0, 0], sizes = [16, 48], strides = [1, 1]} : vector<32x48xf32> to vector<16x48xf32>
    %74 = vector.extract_strided_slice %62 {offsets = [0, 0], sizes = [16, 48], strides = [1, 1]} : vector<32x48xf32> to vector<16x48xf32>
    %75 = vector.extract_strided_slice %68 {offsets = [0, 0], sizes = [16, 48], strides = [1, 1]} : vector<32x48xf32> to vector<16x48xf32>
    %cst_67 = arith.constant dense<0.000000e+00> : vector<48x48xf32>
    %76 = tpu.matmul %73, %74, %cst_67 {dimension_numbers = #tpu.dot_dimension_numbers<[0], [0], [1], [1], [0, 1, 1, 1], [], []>} : vector<16x48xf32>, vector<16x48xf32>, vector<48x48xf32> -> vector<48x48xf32>
    %cst_68 = arith.constant 0.144337565 : f32
    %77 = vector.broadcast %cst_68 : f32 to vector<48x48xf32>
    %78 = arith.mulf %76, %77 : vector<48x48xf32>
    %cst_69 = arith.constant dense<0.000000e+00> : vector<48x48xf32>
    %79 = tpu.matmul %0, %78, %cst_69 {dimension_numbers = #tpu.dot_dimension_numbers<[1], [0], [0], [1], [0, 0, 1, 1], [], []>} : vector<48x48xf32>, vector<48x48xf32>, vector<48x48xf32> -> vector<48x48xf32>
    %cst_70 = arith.constant dense<0.000000e+00> : vector<48xf32>
    %80 = vector.multi_reduction <add>, %79, %cst_70 [1] : vector<48x48xf32> to vector<48xf32>
    %81 = vector.shape_cast %80 : vector<48xf32> to vector<48x1xf32>
    %cst_71 = arith.constant 0.020833334 : f32
    %82 = vector.broadcast %cst_71 : f32 to vector<48x1xf32>
    %83 = arith.mulf %81, %82 : vector<48x1xf32>
    %84 = vector.broadcast %83 : vector<48x1xf32> to vector<48x48xf32>
    %85 = arith.subf %78, %84 : vector<48x48xf32>
    %86 = arith.mulf %85, %85 : vector<48x48xf32>
    %cst_72 = arith.constant dense<0.000000e+00> : vector<48x48xf32>
    %87 = tpu.matmul %0, %86, %cst_72 {dimension_numbers = #tpu.dot_dimension_numbers<[1], [0], [0], [1], [0, 0, 1, 1], [], []>} : vector<48x48xf32>, vector<48x48xf32>, vector<48x48xf32> -> vector<48x48xf32>
    %cst_73 = arith.constant dense<0.000000e+00> : vector<48xf32>
    %88 = vector.multi_reduction <add>, %87, %cst_73 [1] : vector<48x48xf32> to vector<48xf32>
    %89 = vector.shape_cast %88 : vector<48xf32> to vector<48x1xf32>
    %cst_74 = arith.constant 0.020833334 : f32
    %90 = vector.broadcast %cst_74 : f32 to vector<48x1xf32>
    %91 = arith.mulf %89, %90 : vector<48x1xf32>
    %cst_75 = arith.constant 9.99999974E-6 : f32
    %92 = vector.broadcast %cst_75 : f32 to vector<48x1xf32>
    %93 = arith.addf %91, %92 : vector<48x1xf32>
    %94 = math.rsqrt %93 : vector<48x1xf32>
    %95 = vector.broadcast %94 : vector<48x1xf32> to vector<48x48xf32>
    %96 = arith.mulf %85, %95 : vector<48x48xf32>
    %cst_76 = arith.constant dense<0xFF800000> : vector<48xf32>
    %97 = vector.multi_reduction <maximumf>, %96, %cst_76 [1] : vector<48x48xf32> to vector<48xf32>
    %98 = vector.shape_cast %97 : vector<48xf32> to vector<48x1xf32>
    %99 = vector.broadcast %98 : vector<48x1xf32> to vector<48x48xf32>
    %100 = arith.subf %96, %99 : vector<48x48xf32>
    %101 = math.exp %100 : vector<48x48xf32>
    %cst_77 = arith.constant dense<0.000000e+00> : vector<48xf32>
    %102 = vector.multi_reduction <add>, %101, %cst_77 [1] : vector<48x48xf32> to vector<48xf32>
    %103 = vector.shape_cast %102 : vector<48xf32> to vector<48x1xf32>
    %104 = vector.broadcast %103 : vector<48x1xf32> to vector<48x48xf32>
    %105 = arith.divf %101, %104 : vector<48x48xf32>
    %cst_78 = arith.constant dense<0.000000e+00> : vector<16x48xf32>
    %106 = tpu.matmul %75, %105, %cst_78 {dimension_numbers = #tpu.dot_dimension_numbers<[1], [1], [0], [0], [0, 0, 1, 0], [], []>} : vector<16x48xf32>, vector<48x48xf32>, vector<16x48xf32> -> vector<16x48xf32>
    %107 = arith.addf %72, %106 : vector<16x48xf32>
    %108 = vector.extract_strided_slice %59 {offsets = [0, 0], sizes = [16, 48], strides = [1, 1]} : vector<32x48xf32> to vector<16x48xf32>
    %109 = vector.extract_strided_slice %65 {offsets = [0, 0], sizes = [16, 48], strides = [1, 1]} : vector<32x48xf32> to vector<16x48xf32>
    %110 = vector.extract_strided_slice %71 {offsets = [0, 0], sizes = [16, 48], strides = [1, 1]} : vector<32x48xf32> to vector<16x48xf32>
    %cst_79 = arith.constant dense<0.000000e+00> : vector<48x48xf32>
    %111 = tpu.matmul %108, %109, %cst_79 {dimension_numbers = #tpu.dot_dimension_numbers<[0], [0], [1], [1], [0, 1, 1, 1], [], []>} : vector<16x48xf32>, vector<16x48xf32>, vector<48x48xf32> -> vector<48x48xf32>
    %cst_80 = arith.constant 0.144337565 : f32
    %112 = vector.broadcast %cst_80 : f32 to vector<48x48xf32>
    %113 = arith.mulf %111, %112 : vector<48x48xf32>
    %cst_81 = arith.constant dense<0.000000e+00> : vector<48x48xf32>
    %114 = tpu.matmul %0, %113, %cst_81 {dimension_numbers = #tpu.dot_dimension_numbers<[1], [0], [0], [1], [0, 0, 1, 1], [], []>} : vector<48x48xf32>, vector<48x48xf32>, vector<48x48xf32> -> vector<48x48xf32>
    %cst_82 = arith.constant dense<0.000000e+00> : vector<48xf32>
    %115 = vector.multi_reduction <add>, %114, %cst_82 [1] : vector<48x48xf32> to vector<48xf32>
    %116 = vector.shape_cast %115 : vector<48xf32> to vector<48x1xf32>
    %cst_83 = arith.constant 0.020833334 : f32
    %117 = vector.broadcast %cst_83 : f32 to vector<48x1xf32>
    %118 = arith.mulf %116, %117 : vector<48x1xf32>
    %119 = vector.broadcast %118 : vector<48x1xf32> to vector<48x48xf32>
    %120 = arith.subf %113, %119 : vector<48x48xf32>
    %121 = arith.mulf %120, %120 : vector<48x48xf32>
    %cst_84 = arith.constant dense<0.000000e+00> : vector<48x48xf32>
    %122 = tpu.matmul %0, %121, %cst_84 {dimension_numbers = #tpu.dot_dimension_numbers<[1], [0], [0], [1], [0, 0, 1, 1], [], []>} : vector<48x48xf32>, vector<48x48xf32>, vector<48x48xf32> -> vector<48x48xf32>
    %cst_85 = arith.constant dense<0.000000e+00> : vector<48xf32>
    %123 = vector.multi_reduction <add>, %122, %cst_85 [1] : vector<48x48xf32> to vector<48xf32>
    %124 = vector.shape_cast %123 : vector<48xf32> to vector<48x1xf32>
    %cst_86 = arith.constant 0.020833334 : f32
    %125 = vector.broadcast %cst_86 : f32 to vector<48x1xf32>
    %126 = arith.mulf %124, %125 : vector<48x1xf32>
    %cst_87 = arith.constant 9.99999974E-6 : f32
    %127 = vector.broadcast %cst_87 : f32 to vector<48x1xf32>
    %128 = arith.addf %126, %127 : vector<48x1xf32>
    %129 = math.rsqrt %128 : vector<48x1xf32>
    %130 = vector.broadcast %129 : vector<48x1xf32> to vector<48x48xf32>
    %131 = arith.mulf %120, %130 : vector<48x48xf32>
    %cst_88 = arith.constant dense<0xFF800000> : vector<48xf32>
    %132 = vector.multi_reduction <maximumf>, %131, %cst_88 [1] : vector<48x48xf32> to vector<48xf32>
    %133 = vector.shape_cast %132 : vector<48xf32> to vector<48x1xf32>
    %134 = vector.broadcast %133 : vector<48x1xf32> to vector<48x48xf32>
    %135 = arith.subf %131, %134 : vector<48x48xf32>
    %136 = math.exp %135 : vector<48x48xf32>
    %cst_89 = arith.constant dense<0.000000e+00> : vector<48xf32>
    %137 = vector.multi_reduction <add>, %136, %cst_89 [1] : vector<48x48xf32> to vector<48xf32>
    %138 = vector.shape_cast %137 : vector<48xf32> to vector<48x1xf32>
    %139 = vector.broadcast %138 : vector<48x1xf32> to vector<48x48xf32>
    %140 = arith.divf %136, %139 : vector<48x48xf32>
    %cst_90 = arith.constant dense<0.000000e+00> : vector<16x48xf32>
    %141 = tpu.matmul %110, %140, %cst_90 {dimension_numbers = #tpu.dot_dimension_numbers<[1], [1], [0], [0], [0, 0, 1, 0], [], []>} : vector<16x48xf32>, vector<48x48xf32>, vector<16x48xf32> -> vector<16x48xf32>
    %142 = arith.addf %107, %141 : vector<16x48xf32>
    %cst_91 = arith.constant 5.000000e-01 : f32
    %143 = vector.broadcast %cst_91 : f32 to vector<16x48xf32>
    %144 = arith.mulf %142, %143 : vector<16x48xf32>
    %c0_92 = arith.constant 0 : index
    %c0_93 = arith.constant 0 : index
    %145 = vector.load %arg43[%c0_92, %c0_93] : memref<32x48xf32, #tpu.memory_space<vmem>>, vector<16x48xf32>
    tpu.vector_store %arg43[%c0_92, %c0_93], %144 {strides = array<i32>} : memref<32x48xf32, #tpu.memory_space<vmem>>, vector<16x48xf32>,
    %cst_94 = arith.constant 0.000000e+00 : f32
    %146 = vector.broadcast %cst_94 : f32 to vector<16x48xf32>
    %147 = vector.extract_strided_slice %56 {offsets = [16, 0], sizes = [16, 48], strides = [1, 1]} : vector<32x48xf32> to vector<16x48xf32>
    %148 = vector.extract_strided_slice %62 {offsets = [16, 0], sizes = [16, 48], strides = [1, 1]} : vector<32x48xf32> to vector<16x48xf32>
    %149 = vector.extract_strided_slice %68 {offsets = [16, 0], sizes = [16, 48], strides = [1, 1]} : vector<32x48xf32> to vector<16x48xf32>
    %cst_95 = arith.constant dense<0.000000e+00> : vector<48x48xf32>
    %150 = tpu.matmul %147, %148, %cst_95 {dimension_numbers = #tpu.dot_dimension_numbers<[0], [0], [1], [1], [0, 1, 1, 1], [], []>} : vector<16x48xf32>, vector<16x48xf32>, vector<48x48xf32> -> vector<48x48xf32>
    %cst_96 = arith.constant 0.144337565 : f32
    %151 = vector.broadcast %cst_96 : f32 to vector<48x48xf32>
    %152 = arith.mulf %150, %151 : vector<48x48xf32>
    %cst_97 = arith.constant dense<0.000000e+00> : vector<48x48xf32>
    %153 = tpu.matmul %0, %152, %cst_97 {dimension_numbers = #tpu.dot_dimension_numbers<[1], [0], [0], [1], [0, 0, 1, 1], [], []>} : vector<48x48xf32>, vector<48x48xf32>, vector<48x48xf32> -> vector<48x48xf32>
    %cst_98 = arith.constant dense<0.000000e+00> : vector<48xf32>
    %154 = vector.multi_reduction <add>, %153, %cst_98 [1] : vector<48x48xf32> to vector<48xf32>
    %155 = vector.shape_cast %154 : vector<48xf32> to vector<48x1xf32>
    %cst_99 = arith.constant 0.020833334 : f32
    %156 = vector.broadcast %cst_99 : f32 to vector<48x1xf32>
    %157 = arith.mulf %155, %156 : vector<48x1xf32>
    %158 = vector.broadcast %157 : vector<48x1xf32> to vector<48x48xf32>
    %159 = arith.subf %152, %158 : vector<48x48xf32>
    %160 = arith.mulf %159, %159 : vector<48x48xf32>
    %cst_100 = arith.constant dense<0.000000e+00> : vector<48x48xf32>
    %161 = tpu.matmul %0, %160, %cst_100 {dimension_numbers = #tpu.dot_dimension_numbers<[1], [0], [0], [1], [0, 0, 1, 1], [], []>} : vector<48x48xf32>, vector<48x48xf32>, vector<48x48xf32> -> vector<48x48xf32>
    %cst_101 = arith.constant dense<0.000000e+00> : vector<48xf32>
    %162 = vector.multi_reduction <add>, %161, %cst_101 [1] : vector<48x48xf32> to vector<48xf32>
    %163 = vector.shape_cast %162 : vector<48xf32> to vector<48x1xf32>
    %cst_102 = arith.constant 0.020833334 : f32
    %164 = vector.broadcast %cst_102 : f32 to vector<48x1xf32>
    %165 = arith.mulf %163, %164 : vector<48x1xf32>
    %cst_103 = arith.constant 9.99999974E-6 : f32
    %166 = vector.broadcast %cst_103 : f32 to vector<48x1xf32>
    %167 = arith.addf %165, %166 : vector<48x1xf32>
    %168 = math.rsqrt %167 : vector<48x1xf32>
    %169 = vector.broadcast %168 : vector<48x1xf32> to vector<48x48xf32>
    %170 = arith.mulf %159, %169 : vector<48x48xf32>
    %cst_104 = arith.constant dense<0xFF800000> : vector<48xf32>
    %171 = vector.multi_reduction <maximumf>, %170, %cst_104 [1] : vector<48x48xf32> to vector<48xf32>
    %172 = vector.shape_cast %171 : vector<48xf32> to vector<48x1xf32>
    %173 = vector.broadcast %172 : vector<48x1xf32> to vector<48x48xf32>
    %174 = arith.subf %170, %173 : vector<48x48xf32>
    %175 = math.exp %174 : vector<48x48xf32>
    %cst_105 = arith.constant dense<0.000000e+00> : vector<48xf32>
    %176 = vector.multi_reduction <add>, %175, %cst_105 [1] : vector<48x48xf32> to vector<48xf32>
    %177 = vector.shape_cast %176 : vector<48xf32> to vector<48x1xf32>
    %178 = vector.broadcast %177 : vector<48x1xf32> to vector<48x48xf32>
    %179 = arith.divf %175, %178 : vector<48x48xf32>
    %cst_106 = arith.constant dense<0.000000e+00> : vector<16x48xf32>
    %180 = tpu.matmul %149, %179, %cst_106 {dimension_numbers = #tpu.dot_dimension_numbers<[1], [1], [0], [0], [0, 0, 1, 0], [], []>} : vector<16x48xf32>, vector<48x48xf32>, vector<16x48xf32> -> vector<16x48xf32>
    %181 = arith.addf %146, %180 : vector<16x48xf32>
    %182 = vector.extract_strided_slice %59 {offsets = [16, 0], sizes = [16, 48], strides = [1, 1]} : vector<32x48xf32> to vector<16x48xf32>
    %183 = vector.extract_strided_slice %65 {offsets = [16, 0], sizes = [16, 48], strides = [1, 1]} : vector<32x48xf32> to vector<16x48xf32>
    %184 = vector.extract_strided_slice %71 {offsets = [16, 0], sizes = [16, 48], strides = [1, 1]} : vector<32x48xf32> to vector<16x48xf32>
    %cst_107 = arith.constant dense<0.000000e+00> : vector<48x48xf32>
    %185 = tpu.matmul %182, %183, %cst_107 {dimension_numbers = #tpu.dot_dimension_numbers<[0], [0], [1], [1], [0, 1, 1, 1], [], []>} : vector<16x48xf32>, vector<16x48xf32>, vector<48x48xf32> -> vector<48x48xf32>
    %cst_108 = arith.constant 0.144337565 : f32
    %186 = vector.broadcast %cst_108 : f32 to vector<48x48xf32>
    %187 = arith.mulf %185, %186 : vector<48x48xf32>
    %cst_109 = arith.constant dense<0.000000e+00> : vector<48x48xf32>
    %188 = tpu.matmul %0, %187, %cst_109 {dimension_numbers = #tpu.dot_dimension_numbers<[1], [0], [0], [1], [0, 0, 1, 1], [], []>} : vector<48x48xf32>, vector<48x48xf32>, vector<48x48xf32> -> vector<48x48xf32>
    %cst_110 = arith.constant dense<0.000000e+00> : vector<48xf32>
    %189 = vector.multi_reduction <add>, %188, %cst_110 [1] : vector<48x48xf32> to vector<48xf32>
    %190 = vector.shape_cast %189 : vector<48xf32> to vector<48x1xf32>
    %cst_111 = arith.constant 0.020833334 : f32
    %191 = vector.broadcast %cst_111 : f32 to vector<48x1xf32>
    %192 = arith.mulf %190, %191 : vector<48x1xf32>
    %193 = vector.broadcast %192 : vector<48x1xf32> to vector<48x48xf32>
    %194 = arith.subf %187, %193 : vector<48x48xf32>
    %195 = arith.mulf %194, %194 : vector<48x48xf32>
    %cst_112 = arith.constant dense<0.000000e+00> : vector<48x48xf32>
    %196 = tpu.matmul %0, %195, %cst_112 {dimension_numbers = #tpu.dot_dimension_numbers<[1], [0], [0], [1], [0, 0, 1, 1], [], []>} : vector<48x48xf32>, vector<48x48xf32>, vector<48x48xf32> -> vector<48x48xf32>
    %cst_113 = arith.constant dense<0.000000e+00> : vector<48xf32>
    %197 = vector.multi_reduction <add>, %196, %cst_113 [1] : vector<48x48xf32> to vector<48xf32>
    %198 = vector.shape_cast %197 : vector<48xf32> to vector<48x1xf32>
    %cst_114 = arith.constant 0.020833334 : f32
    %199 = vector.broadcast %cst_114 : f32 to vector<48x1xf32>
    %200 = arith.mulf %198, %199 : vector<48x1xf32>
    %cst_115 = arith.constant 9.99999974E-6 : f32
    %201 = vector.broadcast %cst_115 : f32 to vector<48x1xf32>
    %202 = arith.addf %200, %201 : vector<48x1xf32>
    %203 = math.rsqrt %202 : vector<48x1xf32>
    %204 = vector.broadcast %203 : vector<48x1xf32> to vector<48x48xf32>
    %205 = arith.mulf %194, %204 : vector<48x48xf32>
    %cst_116 = arith.constant dense<0xFF800000> : vector<48xf32>
    %206 = vector.multi_reduction <maximumf>, %205, %cst_116 [1] : vector<48x48xf32> to vector<48xf32>
    %207 = vector.shape_cast %206 : vector<48xf32> to vector<48x1xf32>
    %208 = vector.broadcast %207 : vector<48x1xf32> to vector<48x48xf32>
    %209 = arith.subf %205, %208 : vector<48x48xf32>
    %210 = math.exp %209 : vector<48x48xf32>
    %cst_117 = arith.constant dense<0.000000e+00> : vector<48xf32>
    %211 = vector.multi_reduction <add>, %210, %cst_117 [1] : vector<48x48xf32> to vector<48xf32>
    %212 = vector.shape_cast %211 : vector<48xf32> to vector<48x1xf32>
    %213 = vector.broadcast %212 : vector<48x1xf32> to vector<48x48xf32>
    %214 = arith.divf %210, %213 : vector<48x48xf32>
    %cst_118 = arith.constant dense<0.000000e+00> : vector<16x48xf32>
    %215 = tpu.matmul %184, %214, %cst_118 {dimension_numbers = #tpu.dot_dimension_numbers<[1], [1], [0], [0], [0, 0, 1, 0], [], []>} : vector<16x48xf32>, vector<48x48xf32>, vector<16x48xf32> -> vector<16x48xf32>
    %216 = arith.addf %181, %215 : vector<16x48xf32>
    %cst_119 = arith.constant 5.000000e-01 : f32
    %217 = vector.broadcast %cst_119 : f32 to vector<16x48xf32>
    %218 = arith.mulf %216, %217 : vector<16x48xf32>
    %c16 = arith.constant 16 : index
    %c0_120 = arith.constant 0 : index
    %219 = vector.load %arg43[%c16, %c0_120] : memref<32x48xf32, #tpu.memory_space<vmem>>, vector<16x48xf32>
    tpu.vector_store %arg43[%c16, %c0_120], %218 {strides = array<i32>} : memref<32x48xf32, #tpu.memory_space<vmem>>, vector<16x48xf32>,
    %c0_121 = arith.constant 0 : index
    %c0_122 = arith.constant 0 : index
    %220 = vector.load %arg43[%c0_121, %c0_122] : memref<32x48xf32, #tpu.memory_space<vmem>>, vector<32x48xf32>
    %c0_123 = arith.constant 0 : index
    %c0_124 = arith.constant 0 : index
    %c0_125 = arith.constant 0 : index
    %221 = vector.load %arg15[%c0_123, %c0_124, %c0_125] : memref<2x48x48xf32, #tpu.memory_space<vmem>>, vector<1x48x48xf32>
    %222 = vector.shape_cast %221 : vector<1x48x48xf32> to vector<48x48xf32>
    %cst_126 = arith.constant dense<0.000000e+00> : vector<32x48xf32>
    %223 = tpu.matmul %220, %222, %cst_126 {dimension_numbers = #tpu.dot_dimension_numbers<[1], [1], [0], [0], [0, 0, 1, 0], [], []>} : vector<32x48xf32>, vector<48x48xf32>, vector<32x48xf32> -> vector<32x48xf32>
    %224 = arith.addf %13, %223 : vector<32x48xf32>
    %c0_127 = arith.constant 0 : index
    %c0_128 = arith.constant 0 : index
    %c0_129 = arith.constant 0 : index
    %225 = vector.load %arg16[%c0_127, %c0_128, %c0_129] : memref<2x1x48xf32, #tpu.memory_space<vmem>>, vector<1x1x48xf32>
    %226 = vector.shape_cast %225 : vector<1x1x48xf32> to vector<1x48xf32>
    %c0_130 = arith.constant 0 : index
    %c0_131 = arith.constant 0 : index
    %c0_132 = arith.constant 0 : index
    %227 = vector.load %arg17[%c0_130, %c0_131, %c0_132] : memref<2x1x48xf32, #tpu.memory_space<vmem>>, vector<1x1x48xf32>
    %228 = vector.shape_cast %227 : vector<1x1x48xf32> to vector<1x48xf32>
    %cst_133 = arith.constant dense<0.000000e+00> : vector<32x48xf32>
    %229 = tpu.matmul %224, %0, %cst_133 {dimension_numbers = #tpu.dot_dimension_numbers<[1], [0], [0], [1], [0, 0, 1, 1], [], []>} : vector<32x48xf32>, vector<48x48xf32>, vector<32x48xf32> -> vector<32x48xf32>
    %230 = arith.subf %224, %229 : vector<32x48xf32>
    %231 = arith.mulf %230, %230 : vector<32x48xf32>
    %cst_134 = arith.constant dense<0.000000e+00> : vector<32x48xf32>
    %232 = tpu.matmul %231, %0, %cst_134 {dimension_numbers = #tpu.dot_dimension_numbers<[1], [0], [0], [1], [0, 0, 1, 1], [], []>} : vector<32x48xf32>, vector<48x48xf32>, vector<32x48xf32> -> vector<32x48xf32>
    %cst_135 = arith.constant 9.99999997E-7 : f32
    %233 = vector.broadcast %cst_135 : f32 to vector<32x48xf32>
    %234 = arith.addf %232, %233 : vector<32x48xf32>
    %235 = math.rsqrt %234 : vector<32x48xf32>
    %236 = arith.mulf %230, %235 : vector<32x48xf32>
    %237 = vector.broadcast %226 : vector<1x48xf32> to vector<32x48xf32>
    %238 = arith.mulf %236, %237 : vector<32x48xf32>
    %239 = vector.broadcast %228 : vector<1x48xf32> to vector<32x48xf32>
    %240 = arith.addf %238, %239 : vector<32x48xf32>
    %c0_136 = arith.constant 0 : index
    %c0_137 = arith.constant 0 : index
    %c0_138 = arith.constant 0 : index
    %241 = vector.load %arg18[%c0_136, %c0_137, %c0_138] : memref<2x96x48xf32, #tpu.memory_space<vmem>>, vector<1x96x48xf32>
    %242 = vector.shape_cast %241 : vector<1x96x48xf32> to vector<96x48xf32>
    %cst_139 = arith.constant dense<0.000000e+00> : vector<32x96xf32>
    %243 = tpu.matmul %240, %242, %cst_139 {dimension_numbers = #tpu.dot_dimension_numbers<[1], [1], [0], [0], [0, 0, 1, 0], [], []>} : vector<32x48xf32>, vector<96x48xf32>, vector<32x96xf32> -> vector<32x96xf32>
    %c0_140 = arith.constant 0 : index
    %c0_141 = arith.constant 0 : index
    %c0_142 = arith.constant 0 : index
    %244 = vector.load %arg19[%c0_140, %c0_141, %c0_142] : memref<2x1x96xf32, #tpu.memory_space<vmem>>, vector<1x1x96xf32>
    %245 = vector.shape_cast %244 : vector<1x1x96xf32> to vector<1x96xf32>
    %246 = vector.broadcast %245 : vector<1x96xf32> to vector<32x96xf32>
    %247 = arith.addf %243, %246 : vector<32x96xf32>
    %cst_143 = arith.constant 5.000000e-01 : f32
    %248 = vector.broadcast %cst_143 : f32 to vector<32x96xf32>
    %249 = arith.mulf %248, %247 : vector<32x96xf32>
    %cst_144 = arith.constant 0.707106769 : f32
    %250 = vector.broadcast %cst_144 : f32 to vector<32x96xf32>
    %251 = arith.mulf %247, %250 : vector<32x96xf32>
    %cst_145 = arith.constant 0.000000e+00 : f32
    %252 = vector.broadcast %cst_145 : f32 to vector<32x96xf32>
    %253 = arith.cmpf oge, %251, %252 : vector<32x96xf32>
    %cst_146 = arith.constant 1.000000e+00 : f32
    %cst_147 = arith.constant -1.000000e+00 : f32
    %254 = vector.broadcast %cst_146 : f32 to vector<32x96xf32>
    %255 = vector.broadcast %cst_147 : f32 to vector<32x96xf32>
    %256 = arith.select %253, %254, %255 : vector<32x96xi1>, vector<32x96xf32>
    %257 = math.absf %251 : vector<32x96xf32>
    %cst_148 = arith.constant 0.327591091 : f32
    %258 = vector.broadcast %cst_148 : f32 to vector<32x96xf32>
    %259 = arith.mulf %258, %257 : vector<32x96xf32>
    %cst_149 = arith.constant 1.000000e+00 : f32
    %260 = vector.broadcast %cst_149 : f32 to vector<32x96xf32>
    %261 = arith.addf %260, %259 : vector<32x96xf32>
    %cst_150 = arith.constant 1.000000e+00 : f32
    %262 = vector.broadcast %cst_150 : f32 to vector<32x96xf32>
    %263 = arith.divf %262, %261 : vector<32x96xf32>
    %cst_151 = arith.constant 1.06140542 : f32
    %264 = vector.broadcast %cst_151 : f32 to vector<32x96xf32>
    %265 = arith.mulf %264, %263 : vector<32x96xf32>
    %cst_152 = arith.constant -1.45315206 : f32
    %266 = vector.broadcast %cst_152 : f32 to vector<32x96xf32>
    %267 = arith.addf %265, %266 : vector<32x96xf32>
    %268 = arith.mulf %267, %263 : vector<32x96xf32>
    %cst_153 = arith.constant 1.42141378 : f32
    %269 = vector.broadcast %cst_153 : f32 to vector<32x96xf32>
    %270 = arith.addf %268, %269 : vector<32x96xf32>
    %271 = arith.mulf %270, %263 : vector<32x96xf32>
    %cst_154 = arith.constant -0.284496725 : f32
    %272 = vector.broadcast %cst_154 : f32 to vector<32x96xf32>
    %273 = arith.addf %271, %272 : vector<32x96xf32>
    %274 = arith.mulf %273, %263 : vector<32x96xf32>
    %cst_155 = arith.constant 0.254829586 : f32
    %275 = vector.broadcast %cst_155 : f32 to vector<32x96xf32>
    %276 = arith.addf %274, %275 : vector<32x96xf32>
    %277 = arith.mulf %276, %263 : vector<32x96xf32>
    %cst_156 = arith.constant 0.000000e+00 : f32
    %278 = vector.broadcast %cst_156 : f32 to vector<32x96xf32>
    %279 = arith.subf %278, %257 : vector<32x96xf32>
    %280 = arith.mulf %279, %257 : vector<32x96xf32>
    %281 = math.exp %280 : vector<32x96xf32>
    %282 = arith.mulf %277, %281 : vector<32x96xf32>
    %cst_157 = arith.constant 1.000000e+00 : f32
    %283 = vector.broadcast %cst_157 : f32 to vector<32x96xf32>
    %284 = arith.subf %283, %282 : vector<32x96xf32>
    %285 = arith.mulf %256, %284 : vector<32x96xf32>
    %cst_158 = arith.constant 1.000000e+00 : f32
    %286 = vector.broadcast %cst_158 : f32 to vector<32x96xf32>
    %287 = arith.addf %286, %285 : vector<32x96xf32>
    %288 = arith.mulf %249, %287 : vector<32x96xf32>
    %c0_159 = arith.constant 0 : index
    %c0_160 = arith.constant 0 : index
    %c0_161 = arith.constant 0 : index
    %289 = vector.load %arg20[%c0_159, %c0_160, %c0_161] : memref<2x48x96xf32, #tpu.memory_space<vmem>>, vector<1x48x96xf32>
    %290 = vector.shape_cast %289 : vector<1x48x96xf32> to vector<48x96xf32>
    %cst_162 = arith.constant dense<0.000000e+00> : vector<32x48xf32>
    %291 = tpu.matmul %288, %290, %cst_162 {dimension_numbers = #tpu.dot_dimension_numbers<[1], [1], [0], [0], [0, 0, 1, 0], [], []>} : vector<32x96xf32>, vector<48x96xf32>, vector<32x48xf32> -> vector<32x48xf32>
    %c0_163 = arith.constant 0 : index
    %c0_164 = arith.constant 0 : index
    %c0_165 = arith.constant 0 : index
    %292 = vector.load %arg21[%c0_163, %c0_164, %c0_165] : memref<2x1x48xf32, #tpu.memory_space<vmem>>, vector<1x1x48xf32>
    %293 = vector.shape_cast %292 : vector<1x1x48xf32> to vector<1x48xf32>
    %294 = vector.broadcast %293 : vector<1x48xf32> to vector<32x48xf32>
    %295 = arith.addf %291, %294 : vector<32x48xf32>
    %296 = arith.addf %224, %295 : vector<32x48xf32>
    %c1_166 = arith.constant 1 : index
    %c0_167 = arith.constant 0 : index
    %c0_168 = arith.constant 0 : index
    %297 = vector.load %arg8[%c1_166, %c0_167, %c0_168] : memref<2x1x48xf32, #tpu.memory_space<vmem>>, vector<1x1x48xf32>
    %298 = vector.shape_cast %297 : vector<1x1x48xf32> to vector<1x48xf32>
    %c1_169 = arith.constant 1 : index
    %c0_170 = arith.constant 0 : index
    %c0_171 = arith.constant 0 : index
    %299 = vector.load %arg9[%c1_169, %c0_170, %c0_171] : memref<2x1x48xf32, #tpu.memory_space<vmem>>, vector<1x1x48xf32>
    %300 = vector.shape_cast %299 : vector<1x1x48xf32> to vector<1x48xf32>
    %cst_172 = arith.constant dense<0.000000e+00> : vector<32x48xf32>
    %301 = tpu.matmul %296, %0, %cst_172 {dimension_numbers = #tpu.dot_dimension_numbers<[1], [0], [0], [1], [0, 0, 1, 1], [], []>} : vector<32x48xf32>, vector<48x48xf32>, vector<32x48xf32> -> vector<32x48xf32>
    %302 = arith.subf %296, %301 : vector<32x48xf32>
    %303 = arith.mulf %302, %302 : vector<32x48xf32>
    %cst_173 = arith.constant dense<0.000000e+00> : vector<32x48xf32>
    %304 = tpu.matmul %303, %0, %cst_173 {dimension_numbers = #tpu.dot_dimension_numbers<[1], [0], [0], [1], [0, 0, 1, 1], [], []>} : vector<32x48xf32>, vector<48x48xf32>, vector<32x48xf32> -> vector<32x48xf32>
    %cst_174 = arith.constant 9.99999997E-7 : f32
    %305 = vector.broadcast %cst_174 : f32 to vector<32x48xf32>
    %306 = arith.addf %304, %305 : vector<32x48xf32>
    %307 = math.rsqrt %306 : vector<32x48xf32>
    %308 = arith.mulf %302, %307 : vector<32x48xf32>
    %309 = vector.broadcast %298 : vector<1x48xf32> to vector<32x48xf32>
    %310 = arith.mulf %308, %309 : vector<32x48xf32>
    %311 = vector.broadcast %300 : vector<1x48xf32> to vector<32x48xf32>
    %312 = arith.addf %310, %311 : vector<32x48xf32>
    %c1_175 = arith.constant 1 : index
    %c0_176 = arith.constant 0 : index
    %c0_177 = arith.constant 0 : index
    %313 = vector.load %arg10[%c1_175, %c0_176, %c0_177] : memref<2x1x48xf32, #tpu.memory_space<vmem>>, vector<1x1x48xf32>
    %314 = vector.shape_cast %313 : vector<1x1x48xf32> to vector<1x48xf32>
    %c1_178 = arith.constant 1 : index
    %c0_179 = arith.constant 0 : index
    %c0_180 = arith.constant 0 : index
    %315 = vector.load %arg11[%c1_178, %c0_179, %c0_180] : memref<2x1x48xf32, #tpu.memory_space<vmem>>, vector<1x1x48xf32>
    %316 = vector.shape_cast %315 : vector<1x1x48xf32> to vector<1x48xf32>
    %cst_181 = arith.constant dense<0.000000e+00> : vector<32xf32>
    %317 = vector.multi_reduction <add>, %296, %cst_181 [1] : vector<32x48xf32> to vector<32xf32>
    %318 = vector.shape_cast %317 : vector<32xf32> to vector<32x1xf32>
    %cst_182 = arith.constant 4.800000e+01 : f32
    %319 = vector.broadcast %cst_182 : f32 to vector<32x1xf32>
    %320 = arith.divf %318, %319 : vector<32x1xf32>
    %321 = vector.broadcast %320 : vector<32x1xf32> to vector<32x48xf32>
    %322 = arith.subf %296, %321 : vector<32x48xf32>
    %323 = arith.mulf %322, %322 : vector<32x48xf32>
    %cst_183 = arith.constant dense<0.000000e+00> : vector<32xf32>
    %324 = vector.multi_reduction <add>, %323, %cst_183 [1] : vector<32x48xf32> to vector<32xf32>
    %325 = vector.shape_cast %324 : vector<32xf32> to vector<32x1xf32>
    %cst_184 = arith.constant 4.800000e+01 : f32
    %326 = vector.broadcast %cst_184 : f32 to vector<32x1xf32>
    %327 = arith.divf %325, %326 : vector<32x1xf32>
    %cst_185 = arith.constant 9.99999997E-7 : f32
    %328 = vector.broadcast %cst_185 : f32 to vector<32x1xf32>
    %329 = arith.addf %327, %328 : vector<32x1xf32>
    %330 = math.rsqrt %329 : vector<32x1xf32>
    %331 = vector.broadcast %330 : vector<32x1xf32> to vector<32x48xf32>
    %332 = arith.mulf %322, %331 : vector<32x48xf32>
    %333 = vector.broadcast %314 : vector<1x48xf32> to vector<32x48xf32>
    %334 = arith.mulf %332, %333 : vector<32x48xf32>
    %335 = vector.broadcast %316 : vector<1x48xf32> to vector<32x48xf32>
    %336 = arith.addf %334, %335 : vector<32x48xf32>
    %c1_186 = arith.constant 1 : index
    %c0_187 = arith.constant 0 : index
    %c0_188 = arith.constant 0 : index
    %c0_189 = arith.constant 0 : index
    %337 = vector.load %arg12[%c1_186, %c0_187, %c0_188, %c0_189] : memref<2x2x48x48xf32, #tpu.memory_space<vmem>>, vector<1x1x48x48xf32>
    %338 = vector.shape_cast %337 : vector<1x1x48x48xf32> to vector<48x48xf32>
    %cst_190 = arith.constant dense<0.000000e+00> : vector<32x48xf32>
    %339 = tpu.matmul %312, %338, %cst_190 {dimension_numbers = #tpu.dot_dimension_numbers<[1], [1], [0], [0], [0, 0, 1, 0], [], []>} : vector<32x48xf32>, vector<48x48xf32>, vector<32x48xf32> -> vector<32x48xf32>
    %c1_191 = arith.constant 1 : index
    %c1_192 = arith.constant 1 : index
    %c0_193 = arith.constant 0 : index
    %c0_194 = arith.constant 0 : index
    %340 = vector.load %arg12[%c1_191, %c1_192, %c0_193, %c0_194] : memref<2x2x48x48xf32, #tpu.memory_space<vmem>>, vector<1x1x48x48xf32>
    %341 = vector.shape_cast %340 : vector<1x1x48x48xf32> to vector<48x48xf32>
    %cst_195 = arith.constant dense<0.000000e+00> : vector<32x48xf32>
    %342 = tpu.matmul %312, %341, %cst_195 {dimension_numbers = #tpu.dot_dimension_numbers<[1], [1], [0], [0], [0, 0, 1, 0], [], []>} : vector<32x48xf32>, vector<48x48xf32>, vector<32x48xf32> -> vector<32x48xf32>
    %c1_196 = arith.constant 1 : index
    %c0_197 = arith.constant 0 : index
    %c0_198 = arith.constant 0 : index
    %c0_199 = arith.constant 0 : index
    %343 = vector.load %arg13[%c1_196, %c0_197, %c0_198, %c0_199] : memref<2x2x48x48xf32, #tpu.memory_space<vmem>>, vector<1x1x48x48xf32>
    %344 = vector.shape_cast %343 : vector<1x1x48x48xf32> to vector<48x48xf32>
    %cst_200 = arith.constant dense<0.000000e+00> : vector<32x48xf32>
    %345 = tpu.matmul %336, %344, %cst_200 {dimension_numbers = #tpu.dot_dimension_numbers<[1], [1], [0], [0], [0, 0, 1, 0], [], []>} : vector<32x48xf32>, vector<48x48xf32>, vector<32x48xf32> -> vector<32x48xf32>
    %c1_201 = arith.constant 1 : index
    %c1_202 = arith.constant 1 : index
    %c0_203 = arith.constant 0 : index
    %c0_204 = arith.constant 0 : index
    %346 = vector.load %arg13[%c1_201, %c1_202, %c0_203, %c0_204] : memref<2x2x48x48xf32, #tpu.memory_space<vmem>>, vector<1x1x48x48xf32>
    %347 = vector.shape_cast %346 : vector<1x1x48x48xf32> to vector<48x48xf32>
    %cst_205 = arith.constant dense<0.000000e+00> : vector<32x48xf32>
    %348 = tpu.matmul %336, %347, %cst_205 {dimension_numbers = #tpu.dot_dimension_numbers<[1], [1], [0], [0], [0, 0, 1, 0], [], []>} : vector<32x48xf32>, vector<48x48xf32>, vector<32x48xf32> -> vector<32x48xf32>
    %c1_206 = arith.constant 1 : index
    %c0_207 = arith.constant 0 : index
    %c0_208 = arith.constant 0 : index
    %c0_209 = arith.constant 0 : index
    %349 = vector.load %arg14[%c1_206, %c0_207, %c0_208, %c0_209] : memref<2x2x48x48xf32, #tpu.memory_space<vmem>>, vector<1x1x48x48xf32>
    %350 = vector.shape_cast %349 : vector<1x1x48x48xf32> to vector<48x48xf32>
    %cst_210 = arith.constant dense<0.000000e+00> : vector<32x48xf32>
    %351 = tpu.matmul %336, %350, %cst_210 {dimension_numbers = #tpu.dot_dimension_numbers<[1], [1], [0], [0], [0, 0, 1, 0], [], []>} : vector<32x48xf32>, vector<48x48xf32>, vector<32x48xf32> -> vector<32x48xf32>
    %c1_211 = arith.constant 1 : index
    %c1_212 = arith.constant 1 : index
    %c0_213 = arith.constant 0 : index
    %c0_214 = arith.constant 0 : index
    %352 = vector.load %arg14[%c1_211, %c1_212, %c0_213, %c0_214] : memref<2x2x48x48xf32, #tpu.memory_space<vmem>>, vector<1x1x48x48xf32>
    %353 = vector.shape_cast %352 : vector<1x1x48x48xf32> to vector<48x48xf32>
    %cst_215 = arith.constant dense<0.000000e+00> : vector<32x48xf32>
    %354 = tpu.matmul %336, %353, %cst_215 {dimension_numbers = #tpu.dot_dimension_numbers<[1], [1], [0], [0], [0, 0, 1, 0], [], []>} : vector<32x48xf32>, vector<48x48xf32>, vector<32x48xf32> -> vector<32x48xf32>
    %cst_216 = arith.constant 0.000000e+00 : f32
    %355 = vector.broadcast %cst_216 : f32 to vector<16x48xf32>
    %356 = vector.extract_strided_slice %339 {offsets = [0, 0], sizes = [16, 48], strides = [1, 1]} : vector<32x48xf32> to vector<16x48xf32>
    %357 = vector.extract_strided_slice %345 {offsets = [0, 0], sizes = [16, 48], strides = [1, 1]} : vector<32x48xf32> to vector<16x48xf32>
    %358 = vector.extract_strided_slice %351 {offsets = [0, 0], sizes = [16, 48], strides = [1, 1]} : vector<32x48xf32> to vector<16x48xf32>
    %cst_217 = arith.constant dense<0.000000e+00> : vector<48x48xf32>
    %359 = tpu.matmul %356, %357, %cst_217 {dimension_numbers = #tpu.dot_dimension_numbers<[0], [0], [1], [1], [0, 1, 1, 1], [], []>} : vector<16x48xf32>, vector<16x48xf32>, vector<48x48xf32> -> vector<48x48xf32>
    %cst_218 = arith.constant 0.144337565 : f32
    %360 = vector.broadcast %cst_218 : f32 to vector<48x48xf32>
    %361 = arith.mulf %359, %360 : vector<48x48xf32>
    %cst_219 = arith.constant dense<0.000000e+00> : vector<48x48xf32>
    %362 = tpu.matmul %0, %361, %cst_219 {dimension_numbers = #tpu.dot_dimension_numbers<[1], [0], [0], [1], [0, 0, 1, 1], [], []>} : vector<48x48xf32>, vector<48x48xf32>, vector<48x48xf32> -> vector<48x48xf32>
    %cst_220 = arith.constant dense<0.000000e+00> : vector<48xf32>
    %363 = vector.multi_reduction <add>, %362, %cst_220 [1] : vector<48x48xf32> to vector<48xf32>
    %364 = vector.shape_cast %363 : vector<48xf32> to vector<48x1xf32>
    %cst_221 = arith.constant 0.020833334 : f32
    %365 = vector.broadcast %cst_221 : f32 to vector<48x1xf32>
    %366 = arith.mulf %364, %365 : vector<48x1xf32>
    %367 = vector.broadcast %366 : vector<48x1xf32> to vector<48x48xf32>
    %368 = arith.subf %361, %367 : vector<48x48xf32>
    %369 = arith.mulf %368, %368 : vector<48x48xf32>
    %cst_222 = arith.constant dense<0.000000e+00> : vector<48x48xf32>
    %370 = tpu.matmul %0, %369, %cst_222 {dimension_numbers = #tpu.dot_dimension_numbers<[1], [0], [0], [1], [0, 0, 1, 1], [], []>} : vector<48x48xf32>, vector<48x48xf32>, vector<48x48xf32> -> vector<48x48xf32>
    %cst_223 = arith.constant dense<0.000000e+00> : vector<48xf32>
    %371 = vector.multi_reduction <add>, %370, %cst_223 [1] : vector<48x48xf32> to vector<48xf32>
    %372 = vector.shape_cast %371 : vector<48xf32> to vector<48x1xf32>
    %cst_224 = arith.constant 0.020833334 : f32
    %373 = vector.broadcast %cst_224 : f32 to vector<48x1xf32>
    %374 = arith.mulf %372, %373 : vector<48x1xf32>
    %cst_225 = arith.constant 9.99999974E-6 : f32
    %375 = vector.broadcast %cst_225 : f32 to vector<48x1xf32>
    %376 = arith.addf %374, %375 : vector<48x1xf32>
    %377 = math.rsqrt %376 : vector<48x1xf32>
    %378 = vector.broadcast %377 : vector<48x1xf32> to vector<48x48xf32>
    %379 = arith.mulf %368, %378 : vector<48x48xf32>
    %cst_226 = arith.constant dense<0xFF800000> : vector<48xf32>
    %380 = vector.multi_reduction <maximumf>, %379, %cst_226 [1] : vector<48x48xf32> to vector<48xf32>
    %381 = vector.shape_cast %380 : vector<48xf32> to vector<48x1xf32>
    %382 = vector.broadcast %381 : vector<48x1xf32> to vector<48x48xf32>
    %383 = arith.subf %379, %382 : vector<48x48xf32>
    %384 = math.exp %383 : vector<48x48xf32>
    %cst_227 = arith.constant dense<0.000000e+00> : vector<48xf32>
    %385 = vector.multi_reduction <add>, %384, %cst_227 [1] : vector<48x48xf32> to vector<48xf32>
    %386 = vector.shape_cast %385 : vector<48xf32> to vector<48x1xf32>
    %387 = vector.broadcast %386 : vector<48x1xf32> to vector<48x48xf32>
    %388 = arith.divf %384, %387 : vector<48x48xf32>
    %c0_228 = arith.constant 0 : index
    %c0_229 = arith.constant 0 : index
    %c0_230 = arith.constant 0 : index
    %c0_231 = arith.constant 0 : index
    %389 = vector.load %arg42[%c0_228, %c0_229, %c0_230, %c0_231] : memref<2x2x48x48xf32, #tpu.memory_space<vmem>>, vector<1x1x48x48xf32>
    %390 = vector.shape_cast %389 : vector<1x1x48x48xf32> to vector<48x48xf32>
    %391 = vector.shape_cast %388 : vector<48x48xf32> to vector<1x1x48x48xf32>
    tpu.vector_store %arg42[%c0_228, %c0_229, %c0_230, %c0_231], %391 {strides = array<i32>} : memref<2x2x48x48xf32, #tpu.memory_space<vmem>>, vector<1x1x48x48xf32>,
    %cst_232 = arith.constant dense<0.000000e+00> : vector<16x48xf32>
    %392 = tpu.matmul %358, %388, %cst_232 {dimension_numbers = #tpu.dot_dimension_numbers<[1], [1], [0], [0], [0, 0, 1, 0], [], []>} : vector<16x48xf32>, vector<48x48xf32>, vector<16x48xf32> -> vector<16x48xf32>
    %393 = arith.addf %355, %392 : vector<16x48xf32>
    %394 = vector.extract_strided_slice %342 {offsets = [0, 0], sizes = [16, 48], strides = [1, 1]} : vector<32x48xf32> to vector<16x48xf32>
    %395 = vector.extract_strided_slice %348 {offsets = [0, 0], sizes = [16, 48], strides = [1, 1]} : vector<32x48xf32> to vector<16x48xf32>
    %396 = vector.extract_strided_slice %354 {offsets = [0, 0], sizes = [16, 48], strides = [1, 1]} : vector<32x48xf32> to vector<16x48xf32>
    %cst_233 = arith.constant dense<0.000000e+00> : vector<48x48xf32>
    %397 = tpu.matmul %394, %395, %cst_233 {dimension_numbers = #tpu.dot_dimension_numbers<[0], [0], [1], [1], [0, 1, 1, 1], [], []>} : vector<16x48xf32>, vector<16x48xf32>, vector<48x48xf32> -> vector<48x48xf32>
    %cst_234 = arith.constant 0.144337565 : f32
    %398 = vector.broadcast %cst_234 : f32 to vector<48x48xf32>
    %399 = arith.mulf %397, %398 : vector<48x48xf32>
    %cst_235 = arith.constant dense<0.000000e+00> : vector<48x48xf32>
    %400 = tpu.matmul %0, %399, %cst_235 {dimension_numbers = #tpu.dot_dimension_numbers<[1], [0], [0], [1], [0, 0, 1, 1], [], []>} : vector<48x48xf32>, vector<48x48xf32>, vector<48x48xf32> -> vector<48x48xf32>
    %cst_236 = arith.constant dense<0.000000e+00> : vector<48xf32>
    %401 = vector.multi_reduction <add>, %400, %cst_236 [1] : vector<48x48xf32> to vector<48xf32>
    %402 = vector.shape_cast %401 : vector<48xf32> to vector<48x1xf32>
    %cst_237 = arith.constant 0.020833334 : f32
    %403 = vector.broadcast %cst_237 : f32 to vector<48x1xf32>
    %404 = arith.mulf %402, %403 : vector<48x1xf32>
    %405 = vector.broadcast %404 : vector<48x1xf32> to vector<48x48xf32>
    %406 = arith.subf %399, %405 : vector<48x48xf32>
    %407 = arith.mulf %406, %406 : vector<48x48xf32>
    %cst_238 = arith.constant dense<0.000000e+00> : vector<48x48xf32>
    %408 = tpu.matmul %0, %407, %cst_238 {dimension_numbers = #tpu.dot_dimension_numbers<[1], [0], [0], [1], [0, 0, 1, 1], [], []>} : vector<48x48xf32>, vector<48x48xf32>, vector<48x48xf32> -> vector<48x48xf32>
    %cst_239 = arith.constant dense<0.000000e+00> : vector<48xf32>
    %409 = vector.multi_reduction <add>, %408, %cst_239 [1] : vector<48x48xf32> to vector<48xf32>
    %410 = vector.shape_cast %409 : vector<48xf32> to vector<48x1xf32>
    %cst_240 = arith.constant 0.020833334 : f32
    %411 = vector.broadcast %cst_240 : f32 to vector<48x1xf32>
    %412 = arith.mulf %410, %411 : vector<48x1xf32>
    %cst_241 = arith.constant 9.99999974E-6 : f32
    %413 = vector.broadcast %cst_241 : f32 to vector<48x1xf32>
    %414 = arith.addf %412, %413 : vector<48x1xf32>
    %415 = math.rsqrt %414 : vector<48x1xf32>
    %416 = vector.broadcast %415 : vector<48x1xf32> to vector<48x48xf32>
    %417 = arith.mulf %406, %416 : vector<48x48xf32>
    %cst_242 = arith.constant dense<0xFF800000> : vector<48xf32>
    %418 = vector.multi_reduction <maximumf>, %417, %cst_242 [1] : vector<48x48xf32> to vector<48xf32>
    %419 = vector.shape_cast %418 : vector<48xf32> to vector<48x1xf32>
    %420 = vector.broadcast %419 : vector<48x1xf32> to vector<48x48xf32>
    %421 = arith.subf %417, %420 : vector<48x48xf32>
    %422 = math.exp %421 : vector<48x48xf32>
    %cst_243 = arith.constant dense<0.000000e+00> : vector<48xf32>
    %423 = vector.multi_reduction <add>, %422, %cst_243 [1] : vector<48x48xf32> to vector<48xf32>
    %424 = vector.shape_cast %423 : vector<48xf32> to vector<48x1xf32>
    %425 = vector.broadcast %424 : vector<48x1xf32> to vector<48x48xf32>
    %426 = arith.divf %422, %425 : vector<48x48xf32>
    %c0_244 = arith.constant 0 : index
    %c1_245 = arith.constant 1 : index
    %c0_246 = arith.constant 0 : index
    %c0_247 = arith.constant 0 : index
    %427 = vector.load %arg42[%c0_244, %c1_245, %c0_246, %c0_247] : memref<2x2x48x48xf32, #tpu.memory_space<vmem>>, vector<1x1x48x48xf32>
    %428 = vector.shape_cast %427 : vector<1x1x48x48xf32> to vector<48x48xf32>
    %429 = vector.shape_cast %426 : vector<48x48xf32> to vector<1x1x48x48xf32>
    tpu.vector_store %arg42[%c0_244, %c1_245, %c0_246, %c0_247], %429 {strides = array<i32>} : memref<2x2x48x48xf32, #tpu.memory_space<vmem>>, vector<1x1x48x48xf32>,
    %cst_248 = arith.constant dense<0.000000e+00> : vector<16x48xf32>
    %430 = tpu.matmul %396, %426, %cst_248 {dimension_numbers = #tpu.dot_dimension_numbers<[1], [1], [0], [0], [0, 0, 1, 0], [], []>} : vector<16x48xf32>, vector<48x48xf32>, vector<16x48xf32> -> vector<16x48xf32>
    %431 = arith.addf %393, %430 : vector<16x48xf32>
    %cst_249 = arith.constant 5.000000e-01 : f32
    %432 = vector.broadcast %cst_249 : f32 to vector<16x48xf32>
    %433 = arith.mulf %431, %432 : vector<16x48xf32>
    %c0_250 = arith.constant 0 : index
    %c0_251 = arith.constant 0 : index
    %434 = vector.load %arg43[%c0_250, %c0_251] : memref<32x48xf32, #tpu.memory_space<vmem>>, vector<16x48xf32>
    tpu.vector_store %arg43[%c0_250, %c0_251], %433 {strides = array<i32>} : memref<32x48xf32, #tpu.memory_space<vmem>>, vector<16x48xf32>,
    %cst_252 = arith.constant 0.000000e+00 : f32
    %435 = vector.broadcast %cst_252 : f32 to vector<16x48xf32>
    %436 = vector.extract_strided_slice %339 {offsets = [16, 0], sizes = [16, 48], strides = [1, 1]} : vector<32x48xf32> to vector<16x48xf32>
    %437 = vector.extract_strided_slice %345 {offsets = [16, 0], sizes = [16, 48], strides = [1, 1]} : vector<32x48xf32> to vector<16x48xf32>
    %438 = vector.extract_strided_slice %351 {offsets = [16, 0], sizes = [16, 48], strides = [1, 1]} : vector<32x48xf32> to vector<16x48xf32>
    %cst_253 = arith.constant dense<0.000000e+00> : vector<48x48xf32>
    %439 = tpu.matmul %436, %437, %cst_253 {dimension_numbers = #tpu.dot_dimension_numbers<[0], [0], [1], [1], [0, 1, 1, 1], [], []>} : vector<16x48xf32>, vector<16x48xf32>, vector<48x48xf32> -> vector<48x48xf32>
    %cst_254 = arith.constant 0.144337565 : f32
    %440 = vector.broadcast %cst_254 : f32 to vector<48x48xf32>
    %441 = arith.mulf %439, %440 : vector<48x48xf32>
    %cst_255 = arith.constant dense<0.000000e+00> : vector<48x48xf32>
    %442 = tpu.matmul %0, %441, %cst_255 {dimension_numbers = #tpu.dot_dimension_numbers<[1], [0], [0], [1], [0, 0, 1, 1], [], []>} : vector<48x48xf32>, vector<48x48xf32>, vector<48x48xf32> -> vector<48x48xf32>
    %cst_256 = arith.constant dense<0.000000e+00> : vector<48xf32>
    %443 = vector.multi_reduction <add>, %442, %cst_256 [1] : vector<48x48xf32> to vector<48xf32>
    %444 = vector.shape_cast %443 : vector<48xf32> to vector<48x1xf32>
    %cst_257 = arith.constant 0.020833334 : f32
    %445 = vector.broadcast %cst_257 : f32 to vector<48x1xf32>
    %446 = arith.mulf %444, %445 : vector<48x1xf32>
    %447 = vector.broadcast %446 : vector<48x1xf32> to vector<48x48xf32>
    %448 = arith.subf %441, %447 : vector<48x48xf32>
    %449 = arith.mulf %448, %448 : vector<48x48xf32>
    %cst_258 = arith.constant dense<0.000000e+00> : vector<48x48xf32>
    %450 = tpu.matmul %0, %449, %cst_258 {dimension_numbers = #tpu.dot_dimension_numbers<[1], [0], [0], [1], [0, 0, 1, 1], [], []>} : vector<48x48xf32>, vector<48x48xf32>, vector<48x48xf32> -> vector<48x48xf32>
    %cst_259 = arith.constant dense<0.000000e+00> : vector<48xf32>
    %451 = vector.multi_reduction <add>, %450, %cst_259 [1] : vector<48x48xf32> to vector<48xf32>
    %452 = vector.shape_cast %451 : vector<48xf32> to vector<48x1xf32>
    %cst_260 = arith.constant 0.020833334 : f32
    %453 = vector.broadcast %cst_260 : f32 to vector<48x1xf32>
    %454 = arith.mulf %452, %453 : vector<48x1xf32>
    %cst_261 = arith.constant 9.99999974E-6 : f32
    %455 = vector.broadcast %cst_261 : f32 to vector<48x1xf32>
    %456 = arith.addf %454, %455 : vector<48x1xf32>
    %457 = math.rsqrt %456 : vector<48x1xf32>
    %458 = vector.broadcast %457 : vector<48x1xf32> to vector<48x48xf32>
    %459 = arith.mulf %448, %458 : vector<48x48xf32>
    %cst_262 = arith.constant dense<0xFF800000> : vector<48xf32>
    %460 = vector.multi_reduction <maximumf>, %459, %cst_262 [1] : vector<48x48xf32> to vector<48xf32>
    %461 = vector.shape_cast %460 : vector<48xf32> to vector<48x1xf32>
    %462 = vector.broadcast %461 : vector<48x1xf32> to vector<48x48xf32>
    %463 = arith.subf %459, %462 : vector<48x48xf32>
    %464 = math.exp %463 : vector<48x48xf32>
    %cst_263 = arith.constant dense<0.000000e+00> : vector<48xf32>
    %465 = vector.multi_reduction <add>, %464, %cst_263 [1] : vector<48x48xf32> to vector<48xf32>
    %466 = vector.shape_cast %465 : vector<48xf32> to vector<48x1xf32>
    %467 = vector.broadcast %466 : vector<48x1xf32> to vector<48x48xf32>
    %468 = arith.divf %464, %467 : vector<48x48xf32>
    %c1_264 = arith.constant 1 : index
    %c0_265 = arith.constant 0 : index
    %c0_266 = arith.constant 0 : index
    %c0_267 = arith.constant 0 : index
    %469 = vector.load %arg42[%c1_264, %c0_265, %c0_266, %c0_267] : memref<2x2x48x48xf32, #tpu.memory_space<vmem>>, vector<1x1x48x48xf32>
    %470 = vector.shape_cast %469 : vector<1x1x48x48xf32> to vector<48x48xf32>
    %471 = vector.shape_cast %468 : vector<48x48xf32> to vector<1x1x48x48xf32>
    tpu.vector_store %arg42[%c1_264, %c0_265, %c0_266, %c0_267], %471 {strides = array<i32>} : memref<2x2x48x48xf32, #tpu.memory_space<vmem>>, vector<1x1x48x48xf32>,
    %cst_268 = arith.constant dense<0.000000e+00> : vector<16x48xf32>
    %472 = tpu.matmul %438, %468, %cst_268 {dimension_numbers = #tpu.dot_dimension_numbers<[1], [1], [0], [0], [0, 0, 1, 0], [], []>} : vector<16x48xf32>, vector<48x48xf32>, vector<16x48xf32> -> vector<16x48xf32>
    %473 = arith.addf %435, %472 : vector<16x48xf32>
    %474 = vector.extract_strided_slice %342 {offsets = [16, 0], sizes = [16, 48], strides = [1, 1]} : vector<32x48xf32> to vector<16x48xf32>
    %475 = vector.extract_strided_slice %348 {offsets = [16, 0], sizes = [16, 48], strides = [1, 1]} : vector<32x48xf32> to vector<16x48xf32>
    %476 = vector.extract_strided_slice %354 {offsets = [16, 0], sizes = [16, 48], strides = [1, 1]} : vector<32x48xf32> to vector<16x48xf32>
    %cst_269 = arith.constant dense<0.000000e+00> : vector<48x48xf32>
    %477 = tpu.matmul %474, %475, %cst_269 {dimension_numbers = #tpu.dot_dimension_numbers<[0], [0], [1], [1], [0, 1, 1, 1], [], []>} : vector<16x48xf32>, vector<16x48xf32>, vector<48x48xf32> -> vector<48x48xf32>
    %cst_270 = arith.constant 0.144337565 : f32
    %478 = vector.broadcast %cst_270 : f32 to vector<48x48xf32>
    %479 = arith.mulf %477, %478 : vector<48x48xf32>
    %cst_271 = arith.constant dense<0.000000e+00> : vector<48x48xf32>
    %480 = tpu.matmul %0, %479, %cst_271 {dimension_numbers = #tpu.dot_dimension_numbers<[1], [0], [0], [1], [0, 0, 1, 1], [], []>} : vector<48x48xf32>, vector<48x48xf32>, vector<48x48xf32> -> vector<48x48xf32>
    %cst_272 = arith.constant dense<0.000000e+00> : vector<48xf32>
    %481 = vector.multi_reduction <add>, %480, %cst_272 [1] : vector<48x48xf32> to vector<48xf32>
    %482 = vector.shape_cast %481 : vector<48xf32> to vector<48x1xf32>
    %cst_273 = arith.constant 0.020833334 : f32
    %483 = vector.broadcast %cst_273 : f32 to vector<48x1xf32>
    %484 = arith.mulf %482, %483 : vector<48x1xf32>
    %485 = vector.broadcast %484 : vector<48x1xf32> to vector<48x48xf32>
    %486 = arith.subf %479, %485 : vector<48x48xf32>
    %487 = arith.mulf %486, %486 : vector<48x48xf32>
    %cst_274 = arith.constant dense<0.000000e+00> : vector<48x48xf32>
    %488 = tpu.matmul %0, %487, %cst_274 {dimension_numbers = #tpu.dot_dimension_numbers<[1], [0], [0], [1], [0, 0, 1, 1], [], []>} : vector<48x48xf32>, vector<48x48xf32>, vector<48x48xf32> -> vector<48x48xf32>
    %cst_275 = arith.constant dense<0.000000e+00> : vector<48xf32>
    %489 = vector.multi_reduction <add>, %488, %cst_275 [1] : vector<48x48xf32> to vector<48xf32>
    %490 = vector.shape_cast %489 : vector<48xf32> to vector<48x1xf32>
    %cst_276 = arith.constant 0.020833334 : f32
    %491 = vector.broadcast %cst_276 : f32 to vector<48x1xf32>
    %492 = arith.mulf %490, %491 : vector<48x1xf32>
    %cst_277 = arith.constant 9.99999974E-6 : f32
    %493 = vector.broadcast %cst_277 : f32 to vector<48x1xf32>
    %494 = arith.addf %492, %493 : vector<48x1xf32>
    %495 = math.rsqrt %494 : vector<48x1xf32>
    %496 = vector.broadcast %495 : vector<48x1xf32> to vector<48x48xf32>
    %497 = arith.mulf %486, %496 : vector<48x48xf32>
    %cst_278 = arith.constant dense<0xFF800000> : vector<48xf32>
    %498 = vector.multi_reduction <maximumf>, %497, %cst_278 [1] : vector<48x48xf32> to vector<48xf32>
    %499 = vector.shape_cast %498 : vector<48xf32> to vector<48x1xf32>
    %500 = vector.broadcast %499 : vector<48x1xf32> to vector<48x48xf32>
    %501 = arith.subf %497, %500 : vector<48x48xf32>
    %502 = math.exp %501 : vector<48x48xf32>
    %cst_279 = arith.constant dense<0.000000e+00> : vector<48xf32>
    %503 = vector.multi_reduction <add>, %502, %cst_279 [1] : vector<48x48xf32> to vector<48xf32>
    %504 = vector.shape_cast %503 : vector<48xf32> to vector<48x1xf32>
    %505 = vector.broadcast %504 : vector<48x1xf32> to vector<48x48xf32>
    %506 = arith.divf %502, %505 : vector<48x48xf32>
    %c1_280 = arith.constant 1 : index
    %c1_281 = arith.constant 1 : index
    %c0_282 = arith.constant 0 : index
    %c0_283 = arith.constant 0 : index
    %507 = vector.load %arg42[%c1_280, %c1_281, %c0_282, %c0_283] : memref<2x2x48x48xf32, #tpu.memory_space<vmem>>, vector<1x1x48x48xf32>
    %508 = vector.shape_cast %507 : vector<1x1x48x48xf32> to vector<48x48xf32>
    %509 = vector.shape_cast %506 : vector<48x48xf32> to vector<1x1x48x48xf32>
    tpu.vector_store %arg42[%c1_280, %c1_281, %c0_282, %c0_283], %509 {strides = array<i32>} : memref<2x2x48x48xf32, #tpu.memory_space<vmem>>, vector<1x1x48x48xf32>,
    %cst_284 = arith.constant dense<0.000000e+00> : vector<16x48xf32>
    %510 = tpu.matmul %476, %506, %cst_284 {dimension_numbers = #tpu.dot_dimension_numbers<[1], [1], [0], [0], [0, 0, 1, 0], [], []>} : vector<16x48xf32>, vector<48x48xf32>, vector<16x48xf32> -> vector<16x48xf32>
    %511 = arith.addf %473, %510 : vector<16x48xf32>
    %cst_285 = arith.constant 5.000000e-01 : f32
    %512 = vector.broadcast %cst_285 : f32 to vector<16x48xf32>
    %513 = arith.mulf %511, %512 : vector<16x48xf32>
    %c16_286 = arith.constant 16 : index
    %c0_287 = arith.constant 0 : index
    %514 = vector.load %arg43[%c16_286, %c0_287] : memref<32x48xf32, #tpu.memory_space<vmem>>, vector<16x48xf32>
    tpu.vector_store %arg43[%c16_286, %c0_287], %513 {strides = array<i32>} : memref<32x48xf32, #tpu.memory_space<vmem>>, vector<16x48xf32>,
    %c0_288 = arith.constant 0 : index
    %c0_289 = arith.constant 0 : index
    %515 = vector.load %arg43[%c0_288, %c0_289] : memref<32x48xf32, #tpu.memory_space<vmem>>, vector<32x48xf32>
    %c1_290 = arith.constant 1 : index
    %c0_291 = arith.constant 0 : index
    %c0_292 = arith.constant 0 : index
    %516 = vector.load %arg15[%c1_290, %c0_291, %c0_292] : memref<2x48x48xf32, #tpu.memory_space<vmem>>, vector<1x48x48xf32>
    %517 = vector.shape_cast %516 : vector<1x48x48xf32> to vector<48x48xf32>
    %cst_293 = arith.constant dense<0.000000e+00> : vector<32x48xf32>
    %518 = tpu.matmul %515, %517, %cst_293 {dimension_numbers = #tpu.dot_dimension_numbers<[1], [1], [0], [0], [0, 0, 1, 0], [], []>} : vector<32x48xf32>, vector<48x48xf32>, vector<32x48xf32> -> vector<32x48xf32>
    %519 = arith.addf %296, %518 : vector<32x48xf32>
    %c1_294 = arith.constant 1 : index
    %c0_295 = arith.constant 0 : index
    %c0_296 = arith.constant 0 : index
    %520 = vector.load %arg16[%c1_294, %c0_295, %c0_296] : memref<2x1x48xf32, #tpu.memory_space<vmem>>, vector<1x1x48xf32>
    %521 = vector.shape_cast %520 : vector<1x1x48xf32> to vector<1x48xf32>
    %c1_297 = arith.constant 1 : index
    %c0_298 = arith.constant 0 : index
    %c0_299 = arith.constant 0 : index
    %522 = vector.load %arg17[%c1_297, %c0_298, %c0_299] : memref<2x1x48xf32, #tpu.memory_space<vmem>>, vector<1x1x48xf32>
    %523 = vector.shape_cast %522 : vector<1x1x48xf32> to vector<1x48xf32>
    %cst_300 = arith.constant dense<0.000000e+00> : vector<32x48xf32>
    %524 = tpu.matmul %519, %0, %cst_300 {dimension_numbers = #tpu.dot_dimension_numbers<[1], [0], [0], [1], [0, 0, 1, 1], [], []>} : vector<32x48xf32>, vector<48x48xf32>, vector<32x48xf32> -> vector<32x48xf32>
    %525 = arith.subf %519, %524 : vector<32x48xf32>
    %526 = arith.mulf %525, %525 : vector<32x48xf32>
    %cst_301 = arith.constant dense<0.000000e+00> : vector<32x48xf32>
    %527 = tpu.matmul %526, %0, %cst_301 {dimension_numbers = #tpu.dot_dimension_numbers<[1], [0], [0], [1], [0, 0, 1, 1], [], []>} : vector<32x48xf32>, vector<48x48xf32>, vector<32x48xf32> -> vector<32x48xf32>
    %cst_302 = arith.constant 9.99999997E-7 : f32
    %528 = vector.broadcast %cst_302 : f32 to vector<32x48xf32>
    %529 = arith.addf %527, %528 : vector<32x48xf32>
    %530 = math.rsqrt %529 : vector<32x48xf32>
    %531 = arith.mulf %525, %530 : vector<32x48xf32>
    %532 = vector.broadcast %521 : vector<1x48xf32> to vector<32x48xf32>
    %533 = arith.mulf %531, %532 : vector<32x48xf32>
    %534 = vector.broadcast %523 : vector<1x48xf32> to vector<32x48xf32>
    %535 = arith.addf %533, %534 : vector<32x48xf32>
    %c1_303 = arith.constant 1 : index
    %c0_304 = arith.constant 0 : index
    %c0_305 = arith.constant 0 : index
    %536 = vector.load %arg18[%c1_303, %c0_304, %c0_305] : memref<2x96x48xf32, #tpu.memory_space<vmem>>, vector<1x96x48xf32>
    %537 = vector.shape_cast %536 : vector<1x96x48xf32> to vector<96x48xf32>
    %cst_306 = arith.constant dense<0.000000e+00> : vector<32x96xf32>
    %538 = tpu.matmul %535, %537, %cst_306 {dimension_numbers = #tpu.dot_dimension_numbers<[1], [1], [0], [0], [0, 0, 1, 0], [], []>} : vector<32x48xf32>, vector<96x48xf32>, vector<32x96xf32> -> vector<32x96xf32>
    %c1_307 = arith.constant 1 : index
    %c0_308 = arith.constant 0 : index
    %c0_309 = arith.constant 0 : index
    %539 = vector.load %arg19[%c1_307, %c0_308, %c0_309] : memref<2x1x96xf32, #tpu.memory_space<vmem>>, vector<1x1x96xf32>
    %540 = vector.shape_cast %539 : vector<1x1x96xf32> to vector<1x96xf32>
    %541 = vector.broadcast %540 : vector<1x96xf32> to vector<32x96xf32>
    %542 = arith.addf %538, %541 : vector<32x96xf32>
    %cst_310 = arith.constant 5.000000e-01 : f32
    %543 = vector.broadcast %cst_310 : f32 to vector<32x96xf32>
    %544 = arith.mulf %543, %542 : vector<32x96xf32>
    %cst_311 = arith.constant 0.707106769 : f32
    %545 = vector.broadcast %cst_311 : f32 to vector<32x96xf32>
    %546 = arith.mulf %542, %545 : vector<32x96xf32>
    %cst_312 = arith.constant 0.000000e+00 : f32
    %547 = vector.broadcast %cst_312 : f32 to vector<32x96xf32>
    %548 = arith.cmpf oge, %546, %547 : vector<32x96xf32>
    %cst_313 = arith.constant 1.000000e+00 : f32
    %cst_314 = arith.constant -1.000000e+00 : f32
    %549 = vector.broadcast %cst_313 : f32 to vector<32x96xf32>
    %550 = vector.broadcast %cst_314 : f32 to vector<32x96xf32>
    %551 = arith.select %548, %549, %550 : vector<32x96xi1>, vector<32x96xf32>
    %552 = math.absf %546 : vector<32x96xf32>
    %cst_315 = arith.constant 0.327591091 : f32
    %553 = vector.broadcast %cst_315 : f32 to vector<32x96xf32>
    %554 = arith.mulf %553, %552 : vector<32x96xf32>
    %cst_316 = arith.constant 1.000000e+00 : f32
    %555 = vector.broadcast %cst_316 : f32 to vector<32x96xf32>
    %556 = arith.addf %555, %554 : vector<32x96xf32>
    %cst_317 = arith.constant 1.000000e+00 : f32
    %557 = vector.broadcast %cst_317 : f32 to vector<32x96xf32>
    %558 = arith.divf %557, %556 : vector<32x96xf32>
    %cst_318 = arith.constant 1.06140542 : f32
    %559 = vector.broadcast %cst_318 : f32 to vector<32x96xf32>
    %560 = arith.mulf %559, %558 : vector<32x96xf32>
    %cst_319 = arith.constant -1.45315206 : f32
    %561 = vector.broadcast %cst_319 : f32 to vector<32x96xf32>
    %562 = arith.addf %560, %561 : vector<32x96xf32>
    %563 = arith.mulf %562, %558 : vector<32x96xf32>
    %cst_320 = arith.constant 1.42141378 : f32
    %564 = vector.broadcast %cst_320 : f32 to vector<32x96xf32>
    %565 = arith.addf %563, %564 : vector<32x96xf32>
    %566 = arith.mulf %565, %558 : vector<32x96xf32>
    %cst_321 = arith.constant -0.284496725 : f32
    %567 = vector.broadcast %cst_321 : f32 to vector<32x96xf32>
    %568 = arith.addf %566, %567 : vector<32x96xf32>
    %569 = arith.mulf %568, %558 : vector<32x96xf32>
    %cst_322 = arith.constant 0.254829586 : f32
    %570 = vector.broadcast %cst_322 : f32 to vector<32x96xf32>
    %571 = arith.addf %569, %570 : vector<32x96xf32>
    %572 = arith.mulf %571, %558 : vector<32x96xf32>
    %cst_323 = arith.constant 0.000000e+00 : f32
    %573 = vector.broadcast %cst_323 : f32 to vector<32x96xf32>
    %574 = arith.subf %573, %552 : vector<32x96xf32>
    %575 = arith.mulf %574, %552 : vector<32x96xf32>
    %576 = math.exp %575 : vector<32x96xf32>
    %577 = arith.mulf %572, %576 : vector<32x96xf32>
    %cst_324 = arith.constant 1.000000e+00 : f32
    %578 = vector.broadcast %cst_324 : f32 to vector<32x96xf32>
    %579 = arith.subf %578, %577 : vector<32x96xf32>
    %580 = arith.mulf %551, %579 : vector<32x96xf32>
    %cst_325 = arith.constant 1.000000e+00 : f32
    %581 = vector.broadcast %cst_325 : f32 to vector<32x96xf32>
    %582 = arith.addf %581, %580 : vector<32x96xf32>
    %583 = arith.mulf %544, %582 : vector<32x96xf32>
    %c1_326 = arith.constant 1 : index
    %c0_327 = arith.constant 0 : index
    %c0_328 = arith.constant 0 : index
    %584 = vector.load %arg20[%c1_326, %c0_327, %c0_328] : memref<2x48x96xf32, #tpu.memory_space<vmem>>, vector<1x48x96xf32>
    %585 = vector.shape_cast %584 : vector<1x48x96xf32> to vector<48x96xf32>
    %cst_329 = arith.constant dense<0.000000e+00> : vector<32x48xf32>
    %586 = tpu.matmul %583, %585, %cst_329 {dimension_numbers = #tpu.dot_dimension_numbers<[1], [1], [0], [0], [0, 0, 1, 0], [], []>} : vector<32x96xf32>, vector<48x96xf32>, vector<32x48xf32> -> vector<32x48xf32>
    %c1_330 = arith.constant 1 : index
    %c0_331 = arith.constant 0 : index
    %c0_332 = arith.constant 0 : index
    %587 = vector.load %arg21[%c1_330, %c0_331, %c0_332] : memref<2x1x48xf32, #tpu.memory_space<vmem>>, vector<1x1x48xf32>
    %588 = vector.shape_cast %587 : vector<1x1x48xf32> to vector<1x48xf32>
    %589 = vector.broadcast %588 : vector<1x48xf32> to vector<32x48xf32>
    %590 = arith.addf %586, %589 : vector<32x48xf32>
    %591 = arith.addf %519, %590 : vector<32x48xf32>
    %c0_333 = arith.constant 0 : index
    %c0_334 = arith.constant 0 : index
    %592 = vector.load %arg22[%c0_333, %c0_334] : memref<1x48xf32, #tpu.memory_space<vmem>>, vector<1x48xf32>
    %c0_335 = arith.constant 0 : index
    %c0_336 = arith.constant 0 : index
    %593 = vector.load %arg23[%c0_335, %c0_336] : memref<1x48xf32, #tpu.memory_space<vmem>>, vector<1x48xf32>
    %cst_337 = arith.constant dense<0.000000e+00> : vector<32x48xf32>
    %594 = tpu.matmul %591, %0, %cst_337 {dimension_numbers = #tpu.dot_dimension_numbers<[1], [0], [0], [1], [0, 0, 1, 1], [], []>} : vector<32x48xf32>, vector<48x48xf32>, vector<32x48xf32> -> vector<32x48xf32>
    %595 = arith.subf %591, %594 : vector<32x48xf32>
    %596 = arith.mulf %595, %595 : vector<32x48xf32>
    %cst_338 = arith.constant dense<0.000000e+00> : vector<32x48xf32>
    %597 = tpu.matmul %596, %0, %cst_338 {dimension_numbers = #tpu.dot_dimension_numbers<[1], [0], [0], [1], [0, 0, 1, 1], [], []>} : vector<32x48xf32>, vector<48x48xf32>, vector<32x48xf32> -> vector<32x48xf32>
    %cst_339 = arith.constant 9.99999997E-7 : f32
    %598 = vector.broadcast %cst_339 : f32 to vector<32x48xf32>
    %599 = arith.addf %597, %598 : vector<32x48xf32>
    %600 = math.rsqrt %599 : vector<32x48xf32>
    %601 = arith.mulf %595, %600 : vector<32x48xf32>
    %602 = vector.broadcast %592 : vector<1x48xf32> to vector<32x48xf32>
    %603 = arith.mulf %601, %602 : vector<32x48xf32>
    %604 = vector.broadcast %593 : vector<1x48xf32> to vector<32x48xf32>
    %605 = arith.addf %603, %604 : vector<32x48xf32>
    %c0_340 = arith.constant 0 : index
    %c0_341 = arith.constant 0 : index
    %606 = vector.load %arg24[%c0_340, %c0_341] : memref<8x48xf32, #tpu.memory_space<vmem>>, vector<8x48xf32>
    %cst_342 = arith.constant dense<0.000000e+00> : vector<32x8xf32>
    %607 = tpu.matmul %605, %606, %cst_342 {dimension_numbers = #tpu.dot_dimension_numbers<[1], [1], [0], [0], [0, 0, 1, 0], [], []>} : vector<32x48xf32>, vector<8x48xf32>, vector<32x8xf32> -> vector<32x8xf32>
    %c0_343 = arith.constant 0 : index
    %c0_344 = arith.constant 0 : index
    %608 = vector.load %arg27[%c0_343, %c0_344] : memref<1x8xf32, #tpu.memory_space<vmem>>, vector<1x8xf32>
    %609 = vector.broadcast %608 : vector<1x8xf32> to vector<32x8xf32>
    %610 = arith.mulf %607, %609 : vector<32x8xf32>
    %c0_345 = arith.constant 0 : index
    %c0_346 = arith.constant 0 : index
    %611 = vector.load %arg30[%c0_345, %c0_346] : memref<1x8xf32, #tpu.memory_space<vmem>>, vector<1x8xf32>
    %612 = vector.broadcast %611 : vector<1x8xf32> to vector<32x8xf32>
    %613 = arith.addf %610, %612 : vector<32x8xf32>
    %cst_347 = arith.constant 0.000000e+00 : f32
    %614 = vector.broadcast %cst_347 : f32 to vector<32x8xf32>
    %615 = arith.maximumf %613, %614 : vector<32x8xf32>
    %c0_348 = arith.constant 0 : index
    %c0_349 = arith.constant 0 : index
    %616 = vector.load %arg33[%c0_348, %c0_349] : memref<16x256xf32, #tpu.memory_space<vmem>>, vector<16x256xf32>
    %617 = vector.extract_strided_slice %615 {offsets = [0, 0], sizes = [16, 8], strides = [1, 1]} : vector<32x8xf32> to vector<16x8xf32>
    %cst_350 = arith.constant dense<0.000000e+00> : vector<8x256xf32>
    %618 = tpu.matmul %617, %616, %cst_350 {dimension_numbers = #tpu.dot_dimension_numbers<[0], [0], [1], [1], [0, 1, 1, 1], [], []>} : vector<16x8xf32>, vector<16x256xf32>, vector<8x256xf32> -> vector<8x256xf32>
    %c0_351 = arith.constant 0 : index
    %c0_352 = arith.constant 0 : index
    %c0_353 = arith.constant 0 : index
    %619 = vector.load %arg36[%c0_351, %c0_352, %c0_353] : memref<2x8x256xf32, #tpu.memory_space<vmem>>, vector<1x8x256xf32>
    %620 = vector.shape_cast %619 : vector<1x8x256xf32> to vector<8x256xf32>
    %621 = arith.addf %618, %620 : vector<8x256xf32>
    %c0_354 = arith.constant 0 : index
    %c0_355 = arith.constant 0 : index
    %c0_356 = arith.constant 0 : index
    %622 = vector.load %arg39[%c0_354, %c0_355, %c0_356] : memref<2x8x256xf32, #tpu.memory_space<vmem>>, vector<1x8x256xf32>
    %623 = vector.shape_cast %622 : vector<1x8x256xf32> to vector<8x256xf32>
    %624 = vector.shape_cast %621 : vector<8x256xf32> to vector<1x8x256xf32>
    tpu.vector_store %arg39[%c0_354, %c0_355, %c0_356], %624 {strides = array<i32>} : memref<2x8x256xf32, #tpu.memory_space<vmem>>, vector<1x8x256xf32>,
    %625 = vector.extract_strided_slice %615 {offsets = [16, 0], sizes = [16, 8], strides = [1, 1]} : vector<32x8xf32> to vector<16x8xf32>
    %cst_357 = arith.constant dense<0.000000e+00> : vector<8x256xf32>
    %626 = tpu.matmul %625, %616, %cst_357 {dimension_numbers = #tpu.dot_dimension_numbers<[0], [0], [1], [1], [0, 1, 1, 1], [], []>} : vector<16x8xf32>, vector<16x256xf32>, vector<8x256xf32> -> vector<8x256xf32>
    %c1_358 = arith.constant 1 : index
    %c0_359 = arith.constant 0 : index
    %c0_360 = arith.constant 0 : index
    %627 = vector.load %arg36[%c1_358, %c0_359, %c0_360] : memref<2x8x256xf32, #tpu.memory_space<vmem>>, vector<1x8x256xf32>
    %628 = vector.shape_cast %627 : vector<1x8x256xf32> to vector<8x256xf32>
    %629 = arith.addf %626, %628 : vector<8x256xf32>
    %c1_361 = arith.constant 1 : index
    %c0_362 = arith.constant 0 : index
    %c0_363 = arith.constant 0 : index
    %630 = vector.load %arg39[%c1_361, %c0_362, %c0_363] : memref<2x8x256xf32, #tpu.memory_space<vmem>>, vector<1x8x256xf32>
    %631 = vector.shape_cast %630 : vector<1x8x256xf32> to vector<8x256xf32>
    %632 = vector.shape_cast %629 : vector<8x256xf32> to vector<1x8x256xf32>
    tpu.vector_store %arg39[%c1_361, %c0_362, %c0_363], %632 {strides = array<i32>} : memref<2x8x256xf32, #tpu.memory_space<vmem>>, vector<1x8x256xf32>,
    %c0_364 = arith.constant 0 : index
    %c0_365 = arith.constant 0 : index
    %633 = vector.load %arg25[%c0_364, %c0_365] : memref<16x48xf32, #tpu.memory_space<vmem>>, vector<16x48xf32>
    %cst_366 = arith.constant dense<0.000000e+00> : vector<32x16xf32>
    %634 = tpu.matmul %605, %633, %cst_366 {dimension_numbers = #tpu.dot_dimension_numbers<[1], [1], [0], [0], [0, 0, 1, 0], [], []>} : vector<32x48xf32>, vector<16x48xf32>, vector<32x16xf32> -> vector<32x16xf32>
    %c0_367 = arith.constant 0 : index
    %c0_368 = arith.constant 0 : index
    %635 = vector.load %arg28[%c0_367, %c0_368] : memref<1x16xf32, #tpu.memory_space<vmem>>, vector<1x16xf32>
    %636 = vector.broadcast %635 : vector<1x16xf32> to vector<32x16xf32>
    %637 = arith.mulf %634, %636 : vector<32x16xf32>
    %c0_369 = arith.constant 0 : index
    %c0_370 = arith.constant 0 : index
    %638 = vector.load %arg31[%c0_369, %c0_370] : memref<1x16xf32, #tpu.memory_space<vmem>>, vector<1x16xf32>
    %639 = vector.broadcast %638 : vector<1x16xf32> to vector<32x16xf32>
    %640 = arith.addf %637, %639 : vector<32x16xf32>
    %cst_371 = arith.constant 0.000000e+00 : f32
    %641 = vector.broadcast %cst_371 : f32 to vector<32x16xf32>
    %642 = arith.maximumf %640, %641 : vector<32x16xf32>
    %c0_372 = arith.constant 0 : index
    %c0_373 = arith.constant 0 : index
    %643 = vector.load %arg34[%c0_372, %c0_373] : memref<16x64xf32, #tpu.memory_space<vmem>>, vector<16x64xf32>
    %644 = vector.extract_strided_slice %642 {offsets = [0, 0], sizes = [16, 16], strides = [1, 1]} : vector<32x16xf32> to vector<16x16xf32>
    %cst_374 = arith.constant dense<0.000000e+00> : vector<16x64xf32>
    %645 = tpu.matmul %644, %643, %cst_374 {dimension_numbers = #tpu.dot_dimension_numbers<[0], [0], [1], [1], [0, 1, 1, 1], [], []>} : vector<16x16xf32>, vector<16x64xf32>, vector<16x64xf32> -> vector<16x64xf32>
    %c0_375 = arith.constant 0 : index
    %c0_376 = arith.constant 0 : index
    %c0_377 = arith.constant 0 : index
    %646 = vector.load %arg37[%c0_375, %c0_376, %c0_377] : memref<2x16x64xf32, #tpu.memory_space<vmem>>, vector<1x16x64xf32>
    %647 = vector.shape_cast %646 : vector<1x16x64xf32> to vector<16x64xf32>
    %648 = arith.addf %645, %647 : vector<16x64xf32>
    %c0_378 = arith.constant 0 : index
    %c0_379 = arith.constant 0 : index
    %c0_380 = arith.constant 0 : index
    %649 = vector.load %arg40[%c0_378, %c0_379, %c0_380] : memref<2x16x64xf32, #tpu.memory_space<vmem>>, vector<1x16x64xf32>
    %650 = vector.shape_cast %649 : vector<1x16x64xf32> to vector<16x64xf32>
    %651 = vector.shape_cast %648 : vector<16x64xf32> to vector<1x16x64xf32>
    tpu.vector_store %arg40[%c0_378, %c0_379, %c0_380], %651 {strides = array<i32>} : memref<2x16x64xf32, #tpu.memory_space<vmem>>, vector<1x16x64xf32>,
    %652 = vector.extract_strided_slice %642 {offsets = [16, 0], sizes = [16, 16], strides = [1, 1]} : vector<32x16xf32> to vector<16x16xf32>
    %cst_381 = arith.constant dense<0.000000e+00> : vector<16x64xf32>
    %653 = tpu.matmul %652, %643, %cst_381 {dimension_numbers = #tpu.dot_dimension_numbers<[0], [0], [1], [1], [0, 1, 1, 1], [], []>} : vector<16x16xf32>, vector<16x64xf32>, vector<16x64xf32> -> vector<16x64xf32>
    %c1_382 = arith.constant 1 : index
    %c0_383 = arith.constant 0 : index
    %c0_384 = arith.constant 0 : index
    %654 = vector.load %arg37[%c1_382, %c0_383, %c0_384] : memref<2x16x64xf32, #tpu.memory_space<vmem>>, vector<1x16x64xf32>
    %655 = vector.shape_cast %654 : vector<1x16x64xf32> to vector<16x64xf32>
    %656 = arith.addf %653, %655 : vector<16x64xf32>
    %c1_385 = arith.constant 1 : index
    %c0_386 = arith.constant 0 : index
    %c0_387 = arith.constant 0 : index
    %657 = vector.load %arg40[%c1_385, %c0_386, %c0_387] : memref<2x16x64xf32, #tpu.memory_space<vmem>>, vector<1x16x64xf32>
    %658 = vector.shape_cast %657 : vector<1x16x64xf32> to vector<16x64xf32>
    %659 = vector.shape_cast %656 : vector<16x64xf32> to vector<1x16x64xf32>
    tpu.vector_store %arg40[%c1_385, %c0_386, %c0_387], %659 {strides = array<i32>} : memref<2x16x64xf32, #tpu.memory_space<vmem>>, vector<1x16x64xf32>,
    %c0_388 = arith.constant 0 : index
    %c0_389 = arith.constant 0 : index
    %660 = vector.load %arg26[%c0_388, %c0_389] : memref<24x48xf32, #tpu.memory_space<vmem>>, vector<24x48xf32>
    %cst_390 = arith.constant dense<0.000000e+00> : vector<32x24xf32>
    %661 = tpu.matmul %605, %660, %cst_390 {dimension_numbers = #tpu.dot_dimension_numbers<[1], [1], [0], [0], [0, 0, 1, 0], [], []>} : vector<32x48xf32>, vector<24x48xf32>, vector<32x24xf32> -> vector<32x24xf32>
    %c0_391 = arith.constant 0 : index
    %c0_392 = arith.constant 0 : index
    %662 = vector.load %arg29[%c0_391, %c0_392] : memref<1x24xf32, #tpu.memory_space<vmem>>, vector<1x24xf32>
    %663 = vector.broadcast %662 : vector<1x24xf32> to vector<32x24xf32>
    %664 = arith.mulf %661, %663 : vector<32x24xf32>
    %c0_393 = arith.constant 0 : index
    %c0_394 = arith.constant 0 : index
    %665 = vector.load %arg32[%c0_393, %c0_394] : memref<1x24xf32, #tpu.memory_space<vmem>>, vector<1x24xf32>
    %666 = vector.broadcast %665 : vector<1x24xf32> to vector<32x24xf32>
    %667 = arith.addf %664, %666 : vector<32x24xf32>
    %cst_395 = arith.constant 0.000000e+00 : f32
    %668 = vector.broadcast %cst_395 : f32 to vector<32x24xf32>
    %669 = arith.maximumf %667, %668 : vector<32x24xf32>
    %c0_396 = arith.constant 0 : index
    %c0_397 = arith.constant 0 : index
    %670 = vector.load %arg35[%c0_396, %c0_397] : memref<16x16xf32, #tpu.memory_space<vmem>>, vector<16x16xf32>
    %671 = vector.extract_strided_slice %669 {offsets = [0, 0], sizes = [16, 24], strides = [1, 1]} : vector<32x24xf32> to vector<16x24xf32>
    %cst_398 = arith.constant dense<0.000000e+00> : vector<24x16xf32>
    %672 = tpu.matmul %671, %670, %cst_398 {dimension_numbers = #tpu.dot_dimension_numbers<[0], [0], [1], [1], [0, 1, 1, 1], [], []>} : vector<16x24xf32>, vector<16x16xf32>, vector<24x16xf32> -> vector<24x16xf32>
    %c0_399 = arith.constant 0 : index
    %c0_400 = arith.constant 0 : index
    %c0_401 = arith.constant 0 : index
    %673 = vector.load %arg38[%c0_399, %c0_400, %c0_401] : memref<2x24x16xf32, #tpu.memory_space<vmem>>, vector<1x24x16xf32>
    %674 = vector.shape_cast %673 : vector<1x24x16xf32> to vector<24x16xf32>
    %675 = arith.addf %672, %674 : vector<24x16xf32>
    %c0_402 = arith.constant 0 : index
    %c0_403 = arith.constant 0 : index
    %c0_404 = arith.constant 0 : index
    %676 = vector.load %arg41[%c0_402, %c0_403, %c0_404] : memref<2x24x16xf32, #tpu.memory_space<vmem>>, vector<1x24x16xf32>
    %677 = vector.shape_cast %676 : vector<1x24x16xf32> to vector<24x16xf32>
    %678 = vector.shape_cast %675 : vector<24x16xf32> to vector<1x24x16xf32>
    tpu.vector_store %arg41[%c0_402, %c0_403, %c0_404], %678 {strides = array<i32>} : memref<2x24x16xf32, #tpu.memory_space<vmem>>, vector<1x24x16xf32>,
    %679 = vector.extract_strided_slice %669 {offsets = [16, 0], sizes = [16, 24], strides = [1, 1]} : vector<32x24xf32> to vector<16x24xf32>
    %cst_405 = arith.constant dense<0.000000e+00> : vector<24x16xf32>
    %680 = tpu.matmul %679, %670, %cst_405 {dimension_numbers = #tpu.dot_dimension_numbers<[0], [0], [1], [1], [0, 1, 1, 1], [], []>} : vector<16x24xf32>, vector<16x16xf32>, vector<24x16xf32> -> vector<24x16xf32>
    %c1_406 = arith.constant 1 : index
    %c0_407 = arith.constant 0 : index
    %c0_408 = arith.constant 0 : index
    %681 = vector.load %arg38[%c1_406, %c0_407, %c0_408] : memref<2x24x16xf32, #tpu.memory_space<vmem>>, vector<1x24x16xf32>
    %682 = vector.shape_cast %681 : vector<1x24x16xf32> to vector<24x16xf32>
    %683 = arith.addf %680, %682 : vector<24x16xf32>
    %c1_409 = arith.constant 1 : index
    %c0_410 = arith.constant 0 : index
    %c0_411 = arith.constant 0 : index
    %684 = vector.load %arg41[%c1_409, %c0_410, %c0_411] : memref<2x24x16xf32, #tpu.memory_space<vmem>>, vector<1x24x16xf32>
    %685 = vector.shape_cast %684 : vector<1x24x16xf32> to vector<24x16xf32>
    %686 = vector.shape_cast %683 : vector<24x16xf32> to vector<1x24x16xf32>
    tpu.vector_store %arg41[%c1_409, %c0_410, %c0_411], %686 {strides = array<i32>} : memref<2x24x16xf32, #tpu.memory_space<vmem>>, vector<1x24x16xf32>,
    return
  }
}

</mosaic_0001>

<bundles_post_ra>
// kernel: channel_transformer_forward.1
= control target key start
LH: loop header
LB: loop body
LE: loop exit
PB: predicated region body
PF: predicated region fallthrough
CT: control target
= control target key end

     0   :  { %s13126_s3 = smov 4   ;;  %s13127_s7 = smov 3   ;;  %vm195_vm0 = vcmask 523264   ;;  %vm406_vm1 = vcmask 195584   ;;  %vm536_vm2 = vcmask 392192   ;;  %vm1555_vm3 = vcmask 130048   ;;  %s15876_s0 = inlined_call_operand.smem [shape: u32[43], index: -1, kind: input, shape index: {}] }
   0x1   :  { %s13179_s6 = sld [smem:[%s15876_s0 + %s13126_s3]]   ;;  %s13128_s11 = smov 1   ;;  %vm4520_vm4 = vcmask 785408   ;;  %vm13166_vm13 = vmmov 0  }
   0x2   :  { %s13184_s10 = sld [smem:[%s15876_s0 + %s13127_s7]]   ;;  %s13129_s18 = smov 5  }
   0x3   :  { %s13189_s14 = sld [smem:[%s15876_s0 + %s13128_s11]]   ;;  %s13130_s22 = smov 2  }
   0x4   :  { %s13194_s17 = sld [smem:[%s15876_s0]]   ;;  %s13131_s26 = smov 7  }
   0x5   :  { %s13218_s21 = sld [smem:[%s15876_s0 + %s13129_s18]]   ;;  %s13132_s30 = smov 6  }
   0x6   :  { %s13231_s25 = sld [smem:[%s15876_s0 + %s13130_s22]]   ;;  %s13133_s4 = smov 12  }
   0x7   :  { %v194_v0 = vld [vmem:[%s13179_s6 + $0x28] sm:$0xff]  ;;  %v193_v1 = vld [vmem:[%s13179_s6 + $0x20] sm:$0xff]  ;;  %v192_v4 = vld [vmem:[%s13179_s6 + $0x18] sm:$0xff]  ;;  %s13271_s29 = sld [smem:[%s15876_s0 + %s13131_s26]]   ;;  %s13134_s8 = smov 13  }
   0x8   :  { %11456 = vmatprep.subr.msk.mxu0 %vm195_vm0, %v194_v0  ;;  %v184_v2 = vld [vmem:[%s13184_s10 + $0x28] sm:$0xff]  ;;  %v183_v3 = vld [vmem:[%s13184_s10 + $0x20] sm:$0xff]  ;;  %v182_v7 = vld [vmem:[%s13184_s10 + $0x18] sm:$0xff]  ;;  %s10109_s3 = sld [smem:[%s15876_s0 + %s13132_s30]]   ;;  %s13135_s12 = smov 8  }
   0x9   :  { %11474 = vmatprep.subr.mxu1 %v184_v2  ;;  %11457 = vmatpush3.xpose.msk.msra.mxu0 %vm195_vm0, %v194_v0  ;;  %v185_v5 = vld [vmem:[%s13189_s14] sm:$0xff]  ;;  %v191_v8 = vld [vmem:[%s13179_s6 + $0x10] sm:$0xff]  ;;  %v190_v10 = vld [vmem:[%s13179_s6 + $0x8] sm:$0xff]  ;;  %s13387_s7 = sld [smem:[%s15876_s0 + %s13133_s4]]   ;;  %s13136_s16 = smov 9  }
   0xa   :  { %11475 = vmatpush3.xpose.msra.mxu1 %v184_v2  ;;  %11458 = vmatprep.subr.msk.mxu0 %vm195_vm0, %v193_v1  ;;  %v175_v6 = vld [vmem:[%s13194_s17] sm:$0xff]  ;;  %v181_v9 = vld [vmem:[%s13184_s10 + $0x10] sm:$0xff]  ;;  %v180_v11 = vld [vmem:[%s13184_s10 + $0x8] sm:$0xff]  ;;  %s13424_s11 = sld [smem:[%s15876_s0 + %s13134_s8]]   ;;  %s13137_s20 = smov 10  }
   0xb   :  { %11476 = vmatprep.subr.mxu1 %v183_v3  ;;  %11468 = vmatprep.mubr.msk.f32.mxu0 %vm195_vm0, %v185_v5  ;;  %v189_v12 = vld [vmem:[%s13179_s6] sm:$0xff]  ;;  %v405_v14 = vld [vmem:[%s13218_s21 + $0x28] sm:$0xff]  ;;  %v187_v18 = vld [vmem:[%s13189_s14 + $0x10] sm:$0xff]  ;;  %s13449_s15 = sld [smem:[%s15876_s0 + %s13135_s12]]   ;;  %s13138_s24 = smov 11  }
   0xc   :  { %11486 = vmatprep.mubr.f32.mxu1 %v175_v6  ;;  %v179_v13 = vld [vmem:[%s13184_s10] sm:$0xff]  ;;  %v186_v15 = vld [vmem:[%s13189_s14 + $0x8] sm:$0xff]  ;;  %v177_v19 = vld [vmem:[%s13194_s17 + $0x10] sm:$0xff]  ;;  %s13454_s19 = sld [smem:[%s15876_s0 + %s13136_s16]]   ;;  %s13139_s28 = smov 14  }
   0xd   :  { %11459 = vmatpush3.xpose.msk.msra.mxu0 %vm195_vm0, %v193_v1  ;;  %v176_v16 = vld [vmem:[%s13194_s17 + $0x8] sm:$0xff]  ;;  %v404_v17 = vld [vmem:[%s13218_s21 + $0x20] sm:$0xff]  ;;  %v188_v20 = vld [vmem:[%s13189_s14 + $0x18] sm:$0xff]  ;;  %s13459_s23 = sld [smem:[%s15876_s0 + %s13137_s20]]   ;;  %s13141_s8 = smov 18  }
   0xe   :  { %11477 = vmatpush3.xpose.msra.mxu1 %v183_v3  ;;  %11460 = vmatprep.subr.msk.mxu0 %vm195_vm0, %v192_v4  ;;  %v178_v21 = vld [vmem:[%s13194_s17 + $0x18] sm:$0xff]  ;;  %v396_v23 = vld [vmem:[%s13231_s25] sm:$0xff]  ;;  %v402_v24 = vld [vmem:[%s13218_s21 + $0x10] sm:$0xff]  ;;  %s13467_s27 = sld [smem:[%s15876_s0 + %s13138_s24]]   ;;  %s13142_s13 = smov 16  }
   0xf   :  { %11478 = vmatprep.subr.mxu1 %v182_v7  ;;  %v403_v22 = vld [vmem:[%s13218_s21 + $0x18] sm:$0xff]  ;;  %v401_v25 = vld [vmem:[%s13218_s21 + $0x8] sm:$0xff]  ;;  %v400_v26 = vld [vmem:[%s13218_s21] sm:$0xff]  ;;  %s13520_s2 = sld [smem:[%s15876_s0 + %s13139_s28]]   ;;  %s13143_s18 = smov 17  }
  0x10   :  { %v397_v27 = vld [vmem:[%s13231_s25 + $0x8] sm:$0xff]  ;;  %v398_v28 = vld [vmem:[%s13231_s25 + $0x10] sm:$0xff]  ;;  %v399_v29 = vld [vmem:[%s13231_s25 + $0x18] sm:$0xff]  ;;  %s14317_s12 = sld [smem:[%s15876_s0 + %s13141_s8]]   ;;  %s13144_s24 = smov 20  }
  0x11   :  { %11461 = vmatpush3.xpose.msk.msra.mxu0 %vm195_vm0, %v192_v4  ;;  %v13274_v30 = vld [vmem:[%s13271_s29 + $0x28] sm:$0xff]  ;;  %v13277_v31 = vld [vmem:[%s13271_s29 + $0x20] sm:$0xff]  ;;  %v13284_v32 = vld [vmem:[%s13271_s29 + $0x18] sm:$0xff]  ;;  %s14376_s17 = sld [smem:[%s15876_s0 + %s13142_s13]]   ;;  %s13145_s30 = smov 19  }
  0x12   :  { %11479 = vmatpush3.xpose.msra.mxu1 %v182_v7  ;;  %11462 = vmatprep.subr.msk.mxu0 %vm195_vm0, %v191_v8  ;;  %v13289_v33 = vld [vmem:[%s13271_s29 + $0x10] sm:$0xff]  ;;  %v13294_v34 = vld [vmem:[%s13271_s29 + $0x8] sm:$0xff]  ;;  %v13299_v35 = vld [vmem:[%s13271_s29] sm:$0xff]  ;;  %s14381_s22 = sld [smem:[%s15876_s0 + %s13143_s18]]   ;;  %s13147_s5 = smov 21  }
  0x13   :  { %11480 = vmatprep.subr.mxu1 %v181_v9  ;;  %v526_v49 = vld [vmem:[%s10109_s3] sm:$0xff]  ;;  %v527_v50 = vld [vmem:[%s10109_s3 + $0x8] sm:$0xff]  ;;  %v528_v59 = vld [vmem:[%s10109_s3 + $0x10] sm:$0xff]  ;;  %s14390_s28 = sld [smem:[%s15876_s0 + %s13144_s24]]   ;;  %s13151_s16 = smov 23  }
  0x14   :  { %v529_v60 = vld [vmem:[%s10109_s3 + $0x18] sm:$0xff]  ;;  %s13140_s3 = smov 15   ;;  %s14414_s4 = sld [smem:[%s15876_s0 + %s13145_s30]]  }
  0x15   :  { %11463 = vmatpush3.xpose.msk.msra.mxu0 %vm195_vm0, %v191_v8  ;;  %s14256_s6 = sld [smem:[%s15876_s0 + %s13140_s3]]   ;;  %s13152_s21 = smov 33  }
  0x16   :  { %11481 = vmatpush3.xpose.msra.mxu1 %v181_v9  ;;  %11464 = vmatprep.subr.msk.mxu0 %vm195_vm0, %v190_v10  ;;  %s14461_s10 = sld [smem:[%s15876_s0 + %s13147_s5]]   ;;  %s13154_s26 = smov 25  }
  0x17   :  { %11482 = vmatprep.subr.mxu1 %v180_v11  ;;  %s10126_s20 = sld [smem:[%s15876_s0 + %s13151_s16]]   ;;  %s13155_s3 = smov 27  }
  0x18   :  { %s10136_s25 = sld [smem:[%s15876_s0 + %s13152_s21]]   ;;  %s13156_s9 = smov 30  }
  0x19   :  { %11465 = vmatpush3.xpose.msk.msra.mxu0 %vm195_vm0, %v190_v10  ;;  %s15736_s1 = sld [smem:[%s15876_s0 + %s13154_s26]]   ;;  %s13159_s13 = smov 39  }
  0x1a   :  { %11483 = vmatpush3.xpose.msra.mxu1 %v180_v11  ;;  %11466 = vmatprep.subr.msk.mxu0 %vm195_vm0, %v189_v12  ;;  %s10130_s8 = sld [smem:[%s15876_s0 + %s13155_s3]]   ;;  %s13160_s18 = smov 28  }
  0x1b   :  { %11484 = vmatprep.subr.mxu1 %v179_v13  ;;  %s13161_s24 = smov 31   ;;  %s13162_s30 = smov 34  }
  0x1c   :  { %s13163_s5 = smov 29  }
  0x1d   :  { %11467 = vmatpush3.xpose.msk.msra.mxu0 %vm195_vm0, %v189_v12 }
  0x1e   :  { %11485 = vmatpush3.xpose.msra.mxu1 %v179_v13  ;;  %11492 = vmatprep.subr.msk.mxu0 %vm406_vm1, %v405_v14 }
  0x1f   :  { %11510 = vmatprep.subr.mxu1 %v13274_v30 }
  0x20   :  { %11469 = vmatmul.mubr.msk.f32.vlgmr.msra.gmra.mxu0 %vm195_vm0, %v186_v15 }
  0x21   :  { %11487 = vmatmul.mubr.f32.vlgmr.msra.gmra.mxu1 %v176_v16  ;;  %11493 = vmatpush3.xpose.msk.msra.mxu0 %vm406_vm1, %v405_v14 }
  0x22   :  { %11494 = vmatprep.subr.msk.mxu0 %vm406_vm1, %v404_v17  ;;  %11471 = vmatprep.mubr.msk.f32.mxu0 %vm195_vm0, %v187_v18 }
  0x23   :  { %11489 = vmatprep.mubr.f32.mxu1 %v177_v19  ;;  %11511 = vmatpush3.msra.mxu1 %v13274_v30 }
  0x24   :  { %11472 = vmatmul.mubr.msk.f32.gmra.mxu0 %vm195_vm0, %v188_v20  ;;  %11512 = vmatprep.subr.mxu1 %v13277_v31 }
  0x25   :  { %11495 = vmatpush3.xpose.msk.msra.mxu0 %vm406_vm1, %v404_v17  ;;  %11490 = vmatmul.mubr.f32.gmra.mxu1 %v178_v21 }
  0x26   :  { %11496 = vmatprep.subr.msk.mxu0 %vm406_vm1, %v403_v22  ;;  %11504 = vmatprep.mubr.msk.f32.mxu0 %vm406_vm1, %v396_v23 }
  0x27   :  { %11513 = vmatpush3.msra.mxu1 %v13277_v31 }
  0x28   :  { %11514 = vmatprep.subr.mxu1 %v13284_v32 }
  0x29   :  { %11497 = vmatpush3.xpose.msk.msra.mxu0 %vm406_vm1, %v403_v22  ;;  %11515 = vmatpush3.msra.mxu1 %v13284_v32 }
  0x2a   :  { %11498 = vmatprep.subr.msk.mxu0 %vm406_vm1, %v402_v24  ;;  %11516 = vmatprep.subr.mxu1 %v13289_v33 }
  0x2b   :  { %11517 = vmatpush3.msra.mxu1 %v13289_v33 }
  0x2c   :  { %11518 = vmatprep.subr.mxu1 %v13294_v34 }
  0x2d   :  { %11499 = vmatpush3.xpose.msk.msra.mxu0 %vm406_vm1, %v402_v24  ;;  %11519 = vmatpush3.msra.mxu1 %v13294_v34 }
  0x2e   :  { %11500 = vmatprep.subr.msk.mxu0 %vm406_vm1, %v401_v25  ;;  %11520 = vmatprep.subr.mxu1 %v13299_v35 }
  0x2f   :  { %11521 = vmatpush3.msra.mxu1 %v13299_v35 }
  0x30   :  { %11528 = vmatprep.subr.mxu1 %v13274_v30 }
  0x31   :  { %11501 = vmatpush3.xpose.msk.msra.mxu0 %vm406_vm1, %v401_v25 }
  0x32   :  { %11502 = vmatprep.subr.msk.mxu0 %vm406_vm1, %v400_v26 }
  0x35   :  { %11503 = vmatpush3.xpose.msk.msra.mxu0 %vm406_vm1, %v400_v26 }
  0x38   :  { %11505 = vmatmul.mubr.msk.f32.vlgmr.msra.gmra.mxu0 %vm406_vm1, %v397_v27 }
  0x39   :  { %11507 = vmatprep.mubr.msk.f32.mxu0 %vm406_vm1, %v398_v28 }
  0x3c   :  { %11508 = vmatmul.mubr.msk.f32.gmra.mxu0 %vm406_vm1, %v399_v29 }
  0xe0   :  { %v11470_v36 = vpop.f32.mrf.mxu0 }
  0xe1   :  { %v11488_v37 = vpop.f32.mrf.mxu1 }
  0xe2   :  { %v292_v38 = vpop.f32.mrf.mxu0  ;;  %v383_v43 = vadd.f32 %v11488_v37, %v11470_v36  ;;  %v847_v37 = vld [vmem:[%s13387_s7 + $0x28] sm:$0xff] }
  0xe3   :  { %v377_v40 = vpop.f32.mrf.mxu1  ;;  %11546 = vmatprep.subr.msk.mxu0 %vm536_vm2, %v847_v37 }
  0xe4   :  { %v11473_v39 = vpop.f32.mrf.mxu0  ;;  %v378_v45 = vadd.f32 %v377_v40, %v292_v38  ;;  %v10193_v38 = vld [vmem:[%s13387_s7 + $0x58] sm:$0xff]  ;;  %11547 = vmatpush3.xpose.msk.msra.mxu0 %vm536_vm2, %v847_v37  ;;  %v10192_v40 = vld [vmem:[%s13387_s7 + $0x50] sm:$0xff] }
  0xe5   :  { %v11491_v41 = vpop.f32.mrf.mxu1 }
  0xe6   :  { %v302_v42 = vpop.f32.mrf.mxu0  ;;  %v393_v52 = vadd.f32 %v11491_v41, %v11473_v39  ;;  %v846_v39 = vld [vmem:[%s13387_s7 + $0x20] sm:$0xff]  ;;  %v845_v41 = vld [vmem:[%s13387_s7 + $0x18] sm:$0xff] }
  0xe7   :  { %v387_v46 = vpop.f32.mrf.mxu1  ;;  %11548 = vmatprep.subr.msk.mxu0 %vm536_vm2, %v846_v39 }
  0xe8   :  { %v388_v54 = vadd.f32 %v387_v46, %v302_v42  ;;  %11549 = vmatpush3.xpose.msk.msra.mxu0 %vm536_vm2, %v846_v39  ;;  %v10191_v42 = vld [vmem:[%s13387_s7 + $0x48] sm:$0xff]  ;;  %v10189_v46 = vld [vmem:[%s13387_s7 + $0x38] sm:$0xff]  ;;  %v13474_v39 = vld [vmem:[%s13459_s23] ss:$0 sm:$0xff] }
  0xe9   :  { %11550 = vmatprep.subr.msk.mxu0 %vm536_vm2, %v845_v41 }
  0xec   :  { %11551 = vmatpush3.xpose.msk.msra.mxu0 %vm536_vm2, %v845_v41 }
  0xf8   :  { %v11506_v44 = vpop.f32.mrf.mxu0 }
  0xf9   :  { %v523_v47 = vadd.f32 %v11506_v44, %v383_v43  ;;  %v844_v43 = vld [vmem:[%s13387_s7 + $0x10] sm:$0xff]  ;;  %v10190_v44 = vld [vmem:[%s13387_s7 + $0x40] sm:$0xff] }
  0xfa   :  { %v503_v48 = vpop.f32.mrf.mxu0  ;;  %11552 = vmatprep.subr.msk.mxu0 %vm536_vm2, %v844_v43 }
  0xfb   :  { %v522_v51 = vadd.f32 %v503_v48, %v378_v45  ;;  %v13309_v56 = vadd.f32 %v527_v50, %v523_v47  ;;  %11553 = vmatpush3.xpose.msk.msra.mxu0 %vm536_vm2, %v844_v43  ;;  %v843_v45 = vld [vmem:[%s13387_s7 + $0x8] sm:$0xff]  ;;  %v842_v47 = vld [vmem:[%s13387_s7] sm:$0xff] }
  0xfc   :  { %v11509_v53 = vpop.f32.mrf.mxu0  ;;  %11554 = vmatprep.subr.msk.mxu0 %vm536_vm2, %v843_v45  ;;  %v1077_v43 = vld [vmem:[%s13424_s11 + $0x20] sm:$0xff] }
  0xfd   :  { %v13307_v55 = vadd.f32 %v526_v49, %v522_v51  ;;  %v525_v57 = vadd.f32 %v11509_v53, %v393_v52  ;;  %v772_v1 = vsel %vm536_vm2, %v13309_v56, 0.0  ;;  %v10188_v49 = vld [vmem:[%s13387_s7 + $0x30] sm:$0xff]  ;;  %v13431_v51 = vld [vmem:[%s13424_s11 + $0x28] sm:$0xff]  ;;  %v13434_v52 = vld [vmem:[%s13424_s11 + $0x58] sm:$0xff] }
  0xfe   :  { %v513_v58 = vpop.f32.mrf.mxu0 }
  0xff   :  { %v524_v61 = vadd.f32 %v513_v58, %v388_v54  ;;  %11522 = vmatprep.mubr.msk.f32.mxu1 %vm536_vm2, %v13307_v55  ;;  %v769_v62 = vsel %vm536_vm2, %v13307_v55, 0.0  ;;  %v13320_v0 = vadd.f32 %v529_v60, %v525_v57  ;;  %11555 = vmatpush3.xpose.msk.msra.mxu0 %vm536_vm2, %v843_v45 }
 0x100   :  { %770 = vadd.xlane.f32.xlu0 %v769_v62  ;;  %11523 = vmatmul.mubr.msk.f32.vlgmr.msra.gmra.mxu1 %vm536_vm2, %v13309_v56 }
 0x101   :  { %v13317_v63 = vadd.f32 %v528_v59, %v524_v61  ;;  %11529 = vmatpush3.msra.mxu1 %v13274_v30  ;;  %v778_v17 = vsel %vm536_vm2, %v13320_v0, 0.0  ;;  %11556 = vmatprep.subr.msk.mxu0 %vm536_vm2, %v842_v47 }
 0x102   :  { %11530 = vmatprep.subr.mxu1 %v13277_v31 }
 0x103   :  { %11525 = vmatprep.mubr.msk.f32.mxu1 %vm536_vm2, %v13317_v63  ;;  %11531 = vmatpush3.msra.mxu1 %v13277_v31  ;;  %v775_v2 = vsel %vm536_vm2, %v13317_v63, 0.0 }
 0x104   :  { %773 = vadd.xlane.f32.xlu0 %v772_v1  ;;  %11526 = vmatmul.mubr.msk.f32.gmra.mxu1 %vm536_vm2, %v13320_v0 }
 0x105   :  { %11532 = vmatprep.subr.mxu1 %v13284_v32  ;;  %11557 = vmatpush3.xpose.msk.msra.mxu0 %vm536_vm2, %v842_v47  ;;  %v1076_v47 = vld [vmem:[%s13424_s11 + $0x18] sm:$0xff] }
 0x106   :  { %11533 = vmatpush3.msra.mxu1 %v13284_v32  ;;  %11582 = vmatprep.subr.msk.mxu0 %vm536_vm2, %v13431_v51 }
 0x107   :  { %11534 = vmatprep.subr.mxu1 %v13289_v33 }
 0x108   :  { %776 = vadd.xlane.f32.xlu0 %v775_v2  ;;  %11535 = vmatpush3.msra.mxu1 %v13289_v33 }
 0x109   :  { %11536 = vmatprep.subr.mxu1 %v13294_v34 }
 0x10a   :  { %11537 = vmatpush3.msra.mxu1 %v13294_v34 }
 0x10b   :  { %11538 = vmatprep.subr.mxu1 %v13299_v35 }
 0x10c   :  { %11539 = vmatpush3.msra.mxu1 %v13299_v35 }
 0x10d   :  { %11564 = vmatprep.subr.msk.mxu1 %vm536_vm2, %v10193_v38 }
 0x189   :  { %v771_v3 = vpop.xlane.xlu0 %770 }
 0x18a   :  { %v782_v4 = vmul.f32 0.020833334, %v771_v3 }
 0x18c   :  { %v13341_v5 = vsub.f32 %v13307_v55, %v782_v4 }
 0x18d   :  { %v774_v6 = vpop.xlane.xlu0 %773 }
 0x18e   :  { %v783_v7 = vmul.f32 0.020833334, %v774_v6  ;;  %v790_v8 = vmul.f32 %v13341_v5, %v13341_v5 }
 0x190   :  { %v13346_v9 = vsub.f32 %v13309_v56, %v783_v7  ;;  %v794_v10 = vsel %vm536_vm2, %v790_v8, 0.0 }
 0x191   :  { %795 = vadd.xlane.f32.xlu1 %v794_v10  ;;  %v777_v11 = vpop.xlane.xlu0 %776 }
 0x192   :  { %v784_v12 = vmul.f32 0.020833334, %v777_v11  ;;  %v791_v13 = vmul.f32 %v13346_v9, %v13346_v9 }
 0x194   :  { %v13352_v14 = vsub.f32 %v13317_v63, %v784_v12  ;;  %v797_v15 = vsel %vm536_vm2, %v791_v13, 0.0 }
 0x195   :  { %798 = vadd.xlane.f32.xlu1 %v797_v15 }
 0x196   :  { %v792_v16 = vmul.f32 %v13352_v14, %v13352_v14 }
 0x198   :  { %v800_v18 = vsel %vm536_vm2, %v792_v16, 0.0  ;;  %v10174_v16 = vld [vmem:[%s13449_s15] ss:$0 sm:$0xff] }
 0x199   :  { %779 = vadd.xlane.f32.xlu1 %v778_v17  ;;  %801 = vadd.xlane.f32.xlu0 %v800_v18 }
 0x1c0   :  { %v11524_v19 = vpop.f32.mrf.mxu1 }
 0x1c1   :  { %v13361_v20 = vsub.f32 %v13309_v56, %v11524_v19 }
 0x1c2   :  { %v615_v21 = vpop.f32.mrf.mxu1 }
 0x1c3   :  { %v13364_v22 = vsub.f32 %v13307_v55, %v615_v21  ;;  %v639_v25 = vmul.f32 %v13361_v20, %v13361_v20 }
 0x1c4   :  { %v11527_v23 = vpop.f32.mrf.mxu1 }
 0x1c5   :  { %v638_v24 = vmul.f32 %v13364_v22, %v13364_v22  ;;  %v13371_v26 = vsub.f32 %v13320_v0, %v11527_v23 }
 0x1c6   :  { %v625_v27 = vpop.f32.mrf.mxu1 }
 0x1c7   :  { %v13374_v28 = vsub.f32 %v13317_v63, %v625_v27  ;;  %11540 = vmatprep.mubr.msk.f32.mxu1 %vm536_vm2, %v638_v24  ;;  %v641_v36 = vmul.f32 %v13371_v26, %v13371_v26  ;;  %v10175_v27 = vld [vmem:[%s13454_s19] ss:$0 sm:$0xff] }
 0x1c8   :  { %11541 = vmatmul.mubr.msk.f32.vlgmr.msra.gmra.mxu1 %vm536_vm2, %v639_v25 }
 0x1c9   :  { %v640_v29 = vmul.f32 %v13374_v28, %v13374_v28  ;;  %11565 = vmatpush3.xpose.msk.msra.mxu1 %vm536_vm2, %v10193_v38 }
 0x1ca   :  { %11566 = vmatprep.subr.msk.mxu1 %vm536_vm2, %v10192_v40 }
 0x1cb   :  { %11543 = vmatprep.mubr.msk.f32.mxu1 %vm536_vm2, %v640_v29 }
 0x1cc   :  { %11544 = vmatmul.mubr.msk.f32.gmra.mxu1 %vm536_vm2, %v641_v36 }
 0x1cd   :  { %11567 = vmatpush3.xpose.msk.msra.mxu1 %vm536_vm2, %v10192_v40 }
 0x1ce   :  { %11568 = vmatprep.subr.msk.mxu1 %vm536_vm2, %v10191_v42 }
 0x1d1   :  { %11569 = vmatpush3.xpose.msk.msra.mxu1 %vm536_vm2, %v10191_v42 }
 0x1d2   :  { %11570 = vmatprep.subr.msk.mxu1 %vm536_vm2, %v10190_v44 }
 0x1d5   :  { %11571 = vmatpush3.xpose.msk.msra.mxu1 %vm536_vm2, %v10190_v44  ;;  %v13488_v44 = vld [vmem:[%s13467_s27] ss:$0 sm:$0xff] }
 0x1d6   :  { %11572 = vmatprep.subr.msk.mxu1 %vm536_vm2, %v10189_v46 }
 0x1d9   :  { %11573 = vmatpush3.xpose.msk.msra.mxu1 %vm536_vm2, %v10189_v46 }
 0x1da   :  { %11574 = vmatprep.subr.msk.mxu1 %vm536_vm2, %v10188_v49 }
 0x1dd   :  { %11575 = vmatpush3.xpose.msk.msra.mxu1 %vm536_vm2, %v10188_v49  ;;  %v1075_v49 = vld [vmem:[%s13424_s11 + $0x10] sm:$0xff] }
 0x1de   :  { %11600 = vmatprep.subr.msk.mxu1 %vm536_vm2, %v13434_v52 }
 0x21a   :  { %v796_v48 = vpop.xlane.xlu1 %795 }
 0x21b   :  { %v806_v60 = vmul.f32 0.020833334, %v796_v48  ;;  %v10217_v48 = vld [vmem:[%s13424_s11 + $0x48] sm:$0xff] }
 0x21d   :  { %v810_v1 = vadd.f32 1e-06, %v806_v60  ;;  %v10214_v60 = vld [vmem:[%s13424_s11 + $0x30] sm:$0xff] }
 0x21e   :  { %v799_v50 = vpop.xlane.xlu1 %798 }
 0x21f   :  { %v807_v12 = vmul.f32 0.020833334, %v799_v50  ;;  %v10216_v50 = vld [vmem:[%s13424_s11 + $0x40] sm:$0xff] }
 0x221   :  { %v811_v23 = vadd.f32 1e-06, %v807_v12  ;;  %v10243_v12 = vld [vmem:[%s13520_s2 + $0x48] sm:$0xff] }
 0x222   :  { %v780_v53 = vpop.xlane.xlu1 %779  ;;  %v802_v10 = vpop.xlane.xlu0 %801 }
 0x223   :  { %v785_v54 = vmul.f32 0.020833334, %v780_v53  ;;  %v808_v13 = vmul.f32 0.020833334, %v802_v10  ;;  %v10215_v53 = vld [vmem:[%s13424_s11 + $0x38] sm:$0xff]  ;;  %v10244_v10 = vld [vmem:[%s13520_s2 + $0x50] sm:$0xff] }
 0x225   :  { %v13441_v57 = vsub.f32 %v13320_v0, %v785_v54  ;;  %v812_v25 = vadd.f32 1e-06, %v808_v13  ;;  %v1306_v13 = vld [vmem:[%s13520_s2 + $0x10] sm:$0xff] }
 0x227   :  { %v793_v58 = vmul.f32 %v13441_v57, %v13441_v57 }
 0x229   :  { %v803_v59 = vsel %vm536_vm2, %v793_v58, 0.0 }
 0x22a   :  { %804 = vadd.xlane.f32.xlu1 %v803_v59  ;;  %v1073_v59 = vld [vmem:[%s13424_s11] sm:$0xff] }
 0x288   :  { %v11542_v61 = vpop.f32.mrf.mxu1 }
 0x289   :  { %v726_v62 = vadd.f32 1e-06, %v11542_v61 }
 0x28a   :  { %v720_v2 = vpop.f32.mrf.mxu1 }
 0x28b   :  { %12715 = vrsqrt.f32 %v726_v62  ;;  %v721_v3 = vadd.f32 1e-06, %v720_v2 }
 0x28c   :  { %v11545_v4 = vpop.f32.mrf.mxu1 }
 0x28d   :  { %12717 = vrsqrt.f32 %v721_v3  ;;  %v736_v6 = vadd.f32 1e-06, %v11545_v4  ;;  %v10245_v3 = vld [vmem:[%s13520_s2 + $0x58] sm:$0xff] }
 0x28e   :  { %12719 = vrsqrt.f32 %v810_v1  ;;  %v730_v7 = vpop.f32.mrf.mxu1 }
 0x28f   :  { %12721 = vrsqrt.f32 %v736_v6  ;;  %v731_v8 = vadd.f32 1e-06, %v730_v7 }
 0x291   :  { %12723 = vrsqrt.f32 %v731_v8  ;;  %v1308_v8 = vld [vmem:[%s13520_s2 + $0x20] sm:$0xff] }
 0x292   :  { %12725 = vrsqrt.f32 %v811_v23 }
 0x293   :  { %12727 = vrsqrt.f32 %v812_v25  ;;  %v10240_v25 = vld [vmem:[%s13520_s2 + $0x30] sm:$0xff] }
 0x298   :  { %v12716_v11 = vpop.eup %12715 }
 0x299   :  { %v744_v15 = vmul.f32 %v12716_v11, %v13361_v20  ;;  %v1307_v11 = vld [vmem:[%s13520_s2 + $0x18] sm:$0xff] }
 0x29a   :  { %v12718_v17 = vpop.eup %12717 }
 0x29b   :  { %v12720_v18 = vpop.eup %12719  ;;  %v743_v19 = vmul.f32 %v12718_v17, %v13364_v22  ;;  %v754_v24 = vmul.f32 %v10174_v16, %v744_v15  ;;  %v10242_v15 = vld [vmem:[%s13520_s2 + $0x40] sm:$0xff]  ;;  %v1305_v17 = vld [vmem:[%s13520_s2 + $0x8] sm:$0xff] }
 0x29c   :  { %v12722_v21 = vpop.eup %12721  ;;  %v818_v37 = vmul.f32 %v12720_v18, %v13341_v5  ;;  %v10241_v18 = vld [vmem:[%s13520_s2 + $0x38] sm:$0xff] }
 0x29d   :  { %v753_v20 = vmul.f32 %v10174_v16, %v743_v19  ;;  %v746_v29 = vmul.f32 %v12722_v21, %v13371_v26  ;;  %v764_v40 = vadd.f32 %v10175_v27, %v754_v24  ;;  %v10218_v26 = vld [vmem:[%s13424_s11 + $0x50] sm:$0xff]  ;;  %v1304_v24 = vld [vmem:[%s13520_s2] sm:$0xff] }
 0x29e   :  { %v12724_v36 = vpop.eup %12723  ;;  %v828_v5 = vmul.f32 %v13474_v39, %v818_v37 }
 0x29f   :  { %v763_v22 = vadd.f32 %v10175_v27, %v753_v20  ;;  %v745_v38 = vmul.f32 %v12724_v36, %v13374_v28  ;;  %v756_v41 = vmul.f32 %v10174_v16, %v746_v29 }
 0x2a0   :  { %v13497_v46 = vadd.f32 %v13488_v44, %v828_v5 }
 0x2a1   :  { %11558 = vmatprep.mubr.msk.f32.mxu0 %vm536_vm2, %v763_v22  ;;  %11576 = vmatprep.mubr.msk.f32.mxu1 %vm536_vm2, %v763_v22  ;;  %v755_v42 = vmul.f32 %v10174_v16, %v745_v38  ;;  %v766_v45 = vadd.f32 %v10175_v27, %v756_v41 }
 0x2a2   :  { %11559 = vmatmul.mubr.msk.f32.vlgmr.msra.gmra.mxu0 %vm536_vm2, %v764_v40  ;;  %11577 = vmatmul.mubr.msk.f32.vlgmr.msra.gmra.mxu1 %vm536_vm2, %v764_v40 }
 0x2a3   :  { %11583 = vmatpush3.xpose.msk.msra.mxu0 %vm536_vm2, %v13431_v51  ;;  %11601 = vmatpush3.xpose.msk.msra.mxu1 %vm536_vm2, %v13434_v52  ;;  %v765_v28 = vadd.f32 %v10175_v27, %v755_v42  ;;  %v12726_v51 = vpop.eup %12725  ;;  %v1074_v52 = vld [vmem:[%s13424_s11 + $0x8] sm:$0xff] }
 0x2a4   :  { %11584 = vmatprep.subr.msk.mxu0 %vm536_vm2, %v1077_v43  ;;  %11602 = vmatprep.subr.msk.mxu1 %vm536_vm2, %v10218_v26  ;;  %v12728_v54 = vpop.eup %12727  ;;  %v819_v58 = vmul.f32 %v12726_v51, %v13346_v9  ;;  %v1309_v9 = vld [vmem:[%s13520_s2 + $0x28] sm:$0xff] }
 0x2a5   :  { %11561 = vmatprep.mubr.msk.f32.mxu0 %vm536_vm2, %v765_v28  ;;  %11579 = vmatprep.mubr.msk.f32.mxu1 %vm536_vm2, %v765_v28  ;;  %v820_v61 = vmul.f32 %v12728_v54, %v13352_v14 }
 0x2a6   :  { %11562 = vmatmul.mubr.msk.f32.gmra.mxu0 %vm536_vm2, %v766_v45  ;;  %11580 = vmatmul.mubr.msk.f32.gmra.mxu1 %vm536_vm2, %v766_v45  ;;  %v829_v1 = vmul.f32 %v13474_v39, %v819_v58 }
 0x2a7   :  { %11585 = vmatpush3.xpose.msk.msra.mxu0 %vm536_vm2, %v1077_v43  ;;  %11603 = vmatpush3.xpose.msk.msra.mxu1 %vm536_vm2, %v10218_v26  ;;  %v830_v4 = vmul.f32 %v13474_v39, %v820_v61 }
 0x2a8   :  { %11594 = vmatprep.mubr.msk.f32.mxu0 %vm536_vm2, %v13497_v46  ;;  %11612 = vmatprep.mubr.msk.f32.mxu1 %vm536_vm2, %v13497_v46  ;;  %v839_v14 = vadd.f32 %v13488_v44, %v829_v1 }
 0x2a9   :  { %11586 = vmatprep.subr.msk.mxu0 %vm536_vm2, %v1076_v47  ;;  %11604 = vmatprep.subr.msk.mxu1 %vm536_vm2, %v10217_v48  ;;  %v840_v7 = vadd.f32 %v13488_v44, %v830_v4 }
 0x2ab   :  { %11587 = vmatpush3.xpose.msk.msra.mxu0 %vm536_vm2, %v1076_v47  ;;  %11605 = vmatpush3.xpose.msk.msra.mxu1 %vm536_vm2, %v10217_v48 }
 0x2ac   :  { %11588 = vmatprep.subr.msk.mxu0 %vm536_vm2, %v1075_v49  ;;  %11606 = vmatprep.subr.msk.mxu1 %vm536_vm2, %v10216_v50 }
 0x2af   :  { %11589 = vmatpush3.xpose.msk.msra.mxu0 %vm536_vm2, %v1075_v49  ;;  %11607 = vmatpush3.xpose.msk.msra.mxu1 %vm536_vm2, %v10216_v50 }
 0x2b0   :  { %11590 = vmatprep.subr.msk.mxu0 %vm536_vm2, %v1074_v52  ;;  %11608 = vmatprep.subr.msk.mxu1 %vm536_vm2, %v10215_v53 }
 0x2b3   :  { %11591 = vmatpush3.xpose.msk.msra.mxu0 %vm536_vm2, %v1074_v52  ;;  %11609 = vmatpush3.xpose.msk.msra.mxu1 %vm536_vm2, %v10215_v53  ;;  %v805_v62 = vpop.xlane.xlu1 %804 }
 0x2b4   :  { %v809_v2 = vmul.f32 0.020833334, %v805_v62  ;;  %11592 = vmatprep.subr.msk.mxu0 %vm536_vm2, %v1073_v59  ;;  %11610 = vmatprep.subr.msk.mxu1 %vm536_vm2, %v10214_v60 }
 0x2b6   :  { %v813_v6 = vadd.f32 1e-06, %v809_v2 }
 0x2b7   :  { %11593 = vmatpush3.xpose.msk.msra.mxu0 %vm536_vm2, %v1073_v59  ;;  %11611 = vmatpush3.xpose.msk.msra.mxu1 %vm536_vm2, %v10214_v60 }
 0x2b8   :  { %12729 = vrsqrt.f32 %v813_v6  ;;  %11618 = vmatprep.subr.msk.mxu0 %vm536_vm2, %v1309_v9  ;;  %11636 = vmatprep.subr.msk.mxu1 %vm536_vm2, %v10245_v3 }
 0x2ba   :  { %11595 = vmatmul.mubr.msk.f32.vlgmr.msra.gmra.mxu0 %vm536_vm2, %v839_v14  ;;  %11613 = vmatmul.mubr.msk.f32.vlgmr.msra.gmra.mxu1 %vm536_vm2, %v839_v14 }
 0x2bb   :  { %11597 = vmatprep.mubr.msk.f32.mxu0 %vm536_vm2, %v840_v7  ;;  %11615 = vmatprep.mubr.msk.f32.mxu1 %vm536_vm2, %v840_v7 }
 0x2bc   :  { %11619 = vmatpush3.xpose.msk.msra.mxu0 %vm536_vm2, %v1309_v9  ;;  %11637 = vmatpush3.xpose.msk.msra.mxu1 %vm536_vm2, %v10245_v3 }
 0x2bd   :  { %11620 = vmatprep.subr.msk.mxu0 %vm536_vm2, %v1308_v8  ;;  %11638 = vmatprep.subr.msk.mxu1 %vm536_vm2, %v10244_v10 }
 0x2c0   :  { %11621 = vmatpush3.xpose.msk.msra.mxu0 %vm536_vm2, %v1308_v8  ;;  %11639 = vmatpush3.xpose.msk.msra.mxu1 %vm536_vm2, %v10244_v10 }
 0x2c1   :  { %11622 = vmatprep.subr.msk.mxu0 %vm536_vm2, %v1307_v11  ;;  %11640 = vmatprep.subr.msk.mxu1 %vm536_vm2, %v10243_v12 }
 0x2c4   :  { %11623 = vmatpush3.xpose.msk.msra.mxu0 %vm536_vm2, %v1307_v11  ;;  %11641 = vmatpush3.xpose.msk.msra.mxu1 %vm536_vm2, %v10243_v12 }
 0x2c5   :  { %v12730_v16 = vpop.eup %12729  ;;  %11624 = vmatprep.subr.msk.mxu0 %vm536_vm2, %v1306_v13  ;;  %11642 = vmatprep.subr.msk.mxu1 %vm536_vm2, %v10242_v15 }
 0x2c6   :  { %v821_v19 = vmul.f32 %v12730_v16, %v13441_v57 }
 0x2c8   :  { %11625 = vmatpush3.xpose.msk.msra.mxu0 %vm536_vm2, %v1306_v13  ;;  %11643 = vmatpush3.xpose.msk.msra.mxu1 %vm536_vm2, %v10242_v15  ;;  %v831_v21 = vmul.f32 %v13474_v39, %v821_v19 }
 0x2c9   :  { %11626 = vmatprep.subr.msk.mxu0 %vm536_vm2, %v1305_v17  ;;  %11644 = vmatprep.subr.msk.mxu1 %vm536_vm2, %v10241_v18 }
 0x2ca   :  { %v841_v23 = vadd.f32 %v13488_v44, %v831_v21 }
 0x2cc   :  { %11627 = vmatpush3.xpose.msk.msra.mxu0 %vm536_vm2, %v1305_v17  ;;  %11645 = vmatpush3.xpose.msk.msra.mxu1 %vm536_vm2, %v10241_v18 }
 0x2cd   :  { %11598 = vmatmul.mubr.msk.f32.gmra.mxu0 %vm536_vm2, %v841_v23  ;;  %11616 = vmatmul.mubr.msk.f32.gmra.mxu1 %vm536_vm2, %v841_v23 }
 0x2ce   :  { %11628 = vmatprep.subr.msk.mxu0 %vm536_vm2, %v1304_v24  ;;  %11630 = vmatprep.mubr.msk.f32.mxu0 %vm536_vm2, %v13497_v46 }
 0x2cf   :  { %11646 = vmatprep.subr.msk.mxu1 %vm536_vm2, %v10240_v25  ;;  %11648 = vmatprep.mubr.msk.f32.mxu1 %vm536_vm2, %v13497_v46 }
 0x2d0   :  { %11629 = vmatpush3.xpose.msk.msra.mxu0 %vm536_vm2, %v1304_v24  ;;  %11647 = vmatpush3.xpose.msk.msra.mxu1 %vm536_vm2, %v10240_v25 }
 0x2d3   :  { %11631 = vmatmul.mubr.msk.f32.vlgmr.msra.gmra.mxu0 %vm536_vm2, %v839_v14  ;;  %11649 = vmatmul.mubr.msk.f32.vlgmr.msra.gmra.mxu1 %vm536_vm2, %v839_v14 }
 0x2d4   :  { %11633 = vmatprep.mubr.msk.f32.mxu0 %vm536_vm2, %v840_v7  ;;  %11651 = vmatprep.mubr.msk.f32.mxu1 %vm536_vm2, %v840_v7 }
 0x2d7   :  { %11634 = vmatmul.mubr.msk.f32.gmra.mxu0 %vm536_vm2, %v841_v23  ;;  %11652 = vmatmul.mubr.msk.f32.gmra.mxu1 %vm536_vm2, %v841_v23 }
 0x2d8   :  { %11679 = vmatprep.mubr.msk.f32.mxu1 %vm536_vm2, %v13299_v35 }
 0x362   :  { %v11560_v57 = vpop.f32.mrf.mxu0  ;;  %v11578_v27 = vpop.f32.mrf.mxu1 }
 0x364   :  { %v944_v20 = vpop.f32.mrf.mxu0  ;;  %v1054_v29 = vpop.f32.mrf.mxu1 }
 0x365   :  { %1523 = vxpose.xlu0.b32.start [1/2] (short) (narrow) %v944_v20, 48  ;;  %2027 = vxpose.xlu1.b32.start [1/2] (short) (narrow) %v1054_v29, 48 }
 0x366   :  { %v13597_v36 = vpop.f32.mrf.mxu0  ;;  %v13630_v61 = vpop.f32.mrf.mxu1 }
 0x368   :  { %v13599_v37 = vpop.f32.mrf.mxu0  ;;  %v13640_v9 = vpop.f32.mrf.mxu1 }
 0x369   :  { %1524 = vxpose.xlu0.b32.end [2/2] (short) (narrow) %v11560_v57, 48  ;;  %2028 = vxpose.xlu1.b32.end [2/2] (short) (narrow) %v11578_v27, 48 }
 0x37a   :  { %v11596_v22 = vpop.f32.mrf.mxu0  ;;  %v11614_v4 = vpop.f32.mrf.mxu1 }
 0x37b   :  { %11654 = vmatprep.subr.mxu0 %v11596_v22 }
 0x37c   :  { %v1175_v38 = vpop.f32.mrf.mxu0  ;;  %11655 = vmatpush3.msra.mxu0 %v11596_v22  ;;  %v1285_v14 = vpop.f32.mrf.mxu1 }
 0x37d   :  { %11656 = vmatprep.subr.mxu0 %v1175_v38 }
 0x37e   :  { %11657 = vmatpush3.msra.mxu0 %v1175_v38 }
 0x38d   :  { %v13609_v5 = vpop.f32.mrf.mxu0  ;;  %v13667_v11 = vpop.f32.mrf.mxu1 }
 0x38f   :  { %v13611_v28 = vpop.f32.mrf.mxu0  ;;  %v13669_v12 = vpop.f32.mrf.mxu1 }
 0x393   :  { %v13613_v44 = vpop.f32.mrf.mxu0  ;;  %v13671_v13 = vpop.f32.mrf.mxu1 }
 0x395   :  { %v13615_v45 = vpop.f32.mrf.mxu0  ;;  %v13673_v15 = vpop.f32.mrf.mxu1 }
 0x397   :  { %v13617_v46 = vpop.f32.mrf.mxu0  ;;  %v13675_v16 = vpop.f32.mrf.mxu1 }
 0x399   :  { %v13619_v47 = vpop.f32.mrf.mxu0  ;;  %v13677_v17 = vpop.f32.mrf.mxu1 }
 0x3e1   :  { %v1539_v39 = vpop.trf.xlu0  ;;  %v2043_v58 = vpop.trf.xlu1 }
 0x3e2   :  { %11658 = vmatprep.mubr.msk.f32.mxu0 %vm1555_vm3, %v1539_v39 }
 0x3e5   :  { %v1540_v40 = vpop.trf.xlu0  ;;  %v2044_v1 = vpop.trf.xlu1 }
 0x3e6   :  { %11659 = vmatmul.mubr.msk.f32.vlgmr.msra.gmra.mxu0 %vm1555_vm3, %v1540_v40 }
 0x3e9   :  { %v1541_v41 = vpop.trf.xlu0  ;;  %v2045_v6 = vpop.trf.xlu1 }
 0x3ea   :  { %11661 = vmatprep.mubr.msk.f32.mxu0 %vm1555_vm3, %v1541_v41 }
 0x3ed   :  { %v1542_v42 = vpop.trf.xlu0  ;;  %v2046_v7 = vpop.trf.xlu1 }
 0x3ee   :  { %11662 = vmatmul.mubr.msk.f32.gmra.mxu0 %vm1555_vm3, %v1542_v42 }
 0x3f1   :  { %v1543_v43 = vpop.trf.xlu0  ;;  %v2047_v8 = vpop.trf.xlu1 }
 0x3f2   :  { %11664 = vmatprep.mubr.msk.f32.mxu0 %vm1555_vm3, %v1543_v43 }
 0x3f5   :  { %v1544_v26 = vpop.trf.xlu0  ;;  %v2048_v10 = vpop.trf.xlu1 }
 0x3f6   :  { %11665 = vmatmul.mubr.msk.f32.gmra.mxu0 %vm1555_vm3, %v1544_v26 }
 0x3f7   :  { %11700 = vmatprep.mubr.msk.f32.mxu0 %vm536_vm2, %v13299_v35 }
 0x4a6   :  { %v11660_v48 = vpop.f32.mrf.mxu0 }
 0x4a7   :  { %v13637_v2 = vmul.f32 0.14433756, %v11660_v48 }
 0x4a8   :  { %v1640_v49 = vpop.f32.mrf.mxu0 }
 0x4a9   :  { %v13643_v3 = vmul.f32 0.14433756, %v1640_v49 }
 0x4ae   :  { %v11663_v50 = vpop.f32.mrf.mxu0 }
 0x4af   :  { %v13627_v60 = vmul.f32 0.14433756, %v11663_v50 }
 0x4b0   :  { %v1650_v51 = vpop.f32.mrf.mxu0 }
 0x4b1   :  { %v13633_v62 = vmul.f32 0.14433756, %v1650_v51 }
 0x4b6   :  { %v11666_v52 = vpop.f32.mrf.mxu0 }
 0x4b7   :  { %v13621_v53 = vmul.f32 0.14433756, %v11666_v52 }
 0x4b8   :  { %v1660_v54 = vpop.f32.mrf.mxu0 }
 0x4b9   :  { %v13623_v59 = vmul.f32 0.14433756, %v1660_v54  ;;  %11667 = vmatprep.subr.mxu1 %v13621_v53 }
 0x4ba   :  { %11668 = vmatpush3.msra.mxu1 %v13621_v53 }
 0x4bb   :  { %11669 = vmatprep.subr.mxu1 %v13623_v59 }
 0x4bc   :  { %11670 = vmatpush3.msra.mxu1 %v13623_v59 }
 0x4bd   :  { %11671 = vmatprep.subr.mxu1 %v13627_v60 }
 0x4be   :  { %11672 = vmatpush3.msra.mxu1 %v13627_v60 }
 0x4bf   :  { %11673 = vmatprep.subr.mxu1 %v13633_v62 }
 0x4c0   :  { %11674 = vmatpush3.msra.mxu1 %v13633_v62 }
 0x4c1   :  { %11675 = vmatprep.subr.mxu1 %v13637_v2 }
 0x4c2   :  { %11676 = vmatpush3.msra.mxu1 %v13637_v2 }
 0x4c3   :  { %11677 = vmatprep.subr.mxu1 %v13643_v3 }
 0x4c4   :  { %11678 = vmatpush3.msra.mxu1 %v13643_v3 }
 0x4c5   :  { %11680 = vmatmul.mubr.msk.f32.vlgmr.msra.gmra.mxu1 %vm536_vm2, %v13294_v34  ;;  %11709 = vmatprep.subr.mxu1 %v11614_v4 }
 0x4c6   :  { %11710 = vmatpush3.msra.mxu1 %v11614_v4  ;;  %11682 = vmatprep.mubr.msk.f32.mxu1 %vm536_vm2, %v13289_v33 }
 0x4c7   :  { %11711 = vmatprep.subr.mxu1 %v1285_v14 }
 0x4c8   :  { %11712 = vmatpush3.msra.mxu1 %v1285_v14 }
 0x4c9   :  { %11683 = vmatmul.mubr.msk.f32.gmra.mxu1 %vm536_vm2, %v13284_v32 }
 0x4ca   :  { %11685 = vmatprep.mubr.msk.f32.mxu1 %vm536_vm2, %v13277_v31 }
 0x4cd   :  { %11686 = vmatmul.mubr.msk.f32.gmra.mxu1 %vm536_vm2, %v13274_v30 }
 0x4ce   :  { %11713 = vmatprep.mubr.msk.f32.mxu1 %vm1555_vm3, %v2043_v58 }
 0x4d1   :  { %11714 = vmatmul.mubr.msk.f32.vlgmr.msra.gmra.mxu1 %vm1555_vm3, %v2044_v1 }
 0x4d2   :  { %11716 = vmatprep.mubr.msk.f32.mxu1 %vm1555_vm3, %v2045_v6 }
 0x4d5   :  { %11717 = vmatmul.mubr.msk.f32.gmra.mxu1 %vm1555_vm3, %v2046_v7 }
 0x4d6   :  { %11719 = vmatprep.mubr.msk.f32.mxu1 %vm1555_vm3, %v2047_v8 }
 0x4d9   :  { %11720 = vmatmul.mubr.msk.f32.gmra.mxu1 %vm1555_vm3, %v2048_v10 }
 0x4da   :  { %11755 = vmatprep.mubr.msk.f32.mxu1 %vm536_vm2, %v13299_v35 }
 0x585   :  { %v11681_v18 = vpop.f32.mrf.mxu1 }
 0x586   :  { %v1791_v22 = vsel %vm536_vm2, %v11681_v18, 0.0 }
 0x587   :  { %v1759_v19 = vpop.f32.mrf.mxu1 }
 0x588   :  { %v1788_v38 = vsel %vm536_vm2, %v1759_v19, 0.0 }
 0x589   :  { %v11684_v21 = vpop.f32.mrf.mxu1 }
 0x58a   :  { %v1797_v20 = vsel %vm536_vm2, %v11684_v21, 0.0 }
 0x58b   :  { %v1769_v23 = vpop.f32.mrf.mxu1 }
 0x58c   :  { %v1794_v29 = vsel %vm536_vm2, %v1769_v23, 0.0 }
 0x58d   :  { %v11687_v24 = vpop.f32.mrf.mxu1 }
 0x58e   :  { %v1803_v25 = vsel %vm536_vm2, %v11687_v24, 0.0 }
 0x58f   :  { %1804 = vadd.xlane.f32.xlu0 %v1803_v25  ;;  %v1779_v57 = vpop.f32.mrf.mxu1 }
 0x590   :  { %v1800_v27 = vsel %vm536_vm2, %v1779_v57, 0.0 }
 0x591   :  { %1801 = vadd.xlane.f32.xlu1 %v1800_v27  ;;  %v11715_v39 = vpop.f32.mrf.mxu1 }
 0x593   :  { %1798 = vadd.xlane.f32.xlu0 %v1797_v20  ;;  %v2143_v48 = vpop.f32.mrf.mxu1  ;;  %v2173_v20 = vmul.f32 0.14433756, %v11715_v39 }
 0x595   :  { %1795 = vadd.xlane.f32.xlu1 %v1794_v29  ;;  %v11718_v54 = vpop.f32.mrf.mxu1  ;;  %v13727_v29 = vmul.f32 0.14433756, %v2143_v48 }
 0x597   :  { %1792 = vadd.xlane.f32.xlu0 %v1791_v22  ;;  %v2153_v8 = vpop.f32.mrf.mxu1 }
 0x598   :  { %v2174_v27 = vmul.f32 0.14433756, %v2153_v8 }
 0x599   :  { %1789 = vadd.xlane.f32.xlu1 %v1788_v38  ;;  %v11721_v21 = vpop.f32.mrf.mxu1 }
 0x59a   :  { %v13713_v24 = vmul.f32 0.14433756, %v11721_v21 }
 0x59b   :  { %v2163_v25 = vpop.f32.mrf.mxu1 }
 0x59c   :  { %v2176_v57 = vmul.f32 0.14433756, %v2163_v25 }
 0x618   :  { %v1805_v40 = vpop.xlane.xlu0 %1804 }
 0x619   :  { %v1811_v41 = vmul.f32 0.020833334, %v1805_v40 }
 0x61a   :  { %v1802_v42 = vpop.xlane.xlu1 %1801 }
 0x61b   :  { %v13686_v43 = vsub.f32 %v13621_v53, %v1811_v41  ;;  %v1810_v26 = vmul.f32 0.020833334, %v1802_v42 }
 0x61c   :  { %v1799_v49 = vpop.xlane.xlu0 %1798 }
 0x61d   :  { %v13689_v50 = vsub.f32 %v13623_v59, %v1810_v26  ;;  %v1809_v51 = vmul.f32 0.020833334, %v1799_v49  ;;  %v1823_v52 = vmul.f32 %v13686_v43, %v13686_v43 }
 0x61e   :  { %v1796_v58 = vpop.xlane.xlu1 %1795 }
 0x61f   :  { %v13694_v1 = vsub.f32 %v13627_v60, %v1809_v51  ;;  %v1808_v4 = vmul.f32 0.020833334, %v1796_v58  ;;  %11688 = vmatprep.subr.mxu0 %v1823_v52  ;;  %v1822_v53 = vmul.f32 %v13689_v50, %v13689_v50 }
 0x620   :  { %11689 = vmatpush3.msra.mxu0 %v1823_v52  ;;  %v1793_v6 = vpop.xlane.xlu0 %1792 }
 0x621   :  { %v13699_v14 = vsub.f32 %v13633_v62, %v1808_v4  ;;  %v1807_v59 = vmul.f32 0.020833334, %v1793_v6  ;;  %11690 = vmatprep.subr.mxu0 %v1822_v53  ;;  %v1821_v7 = vmul.f32 %v13694_v1, %v13694_v1 }
 0x622   :  { %11691 = vmatpush3.msra.mxu0 %v1822_v53  ;;  %v1790_v10 = vpop.xlane.xlu1 %1789 }
 0x623   :  { %v13704_v60 = vsub.f32 %v13637_v2, %v1807_v59  ;;  %v1806_v18 = vmul.f32 0.020833334, %v1790_v10  ;;  %11692 = vmatprep.subr.mxu0 %v1821_v7  ;;  %v1820_v19 = vmul.f32 %v13699_v14, %v13699_v14 }
 0x624   :  { %11693 = vmatpush3.msra.mxu0 %v1821_v7 }
 0x625   :  { %v13709_v62 = vsub.f32 %v13643_v3, %v1806_v18  ;;  %11694 = vmatprep.subr.mxu0 %v1820_v19  ;;  %v1819_v23 = vmul.f32 %v13704_v60, %v13704_v60  ;;  %v2175_v3 = vmul.f32 0.14433756, %v11718_v54 }
 0x626   :  { %11695 = vmatpush3.msra.mxu0 %v1820_v19 }
 0x627   :  { %11696 = vmatprep.subr.mxu0 %v1819_v23  ;;  %v1818_v2 = vmul.f32 %v13709_v62, %v13709_v62 }
 0x628   :  { %11697 = vmatpush3.msra.mxu0 %v1819_v23 }
 0x629   :  { %11698 = vmatprep.subr.mxu0 %v1818_v2 }
 0x62a   :  { %11699 = vmatpush3.msra.mxu0 %v1818_v2 }
 0x62b   :  { %11701 = vmatmul.mubr.msk.f32.vlgmr.msra.gmra.mxu0 %vm536_vm2, %v13294_v34  ;;  %11722 = vmatprep.subr.mxu0 %v13713_v24 }
 0x62c   :  { %11723 = vmatpush3.msra.mxu0 %v13713_v24  ;;  %11703 = vmatprep.mubr.msk.f32.mxu0 %vm536_vm2, %v13289_v33 }
 0x62d   :  { %11724 = vmatprep.subr.mxu0 %v2176_v57 }
 0x62e   :  { %11725 = vmatpush3.msra.mxu0 %v2176_v57 }
 0x62f   :  { %11704 = vmatmul.mubr.msk.f32.gmra.mxu0 %vm536_vm2, %v13284_v32  ;;  %11726 = vmatprep.subr.mxu0 %v2175_v3 }
 0x630   :  { %11727 = vmatpush3.msra.mxu0 %v2175_v3  ;;  %11706 = vmatprep.mubr.msk.f32.mxu0 %vm536_vm2, %v13277_v31 }
 0x631   :  { %11728 = vmatprep.subr.mxu0 %v2174_v27 }
 0x632   :  { %11729 = vmatpush3.msra.mxu0 %v2174_v27 }
 0x633   :  { %11707 = vmatmul.mubr.msk.f32.gmra.mxu0 %vm536_vm2, %v13274_v30  ;;  %11730 = vmatprep.subr.mxu0 %v2173_v20 }
 0x634   :  { %11731 = vmatpush3.msra.mxu0 %v2173_v20  ;;  %11734 = vmatprep.mubr.msk.f32.mxu0 %vm536_vm2, %v13299_v35 }
 0x635   :  { %11732 = vmatprep.subr.mxu0 %v13727_v29 }
 0x636   :  { %11733 = vmatpush3.msra.mxu0 %v13727_v29 }
 0x637   :  { %11735 = vmatmul.mubr.msk.f32.vlgmr.msra.gmra.mxu0 %vm536_vm2, %v13294_v34 }
 0x638   :  { %11737 = vmatprep.mubr.msk.f32.mxu0 %vm536_vm2, %v13289_v33 }
 0x63b   :  { %11738 = vmatmul.mubr.msk.f32.gmra.mxu0 %vm536_vm2, %v13284_v32 }
 0x63c   :  { %11740 = vmatprep.mubr.msk.f32.mxu0 %vm536_vm2, %v13277_v31 }
 0x63f   :  { %11741 = vmatmul.mubr.msk.f32.gmra.mxu0 %vm536_vm2, %v13274_v30 }
 0x640   :  { %11776 = vmatprep.mubr.msk.f32.mxu0 %vm536_vm2, %v13673_v15 }
 0x6eb   :  { %v13747_v35 = vpop.f32.mrf.mxu0 }
 0x6ed   :  { %v13749_v22 = vpop.f32.mrf.mxu0 }
 0x6ef   :  { %v13751_v34 = vpop.f32.mrf.mxu0 }
 0x6f1   :  { %v13753_v38 = vpop.f32.mrf.mxu0 }
 0x6f3   :  { %v13755_v33 = vpop.f32.mrf.mxu0 }
 0x6f5   :  { %v13757_v32 = vpop.f32.mrf.mxu0 }
 0x6f7   :  { %v11736_v39 = vpop.f32.mrf.mxu0 }
 0x6f8   :  { %v2276_v51 = vsel %vm536_vm2, %v11736_v39, 0.0 }
 0x6f9   :  { %v2244_v31 = vpop.f32.mrf.mxu0 }
 0x6fa   :  { %v2273_v52 = vsel %vm536_vm2, %v2244_v31, 0.0 }
 0x6fb   :  { %v11739_v40 = vpop.f32.mrf.mxu0 }
 0x6fc   :  { %v2282_v48 = vsel %vm536_vm2, %v11739_v40, 0.0 }
 0x6fd   :  { %v2254_v41 = vpop.f32.mrf.mxu0 }
 0x6fe   :  { %v2279_v49 = vsel %vm536_vm2, %v2254_v41, 0.0 }
 0x6ff   :  { %v11742_v30 = vpop.f32.mrf.mxu0 }
 0x700   :  { %v2288_v42 = vsel %vm536_vm2, %v11742_v30, 0.0  ;;  %v13792_v30 = vld [vmem:[%s13271_s29 + $0x8] sm:$0xff] }
 0x701   :  { %2289 = vadd.xlane.f32.xlu0 %v2288_v42  ;;  %v2264_v15 = vpop.f32.mrf.mxu0  ;;  %v13802_v42 = vld [vmem:[%s13271_s29 + $0x18] sm:$0xff] }
 0x702   :  { %v2285_v26 = vsel %vm536_vm2, %v2264_v15, 0.0  ;;  %v13807_v15 = vld [vmem:[%s13271_s29 + $0x20] sm:$0xff] }
 0x703   :  { %2286 = vadd.xlane.f32.xlu1 %v2285_v26  ;;  %v13812_v26 = vld [vmem:[%s13271_s29 + $0x28] sm:$0xff] }
 0x705   :  { %2283 = vadd.xlane.f32.xlu0 %v2282_v48 }
 0x707   :  { %2280 = vadd.xlane.f32.xlu1 %v2279_v49 }
 0x709   :  { %2277 = vadd.xlane.f32.xlu0 %v2276_v51 }
 0x70b   :  { %2274 = vadd.xlane.f32.xlu1 %v2273_v52 }
 0x78a   :  { %v2290_v54 = vpop.xlane.xlu0 %2289 }
 0x78b   :  { %v2296_v58 = vmul.f32 0.020833334, %v2290_v54 }
 0x78c   :  { %v2287_v4 = vpop.xlane.xlu1 %2286 }
 0x78d   :  { %v13766_v53 = vsub.f32 %v13713_v24, %v2296_v58  ;;  %v2295_v6 = vmul.f32 0.020833334, %v2287_v4 }
 0x78e   :  { %v2284_v59 = vpop.xlane.xlu0 %2283 }
 0x78f   :  { %v13768_v7 = vsub.f32 %v2176_v57, %v2295_v6  ;;  %v2294_v8 = vmul.f32 0.020833334, %v2284_v59  ;;  %v2308_v10 = vmul.f32 %v13766_v53, %v13766_v53 }
 0x790   :  { %v2281_v18 = vpop.xlane.xlu1 %2280 }
 0x791   :  { %v13772_v19 = vsub.f32 %v2175_v3, %v2294_v8  ;;  %v2293_v21 = vmul.f32 0.020833334, %v2281_v18  ;;  %11743 = vmatprep.subr.mxu1 %v2308_v10  ;;  %v2307_v23 = vmul.f32 %v13768_v7, %v13768_v7 }
 0x792   :  { %11744 = vmatpush3.msra.mxu1 %v2308_v10  ;;  %v2278_v2 = vpop.xlane.xlu0 %2277 }
 0x793   :  { %v13776_v24 = vsub.f32 %v2174_v27, %v2293_v21  ;;  %v2292_v25 = vmul.f32 0.020833334, %v2278_v2  ;;  %11745 = vmatprep.subr.mxu1 %v2307_v23  ;;  %v2306_v57 = vmul.f32 %v13772_v19, %v13772_v19 }
 0x794   :  { %11746 = vmatpush3.msra.mxu1 %v2307_v23  ;;  %v2275_v39 = vpop.xlane.xlu1 %2274 }
 0x795   :  { %v13780_v31 = vsub.f32 %v2173_v20, %v2292_v25  ;;  %v2291_v3 = vmul.f32 0.020833334, %v2275_v39  ;;  %11747 = vmatprep.subr.mxu1 %v2306_v57  ;;  %v2305_v40 = vmul.f32 %v13776_v24, %v13776_v24 }
 0x796   :  { %11748 = vmatpush3.msra.mxu1 %v2306_v57 }
 0x797   :  { %v13785_v27 = vsub.f32 %v13727_v29, %v2291_v3  ;;  %11749 = vmatprep.subr.mxu1 %v2305_v40  ;;  %v2304_v41 = vmul.f32 %v13780_v31, %v13780_v31  ;;  %v13797_v29 = vld [vmem:[%s13271_s29 + $0x10] sm:$0xff] }
 0x798   :  { %11750 = vmatpush3.msra.mxu1 %v2305_v40 }
 0x799   :  { %11751 = vmatprep.subr.mxu1 %v2304_v41  ;;  %v2303_v20 = vmul.f32 %v13785_v27, %v13785_v27 }
 0x79a   :  { %11752 = vmatpush3.msra.mxu1 %v2304_v41 }
 0x79b   :  { %11753 = vmatprep.subr.mxu1 %v2303_v20 }
 0x79c   :  { %11754 = vmatpush3.msra.mxu1 %v2303_v20 }
 0x79d   :  { %11756 = vmatmul.mubr.msk.f32.vlgmr.msra.gmra.mxu1 %vm536_vm2, %v13792_v30 }
 0x79e   :  { %11758 = vmatprep.mubr.msk.f32.mxu1 %vm536_vm2, %v13797_v29 }
 0x7a1   :  { %11759 = vmatmul.mubr.msk.f32.gmra.mxu1 %vm536_vm2, %v13802_v42 }
 0x7a2   :  { %11761 = vmatprep.mubr.msk.f32.mxu1 %vm536_vm2, %v13807_v15 }
 0x7a5   :  { %11762 = vmatmul.mubr.msk.f32.gmra.mxu1 %vm536_vm2, %v13812_v26 }
 0x7a6   :  { %11791 = vmatprep.mubr.msk.f32.mxu1 %vm536_vm2, %v13615_v45 }
 0x85d   :  { %v11757_v48 = vpop.f32.mrf.mxu1 }
 0x85e   :  { %v2407_v45 = vsel %vm536_vm2, %v11757_v48, 0.0 }
 0x85f   :  { %v2375_v49 = vpop.f32.mrf.mxu1 }
 0x860   :  { %v2404_v10 = vsel %vm536_vm2, %v2375_v49, 0.0 }
 0x861   :  { %v11760_v51 = vpop.f32.mrf.mxu1 }
 0x862   :  { %v2413_v59 = vsel %vm536_vm2, %v11760_v51, 0.0 }
 0x863   :  { %v2385_v52 = vpop.f32.mrf.mxu1 }
 0x864   :  { %v2410_v8 = vsel %vm536_vm2, %v2385_v52, 0.0 }
 0x865   :  { %v11763_v54 = vpop.f32.mrf.mxu1 }
 0x866   :  { %v2419_v58 = vsel %vm536_vm2, %v11763_v54, 0.0 }
 0x867   :  { %2420 = vadd.xlane.f32.xlu0 %v2419_v58  ;;  %v2395_v4 = vpop.f32.mrf.mxu1 }
 0x868   :  { %v2416_v6 = vsel %vm536_vm2, %v2395_v4, 0.0 }
 0x869   :  { %2417 = vadd.xlane.f32.xlu1 %v2416_v6 }
 0x86b   :  { %2414 = vadd.xlane.f32.xlu0 %v2413_v59 }
 0x86d   :  { %2411 = vadd.xlane.f32.xlu1 %v2410_v8 }
 0x86f   :  { %2408 = vadd.xlane.f32.xlu0 %v2407_v45 }
 0x871   :  { %2405 = vadd.xlane.f32.xlu1 %v2404_v10 }
 0x8f0   :  { %v2421_v18 = vpop.xlane.xlu0 %2420 }
 0x8f1   :  { %v2427_v21 = vmul.f32 0.020833334, %v2421_v18 }
 0x8f2   :  { %v2418_v23 = vpop.xlane.xlu1 %2417 }
 0x8f3   :  { %v2433_v2 = vadd.f32 1e-05, %v2427_v21  ;;  %v2426_v25 = vmul.f32 0.020833334, %v2418_v23 }
 0x8f4   :  { %v2415_v57 = vpop.xlane.xlu0 %2414 }
 0x8f5   :  { %12731 = vrsqrt.f32 %v2433_v2  ;;  %v2432_v39 = vadd.f32 1e-05, %v2426_v25  ;;  %v2425_v3 = vmul.f32 0.020833334, %v2415_v57 }
 0x8f6   :  { %v2412_v40 = vpop.xlane.xlu1 %2411 }
 0x8f7   :  { %12733 = vrsqrt.f32 %v2432_v39  ;;  %v2431_v41 = vadd.f32 1e-05, %v2425_v3  ;;  %v2424_v20 = vmul.f32 0.020833334, %v2412_v40 }
 0x8f8   :  { %v2409_v51 = vpop.xlane.xlu0 %2408 }
 0x8f9   :  { %12735 = vrsqrt.f32 %v2431_v41  ;;  %v2430_v48 = vadd.f32 1e-05, %v2424_v20  ;;  %v2423_v52 = vmul.f32 0.020833334, %v2409_v51 }
 0x8fa   :  { %v2406_v54 = vpop.xlane.xlu1 %2405 }
 0x8fb   :  { %12737 = vrsqrt.f32 %v2430_v48  ;;  %v2429_v49 = vadd.f32 1e-05, %v2423_v52  ;;  %v2422_v58 = vmul.f32 0.020833334, %v2406_v54 }
 0x8fd   :  { %12739 = vrsqrt.f32 %v2429_v49  ;;  %v2428_v4 = vadd.f32 1e-05, %v2422_v58 }
 0x8ff   :  { %12741 = vrsqrt.f32 %v2428_v4 }
 0x902   :  { %v12732_v6 = vpop.eup %12731 }
 0x903   :  { %v2445_v59 = vmul.f32 %v12732_v6, %v13766_v53 }
 0x904   :  { %v12734_v8 = vpop.eup %12733 }
 0x905   :  { %v2461_v45 = vsel %vm536_vm2, %v2445_v59, -inf  ;;  %v2444_v10 = vmul.f32 %v12734_v8, %v13768_v7 }
 0x906   :  { %v12736_v18 = vpop.eup %12735  ;;  %2462 = vmax.xlane.f32.xlu0 %v2461_v45 }
 0x907   :  { %v2458_v21 = vsel %vm536_vm2, %v2444_v10, -inf  ;;  %v2443_v23 = vmul.f32 %v12736_v18, %v13772_v19 }
 0x908   :  { %v12738_v2 = vpop.eup %12737  ;;  %2459 = vmax.xlane.f32.xlu1 %v2458_v21 }
 0x909   :  { %v2455_v25 = vsel %vm536_vm2, %v2443_v23, -inf  ;;  %v2442_v57 = vmul.f32 %v12738_v2, %v13776_v24 }
 0x90a   :  { %v12740_v39 = vpop.eup %12739  ;;  %2456 = vmax.xlane.f32.xlu0 %v2455_v25 }
 0x90b   :  { %v2452_v53 = vsel %vm536_vm2, %v2442_v57, -inf  ;;  %v2441_v3 = vmul.f32 %v12740_v39, %v13780_v31 }
 0x90c   :  { %v12742_v40 = vpop.eup %12741  ;;  %2453 = vmax.xlane.f32.xlu1 %v2452_v53 }
 0x90d   :  { %v2449_v7 = vsel %vm536_vm2, %v2441_v3, -inf  ;;  %v2440_v41 = vmul.f32 %v12742_v40, %v13785_v27 }
 0x90e   :  { %2450 = vmax.xlane.f32.xlu0 %v2449_v7 }
 0x90f   :  { %v2446_v19 = vsel %vm536_vm2, %v2440_v41, -inf }
 0x910   :  { %2447 = vmax.xlane.f32.xlu1 %v2446_v19 }
 0x98f   :  { %v2463_v20 = vpop.xlane.xlu0 %2462 }
 0x990   :  { %v2469_v51 = vsub.f32 %v2445_v59, %v2463_v20 }
 0x991   :  { %v2460_v48 = vpop.xlane.xlu1 %2459 }
 0x992   :  { %v2480_v24 = vmul.f32 1.442695, %v2469_v51  ;;  %v2468_v52 = vsub.f32 %v2444_v10, %v2460_v48  ;;  %v1934_v51 = vsel %vm536_vm2, %v13755_v33, 0.0  ;;  %v1931_v48 = vsel %vm536_vm2, %v13757_v32, 0.0 }
 0x993   :  { %v2457_v54 = vpop.xlane.xlu0 %2456  ;;  %v1919_v33 = vsel %vm536_vm2, %v13749_v22, 0.0 }
 0x994   :  { %12743 = vpow2.f32 %v2480_v24  ;;  %v2478_v49 = vmul.f32 1.442695, %v2468_v52  ;;  %v2467_v58 = vsub.f32 %v2443_v23, %v2457_v54  ;;  %v1928_v24 = vsel %vm536_vm2, %v13751_v34, 0.0 }
 0x995   :  { %v2454_v31 = vpop.xlane.xlu1 %2453  ;;  %v1925_v52 = vsel %vm536_vm2, %v13753_v38, 0.0  ;;  %v1922_v54 = vsel %vm536_vm2, %v13747_v35, 0.0 }
 0x996   :  { %12745 = vpow2.f32 %v2478_v49  ;;  %v2476_v4 = vmul.f32 1.442695, %v2467_v58  ;;  %v2466_v6 = vsub.f32 %v2442_v57, %v2454_v31 }
 0x997   :  { %v2451_v8 = vpop.xlane.xlu0 %2450 }
 0x998   :  { %12747 = vpow2.f32 %v2476_v4  ;;  %v2474_v27 = vmul.f32 1.442695, %v2466_v6  ;;  %v2465_v45 = vsub.f32 %v2441_v3, %v2451_v8 }
 0x999   :  { %v2448_v18 = vpop.xlane.xlu1 %2447 }
 0x99a   :  { %12749 = vpow2.f32 %v2474_v27  ;;  %v2472_v21 = vmul.f32 1.442695, %v2465_v45  ;;  %v2464_v2 = vsub.f32 %v2440_v41, %v2448_v18 }
 0x99c   :  { %12751 = vpow2.f32 %v2472_v21  ;;  %v2470_v59 = vmul.f32 1.442695, %v2464_v2 }
 0x99e   :  { %12753 = vpow2.f32 %v2470_v59 }
 0x9a1   :  { %v12744_v10 = vpop.eup %12743 }
 0x9a2   :  { %v2497_v25 = vsel %vm536_vm2, %v12744_v10, 0.0 }
 0x9a3   :  { %v12746_v39 = vpop.eup %12745  ;;  %2498 = vadd.xlane.f32.xlu0 %v2497_v25 }
 0x9a4   :  { %v2494_v23 = vsel %vm536_vm2, %v12746_v39, 0.0 }
 0x9a5   :  { %v12748_v53 = vpop.eup %12747  ;;  %2495 = vadd.xlane.f32.xlu1 %v2494_v23 }
 0x9a6   :  { %v2491_v57 = vsel %vm536_vm2, %v12748_v53, 0.0 }
 0x9a7   :  { %v12750_v40 = vpop.eup %12749  ;;  %2492 = vadd.xlane.f32.xlu0 %v2491_v57 }
 0x9a8   :  { %v2488_v3 = vsel %vm536_vm2, %v12750_v40, 0.0 }
 0x9a9   :  { %v13840_v7 = vpop.eup %12751  ;;  %2489 = vadd.xlane.f32.xlu1 %v2488_v3 }
 0x9aa   :  { %v2485_v41 = vsel %vm536_vm2, %v13840_v7, 0.0 }
 0x9ab   :  { %v13844_v19 = vpop.eup %12753  ;;  %2486 = vadd.xlane.f32.xlu0 %v2485_v41 }
 0x9ac   :  { %v2482_v20 = vsel %vm536_vm2, %v13844_v19, 0.0 }
 0x9ad   :  { %2483 = vadd.xlane.f32.xlu1 %v2482_v20 }
 0x9b1   :  { %1935 = vadd.xlane.f32.xlu1 %v1934_v51 }
 0x9b5   :  { %1932 = vadd.xlane.f32.xlu1 %v1931_v48 }
 0x9b9   :  { %1929 = vadd.xlane.f32.xlu1 %v1928_v24 }
 0x9bd   :  { %1926 = vadd.xlane.f32.xlu1 %v1925_v52 }
 0x9c1   :  { %1923 = vadd.xlane.f32.xlu1 %v1922_v54 }
 0x9c5   :  { %1920 = vadd.xlane.f32.xlu1 %v1919_v33 }
 0x9d8   :  { %2714 = vxpose.xlu0.b32.start [1/2] (short) (narrow) %v13599_v37, 48 }
 0x9dc   :  { %2715 = vxpose.xlu0.b32.end [2/2] (short) (narrow) %v13597_v36, 48 }
 0x9f8   :  { %3199 = vxpose.xlu1.b32.start [1/2] (short) (narrow) %v13640_v9, 48 }
 0x9fc   :  { %3200 = vxpose.xlu1.b32.end [2/2] (short) (narrow) %v13630_v61, 48 }
 0xa2c   :  { %v2499_v34 = vpop.xlane.xlu0 %2498 }
 0xa2d   :  { %12755 = vrcp.f32 %v2499_v34 }
 0xa2e   :  { %v2496_v38 = vpop.xlane.xlu1 %2495 }
 0xa2f   :  { %12757 = vrcp.f32 %v2496_v38 }
 0xa30   :  { %v2493_v32 = vpop.xlane.xlu0 %2492 }
 0xa31   :  { %12759 = vrcp.f32 %v2493_v32 }
 0xa32   :  { %v2490_v35 = vpop.xlane.xlu1 %2489 }
 0xa33   :  { %12761 = vrcp.f32 %v2490_v35 }
 0xa34   :  { %v2487_v49 = vpop.xlane.xlu0 %2486 }
 0xa35   :  { %12763 = vrcp.f32 %v2487_v49 }
 0xa36   :  { %v2484_v58 = vpop.xlane.xlu1 %2483 }
 0xa37   :  { %12765 = vrcp.f32 %v2484_v58 }
 0xa3a   :  { %v12756_v22 = vpop.eup %12755  ;;  %v1936_v31 = vpop.xlane.xlu1 %1935 }
 0xa3b   :  { %v1942_v37 = vmul.f32 0.020833334, %v1936_v31  ;;  %v2511_v4 = vmul.f32 %v12756_v22, %v12744_v10 }
 0xa3c   :  { %v12758_v36 = vpop.eup %12757 }
 0xa3d   :  { %v1948_v9 = vadd.f32 1e-05, %v1942_v37  ;;  %11764 = vmatprep.subr.msk.mxu0 %vm536_vm2, %v2511_v4  ;;  %v2509_v61 = vmul.f32 %v12758_v36, %v12746_v39 }
 0xa3e   :  { %v12760_v6 = vpop.eup %12759  ;;  %11765 = vmatpush3.xpose.msk.msra.mxu0 %vm536_vm2, %v2511_v4  ;;  %v1933_v8 = vpop.xlane.xlu1 %1932 }
 0xa3f   :  { %12767 = vrsqrt.f32 %v1948_v9  ;;  %v1941_v27 = vmul.f32 0.020833334, %v1933_v8  ;;  %11766 = vmatprep.subr.msk.mxu0 %vm536_vm2, %v2509_v61  ;;  %v2507_v18 = vmul.f32 %v12760_v6, %v12748_v53  ;;  %v13903_v8 = vld [vmem:[%s13271_s29] sm:$0xff] }
 0xa40   :  { %v12762_v21 = vpop.eup %12761 }
 0xa41   :  { %v1947_v45 = vadd.f32 1e-05, %v1941_v27  ;;  %v2505_v25 = vmul.f32 %v12762_v21, %v12750_v40 }
 0xa42   :  { %11767 = vmatpush3.xpose.msk.msra.mxu0 %vm536_vm2, %v2509_v61  ;;  %v1930_v2 = vpop.xlane.xlu1 %1929  ;;  %v12764_v39 = vpop.eup %12763 }
 0xa43   :  { %12769 = vrsqrt.f32 %v1947_v45  ;;  %v1940_v59 = vmul.f32 0.020833334, %v1930_v2  ;;  %11768 = vmatprep.subr.msk.mxu0 %vm536_vm2, %v2507_v18  ;;  %v2503_v53 = vmul.f32 %v12764_v39, %v13840_v7 }
 0xa44   :  { %v12766_v41 = vpop.eup %12765 }
 0xa45   :  { %v1946_v10 = vadd.f32 1e-05, %v1940_v59  ;;  %v2501_v24 = vmul.f32 %v12766_v41, %v13844_v19 }
 0xa46   :  { %11769 = vmatpush3.xpose.msk.msra.mxu0 %vm536_vm2, %v2507_v18  ;;  %v1927_v23 = vpop.xlane.xlu1 %1926 }
 0xa47   :  { %12771 = vrsqrt.f32 %v1946_v10  ;;  %v1939_v57 = vmul.f32 0.020833334, %v1927_v23  ;;  %11770 = vmatprep.subr.msk.mxu0 %vm536_vm2, %v2505_v25 }
 0xa49   :  { %v1945_v3 = vadd.f32 1e-05, %v1939_v57 }
 0xa4a   :  { %11771 = vmatpush3.xpose.msk.msra.mxu0 %vm536_vm2, %v2505_v25  ;;  %v1924_v20 = vpop.xlane.xlu1 %1923 }
 0xa4b   :  { %12773 = vrsqrt.f32 %v1945_v3  ;;  %v1938_v51 = vmul.f32 0.020833334, %v1924_v20  ;;  %11772 = vmatprep.subr.msk.mxu0 %vm536_vm2, %v2503_v53 }
 0xa4c   :  { %v12768_v40 = vpop.eup %12767 }
 0xa4d   :  { %v1944_v48 = vadd.f32 1e-05, %v1938_v51  ;;  %v1960_v52 = vmul.f32 %v12768_v40, %v13686_v43 }
 0xa4e   :  { %11773 = vmatpush3.xpose.msk.msra.mxu0 %vm536_vm2, %v2503_v53  ;;  %v1921_v54 = vpop.xlane.xlu1 %1920 }
 0xa4f   :  { %12775 = vrsqrt.f32 %v1944_v48  ;;  %v1937_v33 = vmul.f32 0.020833334, %v1921_v54  ;;  %11774 = vmatprep.subr.msk.mxu0 %vm536_vm2, %v2501_v24  ;;  %v1976_v7 = vsel %vm536_vm2, %v1960_v52, -inf }
 0xa50   :  { %v12770_v34 = vpop.eup %12769  ;;  %1977 = vmax.xlane.f32.xlu0 %v1976_v7 }
 0xa51   :  { %v1943_v38 = vadd.f32 1e-05, %v1937_v33  ;;  %v1959_v32 = vmul.f32 %v12770_v34, %v13689_v50 }
 0xa52   :  { %11775 = vmatpush3.xpose.msk.msra.mxu0 %vm536_vm2, %v2501_v24 }
 0xa53   :  { %12777 = vrsqrt.f32 %v1943_v38  ;;  %11794 = vmatprep.subr.mxu0 %v13609_v5  ;;  %v1973_v43 = vsel %vm536_vm2, %v1959_v32, -inf }
 0xa54   :  { %v12772_v19 = vpop.eup %12771  ;;  %v2730_v35 = vpop.trf.xlu0  ;;  %1974 = vmax.xlane.f32.xlu1 %v1973_v43 }
 0xa55   :  { %11777 = vmatmul.mubr.msk.f32.vlgmr.msra.gmra.mxu0 %vm536_vm2, %v13671_v13  ;;  %v1958_v49 = vmul.f32 %v12772_v19, %v13694_v1 }
 0xa56   :  { %11795 = vmatpush3.msra.mxu0 %v13609_v5  ;;  %11798 = vmatprep.mubr.msk.f32.mxu0 %vm1555_vm3, %v2730_v35 }
 0xa57   :  { %11796 = vmatprep.subr.mxu0 %v13611_v28  ;;  %v1970_v50 = vsel %vm536_vm2, %v1958_v49, -inf }
 0xa58   :  { %v12774_v58 = vpop.eup %12773  ;;  %v2731_v22 = vpop.trf.xlu0  ;;  %11797 = vmatpush3.msra.mxu0 %v13611_v28  ;;  %1971 = vmax.xlane.f32.xlu0 %v1970_v50 }
 0xa59   :  { %11799 = vmatmul.mubr.msk.f32.vlgmr.msra.gmra.mxu0 %vm1555_vm3, %v2731_v22  ;;  %v1957_v31 = vmul.f32 %v12774_v58, %v13699_v14 }
 0xa5b   :  { %v1967_v13 = vsel %vm536_vm2, %v1957_v31, -inf }
 0xa5c   :  { %v12776_v1 = vpop.eup %12775  ;;  %v2732_v37 = vpop.trf.xlu0  ;;  %1968 = vmax.xlane.f32.xlu0 %v1967_v13 }
 0xa5d   :  { %11801 = vmatprep.mubr.msk.f32.mxu0 %vm1555_vm3, %v2732_v37  ;;  %v1956_v5 = vmul.f32 %v12776_v1, %v13704_v60 }
 0xa5f   :  { %v1964_v4 = vsel %vm536_vm2, %v1956_v5, -inf }
 0xa60   :  { %v12778_v36 = vpop.eup %12777  ;;  %v2733_v9 = vpop.trf.xlu0  ;;  %1965 = vmax.xlane.f32.xlu0 %v1964_v4 }
 0xa61   :  { %11802 = vmatmul.mubr.msk.f32.gmra.mxu0 %vm1555_vm3, %v2733_v9  ;;  %v1955_v28 = vmul.f32 %v12778_v36, %v13709_v62 }
 0xa63   :  { %v1961_v14 = vsel %vm536_vm2, %v1955_v28, -inf }
 0xa64   :  { %v2734_v61 = vpop.trf.xlu0  ;;  %1962 = vmax.xlane.f32.xlu0 %v1961_v14 }
 0xa65   :  { %11804 = vmatprep.mubr.msk.f32.mxu0 %vm1555_vm3, %v2734_v61 }
 0xa68   :  { %v2735_v6 = vpop.trf.xlu0 }
 0xa69   :  { %11805 = vmatmul.mubr.msk.f32.gmra.mxu0 %vm1555_vm3, %v2735_v6 }
 0xa6a   :  { %11819 = vmatprep.mubr.msk.f32.mxu0 %vm536_vm2, %v13903_v8 }
 0xa74   :  { %v13907_v60 = vpop.trf.xlu1 }
 0xa78   :  { %v13909_v27 = vpop.trf.xlu1 }
 0xa7c   :  { %v13911_v45 = vpop.trf.xlu1 }
 0xa80   :  { %v13913_v62 = vpop.trf.xlu1 }
 0xa84   :  { %v13915_v18 = vpop.trf.xlu1 }
 0xa88   :  { %v13917_v21 = vpop.trf.xlu1 }
 0xad9   :  { %v1978_v2 = vpop.xlane.xlu0 %1977 }
 0xada   :  { %v1984_v59 = vsub.f32 %v1960_v52, %v1978_v2 }
 0xadc   :  { %v1995_v10 = vmul.f32 1.442695, %v1984_v59 }
 0xadd   :  { %v1975_v25 = vpop.xlane.xlu1 %1974 }
 0xade   :  { %12779 = vpow2.f32 %v1995_v10  ;;  %v1983_v39 = vsub.f32 %v1959_v32, %v1975_v25 }
 0xae0   :  { %v1993_v23 = vmul.f32 1.442695, %v1983_v39 }
 0xae1   :  { %v1972_v57 = vpop.xlane.xlu0 %1971 }
 0xae2   :  { %12781 = vpow2.f32 %v1993_v23  ;;  %v1982_v3 = vsub.f32 %v1958_v49, %v1972_v57 }
 0xae4   :  { %v1991_v53 = vmul.f32 1.442695, %v1982_v3 }
 0xae5   :  { %v1969_v41 = vpop.xlane.xlu0 %1968 }
 0xae6   :  { %12783 = vpow2.f32 %v1991_v53  ;;  %v1981_v20 = vsub.f32 %v1957_v31, %v1969_v41 }
 0xae8   :  { %v1989_v51 = vmul.f32 1.442695, %v1981_v20 }
 0xae9   :  { %v1966_v40 = vpop.xlane.xlu0 %1965 }
 0xaea   :  { %12785 = vpow2.f32 %v1989_v51  ;;  %v1980_v48 = vsub.f32 %v1956_v5, %v1966_v40 }
 0xaeb   :  { %v13919_v24 = vpop.eup %12779 }
 0xaec   :  { %v1987_v54 = vmul.f32 1.442695, %v1980_v48  ;;  %v2012_v52 = vsel %vm536_vm2, %v13919_v24, 0.0 }
 0xaed   :  { %2013 = vadd.xlane.f32.xlu0 %v2012_v52  ;;  %v1963_v33 = vpop.xlane.xlu0 %1962 }
 0xaee   :  { %12787 = vpow2.f32 %v1987_v54  ;;  %v1979_v7 = vsub.f32 %v1955_v28, %v1963_v33 }
 0xaef   :  { %v13923_v34 = vpop.eup %12781 }
 0xaf0   :  { %v1985_v38 = vmul.f32 1.442695, %v1979_v7  ;;  %v2009_v32 = vsel %vm536_vm2, %v13923_v34, 0.0 }
 0xaf1   :  { %2010 = vadd.xlane.f32.xlu0 %v2009_v32 }
 0xaf2   :  { %12789 = vpow2.f32 %v1985_v38 }
 0xaf3   :  { %v13927_v43 = vpop.eup %12783 }
 0xaf4   :  { %v2006_v19 = vsel %vm536_vm2, %v13927_v43, 0.0 }
 0xaf5   :  { %2007 = vadd.xlane.f32.xlu0 %v2006_v19 }
 0xaf7   :  { %v13931_v35 = vpop.eup %12785 }
 0xaf8   :  { %v2003_v49 = vsel %vm536_vm2, %v13931_v35, 0.0 }
 0xaf9   :  { %2004 = vadd.xlane.f32.xlu1 %v2003_v49 }
 0xafb   :  { %v13935_v50 = vpop.eup %12787 }
 0xafc   :  { %v2000_v58 = vsel %vm536_vm2, %v13935_v50, 0.0 }
 0xafd   :  { %2001 = vadd.xlane.f32.xlu0 %v2000_v58 }
 0xaff   :  { %v13939_v22 = vpop.eup %12789 }
 0xb00   :  { %v1997_v31 = vsel %vm536_vm2, %v13939_v22, 0.0 }
 0xb01   :  { %1998 = vadd.xlane.f32.xlu1 %v1997_v31 }
 0xb15   :  { %v13943_v13 = vpop.f32.mrf.mxu0 }
 0xb17   :  { %v13945_v1 = vpop.f32.mrf.mxu0 }
 0xb19   :  { %v11800_v37 = vpop.f32.mrf.mxu0 }
 0xb1a   :  { %v13961_v59 = vmul.f32 0.14433756, %v11800_v37 }
 0xb1b   :  { %v2830_v5 = vpop.f32.mrf.mxu0 }
 0xb1c   :  { %v13965_v10 = vmul.f32 0.14433756, %v2830_v5 }
 0xb21   :  { %v11803_v4 = vpop.f32.mrf.mxu0 }
 0xb22   :  { %v13953_v6 = vmul.f32 0.14433756, %v11803_v4 }
 0xb23   :  { %v2840_v36 = vpop.f32.mrf.mxu0 }
 0xb24   :  { %v13957_v2 = vmul.f32 0.14433756, %v2840_v36 }
 0xb29   :  { %v11806_v9 = vpop.f32.mrf.mxu0 }
 0xb2a   :  { %v13947_v28 = vmul.f32 0.14433756, %v11806_v9 }
 0xb2b   :  { %v2850_v14 = vpop.f32.mrf.mxu0 }
 0xb2c   :  { %v13949_v61 = vmul.f32 0.14433756, %v2850_v14  ;;  %11807 = vmatprep.subr.mxu0 %v13947_v28 }
 0xb2d   :  { %11808 = vmatpush3.msra.mxu0 %v13947_v28 }
 0xb2e   :  { %11809 = vmatprep.subr.mxu0 %v13949_v61 }
 0xb2f   :  { %11810 = vmatpush3.msra.mxu0 %v13949_v61 }
 0xb30   :  { %11811 = vmatprep.subr.mxu0 %v13953_v6 }
 0xb31   :  { %11812 = vmatpush3.msra.mxu0 %v13953_v6 }
 0xb32   :  { %11813 = vmatprep.subr.mxu0 %v13957_v2 }
 0xb33   :  { %11814 = vmatpush3.msra.mxu0 %v13957_v2 }
 0xb34   :  { %11815 = vmatprep.subr.mxu0 %v13961_v59 }
 0xb35   :  { %11816 = vmatpush3.msra.mxu0 %v13961_v59 }
 0xb36   :  { %11817 = vmatprep.subr.mxu0 %v13965_v10 }
 0xb37   :  { %11818 = vmatpush3.msra.mxu0 %v13965_v10 }
 0xb38   :  { %11820 = vmatmul.mubr.msk.f32.vlgmr.msra.gmra.mxu0 %vm536_vm2, %v13792_v30  ;;  %11849 = vmatprep.subr.mxu0 %v13667_v11 }
 0xb39   :  { %11850 = vmatpush3.msra.mxu0 %v13667_v11  ;;  %11822 = vmatprep.mubr.msk.f32.mxu0 %vm536_vm2, %v13797_v29 }
 0xb3a   :  { %11851 = vmatprep.subr.mxu0 %v13669_v12 }
 0xb3b   :  { %11852 = vmatpush3.msra.mxu0 %v13669_v12 }
 0xb3c   :  { %11823 = vmatmul.mubr.msk.f32.gmra.mxu0 %vm536_vm2, %v13802_v42 }
 0xb3d   :  { %11825 = vmatprep.mubr.msk.f32.mxu0 %vm536_vm2, %v13807_v15 }
 0xb40   :  { %11826 = vmatmul.mubr.msk.f32.gmra.mxu0 %vm536_vm2, %v13812_v26 }
 0xb41   :  { %11853 = vmatprep.mubr.msk.f32.mxu0 %vm1555_vm3, %v13907_v60 }
 0xb44   :  { %11854 = vmatmul.mubr.msk.f32.vlgmr.msra.gmra.mxu0 %vm1555_vm3, %v13909_v27 }
 0xb45   :  { %11856 = vmatprep.mubr.msk.f32.mxu0 %vm1555_vm3, %v13911_v45 }
 0xb48   :  { %11857 = vmatmul.mubr.msk.f32.gmra.mxu0 %vm1555_vm3, %v13913_v62 }
 0xb49   :  { %11859 = vmatprep.mubr.msk.f32.mxu0 %vm1555_vm3, %v13915_v18 }
 0xb4c   :  { %11860 = vmatmul.mubr.msk.f32.gmra.mxu0 %vm1555_vm3, %v13917_v21 }
 0xb4d   :  { %11895 = vmatprep.mubr.msk.f32.mxu0 %vm536_vm2, %v13903_v8 }
 0xb76   :  { %v2014_v11 = vpop.xlane.xlu0 %2013 }
 0xb77   :  { %12791 = vrcp.f32 %v2014_v11 }
 0xb7a   :  { %v2011_v12 = vpop.xlane.xlu0 %2010 }
 0xb7b   :  { %12793 = vrcp.f32 %v2011_v12 }
 0xb7e   :  { %v2008_v60 = vpop.xlane.xlu0 %2007 }
 0xb7f   :  { %12795 = vrcp.f32 %v2008_v60 }
 0xb82   :  { %v2005_v27 = vpop.xlane.xlu1 %2004 }
 0xb83   :  { %12797 = vrcp.f32 %v2005_v27 }
 0xb84   :  { %v12792_v45 = vpop.eup %12791 }
 0xb85   :  { %v2026_v62 = vmul.f32 %v12792_v45, %v13919_v24 }
 0xb86   :  { %v2002_v25 = vpop.xlane.xlu0 %2001 }
 0xb87   :  { %12799 = vrcp.f32 %v2002_v25  ;;  %11779 = vmatprep.subr.msk.mxu1 %vm536_vm2, %v2026_v62 }
 0xb88   :  { %v12794_v18 = vpop.eup %12793  ;;  %11780 = vmatpush3.xpose.msk.msra.mxu1 %vm536_vm2, %v2026_v62 }
 0xb89   :  { %v2024_v21 = vmul.f32 %v12794_v18, %v13923_v34 }
 0xb8a   :  { %v1999_v39 = vpop.xlane.xlu1 %1998 }
 0xb8b   :  { %12801 = vrcp.f32 %v1999_v39  ;;  %11781 = vmatprep.subr.msk.mxu1 %vm536_vm2, %v2024_v21 }
 0xb8c   :  { %v12796_v23 = vpop.eup %12795  ;;  %11782 = vmatpush3.xpose.msk.msra.mxu1 %vm536_vm2, %v2024_v21 }
 0xb8d   :  { %v2022_v57 = vmul.f32 %v12796_v23, %v13927_v43 }
 0xb8f   :  { %11783 = vmatprep.subr.msk.mxu1 %vm536_vm2, %v2022_v57 }
 0xb90   :  { %v12798_v3 = vpop.eup %12797  ;;  %11784 = vmatpush3.xpose.msk.msra.mxu1 %vm536_vm2, %v2022_v57 }
 0xb91   :  { %v2020_v53 = vmul.f32 %v12798_v3, %v13931_v35 }
 0xb93   :  { %11785 = vmatprep.subr.msk.mxu1 %vm536_vm2, %v2020_v53 }
 0xb94   :  { %v12800_v41 = vpop.eup %12799  ;;  %11786 = vmatpush3.xpose.msk.msra.mxu1 %vm536_vm2, %v2020_v53 }
 0xb95   :  { %v2018_v20 = vmul.f32 %v12800_v41, %v13935_v50 }
 0xb97   :  { %11787 = vmatprep.subr.msk.mxu1 %vm536_vm2, %v2018_v20 }
 0xb98   :  { %v12802_v51 = vpop.eup %12801  ;;  %11788 = vmatpush3.xpose.msk.msra.mxu1 %vm536_vm2, %v2018_v20 }
 0xb99   :  { %v2016_v40 = vmul.f32 %v12802_v51, %v13939_v22 }
 0xb9b   :  { %11789 = vmatprep.subr.msk.mxu1 %vm536_vm2, %v2016_v40 }
 0xb9c   :  { %11790 = vmatpush3.xpose.msk.msra.mxu1 %vm536_vm2, %v2016_v40 }
 0xb9f   :  { %11792 = vmatmul.mubr.msk.f32.vlgmr.msra.gmra.mxu1 %vm536_vm2, %v13613_v44 }
 0xba0   :  { %11840 = vmatprep.mubr.msk.f32.mxu1 %vm536_vm2, %v13903_v8 }
 0xbf8   :  { %v11821_v48 = vpop.f32.mrf.mxu0 }
 0xbf9   :  { %v2963_v43 = vsel %vm536_vm2, %v11821_v48, 0.0 }
 0xbfa   :  { %v2931_v24 = vpop.f32.mrf.mxu0 }
 0xbfb   :  { %v2960_v19 = vsel %vm536_vm2, %v2931_v24, 0.0 }
 0xbfc   :  { %v11824_v54 = vpop.f32.mrf.mxu0 }
 0xbfd   :  { %v2969_v32 = vsel %vm536_vm2, %v11824_v54, 0.0 }
 0xbfe   :  { %v2941_v52 = vpop.f32.mrf.mxu0 }
 0xbff   :  { %v2966_v44 = vsel %vm536_vm2, %v2941_v52, 0.0 }
 0xc00   :  { %v11827_v33 = vpop.f32.mrf.mxu0 }
 0xc01   :  { %v2975_v7 = vsel %vm536_vm2, %v11827_v33, 0.0 }
 0xc02   :  { %v2951_v34 = vpop.f32.mrf.mxu0  ;;  %2976 = vadd.xlane.f32.xlu0 %v2975_v7 }
 0xc03   :  { %v2972_v38 = vsel %vm536_vm2, %v2951_v34, 0.0 }
 0xc04   :  { %2973 = vadd.xlane.f32.xlu1 %v2972_v38  ;;  %v11855_v37 = vpop.f32.mrf.mxu0 }
 0xc05   :  { %v14083_v54 = vmul.f32 0.14433756, %v11855_v37 }
 0xc06   :  { %2970 = vadd.xlane.f32.xlu0 %v2969_v32  ;;  %v3315_v11 = vpop.f32.mrf.mxu0 }
 0xc07   :  { %v14087_v52 = vmul.f32 0.14433756, %v3315_v11 }
 0xc08   :  { %2967 = vadd.xlane.f32.xlu1 %v2966_v44  ;;  %v11858_v27 = vpop.f32.mrf.mxu0 }
 0xc0a   :  { %2964 = vadd.xlane.f32.xlu0 %v2963_v43  ;;  %v3325_v23 = vpop.f32.mrf.mxu0 }
 0xc0b   :  { %v14075_v24 = vmul.f32 0.14433756, %v3325_v23 }
 0xc0c   :  { %2961 = vadd.xlane.f32.xlu1 %v2960_v19  ;;  %v11861_v41 = vpop.f32.mrf.mxu0 }
 0xc0d   :  { %v14061_v40 = vmul.f32 0.14433756, %v11861_v41 }
 0xc0e   :  { %v3335_v51 = vpop.f32.mrf.mxu0 }
 0xc0f   :  { %v14063_v48 = vmul.f32 0.14433756, %v3335_v51 }
 0xc5f   :  { %v11793_v35 = vpop.f32.mrf.mxu1 }
 0xc60   :  { %v2707_v49 = vadd.f32 %v11793_v35, %v13943_v13 }
 0xc61   :  { %v2701_v50 = vpop.f32.mrf.mxu1 }
 0xc62   :  { %v2711_v58 = vmul.f32 0.5, %v2707_v49  ;;  %v2702_v22 = vadd.f32 %v2701_v50, %v13945_v1 }
 0xc64   :  { %2713 = vst.msk [vmem:[#allocation2 + $0x8] sm:$0xff] %vm536_vm2, %v2711_v58  ;;  %v2710_v31 = vmul.f32 0.5, %v2702_v22 }
 0xc66   :  { %2712 = vst.msk [vmem:[#allocation2] sm:$0xff] %vm536_vm2, %v2710_v31 }
 0xc8b   :  { %v2977_v5 = vpop.xlane.xlu0 %2976 }
 0xc8c   :  { %v2983_v4 = vmul.f32 0.020833334, %v2977_v5 }
 0xc8d   :  { %v2974_v36 = vpop.xlane.xlu1 %2973 }
 0xc8e   :  { %v14032_v9 = vsub.f32 %v13947_v28, %v2983_v4  ;;  %v2982_v14 = vmul.f32 0.020833334, %v2974_v36 }
 0xc8f   :  { %v2971_v12 = vpop.xlane.xlu0 %2970 }
 0xc90   :  { %v14035_v13 = vsub.f32 %v13949_v61, %v2982_v14  ;;  %v2981_v60 = vmul.f32 0.020833334, %v2971_v12  ;;  %v2995_v1 = vmul.f32 %v14032_v9, %v14032_v9 }
 0xc91   :  { %v2968_v45 = vpop.xlane.xlu1 %2967 }
 0xc92   :  { %v14040_v62 = vsub.f32 %v13953_v6, %v2981_v60  ;;  %v2980_v25 = vmul.f32 0.020833334, %v2968_v45  ;;  %11828 = vmatprep.subr.mxu1 %v2995_v1  ;;  %v2994_v28 = vmul.f32 %v14035_v13, %v14035_v13 }
 0xc93   :  { %v2965_v18 = vpop.xlane.xlu0 %2964  ;;  %11829 = vmatpush3.msra.mxu1 %v2995_v1 }
 0xc94   :  { %v14045_v21 = vsub.f32 %v13957_v2, %v2980_v25  ;;  %v2979_v61 = vmul.f32 0.020833334, %v2965_v18  ;;  %11830 = vmatprep.subr.mxu1 %v2994_v28  ;;  %v2993_v39 = vmul.f32 %v14040_v62, %v14040_v62 }
 0xc95   :  { %11831 = vmatpush3.msra.mxu1 %v2994_v28  ;;  %v2962_v57 = vpop.xlane.xlu1 %2961 }
 0xc96   :  { %v14050_v6 = vsub.f32 %v13961_v59, %v2979_v61  ;;  %v2978_v3 = vmul.f32 0.020833334, %v2962_v57  ;;  %11832 = vmatprep.subr.mxu1 %v2993_v39  ;;  %v2992_v53 = vmul.f32 %v14045_v21, %v14045_v21 }
 0xc97   :  { %11833 = vmatpush3.msra.mxu1 %v2993_v39 }
 0xc98   :  { %v14055_v2 = vsub.f32 %v13965_v10, %v2978_v3  ;;  %11834 = vmatprep.subr.mxu1 %v2992_v53  ;;  %v2991_v20 = vmul.f32 %v14050_v6, %v14050_v6  ;;  %v14071_v10 = vmul.f32 0.14433756, %v11858_v27 }
 0xc99   :  { %11835 = vmatpush3.msra.mxu1 %v2992_v53 }
 0xc9a   :  { %11836 = vmatprep.subr.mxu1 %v2991_v20  ;;  %v2990_v59 = vmul.f32 %v14055_v2, %v14055_v2 }
 0xc9b   :  { %11837 = vmatpush3.msra.mxu1 %v2991_v20 }
 0xc9c   :  { %11838 = vmatprep.subr.mxu1 %v2990_v59 }
 0xc9d   :  { %11839 = vmatpush3.msra.mxu1 %v2990_v59 }
 0xc9e   :  { %11841 = vmatmul.mubr.msk.f32.vlgmr.msra.gmra.mxu1 %vm536_vm2, %v13792_v30  ;;  %11862 = vmatprep.subr.mxu1 %v14061_v40 }
 0xc9f   :  { %11863 = vmatpush3.msra.mxu1 %v14061_v40  ;;  %11843 = vmatprep.mubr.msk.f32.mxu1 %vm536_vm2, %v13797_v29 }
 0xca0   :  { %11864 = vmatprep.subr.mxu1 %v14063_v48 }
 0xca1   :  { %11865 = vmatpush3.msra.mxu1 %v14063_v48 }
 0xca2   :  { %11844 = vmatmul.mubr.msk.f32.gmra.mxu1 %vm536_vm2, %v13802_v42  ;;  %11866 = vmatprep.subr.mxu1 %v14071_v10 }
 0xca3   :  { %11867 = vmatpush3.msra.mxu1 %v14071_v10  ;;  %11846 = vmatprep.mubr.msk.f32.mxu1 %vm536_vm2, %v13807_v15 }
 0xca4   :  { %11868 = vmatprep.subr.mxu1 %v14075_v24 }
 0xca5   :  { %11869 = vmatpush3.msra.mxu1 %v14075_v24 }
 0xca6   :  { %11847 = vmatmul.mubr.msk.f32.gmra.mxu1 %vm536_vm2, %v13812_v26  ;;  %11870 = vmatprep.subr.mxu1 %v14083_v54 }
 0xca7   :  { %11871 = vmatpush3.msra.mxu1 %v14083_v54  ;;  %11874 = vmatprep.mubr.msk.f32.mxu1 %vm536_vm2, %v13903_v8 }
 0xca8   :  { %11872 = vmatprep.subr.mxu1 %v14087_v52 }
 0xca9   :  { %11873 = vmatpush3.msra.mxu1 %v14087_v52 }
 0xcaa   :  { %11875 = vmatmul.mubr.msk.f32.vlgmr.msra.gmra.mxu1 %vm536_vm2, %v13792_v30 }
 0xcab   :  { %11877 = vmatprep.mubr.msk.f32.mxu1 %vm536_vm2, %v13797_v29 }
 0xcae   :  { %11878 = vmatmul.mubr.msk.f32.gmra.mxu1 %vm536_vm2, %v13802_v42 }
 0xcaf   :  { %11880 = vmatprep.mubr.msk.f32.mxu1 %vm536_vm2, %v13807_v15 }
 0xcb2   :  { %11881 = vmatmul.mubr.msk.f32.gmra.mxu1 %vm536_vm2, %v13812_v26 }
 0xcb3   :  { %11916 = vmatprep.mubr.msk.f32.mxu1 %vm536_vm2, %v13677_v17 }
 0xd5e   :  { %v11842_v33 = vpop.f32.mrf.mxu1 }
 0xd5f   :  { %v3094_v4 = vsel %vm536_vm2, %v11842_v33, 0.0 }
 0xd60   :  { %v3062_v7 = vpop.f32.mrf.mxu1 }
 0xd61   :  { %v3091_v36 = vsel %vm536_vm2, %v3062_v7, 0.0 }
 0xd62   :  { %v11845_v34 = vpop.f32.mrf.mxu1 }
 0xd63   :  { %v3100_v37 = vsel %vm536_vm2, %v11845_v34, 0.0 }
 0xd64   :  { %v3072_v38 = vpop.f32.mrf.mxu1 }
 0xd65   :  { %v3097_v5 = vsel %vm536_vm2, %v3072_v38, 0.0 }
 0xd66   :  { %v11848_v30 = vpop.f32.mrf.mxu1 }
 0xd67   :  { %v3106_v22 = vsel %vm536_vm2, %v11848_v30, 0.0  ;;  %v14152_v30 = vld [vmem:[%s13271_s29 + $0x8] sm:$0xff] }
 0xd68   :  { %v3082_v32 = vpop.f32.mrf.mxu1 }
 0xd69   :  { %v3103_v31 = vsel %vm536_vm2, %v3082_v32, 0.0 }
 0xd6a   :  { %v11876_v44 = vpop.f32.mrf.mxu1 }
 0xd6b   :  { %v3448_v50 = vsel %vm536_vm2, %v11876_v44, 0.0  ;;  %v14157_v44 = vld [vmem:[%s13271_s29 + $0x10] sm:$0xff] }
 0xd6c   :  { %v3416_v29 = vpop.f32.mrf.mxu1 }
 0xd6d   :  { %v3445_v58 = vsel %vm536_vm2, %v3416_v29, 0.0 }
 0xd6e   :  { %v11879_v43 = vpop.f32.mrf.mxu1 }
 0xd6f   :  { %v3454_v17 = vsel %vm536_vm2, %v11879_v43, 0.0 }
 0xd70   :  { %v3426_v19 = vpop.f32.mrf.mxu1 }
 0xd71   :  { %v3451_v49 = vsel %vm536_vm2, %v3426_v19, 0.0  ;;  %v14162_v19 = vld [vmem:[%s13271_s29 + $0x18] sm:$0xff] }
 0xd72   :  { %v11882_v42 = vpop.f32.mrf.mxu1 }
 0xd73   :  { %v3460_v35 = vsel %vm536_vm2, %v11882_v42, 0.0 }
 0xd74   :  { %3461 = vadd.xlane.f32.xlu0 %v3460_v35  ;;  %v3436_v15 = vpop.f32.mrf.mxu1  ;;  %v14167_v35 = vld [vmem:[%s13271_s29 + $0x20] sm:$0xff] }
 0xd75   :  { %v3457_v26 = vsel %vm536_vm2, %v3436_v15, 0.0 }
 0xd76   :  { %3458 = vadd.xlane.f32.xlu1 %v3457_v26 }
 0xd78   :  { %3455 = vadd.xlane.f32.xlu0 %v3454_v17  ;;  %v14172_v17 = vld [vmem:[%s13271_s29 + $0x28] sm:$0xff] }
 0xd7a   :  { %3452 = vadd.xlane.f32.xlu1 %v3451_v49 }
 0xd7c   :  { %3449 = vadd.xlane.f32.xlu0 %v3448_v50 }
 0xd7e   :  { %3446 = vadd.xlane.f32.xlu1 %v3445_v58 }
 0xd80   :  { %3107 = vadd.xlane.f32.xlu0 %v3106_v22 }
 0xd84   :  { %3104 = vadd.xlane.f32.xlu0 %v3103_v31 }
 0xd88   :  { %3101 = vadd.xlane.f32.xlu0 %v3100_v37 }
 0xd8c   :  { %3098 = vadd.xlane.f32.xlu0 %v3097_v5 }
 0xd90   :  { %3095 = vadd.xlane.f32.xlu0 %v3094_v4 }
 0xd94   :  { %3092 = vadd.xlane.f32.xlu0 %v3091_v36 }
 0xdfd   :  { %v3462_v14 = vpop.xlane.xlu0 %3461 }
 0xdfe   :  { %v3468_v11 = vmul.f32 0.020833334, %v3462_v14 }
 0xdff   :  { %v3459_v12 = vpop.xlane.xlu1 %3458 }
 0xe00   :  { %v14122_v60 = vsub.f32 %v14061_v40, %v3468_v11  ;;  %v3467_v1 = vmul.f32 0.020833334, %v3459_v12 }
 0xe01   :  { %v3456_v27 = vpop.xlane.xlu0 %3455 }
 0xe02   :  { %v14125_v45 = vsub.f32 %v14063_v48, %v3467_v1  ;;  %v3466_v25 = vmul.f32 0.020833334, %v3456_v27  ;;  %v3480_v28 = vmul.f32 %v14122_v60, %v14122_v60 }
 0xe03   :  { %v3453_v18 = vpop.xlane.xlu1 %3452 }
 0xe04   :  { %v14130_v61 = vsub.f32 %v14071_v10, %v3466_v25  ;;  %v3465_v39 = vmul.f32 0.020833334, %v3453_v18  ;;  %11883 = vmatprep.subr.mxu0 %v3480_v28  ;;  %v3479_v23 = vmul.f32 %v14125_v45, %v14125_v45 }
 0xe05   :  { %11884 = vmatpush3.msra.mxu0 %v3480_v28  ;;  %v3450_v57 = vpop.xlane.xlu0 %3449 }
 0xe06   :  { %v14135_v3 = vsub.f32 %v14075_v24, %v3465_v39  ;;  %v3464_v53 = vmul.f32 0.020833334, %v3450_v57  ;;  %11885 = vmatprep.subr.mxu0 %v3479_v23  ;;  %v3478_v41 = vmul.f32 %v14130_v61, %v14130_v61 }
 0xe07   :  { %11886 = vmatpush3.msra.mxu0 %v3479_v23  ;;  %v3447_v20 = vpop.xlane.xlu1 %3446 }
 0xe08   :  { %v14140_v59 = vsub.f32 %v14083_v54, %v3464_v53  ;;  %v3463_v51 = vmul.f32 0.020833334, %v3447_v20  ;;  %11887 = vmatprep.subr.mxu0 %v3478_v41  ;;  %v3477_v40 = vmul.f32 %v14135_v3, %v14135_v3 }
 0xe09   :  { %v3108_v48 = vpop.xlane.xlu0 %3107  ;;  %11888 = vmatpush3.msra.mxu0 %v3478_v41 }
 0xe0a   :  { %v14145_v10 = vsub.f32 %v14087_v52, %v3463_v51  ;;  %v3114_v24 = vmul.f32 0.020833334, %v3108_v48  ;;  %11889 = vmatprep.subr.mxu0 %v3477_v40  ;;  %v3476_v33 = vmul.f32 %v14140_v59, %v14140_v59 }
 0xe0b   :  { %11890 = vmatpush3.msra.mxu0 %v3477_v40 }
 0xe0c   :  { %v3120_v54 = vadd.f32 1e-05, %v3114_v24  ;;  %11891 = vmatprep.subr.mxu0 %v3476_v33  ;;  %v3475_v7 = vmul.f32 %v14145_v10, %v14145_v10 }
 0xe0d   :  { %11892 = vmatpush3.msra.mxu0 %v3476_v33  ;;  %v3105_v34 = vpop.xlane.xlu0 %3104 }
 0xe0e   :  { %12803 = vrsqrt.f32 %v3120_v54  ;;  %v3113_v38 = vmul.f32 0.020833334, %v3105_v34  ;;  %11893 = vmatprep.subr.mxu0 %v3475_v7 }
 0xe0f   :  { %11894 = vmatpush3.msra.mxu0 %v3475_v7 }
 0xe10   :  { %v3119_v52 = vadd.f32 1e-05, %v3113_v38  ;;  %11896 = vmatmul.mubr.msk.f32.vlgmr.msra.gmra.mxu0 %vm536_vm2, %v14152_v30 }
 0xe11   :  { %v3102_v32 = vpop.xlane.xlu0 %3101  ;;  %11898 = vmatprep.mubr.msk.f32.mxu0 %vm536_vm2, %v14157_v44 }
 0xe12   :  { %12805 = vrsqrt.f32 %v3119_v52  ;;  %v3112_v29 = vmul.f32 0.020833334, %v3102_v32 }
 0xe14   :  { %v3118_v43 = vadd.f32 1e-05, %v3112_v29  ;;  %11899 = vmatmul.mubr.msk.f32.gmra.mxu0 %vm536_vm2, %v14162_v19 }
 0xe15   :  { %v3099_v42 = vpop.xlane.xlu0 %3098  ;;  %11901 = vmatprep.mubr.msk.f32.mxu0 %vm536_vm2, %v14167_v35 }
 0xe16   :  { %12807 = vrsqrt.f32 %v3118_v43  ;;  %v3111_v15 = vmul.f32 0.020833334, %v3099_v42 }
 0xe18   :  { %v3117_v26 = vadd.f32 1e-05, %v3111_v15  ;;  %11902 = vmatmul.mubr.msk.f32.gmra.mxu0 %vm536_vm2, %v14172_v17 }
 0xe19   :  { %11931 = vmatprep.mubr.msk.f32.mxu0 %vm536_vm2, %v13619_v47  ;;  %v3096_v49 = vpop.xlane.xlu0 %3095 }
 0xe1a   :  { %12809 = vrsqrt.f32 %v3117_v26  ;;  %v3110_v50 = vmul.f32 0.020833334, %v3096_v49 }
 0xe1b   :  { %v12804_v58 = vpop.eup %12803 }
 0xe1c   :  { %v3116_v22 = vadd.f32 1e-05, %v3110_v50  ;;  %v3132_v31 = vmul.f32 %v12804_v58, %v14032_v9 }
 0xe1d   :  { %v3093_v37 = vpop.xlane.xlu0 %3092 }
 0xe1e   :  { %12811 = vrsqrt.f32 %v3116_v22  ;;  %v3109_v5 = vmul.f32 0.020833334, %v3093_v37  ;;  %v3148_v4 = vsel %vm536_vm2, %v3132_v31, -inf }
 0xe1f   :  { %v12806_v36 = vpop.eup %12805  ;;  %3149 = vmax.xlane.f32.xlu0 %v3148_v4 }
 0xe20   :  { %v3115_v14 = vadd.f32 1e-05, %v3109_v5  ;;  %v3131_v11 = vmul.f32 %v12806_v36, %v14035_v13 }
 0xe22   :  { %12813 = vrsqrt.f32 %v3115_v14  ;;  %v3145_v47 = vsel %vm536_vm2, %v3131_v11, -inf }
 0xe23   :  { %v12808_v12 = vpop.eup %12807  ;;  %3146 = vmax.xlane.f32.xlu0 %v3145_v47 }
 0xe24   :  { %v3130_v1 = vmul.f32 %v12808_v12, %v14040_v62 }
 0xe26   :  { %v3142_v27 = vsel %vm536_vm2, %v3130_v1, -inf }
 0xe27   :  { %v12810_v9 = vpop.eup %12809  ;;  %3143 = vmax.xlane.f32.xlu0 %v3142_v27 }
 0xe28   :  { %v3129_v25 = vmul.f32 %v12810_v9, %v14045_v21 }
 0xe2a   :  { %v3139_v28 = vsel %vm536_vm2, %v3129_v25, -inf }
 0xe2b   :  { %v12812_v18 = vpop.eup %12811  ;;  %3140 = vmax.xlane.f32.xlu0 %v3139_v28 }
 0xe2c   :  { %v3128_v39 = vmul.f32 %v12812_v18, %v14050_v6 }
 0xe2e   :  { %v3136_v13 = vsel %vm536_vm2, %v3128_v39, -inf }
 0xe2f   :  { %v12814_v23 = vpop.eup %12813  ;;  %3137 = vmax.xlane.f32.xlu0 %v3136_v13 }
 0xe30   :  { %v3127_v57 = vmul.f32 %v12814_v23, %v14055_v2 }
 0xe32   :  { %v3133_v62 = vsel %vm536_vm2, %v3127_v57, -inf }
 0xe33   :  { %3134 = vmax.xlane.f32.xlu0 %v3133_v62 }
 0xea8   :  { %v3150_v53 = vpop.xlane.xlu0 %3149 }
 0xea9   :  { %v3156_v41 = vsub.f32 %v3132_v31, %v3150_v53 }
 0xeab   :  { %v3167_v20 = vmul.f32 1.442695, %v3156_v41 }
 0xeac   :  { %v3147_v51 = vpop.xlane.xlu0 %3146 }
 0xead   :  { %12815 = vpow2.f32 %v3167_v20  ;;  %v3155_v21 = vsub.f32 %v3131_v11, %v3147_v51 }
 0xeaf   :  { %v3165_v40 = vmul.f32 1.442695, %v3155_v21 }
 0xeb0   :  { %v3144_v48 = vpop.xlane.xlu0 %3143 }
 0xeb1   :  { %12817 = vpow2.f32 %v3165_v40  ;;  %v3154_v24 = vsub.f32 %v3130_v1, %v3144_v48 }
 0xeb3   :  { %v3163_v6 = vmul.f32 1.442695, %v3154_v24 }
 0xeb4   :  { %v3141_v33 = vpop.xlane.xlu0 %3140 }
 0xeb5   :  { %12819 = vpow2.f32 %v3163_v6  ;;  %v3153_v54 = vsub.f32 %v3129_v25, %v3141_v33 }
 0xeb7   :  { %v3161_v7 = vmul.f32 1.442695, %v3153_v54 }
 0xeb8   :  { %v3138_v34 = vpop.xlane.xlu0 %3137 }
 0xeb9   :  { %12821 = vpow2.f32 %v3161_v7  ;;  %v3152_v2 = vsub.f32 %v3128_v39, %v3138_v34 }
 0xeba   :  { %v12816_v38 = vpop.eup %12815 }
 0xebb   :  { %v3159_v52 = vmul.f32 1.442695, %v3152_v2  ;;  %v3184_v32 = vsel %vm536_vm2, %v12816_v38, 0.0 }
 0xebc   :  { %3185 = vadd.xlane.f32.xlu0 %v3184_v32  ;;  %v3135_v29 = vpop.xlane.xlu0 %3134 }
 0xebd   :  { %12823 = vpow2.f32 %v3159_v52  ;;  %v3151_v43 = vsub.f32 %v3127_v57, %v3135_v29 }
 0xebe   :  { %v12818_v42 = vpop.eup %12817 }
 0xebf   :  { %v3157_v15 = vmul.f32 1.442695, %v3151_v43  ;;  %v3181_v26 = vsel %vm536_vm2, %v12818_v42, 0.0 }
 0xec0   :  { %3182 = vadd.xlane.f32.xlu0 %v3181_v26 }
 0xec1   :  { %12825 = vpow2.f32 %v3157_v15 }
 0xec2   :  { %v12820_v49 = vpop.eup %12819 }
 0xec3   :  { %v3178_v50 = vsel %vm536_vm2, %v12820_v49, 0.0 }
 0xec4   :  { %3179 = vadd.xlane.f32.xlu0 %v3178_v50 }
 0xec6   :  { %v12822_v58 = vpop.eup %12821 }
 0xec7   :  { %v3175_v22 = vsel %vm536_vm2, %v12822_v58, 0.0 }
 0xec8   :  { %3176 = vadd.xlane.f32.xlu0 %v3175_v22 }
 0xeca   :  { %v12824_v31 = vpop.eup %12823 }
 0xecb   :  { %v3172_v37 = vsel %vm536_vm2, %v12824_v31, 0.0 }
 0xecc   :  { %3173 = vadd.xlane.f32.xlu0 %v3172_v37 }
 0xece   :  { %v12826_v5 = vpop.eup %12825 }
 0xecf   :  { %v3169_v4 = vsel %vm536_vm2, %v12826_v5, 0.0 }
 0xed0   :  { %v11897_v36 = vpop.f32.mrf.mxu0  ;;  %3170 = vadd.xlane.f32.xlu0 %v3169_v4 }
 0xed1   :  { %v3579_v18 = vsel %vm536_vm2, %v11897_v36, 0.0 }
 0xed2   :  { %v3547_v14 = vpop.f32.mrf.mxu0 }
 0xed3   :  { %v3576_v39 = vsel %vm536_vm2, %v3547_v14, 0.0 }
 0xed4   :  { %v11900_v11 = vpop.f32.mrf.mxu0 }
 0xed5   :  { %v3585_v25 = vsel %vm536_vm2, %v11900_v11, 0.0 }
 0xed6   :  { %v3557_v47 = vpop.f32.mrf.mxu0 }
 0xed7   :  { %v3582_v28 = vsel %vm536_vm2, %v3557_v47, 0.0 }
 0xed8   :  { %v11903_v12 = vpop.f32.mrf.mxu0 }
 0xed9   :  { %v3591_v1 = vsel %vm536_vm2, %v11903_v12, 0.0 }
 0xeda   :  { %3592 = vadd.xlane.f32.xlu1 %v3591_v1  ;;  %v3567_v27 = vpop.f32.mrf.mxu0 }
 0xedb   :  { %v3588_v9 = vsel %vm536_vm2, %v3567_v27, 0.0 }
 0xede   :  { %3589 = vadd.xlane.f32.xlu1 %v3588_v9 }
 0xee2   :  { %3586 = vadd.xlane.f32.xlu1 %v3585_v25 }
 0xee6   :  { %3583 = vadd.xlane.f32.xlu1 %v3582_v28 }
 0xeea   :  { %3580 = vadd.xlane.f32.xlu1 %v3579_v18 }
 0xeee   :  { %3577 = vadd.xlane.f32.xlu1 %v3576_v39 }
 0xf45   :  { %v3186_v13 = vpop.xlane.xlu0 %3185 }
 0xf46   :  { %12827 = vrcp.f32 %v3186_v13 }
 0xf49   :  { %v3183_v23 = vpop.xlane.xlu0 %3182 }
 0xf4a   :  { %12829 = vrcp.f32 %v3183_v23 }
 0xf4d   :  { %v3180_v57 = vpop.xlane.xlu0 %3179 }
 0xf4e   :  { %12831 = vrcp.f32 %v3180_v57 }
 0xf51   :  { %v3177_v62 = vpop.xlane.xlu0 %3176 }
 0xf52   :  { %12833 = vrcp.f32 %v3177_v62 }
 0xf53   :  { %v12828_v53 = vpop.eup %12827 }
 0xf54   :  { %v3198_v41 = vmul.f32 %v12828_v53, %v12816_v38 }
 0xf55   :  { %v3174_v20 = vpop.xlane.xlu0 %3173 }
 0xf56   :  { %12835 = vrcp.f32 %v3174_v20  ;;  %11919 = vmatprep.subr.msk.mxu0 %vm536_vm2, %v3198_v41 }
 0xf57   :  { %v12830_v51 = vpop.eup %12829  ;;  %11920 = vmatpush3.xpose.msk.msra.mxu0 %vm536_vm2, %v3198_v41 }
 0xf58   :  { %v3196_v21 = vmul.f32 %v12830_v51, %v12818_v42 }
 0xf59   :  { %v3171_v40 = vpop.xlane.xlu0 %3170 }
 0xf5a   :  { %12837 = vrcp.f32 %v3171_v40  ;;  %11921 = vmatprep.subr.msk.mxu0 %vm536_vm2, %v3196_v21 }
 0xf5b   :  { %v12832_v48 = vpop.eup %12831  ;;  %11922 = vmatpush3.xpose.msk.msra.mxu0 %vm536_vm2, %v3196_v21 }
 0xf5c   :  { %v3194_v24 = vmul.f32 %v12832_v48, %v12820_v49 }
 0xf5e   :  { %11923 = vmatprep.subr.msk.mxu0 %vm536_vm2, %v3194_v24 }
 0xf5f   :  { %v12834_v6 = vpop.eup %12833  ;;  %11924 = vmatpush3.xpose.msk.msra.mxu0 %vm536_vm2, %v3194_v24 }
 0xf60   :  { %v3192_v33 = vmul.f32 %v12834_v6, %v12822_v58 }
 0xf62   :  { %11925 = vmatprep.subr.msk.mxu0 %vm536_vm2, %v3192_v33 }
 0xf63   :  { %v12836_v54 = vpop.eup %12835  ;;  %v3593_v7 = vpop.xlane.xlu1 %3592  ;;  %11926 = vmatpush3.xpose.msk.msra.mxu0 %vm536_vm2, %v3192_v33 }
 0xf64   :  { %v3599_v34 = vmul.f32 0.020833334, %v3593_v7  ;;  %v3190_v2 = vmul.f32 %v12836_v54, %v12824_v31 }
 0xf66   :  { %v3605_v38 = vadd.f32 1e-05, %v3599_v34  ;;  %11927 = vmatprep.subr.msk.mxu0 %vm536_vm2, %v3190_v2 }
 0xf67   :  { %v12838_v52 = vpop.eup %12837  ;;  %v3590_v32 = vpop.xlane.xlu1 %3589  ;;  %11928 = vmatpush3.xpose.msk.msra.mxu0 %vm536_vm2, %v3190_v2 }
 0xf68   :  { %12839 = vrsqrt.f32 %v3605_v38  ;;  %v3598_v29 = vmul.f32 0.020833334, %v3590_v32  ;;  %v3188_v43 = vmul.f32 %v12838_v52, %v12826_v5 }
 0xf6a   :  { %v3604_v42 = vadd.f32 1e-05, %v3598_v29  ;;  %11929 = vmatprep.subr.msk.mxu0 %vm536_vm2, %v3188_v43 }
 0xf6b   :  { %v3587_v15 = vpop.xlane.xlu1 %3586  ;;  %11930 = vmatpush3.xpose.msk.msra.mxu0 %vm536_vm2, %v3188_v43 }
 0xf6c   :  { %12841 = vrsqrt.f32 %v3604_v42  ;;  %v3597_v26 = vmul.f32 0.020833334, %v3587_v15  ;;  %11952 = vmatprep.subr.mxu0 %v14172_v17 }
 0xf6e   :  { %v3603_v49 = vadd.f32 1e-05, %v3597_v26  ;;  %11932 = vmatmul.mubr.msk.f32.vlgmr.msra.gmra.mxu0 %vm536_vm2, %v13617_v46 }
 0xf6f   :  { %v3584_v50 = vpop.xlane.xlu1 %3583  ;;  %11953 = vmatpush3.msra.mxu0 %v14172_v17 }
 0xf70   :  { %12843 = vrsqrt.f32 %v3603_v49  ;;  %v3596_v58 = vmul.f32 0.020833334, %v3584_v50  ;;  %11954 = vmatprep.subr.mxu0 %v14167_v35 }
 0xf71   :  { %11955 = vmatpush3.msra.mxu0 %v14167_v35 }
 0xf72   :  { %v3602_v22 = vadd.f32 1e-05, %v3596_v58  ;;  %11956 = vmatprep.subr.mxu0 %v14162_v19 }
 0xf73   :  { %v3581_v31 = vpop.xlane.xlu1 %3580  ;;  %11957 = vmatpush3.msra.mxu0 %v14162_v19 }
 0xf74   :  { %12845 = vrsqrt.f32 %v3602_v22  ;;  %v3595_v37 = vmul.f32 0.020833334, %v3581_v31  ;;  %11958 = vmatprep.subr.mxu0 %v14157_v44 }
 0xf75   :  { %v12840_v46 = vpop.eup %12839  ;;  %11959 = vmatpush3.msra.mxu0 %v14157_v44 }
 0xf76   :  { %v3601_v5 = vadd.f32 1e-05, %v3595_v37  ;;  %v3617_v4 = vmul.f32 %v12840_v46, %v14122_v60  ;;  %11960 = vmatprep.subr.mxu0 %v14152_v30 }
 0xf77   :  { %v3578_v36 = vpop.xlane.xlu1 %3577  ;;  %11961 = vmatpush3.msra.mxu0 %v14152_v30 }
 0xf78   :  { %12847 = vrsqrt.f32 %v3601_v5  ;;  %v3594_v14 = vmul.f32 0.020833334, %v3578_v36  ;;  %v3633_v11 = vsel %vm536_vm2, %v3617_v4, -inf  ;;  %11962 = vmatprep.subr.mxu0 %v13903_v8 }
 0xf79   :  { %v12842_v47 = vpop.eup %12841  ;;  %3634 = vmax.xlane.f32.xlu1 %v3633_v11  ;;  %11963 = vmatpush3.msra.mxu0 %v13903_v8 }
 0xf7a   :  { %v3600_v12 = vadd.f32 1e-05, %v3594_v14  ;;  %v3616_v1 = vmul.f32 %v12842_v47, %v14125_v45  ;;  %11970 = vmatprep.subr.mxu0 %v14172_v17 }
 0xf7c   :  { %12849 = vrsqrt.f32 %v3600_v12  ;;  %v3630_v60 = vsel %vm536_vm2, %v3616_v1, -inf }
 0xf7d   :  { %v12844_v27 = vpop.eup %12843  ;;  %3631 = vmax.xlane.f32.xlu1 %v3630_v60 }
 0xf7e   :  { %v3615_v9 = vmul.f32 %v12844_v27, %v14130_v61 }
 0xf80   :  { %v3627_v25 = vsel %vm536_vm2, %v3615_v9, -inf }
 0xf81   :  { %v12846_v28 = vpop.eup %12845  ;;  %3628 = vmax.xlane.f32.xlu1 %v3627_v25 }
 0xf82   :  { %v3614_v18 = vmul.f32 %v12846_v28, %v14135_v3 }
 0xf84   :  { %v3624_v8 = vsel %vm536_vm2, %v3614_v18, -inf }
 0xf85   :  { %v12848_v39 = vpop.eup %12847  ;;  %3625 = vmax.xlane.f32.xlu1 %v3624_v8 }
 0xf86   :  { %v3613_v45 = vmul.f32 %v12848_v39, %v14140_v59  ;;  %v3895_v39 = vld [vmem:[%s14256_s6 + $0x28] sm:$0xff] }
 0xf88   :  { %v3621_v13 = vsel %vm536_vm2, %v3613_v45, -inf }
 0xf89   :  { %v12850_v23 = vpop.eup %12849  ;;  %3622 = vmax.xlane.f32.xlu1 %v3621_v13  ;;  %v3886_v13 = vld [vmem:[#allocation2] sm:$0xff] }
 0xf8a   :  { %v3612_v57 = vmul.f32 %v12850_v23, %v14145_v10  ;;  %v3893_v23 = vld [vmem:[%s14256_s6 + $0x18] sm:$0xff] }
 0xf8c   :  { %v3618_v61 = vsel %vm536_vm2, %v3612_v57, -inf }
 0xf8d   :  { %3619 = vmax.xlane.f32.xlu1 %v3618_v61  ;;  %v3891_v61 = vld [vmem:[%s14256_s6 + $0x8] sm:$0xff] }
0x1002   :  { %v3635_v62 = vpop.xlane.xlu1 %3634 }
0x1003   :  { %v3641_v53 = vsub.f32 %v3617_v4, %v3635_v62  ;;  %v3887_v62 = vld [vmem:[#allocation2 + $0x8] sm:$0xff] }
0x1005   :  { %v3652_v41 = vmul.f32 1.442695, %v3641_v53 }
0x1006   :  { %v3632_v20 = vpop.xlane.xlu1 %3631 }
0x1007   :  { %12851 = vpow2.f32 %v3652_v41  ;;  %v3640_v3 = vsub.f32 %v3616_v1, %v3632_v20 }
0x1009   :  { %v3650_v51 = vmul.f32 1.442695, %v3640_v3 }
0x100a   :  { %v3629_v21 = vpop.xlane.xlu1 %3628 }
0x100b   :  { %12853 = vpow2.f32 %v3650_v51  ;;  %v3639_v40 = vsub.f32 %v3615_v9, %v3629_v21 }
0x100d   :  { %v3648_v59 = vmul.f32 1.442695, %v3639_v40 }
0x100e   :  { %v3626_v48 = vpop.xlane.xlu1 %3625 }
0x100f   :  { %12855 = vpow2.f32 %v3648_v59  ;;  %v3638_v24 = vsub.f32 %v3614_v18, %v3626_v48 }
0x1011   :  { %v3646_v6 = vmul.f32 1.442695, %v3638_v24 }
0x1012   :  { %v3623_v33 = vpop.xlane.xlu1 %3622 }
0x1013   :  { %12857 = vpow2.f32 %v3646_v6  ;;  %v3637_v10 = vsub.f32 %v3613_v45, %v3623_v33  ;;  %v3894_v45 = vld [vmem:[%s14256_s6 + $0x20] sm:$0xff] }
0x1014   :  { %v12852_v54 = vpop.eup %12851 }
0x1015   :  { %v3644_v7 = vmul.f32 1.442695, %v3637_v10  ;;  %v3669_v34 = vsel %vm536_vm2, %v12852_v54, 0.0 }
0x1016   :  { %3670 = vadd.xlane.f32.xlu1 %v3669_v34  ;;  %v3620_v2 = vpop.xlane.xlu1 %3619 }
0x1017   :  { %12859 = vpow2.f32 %v3644_v7  ;;  %v3636_v38 = vsub.f32 %v3612_v57, %v3620_v2  ;;  %v3892_v57 = vld [vmem:[%s14256_s6 + $0x10] sm:$0xff] }
0x1018   :  { %v12854_v52 = vpop.eup %12853 }
0x1019   :  { %v3642_v32 = vmul.f32 1.442695, %v3636_v38  ;;  %v3666_v29 = vsel %vm536_vm2, %v12854_v52, 0.0 }
0x101a   :  { %3667 = vadd.xlane.f32.xlu1 %v3666_v29  ;;  %v4255_v29 = vld [vmem:[%s14317_s12 + $0x40] sm:$0xff] }
0x101b   :  { %12861 = vpow2.f32 %v3642_v32 }
0x101c   :  { %v12856_v43 = vpop.eup %12855 }
0x101d   :  { %v3663_v42 = vsel %vm536_vm2, %v12856_v43, 0.0 }
0x101e   :  { %3664 = vadd.xlane.f32.xlu1 %v3663_v42  ;;  %v4253_v42 = vld [vmem:[%s14317_s12 + $0x30] sm:$0xff] }
0x1020   :  { %v12858_v15 = vpop.eup %12857 }
0x1021   :  { %v3660_v26 = vsel %vm536_vm2, %v12858_v15, 0.0 }
0x1022   :  { %3661 = vadd.xlane.f32.xlu1 %v3660_v26  ;;  %v4251_v26 = vld [vmem:[%s14317_s12 + $0x20] sm:$0xff] }
0x1024   :  { %v12860_v49 = vpop.eup %12859 }
0x1025   :  { %v3657_v50 = vsel %vm536_vm2, %v12860_v49, 0.0 }
0x1026   :  { %3658 = vadd.xlane.f32.xlu1 %v3657_v50  ;;  %v4249_v50 = vld [vmem:[%s14317_s12 + $0x10] sm:$0xff] }
0x1028   :  { %v12862_v58 = vpop.eup %12861 }
0x1029   :  { %v3654_v22 = vsel %vm536_vm2, %v12862_v58, 0.0 }
0x102a   :  { %3655 = vadd.xlane.f32.xlu1 %v3654_v22  ;;  %v4247_v22 = vld [vmem:[%s14317_s12] sm:$0xff] }
0x102e   :  { %v11933_v53 = vpop.f32.mrf.mxu0 }
0x1030   :  { %v3873_v3 = vpop.f32.mrf.mxu0 }
0x109f   :  { %v3671_v31 = vpop.xlane.xlu1 %3670 }
0x10a0   :  { %12863 = vrcp.f32 %v3671_v31 }
0x10a3   :  { %v3668_v37 = vpop.xlane.xlu1 %3667 }
0x10a4   :  { %12865 = vrcp.f32 %v3668_v37 }
0x10a7   :  { %v3665_v46 = vpop.xlane.xlu1 %3664 }
0x10a8   :  { %12867 = vrcp.f32 %v3665_v46 }
0x10ab   :  { %v3662_v5 = vpop.xlane.xlu1 %3661 }
0x10ac   :  { %12869 = vrcp.f32 %v3662_v5 }
0x10ad   :  { %v12864_v4 = vpop.eup %12863 }
0x10ae   :  { %v3683_v36 = vmul.f32 %v12864_v4, %v12852_v54 }
0x10af   :  { %v3659_v14 = vpop.xlane.xlu1 %3658 }
0x10b0   :  { %12871 = vrcp.f32 %v3659_v14  ;;  %11904 = vmatprep.subr.msk.mxu1 %vm536_vm2, %v3683_v36 }
0x10b1   :  { %v12866_v11 = vpop.eup %12865  ;;  %11905 = vmatpush3.xpose.msk.msra.mxu1 %vm536_vm2, %v3683_v36 }
0x10b2   :  { %v3681_v47 = vmul.f32 %v12866_v11, %v12854_v52 }
0x10b3   :  { %v3656_v12 = vpop.xlane.xlu1 %3655 }
0x10b4   :  { %12873 = vrcp.f32 %v3656_v12  ;;  %11906 = vmatprep.subr.msk.mxu1 %vm536_vm2, %v3681_v47 }
0x10b5   :  { %v12868_v1 = vpop.eup %12867  ;;  %11907 = vmatpush3.xpose.msk.msra.mxu1 %vm536_vm2, %v3681_v47 }
0x10b6   :  { %v3679_v60 = vmul.f32 %v12868_v1, %v12856_v43  ;;  %v4254_v43 = vld [vmem:[%s14317_s12 + $0x38] sm:$0xff] }
0x10b8   :  { %11908 = vmatprep.subr.msk.mxu1 %vm536_vm2, %v3679_v60 }
0x10b9   :  { %v12870_v27 = vpop.eup %12869  ;;  %11909 = vmatpush3.xpose.msk.msra.mxu1 %vm536_vm2, %v3679_v60 }
0x10ba   :  { %v3677_v9 = vmul.f32 %v12870_v27, %v12858_v15  ;;  %v4252_v15 = vld [vmem:[%s14317_s12 + $0x28] sm:$0xff]  ;;  %v10378_v27 = vld [vmem:[%s14376_s17] ss:$0 sm:$0xff] }
0x10bc   :  { %11910 = vmatprep.subr.msk.mxu1 %vm536_vm2, %v3677_v9 }
0x10bd   :  { %v12872_v25 = vpop.eup %12871  ;;  %11911 = vmatpush3.xpose.msk.msra.mxu1 %vm536_vm2, %v3677_v9 }
0x10be   :  { %v3675_v28 = vmul.f32 %v12872_v25, %v12860_v49  ;;  %v4250_v49 = vld [vmem:[%s14317_s12 + $0x18] sm:$0xff] }
0x10c0   :  { %11912 = vmatprep.subr.msk.mxu1 %vm536_vm2, %v3675_v28 }
0x10c1   :  { %v12874_v18 = vpop.eup %12873  ;;  %11913 = vmatpush3.xpose.msk.msra.mxu1 %vm536_vm2, %v3675_v28 }
0x10c2   :  { %v3673_v8 = vmul.f32 %v12874_v18, %v12862_v58  ;;  %v4248_v58 = vld [vmem:[%s14317_s12 + $0x8] sm:$0xff]  ;;  %v10379_v18 = vld [vmem:[%s14381_s22] ss:$0 sm:$0xff] }
0x10c4   :  { %11914 = vmatprep.subr.msk.mxu1 %vm536_vm2, %v3673_v8 }
0x10c5   :  { %11915 = vmatpush3.xpose.msk.msra.mxu1 %vm536_vm2, %v3673_v8 }
0x10c6   :  { %11934 = vmatprep.subr.msk.mxu1 %vm536_vm2, %v3895_v39 }
0x10c8   :  { %11917 = vmatmul.mubr.msk.f32.vlgmr.msra.gmra.mxu1 %vm536_vm2, %v13675_v16  ;;  %v3890_v16 = vld [vmem:[%s14256_s6] sm:$0xff] }
0x10c9   :  { %11935 = vmatpush3.xpose.msk.msra.mxu1 %vm536_vm2, %v3895_v39  ;;  %11946 = vmatprep.mubr.msk.f32.mxu1 %vm536_vm2, %v3886_v13  ;;  %v4512_v13 = vld [vmem:[%s14390_s28 + $0x28] sm:$0xff] }
0x10ca   :  { %11936 = vmatprep.subr.msk.mxu1 %vm536_vm2, %v3894_v45 }
0x10cd   :  { %11937 = vmatpush3.xpose.msk.msra.mxu1 %vm536_vm2, %v3894_v45 }
0x10ce   :  { %11938 = vmatprep.subr.msk.mxu1 %vm536_vm2, %v3893_v23 }
0x10d1   :  { %11939 = vmatpush3.xpose.msk.msra.mxu1 %vm536_vm2, %v3893_v23  ;;  %v4511_v23 = vld [vmem:[%s14390_s28 + $0x20] sm:$0xff] }
0x10d2   :  { %11940 = vmatprep.subr.msk.mxu1 %vm536_vm2, %v3892_v57 }
0x10d5   :  { %11941 = vmatpush3.xpose.msk.msra.mxu1 %vm536_vm2, %v3892_v57  ;;  %v4510_v57 = vld [vmem:[%s14390_s28 + $0x18] sm:$0xff] }
0x10d6   :  { %11942 = vmatprep.subr.msk.mxu1 %vm536_vm2, %v3891_v61 }
0x10d9   :  { %11943 = vmatpush3.xpose.msk.msra.mxu1 %vm536_vm2, %v3891_v61  ;;  %v4509_v61 = vld [vmem:[%s14390_s28 + $0x10] sm:$0xff] }
0x10da   :  { %11944 = vmatprep.subr.msk.mxu1 %vm536_vm2, %v3890_v16 }
0x10dd   :  { %11945 = vmatpush3.xpose.msk.msra.mxu1 %vm536_vm2, %v3890_v16  ;;  %v4508_v16 = vld [vmem:[%s14390_s28 + $0x8] sm:$0xff] }
0x10e0   :  { %11947 = vmatmul.mubr.msk.f32.vlgmr.msra.gmra.mxu1 %vm536_vm2, %v3887_v62  ;;  %v4507_v62 = vld [vmem:[%s14390_s28] sm:$0xff] }
0x1188   :  { %v11918_v41 = vpop.f32.mrf.mxu1 }
0x1189   :  { %v3879_v20 = vadd.f32 %v11933_v53, %v11918_v41 }
0x118a   :  { %v3774_v51 = vpop.f32.mrf.mxu1 }
0x118b   :  { %v3883_v21 = vmul.f32 0.5, %v3879_v20  ;;  %v3874_v40 = vadd.f32 %v3873_v3, %v3774_v51 }
0x118d   :  { %3885 = vst.msk [vmem:[#allocation2 + $0x18] sm:$0xff] %vm536_vm2, %v3883_v21  ;;  %v3882_v59 = vmul.f32 0.5, %v3874_v40 }
0x118f   :  { %3884 = vst.msk [vmem:[#allocation2 + $0x10] sm:$0xff] %vm536_vm2, %v3882_v59 }
0x1194   :  { %v3889_v24 = vld [vmem:[#allocation2 + $0x18] sm:$0xff] }
0x1196   :  { %v3888_v48 = vld [vmem:[#allocation2 + $0x10] sm:$0xff] }
0x1197   :  { %11949 = vmatprep.mubr.msk.f32.mxu1 %vm536_vm2, %v3888_v48 }
0x1198   :  { %11950 = vmatmul.mubr.msk.f32.gmra.mxu1 %vm536_vm2, %v3889_v24 }
0x11a0   :  { %v11948_v6 = vpop.f32.mrf.mxu1 }
0x11a1   :  { %v14294_v54 = vadd.f32 %v11948_v6, %v13309_v56  ;;  %v4258_v56 = vld [vmem:[%s14317_s12 + $0x58] sm:$0xff] }
0x11a2   :  { %v3992_v33 = vpop.f32.mrf.mxu1  ;;  %11988 = vmatprep.subr.msk.mxu1 %vm536_vm2, %v4258_v56 }
0x11a3   :  { %v14291_v10 = vadd.f32 %v3992_v33, %v13307_v55  ;;  %v14310_v55 = vld [vmem:[%s13271_s29] sm:$0xff]  ;;  %11989 = vmatpush3.xpose.msk.msra.mxu1 %vm536_vm2, %v4258_v56 }
0x11a5   :  { %11964 = vmatprep.mubr.msk.f32.mxu0 %vm536_vm2, %v14291_v10 }
0x11a6   :  { %11965 = vmatmul.mubr.msk.f32.vlgmr.msra.gmra.mxu0 %vm536_vm2, %v14294_v54 }
0x11a7   :  { %11971 = vmatpush3.msra.mxu0 %v14172_v17 }
0x11a8   :  { %11972 = vmatprep.subr.mxu0 %v14167_v35 }
0x11a9   :  { %11973 = vmatpush3.msra.mxu0 %v14167_v35 }
0x11aa   :  { %11974 = vmatprep.subr.mxu0 %v14162_v19 }
0x11ab   :  { %11975 = vmatpush3.msra.mxu0 %v14162_v19 }
0x11ac   :  { %11976 = vmatprep.subr.mxu0 %v14157_v44 }
0x11ad   :  { %11977 = vmatpush3.msra.mxu0 %v14157_v44  ;;  %v4257_v44 = vld [vmem:[%s14317_s12 + $0x50] sm:$0xff] }
0x11ae   :  { %11978 = vmatprep.subr.mxu0 %v14152_v30  ;;  %11990 = vmatprep.subr.msk.mxu1 %vm536_vm2, %v4257_v44 }
0x11af   :  { %11979 = vmatpush3.msra.mxu0 %v14152_v30  ;;  %11991 = vmatpush3.xpose.msk.msra.mxu1 %vm536_vm2, %v4257_v44 }
0x11b0   :  { %11980 = vmatprep.subr.mxu0 %v14310_v55 }
0x11b1   :  { %11981 = vmatpush3.msra.mxu0 %v14310_v55 }
0x11b2   :  { %12018 = vmatprep.subr.msk.mxu0 %vm4520_vm4, %v4512_v13 }
0x1258   :  { %v11951_v30 = vpop.f32.mrf.mxu1 }
0x1259   :  { %v14329_v7 = vadd.f32 %v11951_v30, %v13320_v0  ;;  %v4256_v0 = vld [vmem:[%s14317_s12 + $0x48] sm:$0xff] }
0x125a   :  { %v4002_v19 = vpop.f32.mrf.mxu1  ;;  %11992 = vmatprep.subr.msk.mxu1 %vm536_vm2, %v4256_v0 }
0x125b   :  { %v14326_v35 = vadd.f32 %v4002_v19, %v13317_v63  ;;  %11993 = vmatpush3.xpose.msk.msra.mxu1 %vm536_vm2, %v4256_v0 }
0x125c   :  { %11994 = vmatprep.subr.msk.mxu1 %vm536_vm2, %v4255_v29 }
0x125d   :  { %11967 = vmatprep.mubr.msk.f32.mxu0 %vm536_vm2, %v14326_v35 }
0x125e   :  { %11968 = vmatmul.mubr.msk.f32.gmra.mxu0 %vm536_vm2, %v14329_v7 }
0x125f   :  { %11995 = vmatpush3.xpose.msk.msra.mxu1 %vm536_vm2, %v4255_v29 }
0x1260   :  { %11996 = vmatprep.subr.msk.mxu1 %vm536_vm2, %v4254_v43 }
0x1263   :  { %11997 = vmatpush3.xpose.msk.msra.mxu1 %vm536_vm2, %v4254_v43 }
0x1264   :  { %11998 = vmatprep.subr.msk.mxu1 %vm536_vm2, %v4253_v42 }
0x1266   :  { %v11966_v34 = vpop.f32.mrf.mxu0 }
0x1267   :  { %v4115_v2 = vsub.f32 %v14294_v54, %v11966_v34  ;;  %11999 = vmatpush3.xpose.msk.msra.mxu1 %vm536_vm2, %v4253_v42 }
0x1268   :  { %v4095_v38 = vpop.f32.mrf.mxu0  ;;  %12000 = vmatprep.subr.msk.mxu1 %vm536_vm2, %v4252_v15 }
0x1269   :  { %v4114_v52 = vsub.f32 %v14291_v10, %v4095_v38  ;;  %v4119_v63 = vmul.f32 %v4115_v2, %v4115_v2 }
0x126b   :  { %v4118_v32 = vmul.f32 %v4114_v52, %v4114_v52  ;;  %12001 = vmatpush3.xpose.msk.msra.mxu1 %vm536_vm2, %v4252_v15 }
0x126c   :  { %12002 = vmatprep.subr.msk.mxu1 %vm536_vm2, %v4251_v26 }
0x126d   :  { %11982 = vmatprep.mubr.msk.f32.mxu0 %vm536_vm2, %v4118_v32 }
0x126e   :  { %11983 = vmatmul.mubr.msk.f32.vlgmr.msra.gmra.mxu0 %vm536_vm2, %v4119_v63 }
0x126f   :  { %12003 = vmatpush3.xpose.msk.msra.mxu1 %vm536_vm2, %v4251_v26  ;;  %12019 = vmatpush3.xpose.msk.msra.mxu0 %vm4520_vm4, %v4512_v13 }
0x1270   :  { %12004 = vmatprep.subr.msk.mxu1 %vm536_vm2, %v4250_v49  ;;  %12020 = vmatprep.subr.msk.mxu0 %vm4520_vm4, %v4511_v23 }
0x1273   :  { %12005 = vmatpush3.xpose.msk.msra.mxu1 %vm536_vm2, %v4250_v49  ;;  %12021 = vmatpush3.xpose.msk.msra.mxu0 %vm4520_vm4, %v4511_v23 }
0x1274   :  { %12006 = vmatprep.subr.msk.mxu1 %vm536_vm2, %v4249_v50  ;;  %12022 = vmatprep.subr.msk.mxu0 %vm4520_vm4, %v4510_v57 }
0x1277   :  { %12007 = vmatpush3.xpose.msk.msra.mxu1 %vm536_vm2, %v4249_v50  ;;  %12023 = vmatpush3.xpose.msk.msra.mxu0 %vm4520_vm4, %v4510_v57  ;;  %v13146_v57 = vmov -1.0  }
0x1278   :  { %12008 = vmatprep.subr.msk.mxu1 %vm536_vm2, %v4248_v58  ;;  %12024 = vmatprep.subr.msk.mxu0 %vm4520_vm4, %v4509_v61 }
0x127b   :  { %12009 = vmatpush3.xpose.msk.msra.mxu1 %vm536_vm2, %v4248_v58  ;;  %12025 = vmatpush3.xpose.msk.msra.mxu0 %vm4520_vm4, %v4509_v61 }
0x127c   :  { %12010 = vmatprep.subr.msk.mxu1 %vm536_vm2, %v4247_v22  ;;  %12026 = vmatprep.subr.msk.mxu0 %vm4520_vm4, %v4508_v16 }
0x127f   :  { %12011 = vmatpush3.xpose.msk.msra.mxu1 %vm536_vm2, %v4247_v22  ;;  %12027 = vmatpush3.xpose.msk.msra.mxu0 %vm4520_vm4, %v4508_v16 }
0x1280   :  { %12028 = vmatprep.subr.msk.mxu0 %vm4520_vm4, %v4507_v62 }
0x1283   :  { %12029 = vmatpush3.xpose.msk.msra.mxu0 %vm4520_vm4, %v4507_v62 }
0x1284   :  { %12036 = vmatprep.subr.mxu0 %v14172_v17  ;;  %v14419_v17 = vld [vmem:[%s14414_s4] ss:$0 sm:$0xff] }
0x131e   :  { %v11969_v31 = vpop.f32.mrf.mxu0 }
0x131f   :  { %v4117_v37 = vsub.f32 %v14329_v7, %v11969_v31 }
0x1320   :  { %v4105_v46 = vpop.f32.mrf.mxu0 }
0x1321   :  { %v4116_v5 = vsub.f32 %v14326_v35, %v4105_v46  ;;  %v4121_v36 = vmul.f32 %v4117_v37, %v4117_v37 }
0x1323   :  { %v4120_v4 = vmul.f32 %v4116_v5, %v4116_v5 }
0x1325   :  { %11985 = vmatprep.mubr.msk.f32.mxu0 %vm536_vm2, %v4120_v4 }
0x1326   :  { %11986 = vmatmul.mubr.msk.f32.gmra.mxu0 %vm536_vm2, %v4121_v36 }
0x132e   :  { %v11984_v14 = vpop.f32.mrf.mxu0 }
0x132f   :  { %v4206_v11 = vadd.f32 1e-06, %v11984_v14 }
0x1330   :  { %v4200_v47 = vpop.f32.mrf.mxu0 }
0x1331   :  { %12875 = vrsqrt.f32 %v4206_v11  ;;  %v4201_v12 = vadd.f32 1e-06, %v4200_v47 }
0x1333   :  { %12877 = vrsqrt.f32 %v4201_v12 }
0x133e   :  { %v12876_v1 = vpop.eup %12875 }
0x133f   :  { %v4224_v60 = vmul.f32 %v12876_v1, %v4115_v2 }
0x1340   :  { %v12878_v9 = vpop.eup %12877 }
0x1341   :  { %v4223_v25 = vmul.f32 %v12878_v9, %v4114_v52  ;;  %v4234_v28 = vmul.f32 %v10378_v27, %v4224_v60 }
0x1343   :  { %v4233_v8 = vmul.f32 %v10378_v27, %v4223_v25  ;;  %v4244_v45 = vadd.f32 %v10379_v18, %v4234_v28 }
0x1345   :  { %v4243_v39 = vadd.f32 %v10379_v18, %v4233_v8 }
0x1347   :  { %12012 = vmatprep.mubr.msk.f32.mxu1 %vm536_vm2, %v4243_v39 }
0x1348   :  { %12013 = vmatmul.mubr.msk.f32.vlgmr.msra.gmra.mxu1 %vm536_vm2, %v4244_v45 }
0x13e6   :  { %v11987_v53 = vpop.f32.mrf.mxu0 }
0x13e7   :  { %v4216_v41 = vadd.f32 1e-06, %v11987_v53 }
0x13e8   :  { %v4210_v20 = vpop.f32.mrf.mxu0 }
0x13e9   :  { %12879 = vrsqrt.f32 %v4216_v41  ;;  %v4211_v3 = vadd.f32 1e-06, %v4210_v20 }
0x13eb   :  { %12881 = vrsqrt.f32 %v4211_v3 }
0x13f6   :  { %v12880_v51 = vpop.eup %12879 }
0x13f7   :  { %v4226_v21 = vmul.f32 %v12880_v51, %v4117_v37 }
0x13f8   :  { %v12882_v40 = vpop.eup %12881 }
0x13f9   :  { %v4225_v59 = vmul.f32 %v12882_v40, %v4116_v5  ;;  %v4236_v48 = vmul.f32 %v10378_v27, %v4226_v21 }
0x13fb   :  { %v4235_v24 = vmul.f32 %v10378_v27, %v4225_v59  ;;  %v4246_v33 = vadd.f32 %v10379_v18, %v4236_v48 }
0x13fd   :  { %v4245_v6 = vadd.f32 %v10379_v18, %v4235_v24  ;;  %v14428_v24 = vld [vmem:[%s13271_s29 + $0x28] sm:$0xff] }
0x13ff   :  { %12015 = vmatprep.mubr.msk.f32.mxu1 %vm536_vm2, %v4245_v6  ;;  %v14432_v6 = vld [vmem:[%s13271_s29 + $0x20] sm:$0xff] }
0x1400   :  { %12016 = vmatmul.mubr.msk.f32.gmra.mxu1 %vm536_vm2, %v4246_v33  ;;  %v14437_v33 = vld [vmem:[%s13271_s29 + $0x18] sm:$0xff] }
0x1408   :  { %v12014_v56 = vpop.f32.mrf.mxu1 }
0x1409   :  { %v4386_v44 = vadd.f32 %v12014_v56, %v14419_v17  ;;  %v14442_v56 = vld [vmem:[%s13271_s29 + $0x10] sm:$0xff] }
0x140a   :  { %v4380_v30 = vpop.f32.mrf.mxu1 }
0x140b   :  { %v4404_v19 = vmul.f32 0.70710677, %v4386_v44  ;;  %v4381_v34 = vadd.f32 %v14419_v17, %v4380_v30  ;;  %v4400_v40 = vmul.f32 0.5, %v4386_v44  ;;  %v14447_v44 = vld [vmem:[%s13271_s29 + $0x8] sm:$0xff] }
0x140d   :  { %v4416_v2 = vand.u32 2147483647, %v4404_v19  ;;  %v4403_v38 = vmul.f32 0.70710677, %v4381_v34  ;;  %vm4408_vm5 = vcmp.ge.f32.partialorder %v4404_v19, 0.0  ;;  %v4399_v51 = vmul.f32 0.5, %v4381_v34 }
0x140e   :  { %v4412_v61 = vsel %vm4408_vm5, 1.0, %v13146_v57 }
0x140f   :  { %v4420_v52 = vmul.f32 0.3275911, %v4416_v2  ;;  %v4415_v32 = vand.u32 2147483647, %v4403_v38  ;;  %v4472_v43 = vsub.f32 0.0, %v4416_v2  ;;  %vm4407_vm6 = vcmp.ge.f32.partialorder %v4403_v38, 0.0 }
0x1410   :  { %v4411_v41 = vsel %vm4407_vm6, 1.0, %v13146_v57 }
0x1411   :  { %v4424_v63 = vadd.f32 1.0, %v4420_v52  ;;  %v4419_v0 = vmul.f32 0.3275911, %v4415_v32  ;;  %v4471_v42 = vsub.f32 0.0, %v4415_v32  ;;  %v4476_v15 = vmul.f32 %v4472_v43, %v4416_v2 }
0x1413   :  { %12883 = vrcp.f32 %v4424_v63  ;;  %v4423_v29 = vadd.f32 1.0, %v4419_v0  ;;  %v4475_v49 = vmul.f32 %v4471_v42, %v4415_v32  ;;  %v4481_v58 = vmul.f32 1.442695, %v4476_v15 }
0x1415   :  { %12885 = vrcp.f32 %v4423_v29  ;;  %v4479_v46 = vmul.f32 1.442695, %v4475_v49 }
0x1416   :  { %12887 = vpow2.f32 %v4481_v58 }
0x1417   :  { %12889 = vpow2.f32 %v4479_v46 }
0x1420   :  { %v12884_v26 = vpop.eup %12883 }
0x1421   :  { %v4436_v50 = vmul.f32 1.0614054, %v12884_v26 }
0x1422   :  { %v12886_v22 = vpop.eup %12885 }
0x1423   :  { %v4440_v31 = vadd.f32 -1.4531521, %v4436_v50  ;;  %v4435_v37 = vmul.f32 1.0614054, %v12886_v22  ;;  %v12888_v18 = vpop.eup %12887 }
0x1424   :  { %v12890_v13 = vpop.eup %12889 }
0x1425   :  { %v4444_v5 = vmul.f32 %v12884_v26, %v4440_v31  ;;  %v4439_v4 = vadd.f32 -1.4531521, %v4435_v37 }
0x1427   :  { %v4448_v36 = vadd.f32 1.4214138, %v4444_v5  ;;  %v4443_v14 = vmul.f32 %v12886_v22, %v4439_v4 }
0x1429   :  { %v4452_v11 = vmul.f32 %v12884_v26, %v4448_v36  ;;  %v4447_v47 = vadd.f32 1.4214138, %v4443_v14 }
0x142b   :  { %v4456_v12 = vadd.f32 -0.28449672, %v4452_v11  ;;  %v4451_v1 = vmul.f32 %v12886_v22, %v4447_v47 }
0x142d   :  { %v4460_v60 = vmul.f32 %v12884_v26, %v4456_v12  ;;  %v4455_v27 = vadd.f32 -0.28449672, %v4451_v1 }
0x142f   :  { %v4464_v9 = vadd.f32 0.2548296, %v4460_v60  ;;  %v4459_v25 = vmul.f32 %v12886_v22, %v4455_v27 }
0x1431   :  { %v4468_v28 = vmul.f32 %v12884_v26, %v4464_v9  ;;  %v4463_v8 = vadd.f32 0.2548296, %v4459_v25 }
0x1433   :  { %v4488_v39 = vmul.f32 %v12888_v18, %v4468_v28  ;;  %v4467_v45 = vmul.f32 %v12886_v22, %v4463_v8 }
0x1435   :  { %v4492_v23 = vsub.f32 1.0, %v4488_v39  ;;  %v4487_v16 = vmul.f32 %v12890_v13, %v4467_v45 }
0x1437   :  { %v4496_v62 = vmul.f32 %v4492_v23, %v4412_v61  ;;  %v4491_v53 = vsub.f32 1.0, %v4487_v16 }
0x1439   :  { %v4495_v20 = vmul.f32 %v4491_v53, %v4411_v41  ;;  %v4500_v3 = vadd.f32 1.0, %v4496_v62 }
0x143b   :  { %v4499_v21 = vadd.f32 1.0, %v4495_v20  ;;  %v4504_v48 = vmul.f32 %v4500_v3, %v4400_v40 }
0x143d   :  { %v4503_v59 = vmul.f32 %v4499_v21, %v4399_v51 }
0x143f   :  { %12030 = vmatprep.mubr.msk.f32.mxu0 %vm4520_vm4, %v4503_v59 }
0x1440   :  { %12031 = vmatmul.mubr.msk.f32.vlgmr.msra.gmra.mxu0 %vm4520_vm4, %v4504_v48 }
0x1441   :  { %12037 = vmatpush3.msra.mxu0 %v14428_v24 }
0x1442   :  { %12038 = vmatprep.subr.mxu0 %v14432_v6 }
0x1443   :  { %12039 = vmatpush3.msra.mxu0 %v14432_v6 }
0x1444   :  { %12040 = vmatprep.subr.mxu0 %v14437_v33 }
0x1445   :  { %12041 = vmatpush3.msra.mxu0 %v14437_v33 }
0x1446   :  { %12042 = vmatprep.subr.mxu0 %v14442_v56 }
0x1447   :  { %12043 = vmatpush3.msra.mxu0 %v14442_v56 }
0x1448   :  { %12044 = vmatprep.subr.mxu0 %v14447_v44 }
0x1449   :  { %12045 = vmatpush3.msra.mxu0 %v14447_v44 }
0x144a   :  { %12046 = vmatprep.subr.mxu0 %v14310_v55 }
0x144b   :  { %12047 = vmatpush3.msra.mxu0 %v14310_v55 }
0x144c   :  { %12054 = vmatprep.subr.mxu0 %v14428_v24 }
0x14c0   :  { %v12017_v30 = vpop.f32.mrf.mxu1 }
0x14c1   :  { %v4396_v19 = vadd.f32 %v12017_v30, %v14419_v17 }
0x14c2   :  { %v4390_v34 = vpop.f32.mrf.mxu1 }
0x14c3   :  { %v4406_v2 = vmul.f32 0.70710677, %v4396_v19  ;;  %v4391_v38 = vadd.f32 %v14419_v17, %v4390_v34  ;;  %v4402_v59 = vmul.f32 0.5, %v4396_v19  ;;  %v10397_v34 = vld [vmem:[%s14461_s10] ss:$0 sm:$0xff] }
0x14c5   :  { %v4418_v52 = vand.u32 2147483647, %v4406_v2  ;;  %v4405_v32 = vmul.f32 0.70710677, %v4391_v38  ;;  %vm4410_vm7 = vcmp.ge.f32.partialorder %v4406_v2, 0.0  ;;  %v4401_v21 = vmul.f32 0.5, %v4391_v38 }
0x14c6   :  { %v4414_v16 = vsel %vm4410_vm7, 1.0, %v13146_v57 }
0x14c7   :  { %v4422_v63 = vmul.f32 0.3275911, %v4418_v52  ;;  %v4417_v0 = vand.u32 2147483647, %v4405_v32  ;;  %v4474_v15 = vsub.f32 0.0, %v4418_v52  ;;  %vm4409_vm8 = vcmp.ge.f32.partialorder %v4405_v32, 0.0 }
0x14c8   :  { %v4413_v20 = vsel %vm4409_vm8, 1.0, %v13146_v57 }
0x14c9   :  { %v4426_v29 = vadd.f32 1.0, %v4422_v63  ;;  %v4421_v43 = vmul.f32 0.3275911, %v4417_v0  ;;  %v4473_v26 = vsub.f32 0.0, %v4417_v0  ;;  %v4478_v49 = vmul.f32 %v4474_v15, %v4418_v52 }
0x14cb   :  { %12891 = vrcp.f32 %v4426_v29  ;;  %v4425_v42 = vadd.f32 1.0, %v4421_v43  ;;  %v4477_v58 = vmul.f32 %v4473_v26, %v4417_v0  ;;  %v4485_v31 = vmul.f32 1.442695, %v4478_v49 }
0x14cd   :  { %12893 = vrcp.f32 %v4425_v42  ;;  %v4483_v17 = vmul.f32 1.442695, %v4477_v58 }
0x14ce   :  { %12895 = vpow2.f32 %v4485_v31 }
0x14cf   :  { %12897 = vpow2.f32 %v4483_v17 }
0x14d8   :  { %v12892_v50 = vpop.eup %12891 }
0x14d9   :  { %v4438_v22 = vmul.f32 1.0614054, %v12892_v50 }
0x14da   :  { %v12894_v37 = vpop.eup %12893 }
0x14db   :  { %v4442_v46 = vadd.f32 -1.4531521, %v4438_v22  ;;  %v4437_v5 = vmul.f32 1.0614054, %v12894_v37  ;;  %v12896_v8 = vpop.eup %12895 }
0x14dc   :  { %v12898_v23 = vpop.eup %12897 }
0x14dd   :  { %v4446_v4 = vmul.f32 %v12892_v50, %v4442_v46  ;;  %v4441_v36 = vadd.f32 -1.4531521, %v4437_v5 }
0x14df   :  { %v4450_v14 = vadd.f32 1.4214138, %v4446_v4  ;;  %v4445_v11 = vmul.f32 %v12894_v37, %v4441_v36 }
0x14e1   :  { %v4454_v47 = vmul.f32 %v12892_v50, %v4450_v14  ;;  %v4449_v12 = vadd.f32 1.4214138, %v4445_v11 }
0x14e3   :  { %v4458_v1 = vadd.f32 -0.28449672, %v4454_v47  ;;  %v4453_v60 = vmul.f32 %v12894_v37, %v4449_v12 }
0x14e5   :  { %v4462_v27 = vmul.f32 %v12892_v50, %v4458_v1  ;;  %v4457_v9 = vadd.f32 -0.28449672, %v4453_v60  ;;  %v10429_v1 = vld [vmem:[%s13387_s7 + $0x88] sm:$0xff]  ;;  %v10445_v60 = vld [vmem:[%s13387_s7 + $0xb8] sm:$0xff] }
0x14e6   :  { %12072 = vmatprep.subr.msk.mxu1 %vm536_vm2, %v10429_v1 }
0x14e7   :  { %v4466_v25 = vadd.f32 0.2548296, %v4462_v27  ;;  %v4461_v28 = vmul.f32 %v12894_v37, %v4457_v9  ;;  %12073 = vmatpush3.xpose.msk.msra.mxu1 %vm536_vm2, %v10429_v1  ;;  %v10428_v27 = vld [vmem:[%s13387_s7 + $0x80] sm:$0xff]  ;;  %v10444_v9 = vld [vmem:[%s13387_s7 + $0xb0] sm:$0xff]  ;;  %v10457_v1 = vld [vmem:[%s13424_s11 + $0x68] sm:$0xff] }
0x14e8   :  { %12074 = vmatprep.subr.msk.mxu1 %vm536_vm2, %v10428_v27 }
0x14e9   :  { %v4470_v18 = vmul.f32 %v12892_v50, %v4466_v25  ;;  %v4465_v39 = vadd.f32 0.2548296, %v4461_v28  ;;  %v10427_v25 = vld [vmem:[%s13387_s7 + $0x78] sm:$0xff]  ;;  %v10443_v28 = vld [vmem:[%s13387_s7 + $0xa8] sm:$0xff] }
0x14eb   :  { %v4490_v45 = vmul.f32 %v12896_v8, %v4470_v18  ;;  %v4469_v13 = vmul.f32 %v12894_v37, %v4465_v39  ;;  %12075 = vmatpush3.xpose.msk.msra.mxu1 %vm536_vm2, %v10428_v27  ;;  %v10426_v18 = vld [vmem:[%s13387_s7 + $0x70] sm:$0xff]  ;;  %v10442_v8 = vld [vmem:[%s13387_s7 + $0xa0] sm:$0xff]  ;;  %v10425_v39 = vld [vmem:[%s13387_s7 + $0x68] sm:$0xff] }
0x14ec   :  { %12076 = vmatprep.subr.msk.mxu1 %vm536_vm2, %v10427_v25  ;;  %v10456_v27 = vld [vmem:[%s13424_s11 + $0x60] sm:$0xff] }
0x14ed   :  { %v4494_v61 = vsub.f32 1.0, %v4490_v45  ;;  %v4489_v62 = vmul.f32 %v12898_v23, %v4469_v13  ;;  %v10441_v45 = vld [vmem:[%s13387_s7 + $0x98] sm:$0xff]  ;;  %v10424_v13 = vld [vmem:[%s13387_s7 + $0x60] sm:$0xff]  ;;  %v10440_v23 = vld [vmem:[%s13387_s7 + $0x90] sm:$0xff]  ;;  %s13148_s7 = smov 42  }
0x14ef   :  { %v4498_v53 = vmul.f32 %v4494_v61, %v4414_v16  ;;  %v4493_v41 = vsub.f32 1.0, %v4489_v62  ;;  %12077 = vmatpush3.xpose.msk.msra.mxu1 %vm536_vm2, %v10427_v25  ;;  %v10493_v25 = vld [vmem:[%s13520_s2 + $0x88] sm:$0xff] }
0x14f0   :  { %12078 = vmatprep.subr.msk.mxu1 %vm536_vm2, %v10426_v18 }
0x14f1   :  { %v4497_v3 = vmul.f32 %v4493_v41, %v4413_v20  ;;  %v4502_v51 = vadd.f32 1.0, %v4498_v53 }
0x14f3   :  { %v4501_v40 = vadd.f32 1.0, %v4497_v3  ;;  %v4506_v30 = vmul.f32 %v4502_v51, %v4402_v59  ;;  %12079 = vmatpush3.xpose.msk.msra.mxu1 %vm536_vm2, %v10426_v18 }
0x14f4   :  { %12080 = vmatprep.subr.msk.mxu1 %vm536_vm2, %v10425_v39 }
0x14f5   :  { %v4505_v48 = vmul.f32 %v4501_v40, %v4401_v21 }
0x14f7   :  { %12033 = vmatprep.mubr.msk.f32.mxu0 %vm4520_vm4, %v4505_v48  ;;  %12081 = vmatpush3.xpose.msk.msra.mxu1 %vm536_vm2, %v10425_v39 }
0x14f8   :  { %12034 = vmatmul.mubr.msk.f32.gmra.mxu0 %vm4520_vm4, %v4506_v30  ;;  %12082 = vmatprep.subr.msk.mxu1 %vm536_vm2, %v10424_v13 }
0x14fb   :  { %12083 = vmatpush3.xpose.msk.msra.mxu1 %vm536_vm2, %v10424_v13 }
0x1500   :  { %v12032_v2 = vpop.f32.mrf.mxu0 }
0x1501   :  { %v4623_v52 = vadd.f32 %v12032_v2, %v10397_v34 }
0x1502   :  { %v4617_v32 = vpop.f32.mrf.mxu0 }
0x1503   :  { %v14467_v38 = vadd.f32 %v4623_v52, %v14294_v54  ;;  %v4618_v19 = vadd.f32 %v10397_v34, %v4617_v32 }
0x1505   :  { %v14470_v63 = vadd.f32 %v4618_v19, %v14291_v10  ;;  %v4881_v0 = vsel %vm536_vm2, %v14467_v38, 0.0 }
0x1506   :  { %4882 = vadd.xlane.f32.xlu1 %v4881_v0 }
0x1507   :  { %12048 = vmatprep.mubr.msk.f32.mxu0 %vm536_vm2, %v14470_v63  ;;  %v4878_v29 = vsel %vm536_vm2, %v14470_v63, 0.0 }
0x1508   :  { %4879 = vadd.xlane.f32.xlu0 %v4878_v29  ;;  %12049 = vmatmul.mubr.msk.f32.vlgmr.msra.gmra.mxu0 %vm536_vm2, %v14467_v38 }
0x1509   :  { %12055 = vmatpush3.msra.mxu0 %v14428_v24 }
0x150a   :  { %12056 = vmatprep.subr.mxu0 %v14432_v6 }
0x150b   :  { %12057 = vmatpush3.msra.mxu0 %v14432_v6 }
0x150c   :  { %12058 = vmatprep.subr.mxu0 %v14437_v33 }
0x150d   :  { %12059 = vmatpush3.msra.mxu0 %v14437_v33 }
0x150e   :  { %12060 = vmatprep.subr.mxu0 %v14442_v56 }
0x150f   :  { %12061 = vmatpush3.msra.mxu0 %v14442_v56 }
0x1510   :  { %12062 = vmatprep.subr.mxu0 %v14447_v44 }
0x1511   :  { %12063 = vmatpush3.msra.mxu0 %v14447_v44 }
0x1512   :  { %12064 = vmatprep.subr.mxu0 %v14310_v55 }
0x1513   :  { %12065 = vmatpush3.msra.mxu0 %v14310_v55 }
0x1514   :  { %12090 = vmatprep.subr.msk.mxu0 %vm536_vm2, %v10445_v60 }
0x158f   :  { %v4883_v10 = vpop.xlane.xlu1 %4882 }
0x1590   :  { %v4891_v54 = vmul.f32 0.020833334, %v4883_v10 }
0x1591   :  { %v4880_v43 = vpop.xlane.xlu0 %4879 }
0x1592   :  { %v14492_v42 = vsub.f32 %v14467_v38, %v4891_v54  ;;  %v4890_v15 = vmul.f32 0.020833334, %v4880_v43 }
0x1594   :  { %v14495_v26 = vsub.f32 %v14470_v63, %v4890_v15  ;;  %v4899_v49 = vmul.f32 %v14492_v42, %v14492_v42 }
0x1596   :  { %v4905_v50 = vsel %vm536_vm2, %v4899_v49, 0.0  ;;  %v4898_v58 = vmul.f32 %v14495_v26, %v14495_v26  ;;  %v14595_v49 = vld [vmem:[%s13449_s15 + $0x1] ss:$0 sm:$0xff]  ;;  %s13157_s15 = smov 26  }
0x1597   :  { %4906 = vadd.xlane.f32.xlu1 %v4905_v50 }
0x1598   :  { %v4902_v55 = vsel %vm536_vm2, %v4898_v58, 0.0 }
0x1599   :  { %4903 = vadd.xlane.f32.xlu0 %v4902_v55 }
0x15b8   :  { %v12035_v22 = vpop.f32.mrf.mxu0 }
0x15b9   :  { %v4633_v31 = vadd.f32 %v12035_v22, %v10397_v34  ;;  %v14600_v22 = vld [vmem:[%s13454_s19 + $0x1] ss:$0 sm:$0xff]  ;;  %s15007_s19 = sld [smem:[%s15876_s0 + %s13148_s7]]   ;;  %s13164_s7 = smov 32  }
0x15ba   :  { %v4627_v37 = vpop.f32.mrf.mxu0 }
0x15bb   :  { %v14504_v46 = vadd.f32 %v4633_v31, %v14329_v7  ;;  %v4628_v5 = vadd.f32 %v10397_v34, %v4627_v37 }
0x15bd   :  { %v14507_v17 = vadd.f32 %v4628_v5, %v14326_v35  ;;  %v4887_v4 = vsel %vm536_vm2, %v14504_v46, 0.0 }
0x15be   :  { %4888 = vadd.xlane.f32.xlu1 %v4887_v4  ;;  %v10461_v4 = vld [vmem:[%s13424_s11 + $0x88] sm:$0xff] }
0x15bf   :  { %12051 = vmatprep.mubr.msk.f32.mxu0 %vm536_vm2, %v14507_v17  ;;  %v4884_v36 = vsel %vm536_vm2, %v14507_v17, 0.0  ;;  %12108 = vmatprep.subr.msk.mxu1 %vm536_vm2, %v10461_v4 }
0x15c0   :  { %4885 = vadd.xlane.f32.xlu0 %v4884_v36  ;;  %12052 = vmatmul.mubr.msk.f32.gmra.mxu0 %vm536_vm2, %v14504_v46  ;;  %v10477_v36 = vld [vmem:[%s13424_s11 + $0xb8] sm:$0xff] }
0x15c8   :  { %v12050_v7 = vpop.f32.mrf.mxu0 }
0x15c9   :  { %v14518_v35 = vsub.f32 %v14467_v38, %v12050_v7  ;;  %v10460_v7 = vld [vmem:[%s13424_s11 + $0x80] sm:$0xff] }
0x15ca   :  { %v4722_v14 = vpop.f32.mrf.mxu0 }
0x15cb   :  { %v14521_v11 = vsub.f32 %v14470_v63, %v4722_v14  ;;  %v4746_v12 = vmul.f32 %v14518_v35, %v14518_v35  ;;  %v10459_v14 = vld [vmem:[%s13424_s11 + $0x78] sm:$0xff] }
0x15cd   :  { %v4745_v47 = vmul.f32 %v14521_v11, %v14521_v11 }
0x15cf   :  { %12066 = vmatprep.mubr.msk.f32.mxu0 %vm536_vm2, %v4745_v47  ;;  %v10458_v47 = vld [vmem:[%s13424_s11 + $0x70] sm:$0xff] }
0x15d0   :  { %12067 = vmatmul.mubr.msk.f32.vlgmr.msra.gmra.mxu0 %vm536_vm2, %v4746_v12  ;;  %v10474_v12 = vld [vmem:[%s13424_s11 + $0xa0] sm:$0xff] }
0x15d1   :  { %12091 = vmatpush3.xpose.msk.msra.mxu0 %vm536_vm2, %v10445_v60  ;;  %v10473_v60 = vld [vmem:[%s13424_s11 + $0x98] sm:$0xff] }
0x15d2   :  { %12092 = vmatprep.subr.msk.mxu0 %vm536_vm2, %v10444_v9 }
0x15d5   :  { %12093 = vmatpush3.xpose.msk.msra.mxu0 %vm536_vm2, %v10444_v9  ;;  %v10472_v9 = vld [vmem:[%s13424_s11 + $0x90] sm:$0xff] }
0x15d6   :  { %12094 = vmatprep.subr.msk.mxu0 %vm536_vm2, %v10443_v28 }
0x15d9   :  { %12095 = vmatpush3.xpose.msk.msra.mxu0 %vm536_vm2, %v10443_v28  ;;  %v10509_v28 = vld [vmem:[%s13520_s2 + $0xb8] sm:$0xff] }
0x15da   :  { %12096 = vmatprep.subr.msk.mxu0 %vm536_vm2, %v10442_v8 }
0x15dd   :  { %12097 = vmatpush3.xpose.msk.msra.mxu0 %vm536_vm2, %v10442_v8 }
0x15de   :  { %12098 = vmatprep.subr.msk.mxu0 %vm536_vm2, %v10441_v45 }
0x15e1   :  { %12099 = vmatpush3.xpose.msk.msra.mxu0 %vm536_vm2, %v10441_v45 }
0x15e2   :  { %12100 = vmatprep.subr.msk.mxu0 %vm536_vm2, %v10440_v23 }
0x15e5   :  { %12101 = vmatpush3.xpose.msk.msra.mxu0 %vm536_vm2, %v10440_v23 }
0x15e6   :  { %12126 = vmatprep.subr.msk.mxu0 %vm536_vm2, %v10477_v36 }
0x1620   :  { %v14565_v61 = vpop.xlane.xlu1 %4906 }
0x1621   :  { %v4915_v39 = vmul.f32 0.020833334, %v14565_v61 }
0x1622   :  { %v14567_v16 = vpop.xlane.xlu0 %4903 }
0x1623   :  { %v4914_v18 = vmul.f32 0.020833334, %v14567_v16 }
0x1625   :  { %v4918_v45 = vadd.f32 1e-06, %v4914_v18  ;;  %v14716_v18 = vld [vmem:[%s13271_s29] sm:$0xff] }
0x1647   :  { %v4889_v62 = vpop.xlane.xlu1 %4888 }
0x1648   :  { %v4893_v53 = vmul.f32 0.020833334, %v4889_v62  ;;  %v4919_v62 = vadd.f32 1e-06, %v4915_v39 }
0x1649   :  { %v4886_v41 = vpop.xlane.xlu0 %4885 }
0x164a   :  { %v14570_v20 = vsub.f32 %v14504_v46, %v4893_v53  ;;  %v4892_v3 = vmul.f32 0.020833334, %v4886_v41 }
0x164c   :  { %v14573_v51 = vsub.f32 %v14507_v17, %v4892_v3  ;;  %v4901_v21 = vmul.f32 %v14570_v20, %v14570_v20 }
0x164e   :  { %v4911_v40 = vsel %vm536_vm2, %v4901_v21, 0.0  ;;  %v4900_v59 = vmul.f32 %v14573_v51, %v14573_v51 }
0x164f   :  { %4912 = vadd.xlane.f32.xlu1 %v4911_v40 }
0x1650   :  { %v4908_v48 = vsel %vm536_vm2, %v4900_v59, 0.0 }
0x1651   :  { %4909 = vadd.xlane.f32.xlu0 %v4908_v48 }
0x1680   :  { %v12053_v30 = vpop.f32.mrf.mxu0 }
0x1681   :  { %v14582_v34 = vsub.f32 %v14504_v46, %v12053_v30 }
0x1682   :  { %v4732_v2 = vpop.f32.mrf.mxu0 }
0x1683   :  { %v14585_v52 = vsub.f32 %v14507_v17, %v4732_v2  ;;  %v4748_v19 = vmul.f32 %v14582_v34, %v14582_v34 }
0x1685   :  { %v4747_v32 = vmul.f32 %v14585_v52, %v14585_v52 }
0x1687   :  { %12069 = vmatprep.mubr.msk.f32.mxu0 %vm536_vm2, %v4747_v32 }
0x1688   :  { %12070 = vmatmul.mubr.msk.f32.gmra.mxu0 %vm536_vm2, %v4748_v19 }
0x1690   :  { %v12068_v0 = vpop.f32.mrf.mxu0 }
0x1691   :  { %v4833_v29 = vadd.f32 1e-06, %v12068_v0 }
0x1692   :  { %v4827_v10 = vpop.f32.mrf.mxu0 }
0x1693   :  { %12899 = vrsqrt.f32 %v4833_v29  ;;  %v4828_v54 = vadd.f32 1e-06, %v4827_v10 }
0x1695   :  { %12901 = vrsqrt.f32 %v4828_v54 }
0x1696   :  { %12903 = vrsqrt.f32 %v4918_v45 }
0x16a0   :  { %v12900_v43 = vpop.eup %12899 }
0x16a1   :  { %v4851_v15 = vmul.f32 %v12900_v43, %v14518_v35  ;;  %v10476_v35 = vld [vmem:[%s13424_s11 + $0xb0] sm:$0xff]  ;;  %v10422_v43 = vld [vmem:[%s13459_s23 + $0x1] ss:$0 sm:$0xff]  ;;  %s10129_s23 = sld [smem:[%s15876_s0 + %s13157_s15]]  }
0x16a2   :  { %v12902_v50 = vpop.eup %12901 }
0x16a3   :  { %v4850_v58 = vmul.f32 %v12902_v50, %v14521_v11  ;;  %v4861_v55 = vmul.f32 %v14595_v49, %v4851_v15  ;;  %v10475_v11 = vld [vmem:[%s13424_s11 + $0xa8] sm:$0xff]  ;;  %v12904_v16 = vpop.eup %12903  ;;  %s10133_s11 = sld [smem:[%s15876_s0 + %s13156_s9]]  }
0x16a4   :  { %v4926_v32 = vmul.f32 %v12904_v16, %v14495_v26  ;;  %v10423_v26 = vld [vmem:[%s13467_s27 + $0x1] ss:$0 sm:$0xff]  ;;  %s13158_s27 = smov 36  }
0x16a5   :  { %v4860_v31 = vmul.f32 %v14595_v49, %v4850_v58  ;;  %v4871_v5 = vadd.f32 %v14600_v22, %v4861_v55 }
0x16a6   :  { %v4936_v58 = vmul.f32 %v10422_v43, %v4926_v32 }
0x16a7   :  { %v4870_v37 = vadd.f32 %v14600_v22, %v4860_v31 }
0x16a9   :  { %12084 = vmatprep.mubr.msk.f32.mxu1 %vm536_vm2, %v4870_v37  ;;  %12102 = vmatprep.mubr.msk.f32.mxu0 %vm536_vm2, %v4870_v37 }
0x16aa   :  { %12085 = vmatmul.mubr.msk.f32.vlgmr.msra.gmra.mxu1 %vm536_vm2, %v4871_v5  ;;  %12103 = vmatmul.mubr.msk.f32.vlgmr.msra.gmra.mxu0 %vm536_vm2, %v4871_v5  ;;  %v10492_v5 = vld [vmem:[%s13520_s2 + $0x80] sm:$0xff] }
0x16ab   :  { %12109 = vmatpush3.xpose.msk.msra.mxu1 %vm536_vm2, %v10461_v4  ;;  %12127 = vmatpush3.xpose.msk.msra.mxu0 %vm536_vm2, %v10477_v36  ;;  %v10508_v4 = vld [vmem:[%s13520_s2 + $0xb0] sm:$0xff] }
0x16ac   :  { %12110 = vmatprep.subr.msk.mxu1 %vm536_vm2, %v10460_v7  ;;  %12128 = vmatprep.subr.msk.mxu0 %vm536_vm2, %v10476_v35 }
0x16af   :  { %12111 = vmatpush3.xpose.msk.msra.mxu1 %vm536_vm2, %v10460_v7  ;;  %12129 = vmatpush3.xpose.msk.msra.mxu0 %vm536_vm2, %v10476_v35 }
0x16b0   :  { %12112 = vmatprep.subr.msk.mxu1 %vm536_vm2, %v10459_v14  ;;  %12130 = vmatprep.subr.msk.mxu0 %vm536_vm2, %v10475_v11 }
0x16b3   :  { %12113 = vmatpush3.xpose.msk.msra.mxu1 %vm536_vm2, %v10459_v14  ;;  %12131 = vmatpush3.xpose.msk.msra.mxu0 %vm536_vm2, %v10475_v11  ;;  %v10491_v14 = vld [vmem:[%s13520_s2 + $0x78] sm:$0xff]  ;;  %v10507_v11 = vld [vmem:[%s13520_s2 + $0xa8] sm:$0xff] }
0x16b4   :  { %12114 = vmatprep.subr.msk.mxu1 %vm536_vm2, %v10458_v47  ;;  %12132 = vmatprep.subr.msk.mxu0 %vm536_vm2, %v10474_v12 }
0x16b7   :  { %12115 = vmatpush3.xpose.msk.msra.mxu1 %vm536_vm2, %v10458_v47  ;;  %12133 = vmatpush3.xpose.msk.msra.mxu0 %vm536_vm2, %v10474_v12 }
0x16b8   :  { %12116 = vmatprep.subr.msk.mxu1 %vm536_vm2, %v10457_v1  ;;  %12134 = vmatprep.subr.msk.mxu0 %vm536_vm2, %v10473_v60 }
0x16bb   :  { %12117 = vmatpush3.xpose.msk.msra.mxu1 %vm536_vm2, %v10457_v1  ;;  %12135 = vmatpush3.xpose.msk.msra.mxu0 %vm536_vm2, %v10473_v60  ;;  %v10490_v1 = vld [vmem:[%s13520_s2 + $0x70] sm:$0xff]  ;;  %v10506_v60 = vld [vmem:[%s13520_s2 + $0xa0] sm:$0xff] }
0x16bc   :  { %12118 = vmatprep.subr.msk.mxu1 %vm536_vm2, %v10456_v27  ;;  %12136 = vmatprep.subr.msk.mxu0 %vm536_vm2, %v10472_v9 }
0x16bf   :  { %12119 = vmatpush3.xpose.msk.msra.mxu1 %vm536_vm2, %v10456_v27  ;;  %12137 = vmatpush3.xpose.msk.msra.mxu0 %vm536_vm2, %v10472_v9  ;;  %v10489_v27 = vld [vmem:[%s13520_s2 + $0x68] sm:$0xff]  ;;  %v10505_v9 = vld [vmem:[%s13520_s2 + $0x98] sm:$0xff] }
0x16c0   :  { %12144 = vmatprep.subr.msk.mxu1 %vm536_vm2, %v10493_v25  ;;  %12162 = vmatprep.subr.msk.mxu0 %vm536_vm2, %v10509_v28 }
0x16d8   :  { %v4913_v13 = vpop.xlane.xlu1 %4912 }
0x16d9   :  { %v4917_v53 = vmul.f32 0.020833334, %v4913_v13 }
0x16da   :  { %v4910_v8 = vpop.xlane.xlu0 %4909 }
0x16db   :  { %v4916_v23 = vmul.f32 0.020833334, %v4910_v8  ;;  %v4921_v48 = vadd.f32 1e-06, %v4917_v53 }
0x16dd   :  { %v4920_v21 = vadd.f32 1e-06, %v4916_v23 }
0x1748   :  { %v12071_v41 = vpop.f32.mrf.mxu0 }
0x1749   :  { %v4843_v3 = vadd.f32 1e-06, %v12071_v41 }
0x174a   :  { %v4837_v40 = vpop.f32.mrf.mxu0 }
0x174b   :  { %12905 = vrsqrt.f32 %v4843_v3  ;;  %v4838_v59 = vadd.f32 1e-06, %v4837_v40 }
0x174c   :  { %12907 = vrsqrt.f32 %v4919_v62 }
0x174d   :  { %12909 = vrsqrt.f32 %v4838_v59 }
0x174e   :  { %12911 = vrsqrt.f32 %v4920_v21 }
0x174f   :  { %12913 = vrsqrt.f32 %v4921_v48 }
0x1758   :  { %v12906_v61 = vpop.eup %12905 }
0x1759   :  { %v12908_v30 = vpop.eup %12907  ;;  %v4853_v2 = vmul.f32 %v12906_v61, %v14582_v34 }
0x175a   :  { %v12910_v19 = vpop.eup %12909  ;;  %v4927_v10 = vmul.f32 %v12908_v30, %v14492_v42  ;;  %v4946_v42 = vadd.f32 %v10423_v26, %v4936_v58 }
0x175b   :  { %v12912_v0 = vpop.eup %12911  ;;  %v4852_v29 = vmul.f32 %v12910_v19, %v14585_v52  ;;  %v4863_v54 = vmul.f32 %v14595_v49, %v4853_v2 }
0x175c   :  { %v12914_v15 = vpop.eup %12913  ;;  %v4928_v55 = vmul.f32 %v12912_v0, %v14573_v51  ;;  %v4937_v37 = vmul.f32 %v10422_v43, %v4927_v10 }
0x175d   :  { %v4862_v50 = vmul.f32 %v14595_v49, %v4852_v29  ;;  %v4873_v34 = vadd.f32 %v14600_v22, %v4863_v54  ;;  %v4929_v52 = vmul.f32 %v12914_v15, %v14570_v20 }
0x175e   :  { %v4938_v51 = vmul.f32 %v10422_v43, %v4928_v55  ;;  %v4947_v49 = vadd.f32 %v10423_v26, %v4937_v37 }
0x175f   :  { %v4872_v31 = vadd.f32 %v14600_v22, %v4862_v50  ;;  %v4939_v22 = vmul.f32 %v10422_v43, %v4929_v52 }
0x1760   :  { %v4948_v20 = vadd.f32 %v10423_v26, %v4938_v51 }
0x1761   :  { %12087 = vmatprep.mubr.msk.f32.mxu1 %vm536_vm2, %v4872_v31  ;;  %12105 = vmatprep.mubr.msk.f32.mxu0 %vm536_vm2, %v4872_v31  ;;  %v4949_v36 = vadd.f32 %v10423_v26, %v4939_v22 }
0x1762   :  { %12088 = vmatmul.mubr.msk.f32.gmra.mxu1 %vm536_vm2, %v4873_v34  ;;  %12106 = vmatmul.mubr.msk.f32.gmra.mxu0 %vm536_vm2, %v4873_v34 }
0x1763   :  { %12120 = vmatprep.mubr.msk.f32.mxu1 %vm536_vm2, %v4946_v42  ;;  %12138 = vmatprep.mubr.msk.f32.mxu0 %vm536_vm2, %v4946_v42 }
0x1766   :  { %12121 = vmatmul.mubr.msk.f32.vlgmr.msra.gmra.mxu1 %vm536_vm2, %v4947_v49  ;;  %12139 = vmatmul.mubr.msk.f32.vlgmr.msra.gmra.mxu0 %vm536_vm2, %v4947_v49 }
0x1767   :  { %12145 = vmatpush3.xpose.msk.msra.mxu1 %vm536_vm2, %v10493_v25  ;;  %12163 = vmatpush3.xpose.msk.msra.mxu0 %vm536_vm2, %v10509_v28  ;;  %v10488_v25 = vld [vmem:[%s13520_s2 + $0x60] sm:$0xff]  ;;  %v10504_v28 = vld [vmem:[%s13520_s2 + $0x90] sm:$0xff] }
0x1768   :  { %12123 = vmatprep.mubr.msk.f32.mxu1 %vm536_vm2, %v4948_v20  ;;  %12141 = vmatprep.mubr.msk.f32.mxu0 %vm536_vm2, %v4948_v20 }
0x1769   :  { %12146 = vmatprep.subr.msk.mxu1 %vm536_vm2, %v10492_v5  ;;  %12164 = vmatprep.subr.msk.mxu0 %vm536_vm2, %v10508_v4 }
0x176a   :  { %v12086_v7 = vpop.f32.mrf.mxu1  ;;  %v12104_v35 = vpop.f32.mrf.mxu0  ;;  %12124 = vmatmul.mubr.msk.f32.gmra.mxu1 %vm536_vm2, %v4949_v36  ;;  %12142 = vmatmul.mubr.msk.f32.gmra.mxu0 %vm536_vm2, %v4949_v36 }
0x176b   :  { %12147 = vmatpush3.xpose.msk.msra.mxu1 %vm536_vm2, %v10492_v5  ;;  %12165 = vmatpush3.xpose.msk.msra.mxu0 %vm536_vm2, %v10508_v4 }
0x176c   :  { %12156 = vmatprep.mubr.msk.f32.mxu1 %vm536_vm2, %v4946_v42  ;;  %12174 = vmatprep.mubr.msk.f32.mxu0 %vm536_vm2, %v4946_v42  ;;  %v5053_v47 = vpop.f32.mrf.mxu1  ;;  %v5163_v12 = vpop.f32.mrf.mxu0 }
0x176d   :  { %5634 = vxpose.xlu0.b32.start [1/2] (short) (narrow) %v5053_v47, 48  ;;  %6125 = vxpose.xlu1.b32.start [1/2] (short) (narrow) %v5163_v12, 48 }
0x176e   :  { %12148 = vmatprep.subr.msk.mxu1 %vm536_vm2, %v10491_v14  ;;  %12166 = vmatprep.subr.msk.mxu0 %vm536_vm2, %v10507_v11 }
0x176f   :  { %12149 = vmatpush3.xpose.msk.msra.mxu1 %vm536_vm2, %v10491_v14  ;;  %12167 = vmatpush3.xpose.msk.msra.mxu0 %vm536_vm2, %v10507_v11 }
0x1770   :  { %12150 = vmatprep.subr.msk.mxu1 %vm536_vm2, %v10490_v1  ;;  %12168 = vmatprep.subr.msk.mxu0 %vm536_vm2, %v10506_v60 }
0x1771   :  { %5635 = vxpose.xlu0.b32.end [2/2] (short) (narrow) %v12086_v7, 48  ;;  %6126 = vxpose.xlu1.b32.end [2/2] (short) (narrow) %v12104_v35, 48 }
0x1773   :  { %12151 = vmatpush3.xpose.msk.msra.mxu1 %vm536_vm2, %v10490_v1  ;;  %12169 = vmatpush3.xpose.msk.msra.mxu0 %vm536_vm2, %v10506_v60 }
0x1774   :  { %12152 = vmatprep.subr.msk.mxu1 %vm536_vm2, %v10489_v27  ;;  %12170 = vmatprep.subr.msk.mxu0 %vm536_vm2, %v10505_v9 }
0x1777   :  { %12153 = vmatpush3.xpose.msk.msra.mxu1 %vm536_vm2, %v10489_v27  ;;  %12171 = vmatpush3.xpose.msk.msra.mxu0 %vm536_vm2, %v10505_v9 }
0x1778   :  { %12154 = vmatprep.subr.msk.mxu1 %vm536_vm2, %v10488_v25  ;;  %12172 = vmatprep.subr.msk.mxu0 %vm536_vm2, %v10504_v28 }
0x177b   :  { %12155 = vmatpush3.xpose.msk.msra.mxu1 %vm536_vm2, %v10488_v25  ;;  %12173 = vmatpush3.xpose.msk.msra.mxu0 %vm536_vm2, %v10504_v28 }
0x177e   :  { %12157 = vmatmul.mubr.msk.f32.vlgmr.msra.gmra.mxu1 %vm536_vm2, %v4947_v49  ;;  %12175 = vmatmul.mubr.msk.f32.vlgmr.msra.gmra.mxu0 %vm536_vm2, %v4947_v49 }
0x177f   :  { %12159 = vmatprep.mubr.msk.f32.mxu1 %vm536_vm2, %v4948_v20  ;;  %12177 = vmatprep.mubr.msk.f32.mxu0 %vm536_vm2, %v4948_v20 }
0x1782   :  { %12160 = vmatmul.mubr.msk.f32.gmra.mxu1 %vm536_vm2, %v4949_v36  ;;  %12178 = vmatmul.mubr.msk.f32.gmra.mxu0 %vm536_vm2, %v4949_v36 }
0x1783   :  { %12226 = vmatprep.mubr.msk.f32.mxu0 %vm536_vm2, %v14716_v18 }
0x17e9   :  { %v5650_v8 = vpop.trf.xlu0  ;;  %v6141_v43 = vpop.trf.xlu1 }
0x17ea   :  { %12184 = vmatprep.mubr.msk.f32.mxu1 %vm1555_vm3, %v5650_v8 }
0x17ed   :  { %v5651_v39 = vpop.trf.xlu0  ;;  %v6142_v34 = vpop.trf.xlu1 }
0x17f1   :  { %v5652_v45 = vpop.trf.xlu0  ;;  %v6143_v42 = vpop.trf.xlu1 }
0x17f5   :  { %v5653_v62 = vpop.trf.xlu0  ;;  %v6144_v49 = vpop.trf.xlu1 }
0x17f9   :  { %v5654_v3 = vpop.trf.xlu0  ;;  %v6145_v22 = vpop.trf.xlu1 }
0x17fd   :  { %v5655_v21 = vpop.trf.xlu0  ;;  %v6146_v20 = vpop.trf.xlu1 }
0x1822   :  { %v14721_v13 = vpop.f32.mrf.mxu1  ;;  %v14749_v50 = vpop.f32.mrf.mxu0 }
0x1824   :  { %v14723_v23 = vpop.f32.mrf.mxu1  ;;  %v14759_v31 = vpop.f32.mrf.mxu0 }
0x1826   :  { %v12122_v53 = vpop.f32.mrf.mxu1  ;;  %v12140_v52 = vpop.f32.mrf.mxu0 }
0x1827   :  { %12180 = vmatprep.subr.mxu1 %v12122_v53 }
0x1828   :  { %v5285_v41 = vpop.f32.mrf.mxu1  ;;  %12181 = vmatpush3.msra.mxu1 %v12122_v53  ;;  %v5395_v51 = vpop.f32.mrf.mxu0 }
0x1829   :  { %12182 = vmatprep.subr.mxu1 %v5285_v41 }
0x182a   :  { %12183 = vmatpush3.msra.mxu1 %v5285_v41  ;;  %v14732_v40 = vpop.f32.mrf.mxu1 }
0x182b   :  { %12185 = vmatmul.mubr.msk.f32.vlgmr.msra.gmra.mxu1 %vm1555_vm3, %v5651_v39 }
0x182c   :  { %12187 = vmatprep.mubr.msk.f32.mxu1 %vm1555_vm3, %v5652_v45  ;;  %v14734_v59 = vpop.f32.mrf.mxu1 }
0x182f   :  { %12188 = vmatmul.mubr.msk.f32.gmra.mxu1 %vm1555_vm3, %v5653_v62 }
0x1830   :  { %12190 = vmatprep.mubr.msk.f32.mxu1 %vm1555_vm3, %v5654_v3 }
0x1833   :  { %12191 = vmatmul.mubr.msk.f32.gmra.mxu1 %vm1555_vm3, %v5655_v21 }
0x1834   :  { %12205 = vmatprep.mubr.msk.f32.mxu1 %vm536_vm2, %v14716_v18 }
0x183e   :  { %v14736_v48 = vpop.f32.mrf.mxu1 }
0x1840   :  { %v14738_v16 = vpop.f32.mrf.mxu1 }
0x1842   :  { %v14740_v61 = vpop.f32.mrf.mxu1 }
0x1844   :  { %v14742_v30 = vpop.f32.mrf.mxu1 }
0x18eb   :  { %v12186_v2 = vpop.f32.mrf.mxu1 }
0x18ec   :  { %v14762_v26 = vmul.f32 0.14433756, %v12186_v2 }
0x18ed   :  { %v5750_v32 = vpop.f32.mrf.mxu1 }
0x18ee   :  { %v14766_v37 = vmul.f32 0.14433756, %v5750_v32 }
0x18ef   :  { %v12189_v19 = vpop.f32.mrf.mxu1 }
0x18f0   :  { %v14752_v58 = vmul.f32 0.14433756, %v12189_v19 }
0x18f1   :  { %v5760_v0 = vpop.f32.mrf.mxu1 }
0x18f2   :  { %v14756_v55 = vmul.f32 0.14433756, %v5760_v0 }
0x18f3   :  { %v12192_v29 = vpop.f32.mrf.mxu1 }
0x18f4   :  { %v14744_v10 = vmul.f32 0.14433756, %v12192_v29 }
0x18f5   :  { %v5770_v54 = vpop.f32.mrf.mxu1 }
0x18f6   :  { %v14746_v15 = vmul.f32 0.14433756, %v5770_v54  ;;  %12193 = vmatprep.subr.mxu1 %v14744_v10 }
0x18f7   :  { %12194 = vmatpush3.msra.mxu1 %v14744_v10 }
0x18f8   :  { %12195 = vmatprep.subr.mxu1 %v14746_v15 }
0x18f9   :  { %12196 = vmatpush3.msra.mxu1 %v14746_v15 }
0x18fa   :  { %12197 = vmatprep.subr.mxu1 %v14752_v58 }
0x18fb   :  { %12198 = vmatpush3.msra.mxu1 %v14752_v58 }
0x18fc   :  { %12199 = vmatprep.subr.mxu1 %v14756_v55 }
0x18fd   :  { %12200 = vmatpush3.msra.mxu1 %v14756_v55 }
0x18fe   :  { %12201 = vmatprep.subr.mxu1 %v14762_v26 }
0x18ff   :  { %12202 = vmatpush3.msra.mxu1 %v14762_v26 }
0x1900   :  { %12203 = vmatprep.subr.mxu1 %v14766_v37 }
0x1901   :  { %12204 = vmatpush3.msra.mxu1 %v14766_v37 }
0x1902   :  { %12206 = vmatmul.mubr.msk.f32.vlgmr.msra.gmra.mxu1 %vm536_vm2, %v14447_v44  ;;  %12235 = vmatprep.subr.mxu1 %v12140_v52 }
0x1903   :  { %12236 = vmatpush3.msra.mxu1 %v12140_v52  ;;  %12208 = vmatprep.mubr.msk.f32.mxu1 %vm536_vm2, %v14442_v56 }
0x1904   :  { %12237 = vmatprep.subr.mxu1 %v5395_v51 }
0x1905   :  { %12238 = vmatpush3.msra.mxu1 %v5395_v51 }
0x1906   :  { %12209 = vmatmul.mubr.msk.f32.gmra.mxu1 %vm536_vm2, %v14437_v33 }
0x1907   :  { %12211 = vmatprep.mubr.msk.f32.mxu1 %vm536_vm2, %v14432_v6 }
0x190a   :  { %12212 = vmatmul.mubr.msk.f32.gmra.mxu1 %vm536_vm2, %v14428_v24 }
0x190b   :  { %12239 = vmatprep.mubr.msk.f32.mxu1 %vm1555_vm3, %v6141_v43 }
0x190e   :  { %12240 = vmatmul.mubr.msk.f32.vlgmr.msra.gmra.mxu1 %vm1555_vm3, %v6142_v34 }
0x190f   :  { %12242 = vmatprep.mubr.msk.f32.mxu1 %vm1555_vm3, %v6143_v42 }
0x1912   :  { %12243 = vmatmul.mubr.msk.f32.gmra.mxu1 %vm1555_vm3, %v6144_v49 }
0x1913   :  { %12245 = vmatprep.mubr.msk.f32.mxu1 %vm1555_vm3, %v6145_v22 }
0x1916   :  { %12246 = vmatmul.mubr.msk.f32.gmra.mxu1 %vm1555_vm3, %v6146_v20 }
0x1917   :  { %12281 = vmatprep.mubr.msk.f32.mxu1 %vm536_vm2, %v14716_v18 }
0x19c2   :  { %v12207_v5 = vpop.f32.mrf.mxu1 }
0x19c3   :  { %v5883_v1 = vsel %vm536_vm2, %v12207_v5, 0.0 }
0x19c4   :  { %v5851_v4 = vpop.f32.mrf.mxu1 }
0x19c5   :  { %v5880_v60 = vsel %vm536_vm2, %v5851_v4, 0.0 }
0x19c6   :  { %v12210_v24 = vpop.f32.mrf.mxu1 }
0x19c7   :  { %v5889_v47 = vsel %vm536_vm2, %v12210_v24, 0.0  ;;  %v14855_v24 = vld [vmem:[%s13271_s29 + $0x28] sm:$0xff] }
0x19c8   :  { %v5861_v36 = vpop.f32.mrf.mxu1 }
0x19c9   :  { %v5886_v12 = vsel %vm536_vm2, %v5861_v36, 0.0  ;;  %v14873_v36 = vld [vmem:[%s13271_s29 + $0x10] sm:$0xff] }
0x19ca   :  { %v12213_v7 = vpop.f32.mrf.mxu1 }
0x19cb   :  { %v5895_v35 = vsel %vm536_vm2, %v12213_v7, 0.0 }
0x19cc   :  { %5896 = vadd.xlane.f32.xlu0 %v5895_v35  ;;  %v5871_v14 = vpop.f32.mrf.mxu1 }
0x19cd   :  { %v5892_v11 = vsel %vm536_vm2, %v5871_v14, 0.0  ;;  %v14882_v14 = vld [vmem:[%s13271_s29 + $0x18] sm:$0xff] }
0x19ce   :  { %5893 = vadd.xlane.f32.xlu1 %v5892_v11  ;;  %v12241_v9 = vpop.f32.mrf.mxu1  ;;  %v14887_v11 = vld [vmem:[%s13271_s29 + $0x20] sm:$0xff] }
0x19d0   :  { %5890 = vadd.xlane.f32.xlu0 %v5889_v47  ;;  %v6241_v62 = vpop.f32.mrf.mxu1 }
0x19d2   :  { %5887 = vadd.xlane.f32.xlu1 %v5886_v12  ;;  %v12244_v2 = vpop.f32.mrf.mxu1 }
0x19d4   :  { %5884 = vadd.xlane.f32.xlu0 %v5883_v1  ;;  %v6251_v34 = vpop.f32.mrf.mxu1 }
0x19d5   :  { %v14840_v4 = vmul.f32 0.14433756, %v6251_v34 }
0x19d6   :  { %5881 = vadd.xlane.f32.xlu1 %v5880_v60  ;;  %v12247_v51 = vpop.f32.mrf.mxu1 }
0x19d7   :  { %v14824_v22 = vmul.f32 0.14433756, %v12247_v51 }
0x19d8   :  { %v6261_v20 = vpop.f32.mrf.mxu1 }
0x19d9   :  { %v14828_v5 = vmul.f32 0.14433756, %v6261_v20 }
0x1a55   :  { %v5897_v27 = vpop.xlane.xlu0 %5896 }
0x1a56   :  { %v5903_v25 = vmul.f32 0.020833334, %v5897_v27 }
0x1a57   :  { %v5894_v28 = vpop.xlane.xlu1 %5893 }
0x1a58   :  { %v14797_v8 = vsub.f32 %v14744_v10, %v5903_v25  ;;  %v5902_v39 = vmul.f32 0.020833334, %v5894_v28 }
0x1a59   :  { %v5891_v45 = vpop.xlane.xlu0 %5890 }
0x1a5a   :  { %v14800_v53 = vsub.f32 %v14746_v15, %v5902_v39  ;;  %v5901_v41 = vmul.f32 0.020833334, %v5891_v45  ;;  %v5915_v3 = vmul.f32 %v14797_v8, %v14797_v8 }
0x1a5b   :  { %v5888_v21 = vpop.xlane.xlu1 %5887 }
0x1a5c   :  { %v14805_v32 = vsub.f32 %v14752_v58, %v5901_v41  ;;  %v5900_v19 = vmul.f32 0.020833334, %v5888_v21  ;;  %12214 = vmatprep.subr.mxu0 %v5915_v3  ;;  %v5914_v0 = vmul.f32 %v14800_v53, %v14800_v53 }
0x1a5d   :  { %12215 = vmatpush3.msra.mxu0 %v5915_v3  ;;  %v5885_v29 = vpop.xlane.xlu0 %5884 }
0x1a5e   :  { %v14810_v10 = vsub.f32 %v14756_v55, %v5900_v19  ;;  %v5899_v54 = vmul.f32 0.020833334, %v5885_v29  ;;  %12216 = vmatprep.subr.mxu0 %v5914_v0  ;;  %v5913_v43 = vmul.f32 %v14805_v32, %v14805_v32 }
0x1a5f   :  { %12217 = vmatpush3.msra.mxu0 %v5914_v0  ;;  %v5882_v15 = vpop.xlane.xlu1 %5881 }
0x1a60   :  { %v14815_v58 = vsub.f32 %v14762_v26, %v5899_v54  ;;  %v5898_v52 = vmul.f32 0.020833334, %v5882_v15  ;;  %12218 = vmatprep.subr.mxu0 %v5913_v43  ;;  %v5912_v42 = vmul.f32 %v14810_v10, %v14810_v10 }
0x1a61   :  { %12219 = vmatpush3.msra.mxu0 %v5913_v43 }
0x1a62   :  { %v14820_v55 = vsub.f32 %v14766_v37, %v5898_v52  ;;  %12220 = vmatprep.subr.mxu0 %v5912_v42  ;;  %v5911_v49 = vmul.f32 %v14815_v58, %v14815_v58  ;;  %v14836_v37 = vmul.f32 0.14433756, %v12244_v2 }
0x1a63   :  { %12221 = vmatpush3.msra.mxu0 %v5912_v42 }
0x1a64   :  { %12222 = vmatprep.subr.mxu0 %v5911_v49  ;;  %v5910_v26 = vmul.f32 %v14820_v55, %v14820_v55 }
0x1a65   :  { %12223 = vmatpush3.msra.mxu0 %v5911_v49 }
0x1a66   :  { %12224 = vmatprep.subr.mxu0 %v5910_v26 }
0x1a67   :  { %12225 = vmatpush3.msra.mxu0 %v5910_v26 }
0x1a68   :  { %12227 = vmatmul.mubr.msk.f32.vlgmr.msra.gmra.mxu0 %vm536_vm2, %v14447_v44  ;;  %12248 = vmatprep.subr.mxu0 %v14824_v22  ;;  %v14852_v44 = vmul.f32 0.14433756, %v6241_v62 }
0x1a69   :  { %12249 = vmatpush3.msra.mxu0 %v14824_v22  ;;  %12229 = vmatprep.mubr.msk.f32.mxu0 %vm536_vm2, %v14442_v56  ;;  %v14848_v56 = vmul.f32 0.14433756, %v12241_v9 }
0x1a6a   :  { %12250 = vmatprep.subr.mxu0 %v14828_v5 }
0x1a6b   :  { %12251 = vmatpush3.msra.mxu0 %v14828_v5 }
0x1a6c   :  { %12230 = vmatmul.mubr.msk.f32.gmra.mxu0 %vm536_vm2, %v14437_v33  ;;  %12252 = vmatprep.subr.mxu0 %v14836_v37  ;;  %v14868_v33 = vld [vmem:[%s13271_s29 + $0x8] sm:$0xff] }
0x1a6d   :  { %12253 = vmatpush3.msra.mxu0 %v14836_v37  ;;  %12232 = vmatprep.mubr.msk.f32.mxu0 %vm536_vm2, %v14432_v6  ;;  %v14863_v6 = vpop.f32.mrf.mxu0 }
0x1a6e   :  { %12254 = vmatprep.subr.mxu0 %v14840_v4 }
0x1a6f   :  { %12255 = vmatpush3.msra.mxu0 %v14840_v4  ;;  %v14877_v7 = vpop.f32.mrf.mxu0 }
0x1a70   :  { %12233 = vmatmul.mubr.msk.f32.gmra.mxu0 %vm536_vm2, %v14855_v24  ;;  %12256 = vmatprep.subr.mxu0 %v14848_v56 }
0x1a71   :  { %12257 = vmatpush3.msra.mxu0 %v14848_v56  ;;  %12260 = vmatprep.mubr.msk.f32.mxu0 %vm536_vm2, %v14716_v18  ;;  %v14879_v35 = vpop.f32.mrf.mxu0 }
0x1a72   :  { %12258 = vmatprep.subr.mxu0 %v14852_v44 }
0x1a73   :  { %12259 = vmatpush3.msra.mxu0 %v14852_v44  ;;  %v5615_v47 = vpop.f32.mrf.mxu0 }
0x1a74   :  { %12261 = vmatmul.mubr.msk.f32.vlgmr.msra.gmra.mxu0 %vm536_vm2, %v14868_v33 }
0x1a75   :  { %12263 = vmatprep.mubr.msk.f32.mxu0 %vm536_vm2, %v14873_v36  ;;  %v14894_v12 = vpop.f32.mrf.mxu0 }
0x1a77   :  { %v14896_v1 = vpop.f32.mrf.mxu0 }
0x1a78   :  { %12264 = vmatmul.mubr.msk.f32.gmra.mxu0 %vm536_vm2, %v14882_v14 }
0x1a79   :  { %12266 = vmatprep.mubr.msk.f32.mxu0 %vm536_vm2, %v14887_v11 }
0x1a7c   :  { %12267 = vmatmul.mubr.msk.f32.gmra.mxu0 %vm536_vm2, %v14855_v24 }
0x1a7d   :  { %12302 = vmatprep.mubr.msk.f32.mxu0 %vm536_vm2, %v5615_v47 }
0x1b28   :  { %v14898_v60 = vpop.f32.mrf.mxu0 }
0x1b2a   :  { %v14900_v27 = vpop.f32.mrf.mxu0 }
0x1b2c   :  { %v14902_v9 = vpop.f32.mrf.mxu0 }
0x1b2e   :  { %v14904_v25 = vpop.f32.mrf.mxu0 }
0x1b30   :  { %v14906_v28 = vpop.f32.mrf.mxu0 }
0x1b32   :  { %v14908_v39 = vpop.f32.mrf.mxu0 }
0x1b34   :  { %v12262_v45 = vpop.f32.mrf.mxu0 }
0x1b35   :  { %v6374_v43 = vsel %vm536_vm2, %v12262_v45, 0.0 }
0x1b36   :  { %v6342_v62 = vpop.f32.mrf.mxu0 }
0x1b37   :  { %v6371_v15 = vsel %vm536_vm2, %v6342_v62, 0.0 }
0x1b38   :  { %v12265_v41 = vpop.f32.mrf.mxu0 }
0x1b39   :  { %v6380_v29 = vsel %vm536_vm2, %v12265_v41, 0.0 }
0x1b3a   :  { %v6352_v3 = vpop.f32.mrf.mxu0 }
0x1b3b   :  { %v6377_v54 = vsel %vm536_vm2, %v6352_v3, 0.0 }
0x1b3c   :  { %v12268_v21 = vpop.f32.mrf.mxu0 }
0x1b3d   :  { %v6386_v2 = vsel %vm536_vm2, %v12268_v21, 0.0 }
0x1b3e   :  { %6387 = vadd.xlane.f32.xlu0 %v6386_v2  ;;  %v6362_v19 = vpop.f32.mrf.mxu0 }
0x1b3f   :  { %v6383_v0 = vsel %vm536_vm2, %v6362_v19, 0.0 }
0x1b40   :  { %6384 = vadd.xlane.f32.xlu1 %v6383_v0 }
0x1b42   :  { %6381 = vadd.xlane.f32.xlu0 %v6380_v29 }
0x1b44   :  { %6378 = vadd.xlane.f32.xlu1 %v6377_v54 }
0x1b46   :  { %6375 = vadd.xlane.f32.xlu0 %v6374_v43 }
0x1b48   :  { %6372 = vadd.xlane.f32.xlu1 %v6371_v15 }
0x1bc7   :  { %v6388_v34 = vpop.xlane.xlu0 %6387 }
0x1bc8   :  { %v6394_v52 = vmul.f32 0.020833334, %v6388_v34 }
0x1bc9   :  { %v6385_v42 = vpop.xlane.xlu1 %6384 }
0x1bca   :  { %v14917_v51 = vsub.f32 %v14824_v22, %v6394_v52  ;;  %v6393_v49 = vmul.f32 0.020833334, %v6385_v42 }
0x1bcb   :  { %v6382_v26 = vpop.xlane.xlu0 %6381 }
0x1bcc   :  { %v14920_v20 = vsub.f32 %v14828_v5, %v6393_v49  ;;  %v6392_v47 = vmul.f32 0.020833334, %v6382_v26  ;;  %v6406_v41 = vmul.f32 %v14917_v51, %v14917_v51 }
0x1bcd   :  { %v6379_v45 = vpop.xlane.xlu1 %6378 }
0x1bce   :  { %v14925_v3 = vsub.f32 %v14836_v37, %v6392_v47  ;;  %v6391_v62 = vmul.f32 0.020833334, %v6379_v45  ;;  %12269 = vmatprep.subr.mxu1 %v6406_v41  ;;  %v6405_v21 = vmul.f32 %v14920_v20, %v14920_v20 }
0x1bcf   :  { %12270 = vmatpush3.msra.mxu1 %v6406_v41  ;;  %v6376_v22 = vpop.xlane.xlu0 %6375 }
0x1bd0   :  { %v14930_v2 = vsub.f32 %v14840_v4, %v6391_v62  ;;  %v6390_v5 = vmul.f32 0.020833334, %v6376_v22  ;;  %12271 = vmatprep.subr.mxu1 %v6405_v21  ;;  %v6404_v19 = vmul.f32 %v14925_v3, %v14925_v3 }
0x1bd1   :  { %12272 = vmatpush3.msra.mxu1 %v6405_v21  ;;  %v6373_v0 = vpop.xlane.xlu1 %6372 }
0x1bd2   :  { %v14935_v37 = vsub.f32 %v14848_v56, %v6390_v5  ;;  %v6389_v29 = vmul.f32 0.020833334, %v6373_v0  ;;  %12273 = vmatprep.subr.mxu1 %v6404_v19  ;;  %v6403_v54 = vmul.f32 %v14930_v2, %v14930_v2 }
0x1bd3   :  { %12274 = vmatpush3.msra.mxu1 %v6404_v19 }
0x1bd4   :  { %v14940_v43 = vsub.f32 %v14852_v44, %v6389_v29  ;;  %12275 = vmatprep.subr.mxu1 %v6403_v54  ;;  %v6402_v4 = vmul.f32 %v14935_v37, %v14935_v37 }
0x1bd5   :  { %12276 = vmatpush3.msra.mxu1 %v6403_v54 }
0x1bd6   :  { %12277 = vmatprep.subr.mxu1 %v6402_v4  ;;  %v6401_v15 = vmul.f32 %v14940_v43, %v14940_v43 }
0x1bd7   :  { %12278 = vmatpush3.msra.mxu1 %v6402_v4 }
0x1bd8   :  { %12279 = vmatprep.subr.mxu1 %v6401_v15 }
0x1bd9   :  { %12280 = vmatpush3.msra.mxu1 %v6401_v15 }
0x1bda   :  { %12282 = vmatmul.mubr.msk.f32.vlgmr.msra.gmra.mxu1 %vm536_vm2, %v14868_v33 }
0x1bdb   :  { %12284 = vmatprep.mubr.msk.f32.mxu1 %vm536_vm2, %v14873_v36 }
0x1bde   :  { %12285 = vmatmul.mubr.msk.f32.gmra.mxu1 %vm536_vm2, %v14882_v14 }
0x1bdf   :  { %12287 = vmatprep.mubr.msk.f32.mxu1 %vm536_vm2, %v14887_v11 }
0x1be2   :  { %12288 = vmatmul.mubr.msk.f32.gmra.mxu1 %vm536_vm2, %v14855_v24 }
0x1be3   :  { %12317 = vmatprep.mubr.msk.f32.mxu1 %vm536_vm2, %v14738_v16 }
0x1c9a   :  { %v12283_v56 = vpop.f32.mrf.mxu1 }
0x1c9b   :  { %v6505_v16 = vsel %vm536_vm2, %v12283_v56, 0.0 }
0x1c9c   :  { %v6473_v44 = vpop.f32.mrf.mxu1 }
0x1c9d   :  { %v6502_v62 = vsel %vm536_vm2, %v6473_v44, 0.0 }
0x1c9e   :  { %v12286_v34 = vpop.f32.mrf.mxu1 }
0x1c9f   :  { %v6511_v41 = vsel %vm536_vm2, %v12286_v34, 0.0 }
0x1ca0   :  { %v6483_v52 = vpop.f32.mrf.mxu1 }
0x1ca1   :  { %v6508_v45 = vsel %vm536_vm2, %v6483_v52, 0.0 }
0x1ca2   :  { %v12289_v42 = vpop.f32.mrf.mxu1 }
0x1ca3   :  { %v6517_v49 = vsel %vm536_vm2, %v12289_v42, 0.0 }
0x1ca4   :  { %6518 = vadd.xlane.f32.xlu0 %v6517_v49  ;;  %v6493_v26 = vpop.f32.mrf.mxu1 }
0x1ca5   :  { %v6514_v47 = vsel %vm536_vm2, %v6493_v26, 0.0 }
0x1ca6   :  { %6515 = vadd.xlane.f32.xlu1 %v6514_v47 }
0x1ca8   :  { %6512 = vadd.xlane.f32.xlu0 %v6511_v41 }
0x1caa   :  { %6509 = vadd.xlane.f32.xlu1 %v6508_v45 }
0x1cac   :  { %6506 = vadd.xlane.f32.xlu0 %v6505_v16 }
0x1cae   :  { %6503 = vadd.xlane.f32.xlu1 %v6502_v62 }
0x1d2d   :  { %v6519_v21 = vpop.xlane.xlu0 %6518 }
0x1d2e   :  { %v6525_v22 = vmul.f32 0.020833334, %v6519_v21 }
0x1d2f   :  { %v6516_v5 = vpop.xlane.xlu1 %6515 }
0x1d30   :  { %v6531_v19 = vadd.f32 1e-05, %v6525_v22  ;;  %v6524_v0 = vmul.f32 0.020833334, %v6516_v5 }
0x1d31   :  { %v6513_v29 = vpop.xlane.xlu0 %6512 }
0x1d32   :  { %12915 = vrsqrt.f32 %v6531_v19  ;;  %v6530_v54 = vadd.f32 1e-05, %v6524_v0  ;;  %v6523_v4 = vmul.f32 0.020833334, %v6513_v29 }
0x1d33   :  { %v6510_v15 = vpop.xlane.xlu1 %6509 }
0x1d34   :  { %12917 = vrsqrt.f32 %v6530_v54  ;;  %v6529_v34 = vadd.f32 1e-05, %v6523_v4  ;;  %v6522_v52 = vmul.f32 0.020833334, %v6510_v15 }
0x1d35   :  { %v6507_v42 = vpop.xlane.xlu0 %6506 }
0x1d36   :  { %12919 = vrsqrt.f32 %v6529_v34  ;;  %v6528_v56 = vadd.f32 1e-05, %v6522_v52  ;;  %v6521_v49 = vmul.f32 0.020833334, %v6507_v42 }
0x1d37   :  { %v6504_v26 = vpop.xlane.xlu1 %6503 }
0x1d38   :  { %12921 = vrsqrt.f32 %v6528_v56  ;;  %v6527_v44 = vadd.f32 1e-05, %v6521_v49  ;;  %v6520_v47 = vmul.f32 0.020833334, %v6504_v26 }
0x1d3a   :  { %12923 = vrsqrt.f32 %v6527_v44  ;;  %v6526_v41 = vadd.f32 1e-05, %v6520_v47 }
0x1d3c   :  { %12925 = vrsqrt.f32 %v6526_v41 }
0x1d3f   :  { %v12916_v45 = vpop.eup %12915 }
0x1d40   :  { %v6543_v16 = vmul.f32 %v12916_v45, %v14917_v51 }
0x1d41   :  { %v12918_v62 = vpop.eup %12917 }
0x1d42   :  { %v6559_v21 = vsel %vm536_vm2, %v6543_v16, -inf  ;;  %v6542_v22 = vmul.f32 %v12918_v62, %v14920_v20 }
0x1d43   :  { %v12920_v5 = vpop.eup %12919  ;;  %6560 = vmax.xlane.f32.xlu0 %v6559_v21 }
0x1d44   :  { %v6556_v19 = vsel %vm536_vm2, %v6542_v22, -inf  ;;  %v6541_v0 = vmul.f32 %v12920_v5, %v14925_v3 }
0x1d45   :  { %v12922_v29 = vpop.eup %12921  ;;  %6557 = vmax.xlane.f32.xlu1 %v6556_v19 }
0x1d46   :  { %v6553_v54 = vsel %vm536_vm2, %v6541_v0, -inf  ;;  %v6540_v4 = vmul.f32 %v12922_v29, %v14930_v2 }
0x1d47   :  { %v12924_v15 = vpop.eup %12923  ;;  %6554 = vmax.xlane.f32.xlu0 %v6553_v54 }
0x1d48   :  { %v6550_v51 = vsel %vm536_vm2, %v6540_v4, -inf  ;;  %v6539_v34 = vmul.f32 %v12924_v15, %v14935_v37 }
0x1d49   :  { %v12926_v52 = vpop.eup %12925  ;;  %6551 = vmax.xlane.f32.xlu1 %v6550_v51 }
0x1d4a   :  { %v6547_v20 = vsel %vm536_vm2, %v6539_v34, -inf  ;;  %v6538_v42 = vmul.f32 %v12926_v52, %v14940_v43 }
0x1d4b   :  { %6548 = vmax.xlane.f32.xlu0 %v6547_v20 }
0x1d4c   :  { %v6544_v3 = vsel %vm536_vm2, %v6538_v42, -inf }
0x1d4d   :  { %6545 = vmax.xlane.f32.xlu1 %v6544_v3 }
0x1dcc   :  { %v6561_v56 = vpop.xlane.xlu0 %6560 }
0x1dcd   :  { %v6567_v49 = vsub.f32 %v6543_v16, %v6561_v56 }
0x1dce   :  { %v6558_v26 = vpop.xlane.xlu1 %6557 }
0x1dcf   :  { %v6578_v2 = vmul.f32 1.442695, %v6567_v49  ;;  %v6566_v44 = vsub.f32 %v6542_v22, %v6558_v26 }
0x1dd0   :  { %v6555_v47 = vpop.xlane.xlu0 %6554 }
0x1dd1   :  { %12927 = vpow2.f32 %v6578_v2  ;;  %v6576_v41 = vmul.f32 1.442695, %v6566_v44  ;;  %v6565_v45 = vsub.f32 %v6541_v0, %v6555_v47  ;;  %v6026_v2 = vsel %vm536_vm2, %v14906_v28, 0.0 }
0x1dd2   :  { %v6552_v37 = vpop.xlane.xlu1 %6551  ;;  %v6023_v44 = vsel %vm536_vm2, %v14908_v39, 0.0  ;;  %v6020_v47 = vsel %vm536_vm2, %v14902_v9, 0.0  ;;  %v6011_v28 = vsel %vm536_vm2, %v14900_v27, 0.0 }
0x1dd3   :  { %12929 = vpow2.f32 %v6576_v41  ;;  %v6574_v62 = vmul.f32 1.442695, %v6565_v45  ;;  %v6564_v21 = vsub.f32 %v6540_v4, %v6552_v37  ;;  %v6017_v41 = vsel %vm536_vm2, %v14904_v25, 0.0 }
0x1dd4   :  { %v6549_v5 = vpop.xlane.xlu0 %6548  ;;  %v6014_v45 = vsel %vm536_vm2, %v14898_v60, 0.0 }
0x1dd5   :  { %12931 = vpow2.f32 %v6574_v62  ;;  %v6572_v43 = vmul.f32 1.442695, %v6564_v21  ;;  %v6563_v19 = vsub.f32 %v6539_v34, %v6549_v5 }
0x1dd6   :  { %v6546_v29 = vpop.xlane.xlu1 %6545 }
0x1dd7   :  { %12933 = vpow2.f32 %v6572_v43  ;;  %v6570_v54 = vmul.f32 1.442695, %v6563_v19  ;;  %v6562_v15 = vsub.f32 %v6538_v42, %v6546_v29 }
0x1dd9   :  { %12935 = vpow2.f32 %v6570_v54  ;;  %v6568_v16 = vmul.f32 1.442695, %v6562_v15 }
0x1ddb   :  { %12937 = vpow2.f32 %v6568_v16 }
0x1dde   :  { %v12928_v22 = vpop.eup %12927 }
0x1ddf   :  { %v6595_v51 = vsel %vm536_vm2, %v12928_v22, 0.0 }
0x1de0   :  { %v12930_v52 = vpop.eup %12929  ;;  %6596 = vadd.xlane.f32.xlu0 %v6595_v51 }
0x1de1   :  { %v6592_v0 = vsel %vm536_vm2, %v12930_v52, 0.0 }
0x1de2   :  { %v12932_v20 = vpop.eup %12931  ;;  %6593 = vadd.xlane.f32.xlu1 %v6592_v0 }
0x1de3   :  { %v6589_v4 = vsel %vm536_vm2, %v12932_v20, 0.0 }
0x1de4   :  { %v12934_v3 = vpop.eup %12933  ;;  %6590 = vadd.xlane.f32.xlu0 %v6589_v4 }
0x1de5   :  { %v6586_v34 = vsel %vm536_vm2, %v12934_v3, 0.0 }
0x1de6   :  { %v14980_v56 = vpop.eup %12935  ;;  %6587 = vadd.xlane.f32.xlu1 %v6586_v34 }
0x1de7   :  { %v6583_v42 = vsel %vm536_vm2, %v14980_v56, 0.0 }
0x1de8   :  { %v14984_v49 = vpop.eup %12937  ;;  %6584 = vadd.xlane.f32.xlu0 %v6583_v42 }
0x1de9   :  { %v6580_v26 = vsel %vm536_vm2, %v14984_v49, 0.0 }
0x1dea   :  { %6581 = vadd.xlane.f32.xlu1 %v6580_v26 }
0x1dee   :  { %6027 = vadd.xlane.f32.xlu1 %v6026_v2 }
0x1df2   :  { %6024 = vadd.xlane.f32.xlu1 %v6023_v44 }
0x1df6   :  { %6021 = vadd.xlane.f32.xlu1 %v6020_v47 }
0x1dfa   :  { %6018 = vadd.xlane.f32.xlu1 %v6017_v41 }
0x1dfe   :  { %6015 = vadd.xlane.f32.xlu1 %v6014_v45 }
0x1e02   :  { %6012 = vadd.xlane.f32.xlu1 %v6011_v28 }
0x1e15   :  { %6819 = vxpose.xlu0.b32.start [1/2] (short) (narrow) %v14723_v23, 48 }
0x1e19   :  { %6820 = vxpose.xlu0.b32.end [2/2] (short) (narrow) %v14721_v13, 48 }
0x1e35   :  { %7311 = vxpose.xlu1.b32.start [1/2] (short) (narrow) %v14759_v31, 48 }
0x1e39   :  { %7312 = vxpose.xlu1.b32.end [2/2] (short) (narrow) %v14749_v50, 48 }
0x1e69   :  { %v6597_v9 = vpop.xlane.xlu0 %6596 }
0x1e6a   :  { %12939 = vrcp.f32 %v6597_v9 }
0x1e6b   :  { %v6594_v25 = vpop.xlane.xlu1 %6593 }
0x1e6c   :  { %12941 = vrcp.f32 %v6594_v25 }
0x1e6d   :  { %v6591_v39 = vpop.xlane.xlu0 %6590 }
0x1e6e   :  { %12943 = vrcp.f32 %v6591_v39 }
0x1e6f   :  { %v6588_v60 = vpop.xlane.xlu1 %6587 }
0x1e70   :  { %12945 = vrcp.f32 %v6588_v60 }
0x1e71   :  { %v6585_v37 = vpop.xlane.xlu0 %6584 }
0x1e72   :  { %12947 = vrcp.f32 %v6585_v37 }
0x1e73   :  { %v6582_v13 = vpop.xlane.xlu1 %6581 }
0x1e74   :  { %12949 = vrcp.f32 %v6582_v13 }
0x1e77   :  { %v12940_v23 = vpop.eup %12939  ;;  %v6028_v50 = vpop.xlane.xlu1 %6027 }
0x1e78   :  { %v6034_v31 = vmul.f32 0.020833334, %v6028_v50  ;;  %v6609_v27 = vmul.f32 %v12940_v23, %v12928_v22 }
0x1e79   :  { %v12942_v62 = vpop.eup %12941 }
0x1e7a   :  { %v6040_v21 = vadd.f32 1e-05, %v6034_v31  ;;  %10561 = vst.msk [vmem:[%s15007_s19 + $0x58] sm:$0xff] %vm536_vm2, %v6609_v27  ;;  %12290 = vmatprep.subr.msk.mxu0 %vm536_vm2, %v6609_v27  ;;  %v6607_v5 = vmul.f32 %v12942_v62, %v12930_v52 }
0x1e7b   :  { %v12944_v43 = vpop.eup %12943  ;;  %12291 = vmatpush3.xpose.msk.msra.mxu0 %vm536_vm2, %v6609_v27  ;;  %v6025_v19 = vpop.xlane.xlu1 %6024 }
0x1e7c   :  { %12951 = vrsqrt.f32 %v6040_v21  ;;  %v6033_v29 = vmul.f32 0.020833334, %v6025_v19  ;;  %10560 = vst.msk [vmem:[%s15007_s19 + $0x50] sm:$0xff] %vm536_vm2, %v6607_v5  ;;  %12292 = vmatprep.subr.msk.mxu0 %vm536_vm2, %v6607_v5  ;;  %v6605_v54 = vmul.f32 %v12944_v43, %v12932_v20 }
0x1e7d   :  { %v12946_v15 = vpop.eup %12945 }
0x1e7e   :  { %v6039_v16 = vadd.f32 1e-05, %v6033_v29  ;;  %10559 = vst.msk [vmem:[%s15007_s19 + $0x48] sm:$0xff] %vm536_vm2, %v6605_v54  ;;  %v6603_v22 = vmul.f32 %v12946_v15, %v12934_v3 }
0x1e7f   :  { %v12948_v51 = vpop.eup %12947  ;;  %12293 = vmatpush3.xpose.msk.msra.mxu0 %vm536_vm2, %v6607_v5  ;;  %v6022_v52 = vpop.xlane.xlu1 %6021 }
0x1e80   :  { %12953 = vrsqrt.f32 %v6039_v16  ;;  %v6032_v0 = vmul.f32 0.020833334, %v6022_v52  ;;  %12294 = vmatprep.subr.msk.mxu0 %vm536_vm2, %v6605_v54  ;;  %10558 = vst.msk [vmem:[%s15007_s19 + $0x40] sm:$0xff] %vm536_vm2, %v6603_v22  ;;  %v6601_v4 = vmul.f32 %v12948_v51, %v14980_v56 }
0x1e81   :  { %v12950_v34 = vpop.eup %12949 }
0x1e82   :  { %v6038_v20 = vadd.f32 1e-05, %v6032_v0  ;;  %10557 = vst.msk [vmem:[%s15007_s19 + $0x38] sm:$0xff] %vm536_vm2, %v6601_v4  ;;  %v6599_v42 = vmul.f32 %v12950_v34, %v14984_v49 }
0x1e83   :  { %12295 = vmatpush3.xpose.msk.msra.mxu0 %vm536_vm2, %v6605_v54  ;;  %v6019_v3 = vpop.xlane.xlu1 %6018 }
0x1e84   :  { %12955 = vrsqrt.f32 %v6038_v20  ;;  %v6031_v26 = vmul.f32 0.020833334, %v6019_v3  ;;  %12296 = vmatprep.subr.msk.mxu0 %vm536_vm2, %v6603_v22  ;;  %10556 = vst.msk [vmem:[%s15007_s19 + $0x30] sm:$0xff] %vm536_vm2, %v6599_v42 }
0x1e86   :  { %v6037_v2 = vadd.f32 1e-05, %v6031_v26 }
0x1e87   :  { %12297 = vmatpush3.xpose.msk.msra.mxu0 %vm536_vm2, %v6603_v22  ;;  %v6016_v44 = vpop.xlane.xlu1 %6015 }
0x1e88   :  { %12957 = vrsqrt.f32 %v6037_v2  ;;  %v6030_v56 = vmul.f32 0.020833334, %v6016_v44  ;;  %12298 = vmatprep.subr.msk.mxu0 %vm536_vm2, %v6601_v4 }
0x1e89   :  { %v12952_v47 = vpop.eup %12951 }
0x1e8a   :  { %v6036_v41 = vadd.f32 1e-05, %v6030_v56  ;;  %v6052_v49 = vmul.f32 %v12952_v47, %v14797_v8 }
0x1e8b   :  { %12299 = vmatpush3.xpose.msk.msra.mxu0 %vm536_vm2, %v6601_v4  ;;  %v6013_v45 = vpop.xlane.xlu1 %6012 }
0x1e8c   :  { %12959 = vrsqrt.f32 %v6036_v41  ;;  %v6029_v28 = vmul.f32 0.020833334, %v6013_v45  ;;  %12300 = vmatprep.subr.msk.mxu0 %vm536_vm2, %v6599_v42  ;;  %v6068_v9 = vsel %vm536_vm2, %v6052_v49, -inf }
0x1e8d   :  { %v12954_v25 = vpop.eup %12953  ;;  %6069 = vmax.xlane.f32.xlu0 %v6068_v9 }
0x1e8e   :  { %v6035_v39 = vadd.f32 1e-05, %v6029_v28  ;;  %v6051_v60 = vmul.f32 %v12954_v25, %v14800_v53 }
0x1e8f   :  { %12301 = vmatpush3.xpose.msk.msra.mxu0 %vm536_vm2, %v6599_v42 }
0x1e90   :  { %12961 = vrsqrt.f32 %v6035_v39  ;;  %12320 = vmatprep.subr.mxu0 %v14732_v40  ;;  %v6065_v8 = vsel %vm536_vm2, %v6051_v60, -inf }
0x1e91   :  { %v12956_v37 = vpop.eup %12955  ;;  %v6835_v13 = vpop.trf.xlu0  ;;  %6066 = vmax.xlane.f32.xlu1 %v6065_v8 }
0x1e92   :  { %12303 = vmatmul.mubr.msk.f32.vlgmr.msra.gmra.mxu0 %vm536_vm2, %v14879_v35  ;;  %v6050_v23 = vmul.f32 %v12956_v37, %v14805_v32 }
0x1e93   :  { %12321 = vmatpush3.msra.mxu0 %v14732_v40  ;;  %12324 = vmatprep.mubr.msk.f32.mxu0 %vm1555_vm3, %v6835_v13 }
0x1e94   :  { %12322 = vmatprep.subr.mxu0 %v14734_v59  ;;  %v6062_v53 = vsel %vm536_vm2, %v6050_v23, -inf }
0x1e95   :  { %v12958_v50 = vpop.eup %12957  ;;  %v6836_v31 = vpop.trf.xlu0  ;;  %12323 = vmatpush3.msra.mxu0 %v14734_v59  ;;  %6063 = vmax.xlane.f32.xlu0 %v6062_v53 }
0x1e96   :  { %12325 = vmatmul.mubr.msk.f32.vlgmr.msra.gmra.mxu0 %vm1555_vm3, %v6836_v31  ;;  %v6049_v27 = vmul.f32 %v12958_v50, %v14810_v10 }
0x1e98   :  { %v6059_v35 = vsel %vm536_vm2, %v6049_v27, -inf }
0x1e99   :  { %v12960_v32 = vpop.eup %12959  ;;  %v6837_v62 = vpop.trf.xlu0  ;;  %6060 = vmax.xlane.f32.xlu0 %v6059_v35 }
0x1e9a   :  { %v6048_v40 = vmul.f32 %v12960_v32, %v14815_v58  ;;  %12327 = vmatprep.mubr.msk.f32.mxu0 %vm1555_vm3, %v6837_v62 }
0x1e9c   :  { %v6056_v21 = vsel %vm536_vm2, %v6048_v40, -inf }
0x1e9d   :  { %v12962_v5 = vpop.eup %12961  ;;  %v6838_v43 = vpop.trf.xlu0  ;;  %6057 = vmax.xlane.f32.xlu0 %v6056_v21 }
0x1e9e   :  { %12328 = vmatmul.mubr.msk.f32.gmra.mxu0 %vm1555_vm3, %v6838_v43  ;;  %v6047_v59 = vmul.f32 %v12962_v5, %v14820_v55 }
0x1ea0   :  { %v6053_v10 = vsel %vm536_vm2, %v6047_v59, -inf }
0x1ea1   :  { %v6839_v19 = vpop.trf.xlu0  ;;  %6054 = vmax.xlane.f32.xlu0 %v6053_v10 }
0x1ea2   :  { %12330 = vmatprep.mubr.msk.f32.mxu0 %vm1555_vm3, %v6839_v19 }
0x1ea5   :  { %v6840_v29 = vpop.trf.xlu0 }
0x1ea6   :  { %12331 = vmatmul.mubr.msk.f32.gmra.mxu0 %vm1555_vm3, %v6840_v29 }
0x1ea7   :  { %12345 = vmatprep.mubr.msk.f32.mxu0 %vm536_vm2, %v14716_v18 }
0x1eb1   :  { %v15061_v58 = vpop.trf.xlu1 }
0x1eb5   :  { %v15063_v54 = vpop.trf.xlu1 }
0x1eb9   :  { %v15065_v15 = vpop.trf.xlu1 }
0x1ebd   :  { %v15067_v16 = vpop.trf.xlu1 }
0x1ec1   :  { %v15069_v55 = vpop.trf.xlu1 }
0x1ec5   :  { %v15071_v22 = vpop.trf.xlu1 }
0x1f16   :  { %v6070_v51 = vpop.xlane.xlu0 %6069 }
0x1f17   :  { %v6076_v52 = vsub.f32 %v6052_v49, %v6070_v51 }
0x1f19   :  { %v6087_v0 = vmul.f32 1.442695, %v6076_v52 }
0x1f1a   :  { %v6067_v4 = vpop.xlane.xlu1 %6066 }
0x1f1b   :  { %12963 = vpow2.f32 %v6087_v0  ;;  %v6075_v34 = vsub.f32 %v6051_v60, %v6067_v4 }
0x1f1d   :  { %v6085_v20 = vmul.f32 1.442695, %v6075_v34 }
0x1f1e   :  { %v6064_v18 = vpop.xlane.xlu0 %6063 }
0x1f1f   :  { %12965 = vpow2.f32 %v6085_v20  ;;  %v6074_v42 = vsub.f32 %v6050_v23, %v6064_v18 }
0x1f21   :  { %v6083_v3 = vmul.f32 1.442695, %v6074_v42 }
0x1f22   :  { %v6061_v26 = vpop.xlane.xlu0 %6060 }
0x1f23   :  { %12967 = vpow2.f32 %v6083_v3  ;;  %v6073_v2 = vsub.f32 %v6049_v27, %v6061_v26 }
0x1f25   :  { %v6081_v44 = vmul.f32 1.442695, %v6073_v2 }
0x1f26   :  { %v6058_v56 = vpop.xlane.xlu0 %6057 }
0x1f27   :  { %12969 = vpow2.f32 %v6081_v44  ;;  %v6072_v47 = vsub.f32 %v6048_v40, %v6058_v56 }
0x1f28   :  { %v15073_v41 = vpop.eup %12963 }
0x1f29   :  { %v6079_v45 = vmul.f32 1.442695, %v6072_v47  ;;  %v6104_v49 = vsel %vm536_vm2, %v15073_v41, 0.0 }
0x1f2a   :  { %6105 = vadd.xlane.f32.xlu0 %v6104_v49  ;;  %v6055_v28 = vpop.xlane.xlu0 %6054 }
0x1f2b   :  { %12971 = vpow2.f32 %v6079_v45  ;;  %v6071_v9 = vsub.f32 %v6047_v59, %v6055_v28 }
0x1f2c   :  { %v15077_v25 = vpop.eup %12965 }
0x1f2d   :  { %v6077_v39 = vmul.f32 1.442695, %v6071_v9  ;;  %v6101_v60 = vsel %vm536_vm2, %v15077_v25, 0.0 }
0x1f2e   :  { %6102 = vadd.xlane.f32.xlu0 %v6101_v60 }
0x1f2f   :  { %12973 = vpow2.f32 %v6077_v39 }
0x1f30   :  { %v15081_v8 = vpop.eup %12967 }
0x1f31   :  { %v6098_v37 = vsel %vm536_vm2, %v15081_v8, 0.0 }
0x1f32   :  { %6099 = vadd.xlane.f32.xlu0 %v6098_v37 }
0x1f34   :  { %v15085_v13 = vpop.eup %12969 }
0x1f35   :  { %v6095_v23 = vsel %vm536_vm2, %v15085_v13, 0.0 }
0x1f36   :  { %6096 = vadd.xlane.f32.xlu1 %v6095_v23 }
0x1f38   :  { %v15089_v53 = vpop.eup %12971 }
0x1f39   :  { %v6092_v50 = vsel %vm536_vm2, %v15089_v53, 0.0 }
0x1f3a   :  { %6093 = vadd.xlane.f32.xlu0 %v6092_v50 }
0x1f3c   :  { %v15093_v31 = vpop.eup %12973 }
0x1f3d   :  { %v6089_v27 = vsel %vm536_vm2, %v15093_v31, 0.0 }
0x1f3e   :  { %6090 = vadd.xlane.f32.xlu1 %v6089_v27 }
0x1f52   :  { %v15097_v35 = vpop.f32.mrf.mxu0 }
0x1f54   :  { %v15099_v32 = vpop.f32.mrf.mxu0 }
0x1f56   :  { %v12326_v62 = vpop.f32.mrf.mxu0 }
0x1f57   :  { %v15115_v52 = vmul.f32 0.14433756, %v12326_v62 }
0x1f58   :  { %v6935_v40 = vpop.f32.mrf.mxu0 }
0x1f59   :  { %v15119_v0 = vmul.f32 0.14433756, %v6935_v40 }
0x1f5e   :  { %v12329_v21 = vpop.f32.mrf.mxu0 }
0x1f5f   :  { %v15107_v29 = vmul.f32 0.14433756, %v12329_v21 }
0x1f60   :  { %v6945_v5 = vpop.f32.mrf.mxu0 }
0x1f61   :  { %v15111_v51 = vmul.f32 0.14433756, %v6945_v5 }
0x1f66   :  { %v12332_v43 = vpop.f32.mrf.mxu0 }
0x1f67   :  { %v15101_v59 = vmul.f32 0.14433756, %v12332_v43 }
0x1f68   :  { %v6955_v10 = vpop.f32.mrf.mxu0 }
0x1f69   :  { %v15103_v19 = vmul.f32 0.14433756, %v6955_v10  ;;  %12333 = vmatprep.subr.mxu0 %v15101_v59 }
0x1f6a   :  { %12334 = vmatpush3.msra.mxu0 %v15101_v59 }
0x1f6b   :  { %12335 = vmatprep.subr.mxu0 %v15103_v19 }
0x1f6c   :  { %12336 = vmatpush3.msra.mxu0 %v15103_v19 }
0x1f6d   :  { %12337 = vmatprep.subr.mxu0 %v15107_v29 }
0x1f6e   :  { %12338 = vmatpush3.msra.mxu0 %v15107_v29 }
0x1f6f   :  { %12339 = vmatprep.subr.mxu0 %v15111_v51 }
0x1f70   :  { %12340 = vmatpush3.msra.mxu0 %v15111_v51 }
0x1f71   :  { %12341 = vmatprep.subr.mxu0 %v15115_v52 }
0x1f72   :  { %12342 = vmatpush3.msra.mxu0 %v15115_v52 }
0x1f73   :  { %12343 = vmatprep.subr.mxu0 %v15119_v0 }
0x1f74   :  { %12344 = vmatpush3.msra.mxu0 %v15119_v0 }
0x1f75   :  { %12346 = vmatmul.mubr.msk.f32.vlgmr.msra.gmra.mxu0 %vm536_vm2, %v14868_v33  ;;  %12375 = vmatprep.subr.mxu0 %v14863_v6 }
0x1f76   :  { %12376 = vmatpush3.msra.mxu0 %v14863_v6  ;;  %12348 = vmatprep.mubr.msk.f32.mxu0 %vm536_vm2, %v14873_v36 }
0x1f77   :  { %12377 = vmatprep.subr.mxu0 %v14877_v7 }
0x1f78   :  { %12378 = vmatpush3.msra.mxu0 %v14877_v7 }
0x1f79   :  { %12349 = vmatmul.mubr.msk.f32.gmra.mxu0 %vm536_vm2, %v14882_v14 }
0x1f7a   :  { %12351 = vmatprep.mubr.msk.f32.mxu0 %vm536_vm2, %v14887_v11 }
0x1f7d   :  { %12352 = vmatmul.mubr.msk.f32.gmra.mxu0 %vm536_vm2, %v14855_v24  ;;  %v15152_v24 = vld [vmem:[%s13271_s29] sm:$0xff] }
0x1f7e   :  { %12379 = vmatprep.mubr.msk.f32.mxu0 %vm1555_vm3, %v15061_v58 }
0x1f81   :  { %12380 = vmatmul.mubr.msk.f32.vlgmr.msra.gmra.mxu0 %vm1555_vm3, %v15063_v54 }
0x1f82   :  { %12382 = vmatprep.mubr.msk.f32.mxu0 %vm1555_vm3, %v15065_v15 }
0x1f85   :  { %12383 = vmatmul.mubr.msk.f32.gmra.mxu0 %vm1555_vm3, %v15067_v16 }
0x1f86   :  { %12385 = vmatprep.mubr.msk.f32.mxu0 %vm1555_vm3, %v15069_v55 }
0x1f89   :  { %12386 = vmatmul.mubr.msk.f32.gmra.mxu0 %vm1555_vm3, %v15071_v22 }
0x1f8a   :  { %12421 = vmatprep.mubr.msk.f32.mxu0 %vm536_vm2, %v15152_v24 }
0x1fb3   :  { %v6106_v6 = vpop.xlane.xlu0 %6105 }
0x1fb4   :  { %12975 = vrcp.f32 %v6106_v6 }
0x1fb7   :  { %v6103_v33 = vpop.xlane.xlu0 %6102 }
0x1fb8   :  { %12977 = vrcp.f32 %v6103_v33 }
0x1fbb   :  { %v6100_v36 = vpop.xlane.xlu0 %6099 }
0x1fbc   :  { %12979 = vrcp.f32 %v6100_v36 }
0x1fbf   :  { %v6097_v7 = vpop.xlane.xlu1 %6096 }
0x1fc0   :  { %12981 = vrcp.f32 %v6097_v7 }
0x1fc1   :  { %v12976_v14 = vpop.eup %12975 }
0x1fc2   :  { %v6118_v11 = vmul.f32 %v12976_v14, %v15073_v41 }
0x1fc3   :  { %v6094_v58 = vpop.xlane.xlu0 %6093 }
0x1fc4   :  { %12983 = vrcp.f32 %v6094_v58  ;;  %6124 = vst.msk [vmem:[%s15007_s19 + $0x28] sm:$0xff] %vm536_vm2, %v6118_v11  ;;  %12305 = vmatprep.subr.msk.mxu1 %vm536_vm2, %v6118_v11 }
0x1fc5   :  { %v12978_v54 = vpop.eup %12977  ;;  %12306 = vmatpush3.xpose.msk.msra.mxu1 %vm536_vm2, %v6118_v11 }
0x1fc6   :  { %v6116_v15 = vmul.f32 %v12978_v54, %v15077_v25 }
0x1fc7   :  { %v6091_v16 = vpop.xlane.xlu1 %6090 }
0x1fc8   :  { %12985 = vrcp.f32 %v6091_v16  ;;  %6123 = vst.msk [vmem:[%s15007_s19 + $0x20] sm:$0xff] %vm536_vm2, %v6116_v15  ;;  %12307 = vmatprep.subr.msk.mxu1 %vm536_vm2, %v6116_v15 }
0x1fc9   :  { %v12980_v55 = vpop.eup %12979  ;;  %12308 = vmatpush3.xpose.msk.msra.mxu1 %vm536_vm2, %v6116_v15 }
0x1fca   :  { %v6114_v22 = vmul.f32 %v12980_v55, %v15081_v8 }
0x1fcc   :  { %6122 = vst.msk [vmem:[%s15007_s19 + $0x18] sm:$0xff] %vm536_vm2, %v6114_v22  ;;  %12309 = vmatprep.subr.msk.mxu1 %vm536_vm2, %v6114_v22 }
0x1fcd   :  { %v12982_v4 = vpop.eup %12981  ;;  %12310 = vmatpush3.xpose.msk.msra.mxu1 %vm536_vm2, %v6114_v22 }
0x1fce   :  { %v6112_v34 = vmul.f32 %v12982_v4, %v15085_v13 }
0x1fd0   :  { %6121 = vst.msk [vmem:[%s15007_s19 + $0x10] sm:$0xff] %vm536_vm2, %v6112_v34  ;;  %12311 = vmatprep.subr.msk.mxu1 %vm536_vm2, %v6112_v34 }
0x1fd1   :  { %v12984_v20 = vpop.eup %12983  ;;  %12312 = vmatpush3.xpose.msk.msra.mxu1 %vm536_vm2, %v6112_v34 }
0x1fd2   :  { %v6110_v18 = vmul.f32 %v12984_v20, %v15089_v53  ;;  %v15235_v20 = vld [vmem:[%s13271_s29 + $0x8] sm:$0xff] }
0x1fd4   :  { %6120 = vst.msk [vmem:[%s15007_s19 + $0x8] sm:$0xff] %vm536_vm2, %v6110_v18  ;;  %12313 = vmatprep.subr.msk.mxu1 %vm536_vm2, %v6110_v18 }
0x1fd5   :  { %v12986_v42 = vpop.eup %12985  ;;  %12314 = vmatpush3.xpose.msk.msra.mxu1 %vm536_vm2, %v6110_v18  ;;  %v15242_v18 = vld [vmem:[%s13271_s29 + $0x10] sm:$0xff] }
0x1fd6   :  { %v6108_v3 = vmul.f32 %v12986_v42, %v15093_v31 }
0x1fd8   :  { %6119 = vst.msk [vmem:[%s15007_s19] sm:$0xff] %vm536_vm2, %v6108_v3  ;;  %12315 = vmatprep.subr.msk.mxu1 %vm536_vm2, %v6108_v3 }
0x1fd9   :  { %12316 = vmatpush3.xpose.msk.msra.mxu1 %vm536_vm2, %v6108_v3 }
0x1fdc   :  { %12318 = vmatmul.mubr.msk.f32.vlgmr.msra.gmra.mxu1 %vm536_vm2, %v14736_v48 }
0x1fdd   :  { %12366 = vmatprep.mubr.msk.f32.mxu1 %vm536_vm2, %v15152_v24 }
0x2035   :  { %v12347_v26 = vpop.f32.mrf.mxu0 }
0x2036   :  { %v7068_v9 = vsel %vm536_vm2, %v12347_v26, 0.0  ;;  %v15251_v26 = vld [vmem:[%s13271_s29 + $0x18] sm:$0xff] }
0x2037   :  { %v7036_v2 = vpop.f32.mrf.mxu0 }
0x2038   :  { %v7065_v25 = vsel %vm536_vm2, %v7036_v2, 0.0  ;;  %v15256_v2 = vld [vmem:[%s13271_s29 + $0x20] sm:$0xff] }
0x2039   :  { %v12350_v44 = vpop.f32.mrf.mxu0 }
0x203a   :  { %v7074_v28 = vsel %vm536_vm2, %v12350_v44, 0.0 }
0x203b   :  { %v7046_v56 = vpop.f32.mrf.mxu0 }
0x203c   :  { %v7071_v48 = vsel %vm536_vm2, %v7046_v56, 0.0 }
0x203d   :  { %v12353_v47 = vpop.f32.mrf.mxu0 }
0x203e   :  { %v7080_v41 = vsel %vm536_vm2, %v12353_v47, 0.0  ;;  %v15267_v47 = vld [vmem:[%s13271_s29 + $0x28] sm:$0xff] }
0x203f   :  { %v7056_v45 = vpop.f32.mrf.mxu0  ;;  %7081 = vadd.xlane.f32.xlu0 %v7080_v41 }
0x2040   :  { %v7077_v49 = vsel %vm536_vm2, %v7056_v45, 0.0 }
0x2041   :  { %7078 = vadd.xlane.f32.xlu1 %v7077_v49  ;;  %v12381_v53 = vpop.f32.mrf.mxu0 }
0x2042   :  { %v15260_v44 = vmul.f32 0.14433756, %v12381_v53 }
0x2043   :  { %7075 = vadd.xlane.f32.xlu0 %v7074_v28  ;;  %v7427_v21 = vpop.f32.mrf.mxu0 }
0x2044   :  { %v15264_v56 = vmul.f32 0.14433756, %v7427_v21 }
0x2045   :  { %7072 = vadd.xlane.f32.xlu1 %v7071_v48  ;;  %v12384_v10 = vpop.f32.mrf.mxu0 }
0x2046   :  { %v7459_v42 = vmul.f32 0.14433756, %v12384_v10 }
0x2047   :  { %7069 = vadd.xlane.f32.xlu0 %v7068_v9  ;;  %v7437_v58 = vpop.f32.mrf.mxu0 }
0x2048   :  { %v15248_v3 = vmul.f32 0.14433756, %v7437_v58 }
0x2049   :  { %7066 = vadd.xlane.f32.xlu1 %v7065_v25  ;;  %v12387_v55 = vpop.f32.mrf.mxu0 }
0x204a   :  { %v15230_v34 = vmul.f32 0.14433756, %v12387_v55 }
0x204b   :  { %v7447_v4 = vpop.f32.mrf.mxu0 }
0x209c   :  { %v12319_v39 = vpop.f32.mrf.mxu1 }
0x209d   :  { %v6812_v60 = vadd.f32 %v12319_v39, %v15097_v35 }
0x209e   :  { %v6806_v8 = vpop.f32.mrf.mxu1 }
0x209f   :  { %v6816_v37 = vmul.f32 0.5, %v6812_v60  ;;  %v6807_v13 = vadd.f32 %v6806_v8, %v15099_v32 }
0x20a1   :  { %6818 = vst.msk [vmem:[#allocation2 + $0x8] sm:$0xff] %vm536_vm2, %v6816_v37  ;;  %v6815_v23 = vmul.f32 0.5, %v6807_v13 }
0x20a3   :  { %6817 = vst.msk [vmem:[#allocation2] sm:$0xff] %vm536_vm2, %v6815_v23 }
0x20c8   :  { %v7082_v50 = vpop.xlane.xlu0 %7081 }
0x20c9   :  { %v7088_v31 = vmul.f32 0.020833334, %v7082_v50 }
0x20ca   :  { %v7079_v27 = vpop.xlane.xlu1 %7078 }
0x20cb   :  { %v15201_v62 = vsub.f32 %v15101_v59, %v7088_v31  ;;  %v7087_v40 = vmul.f32 0.020833334, %v7079_v27 }
0x20cc   :  { %v7076_v5 = vpop.xlane.xlu0 %7075 }
0x20cd   :  { %v15204_v35 = vsub.f32 %v15103_v19, %v7087_v40  ;;  %v7086_v43 = vmul.f32 0.020833334, %v7076_v5  ;;  %v7100_v32 = vmul.f32 %v15201_v62, %v15201_v62 }
0x20ce   :  { %v7073_v6 = vpop.xlane.xlu1 %7072 }
0x20cf   :  { %v15209_v33 = vsub.f32 %v15107_v29, %v7086_v43  ;;  %v7085_v36 = vmul.f32 0.020833334, %v7073_v6  ;;  %12354 = vmatprep.subr.mxu1 %v7100_v32  ;;  %v7099_v59 = vmul.f32 %v15204_v35, %v15204_v35 }
0x20d0   :  { %v7070_v7 = vpop.xlane.xlu0 %7069  ;;  %12355 = vmatpush3.msra.mxu1 %v7100_v32 }
0x20d1   :  { %v15214_v14 = vsub.f32 %v15111_v51, %v7085_v36  ;;  %v7084_v19 = vmul.f32 0.020833334, %v7070_v7  ;;  %12356 = vmatprep.subr.mxu1 %v7099_v59  ;;  %v7098_v11 = vmul.f32 %v15209_v33, %v15209_v33 }
0x20d2   :  { %12357 = vmatpush3.msra.mxu1 %v7099_v59  ;;  %v7067_v54 = vpop.xlane.xlu1 %7066 }
0x20d3   :  { %v15219_v29 = vsub.f32 %v15115_v52, %v7084_v19  ;;  %v7083_v15 = vmul.f32 0.020833334, %v7067_v54  ;;  %12358 = vmatprep.subr.mxu1 %v7098_v11  ;;  %v7097_v16 = vmul.f32 %v15214_v14, %v15214_v14 }
0x20d4   :  { %12359 = vmatpush3.msra.mxu1 %v7098_v11 }
0x20d5   :  { %v15224_v51 = vsub.f32 %v15119_v0, %v7083_v15  ;;  %12360 = vmatprep.subr.mxu1 %v7097_v16  ;;  %v7096_v22 = vmul.f32 %v15219_v29, %v15219_v29  ;;  %v15232_v0 = vmul.f32 0.14433756, %v7447_v4 }
0x20d6   :  { %12361 = vmatpush3.msra.mxu1 %v7097_v16 }
0x20d7   :  { %12362 = vmatprep.subr.mxu1 %v7096_v22  ;;  %v7095_v52 = vmul.f32 %v15224_v51, %v15224_v51 }
0x20d8   :  { %12363 = vmatpush3.msra.mxu1 %v7096_v22 }
0x20d9   :  { %12364 = vmatprep.subr.mxu1 %v7095_v52 }
0x20da   :  { %12365 = vmatpush3.msra.mxu1 %v7095_v52 }
0x20db   :  { %12367 = vmatmul.mubr.msk.f32.vlgmr.msra.gmra.mxu1 %vm536_vm2, %v15235_v20  ;;  %12388 = vmatprep.subr.mxu1 %v15230_v34 }
0x20dc   :  { %12389 = vmatpush3.msra.mxu1 %v15230_v34  ;;  %12369 = vmatprep.mubr.msk.f32.mxu1 %vm536_vm2, %v15242_v18 }
0x20dd   :  { %12390 = vmatprep.subr.mxu1 %v15232_v0 }
0x20de   :  { %12391 = vmatpush3.msra.mxu1 %v15232_v0 }
0x20df   :  { %12370 = vmatmul.mubr.msk.f32.gmra.mxu1 %vm536_vm2, %v15251_v26  ;;  %12392 = vmatprep.subr.mxu1 %v7459_v42 }
0x20e0   :  { %12393 = vmatpush3.msra.mxu1 %v7459_v42  ;;  %12372 = vmatprep.mubr.msk.f32.mxu1 %vm536_vm2, %v15256_v2 }
0x20e1   :  { %12394 = vmatprep.subr.mxu1 %v15248_v3 }
0x20e2   :  { %12395 = vmatpush3.msra.mxu1 %v15248_v3 }
0x20e3   :  { %12373 = vmatmul.mubr.msk.f32.gmra.mxu1 %vm536_vm2, %v15267_v47  ;;  %12396 = vmatprep.subr.mxu1 %v15260_v44 }
0x20e4   :  { %12397 = vmatpush3.msra.mxu1 %v15260_v44  ;;  %12400 = vmatprep.mubr.msk.f32.mxu1 %vm536_vm2, %v15152_v24 }
0x20e5   :  { %12398 = vmatprep.subr.mxu1 %v15264_v56 }
0x20e6   :  { %12399 = vmatpush3.msra.mxu1 %v15264_v56 }
0x20e7   :  { %12401 = vmatmul.mubr.msk.f32.vlgmr.msra.gmra.mxu1 %vm536_vm2, %v15235_v20 }
0x20e8   :  { %12403 = vmatprep.mubr.msk.f32.mxu1 %vm536_vm2, %v15242_v18 }
0x20eb   :  { %12404 = vmatmul.mubr.msk.f32.gmra.mxu1 %vm536_vm2, %v15251_v26 }
0x20ec   :  { %12406 = vmatprep.mubr.msk.f32.mxu1 %vm536_vm2, %v15256_v2 }
0x20ef   :  { %12407 = vmatmul.mubr.msk.f32.gmra.mxu1 %vm536_vm2, %v15267_v47 }
0x20f0   :  { %12442 = vmatprep.mubr.msk.f32.mxu1 %vm536_vm2, %v14896_v1 }
0x219b   :  { %v15289_v24 = vpop.f32.mrf.mxu1 }
0x219d   :  { %v15291_v41 = vpop.f32.mrf.mxu1 }
0x219f   :  { %v15293_v45 = vpop.f32.mrf.mxu1 }
0x21a1   :  { %v15295_v49 = vpop.f32.mrf.mxu1 }
0x21a3   :  { %v15297_v28 = vpop.f32.mrf.mxu1 }
0x21a5   :  { %v15299_v48 = vpop.f32.mrf.mxu1 }
0x21a7   :  { %v12402_v9 = vpop.f32.mrf.mxu1 }
0x21a8   :  { %v7560_v50 = vsel %vm536_vm2, %v12402_v9, 0.0 }
0x21a9   :  { %v7528_v25 = vpop.f32.mrf.mxu1 }
0x21aa   :  { %v7557_v31 = vsel %vm536_vm2, %v7528_v25, 0.0 }
0x21ab   :  { %v12405_v39 = vpop.f32.mrf.mxu1 }
0x21ac   :  { %v7566_v23 = vsel %vm536_vm2, %v12405_v39, 0.0 }
0x21ad   :  { %v7538_v60 = vpop.f32.mrf.mxu1 }
0x21ae   :  { %v7563_v53 = vsel %vm536_vm2, %v7538_v60, 0.0 }
0x21af   :  { %v12408_v8 = vpop.f32.mrf.mxu1 }
0x21b0   :  { %v7572_v37 = vsel %vm536_vm2, %v12408_v8, 0.0 }
0x21b1   :  { %7573 = vadd.xlane.f32.xlu0 %v7572_v37  ;;  %v7548_v1 = vpop.f32.mrf.mxu1 }
0x21b2   :  { %v7569_v13 = vsel %vm536_vm2, %v7548_v1, 0.0  ;;  %v7211_v1 = vsel %vm536_vm2, %v15297_v28, 0.0  ;;  %v7202_v28 = vsel %vm536_vm2, %v15295_v49, 0.0 }
0x21b3   :  { %7570 = vadd.xlane.f32.xlu1 %v7569_v13  ;;  %v7208_v13 = vsel %vm536_vm2, %v15299_v48, 0.0  ;;  %v7196_v48 = vsel %vm536_vm2, %v15291_v41, 0.0 }
0x21b5   :  { %7567 = vadd.xlane.f32.xlu0 %v7566_v23 }
0x21b7   :  { %7564 = vadd.xlane.f32.xlu1 %v7563_v53  ;;  %v7205_v53 = vsel %vm536_vm2, %v15293_v45, 0.0 }
0x21b9   :  { %7561 = vadd.xlane.f32.xlu0 %v7560_v50 }
0x21bb   :  { %7558 = vadd.xlane.f32.xlu1 %v7557_v31  ;;  %v7199_v31 = vsel %vm536_vm2, %v15289_v24, 0.0 }
0x223a   :  { %v7574_v27 = vpop.xlane.xlu0 %7573 }
0x223b   :  { %v7580_v40 = vmul.f32 0.020833334, %v7574_v27 }
0x223c   :  { %v7571_v21 = vpop.xlane.xlu1 %7570 }
0x223d   :  { %v15308_v5 = vsub.f32 %v15230_v34, %v7580_v40  ;;  %v7579_v43 = vmul.f32 0.020833334, %v7571_v21 }
0x223e   :  { %v7568_v32 = vpop.xlane.xlu0 %7567 }
0x223f   :  { %v15311_v10 = vsub.f32 %v15232_v0, %v7579_v43  ;;  %v7578_v6 = vmul.f32 0.020833334, %v7568_v32  ;;  %v7592_v36 = vmul.f32 %v15308_v5, %v15308_v5 }
0x2240   :  { %v7565_v59 = vpop.xlane.xlu1 %7564 }
0x2241   :  { %v15315_v7 = vsub.f32 %v7459_v42, %v7578_v6  ;;  %v7577_v19 = vmul.f32 0.020833334, %v7565_v59  ;;  %12409 = vmatprep.subr.mxu0 %v7592_v36  ;;  %v7591_v11 = vmul.f32 %v15311_v10, %v15311_v10 }
0x2242   :  { %12410 = vmatpush3.msra.mxu0 %v7592_v36  ;;  %v7562_v58 = vpop.xlane.xlu0 %7561 }
0x2243   :  { %v15320_v54 = vsub.f32 %v15248_v3, %v7577_v19  ;;  %v7576_v15 = vmul.f32 0.020833334, %v7562_v58  ;;  %12411 = vmatprep.subr.mxu0 %v7591_v11  ;;  %v7590_v16 = vmul.f32 %v15315_v7, %v15315_v7 }
0x2244   :  { %12412 = vmatpush3.msra.mxu0 %v7591_v11  ;;  %v7559_v55 = vpop.xlane.xlu1 %7558 }
0x2245   :  { %v15325_v22 = vsub.f32 %v15260_v44, %v7576_v15  ;;  %v7575_v52 = vmul.f32 0.020833334, %v7559_v55  ;;  %12413 = vmatprep.subr.mxu0 %v7590_v16  ;;  %v7589_v4 = vmul.f32 %v15320_v54, %v15320_v54 }
0x2246   :  { %12414 = vmatpush3.msra.mxu0 %v7590_v16 }
0x2247   :  { %v15330_v34 = vsub.f32 %v15264_v56, %v7575_v52  ;;  %12415 = vmatprep.subr.mxu0 %v7589_v4  ;;  %v7588_v0 = vmul.f32 %v15325_v22, %v15325_v22 }
0x2248   :  { %12416 = vmatpush3.msra.mxu0 %v7589_v4 }
0x2249   :  { %12417 = vmatprep.subr.mxu0 %v7588_v0  ;;  %v7587_v42 = vmul.f32 %v15330_v34, %v15330_v34 }
0x224a   :  { %12418 = vmatpush3.msra.mxu0 %v7588_v0 }
0x224b   :  { %12419 = vmatprep.subr.mxu0 %v7587_v42 }
0x224c   :  { %12420 = vmatpush3.msra.mxu0 %v7587_v42 }
0x224d   :  { %12422 = vmatmul.mubr.msk.f32.vlgmr.msra.gmra.mxu0 %vm536_vm2, %v15235_v20 }
0x224e   :  { %12424 = vmatprep.mubr.msk.f32.mxu0 %vm536_vm2, %v15242_v18 }
0x2251   :  { %12425 = vmatmul.mubr.msk.f32.gmra.mxu0 %vm536_vm2, %v15251_v26 }
0x2252   :  { %12427 = vmatprep.mubr.msk.f32.mxu0 %vm536_vm2, %v15256_v2 }
0x2255   :  { %12428 = vmatmul.mubr.msk.f32.gmra.mxu0 %vm536_vm2, %v15267_v47 }
0x2256   :  { %12457 = vmatprep.mubr.msk.f32.mxu0 %vm536_vm2, %v14742_v30 }
0x230d   :  { %v12423_v3 = vpop.f32.mrf.mxu0 }
0x230e   :  { %v7691_v23 = vsel %vm536_vm2, %v12423_v3, 0.0 }
0x230f   :  { %v7659_v44 = vpop.f32.mrf.mxu0 }
0x2310   :  { %v7688_v50 = vsel %vm536_vm2, %v7659_v44, 0.0 }
0x2311   :  { %v12426_v56 = vpop.f32.mrf.mxu0 }
0x2312   :  { %v7697_v37 = vsel %vm536_vm2, %v12426_v56, 0.0 }
0x2313   :  { %v7669_v9 = vpop.f32.mrf.mxu0 }
0x2314   :  { %v7694_v30 = vsel %vm536_vm2, %v7669_v9, 0.0 }
0x2315   :  { %v12429_v25 = vpop.f32.mrf.mxu0 }
0x2316   :  { %v7703_v39 = vsel %vm536_vm2, %v12429_v25, 0.0 }
0x2317   :  { %7704 = vadd.xlane.f32.xlu0 %v7703_v39  ;;  %v7679_v60 = vpop.f32.mrf.mxu0 }
0x2318   :  { %v7700_v8 = vsel %vm536_vm2, %v7679_v60, 0.0 }
0x2319   :  { %7701 = vadd.xlane.f32.xlu1 %v7700_v8 }
0x231b   :  { %7698 = vadd.xlane.f32.xlu0 %v7697_v37 }
0x231d   :  { %7212 = vadd.xlane.f32.xlu1 %v7211_v1 }
0x231f   :  { %7695 = vadd.xlane.f32.xlu0 %v7694_v30 }
0x2321   :  { %7209 = vadd.xlane.f32.xlu1 %v7208_v13 }
0x2323   :  { %7692 = vadd.xlane.f32.xlu0 %v7691_v23 }
0x2325   :  { %7206 = vadd.xlane.f32.xlu1 %v7205_v53 }
0x2327   :  { %7689 = vadd.xlane.f32.xlu0 %v7688_v50 }
0x2329   :  { %7203 = vadd.xlane.f32.xlu1 %v7202_v28 }
0x232b   :  { %7200 = vadd.xlane.f32.xlu0 %v7199_v31 }
0x232d   :  { %7197 = vadd.xlane.f32.xlu1 %v7196_v48 }
0x23a0   :  { %v7705_v27 = vpop.xlane.xlu0 %7704 }
0x23a1   :  { %v7711_v40 = vmul.f32 0.020833334, %v7705_v27 }
0x23a2   :  { %v7702_v21 = vpop.xlane.xlu1 %7701 }
0x23a3   :  { %v7717_v45 = vadd.f32 1e-05, %v7711_v40  ;;  %v7710_v43 = vmul.f32 0.020833334, %v7702_v21 }
0x23a4   :  { %v7699_v32 = vpop.xlane.xlu0 %7698 }
0x23a5   :  { %12987 = vrsqrt.f32 %v7717_v45  ;;  %v7716_v6 = vadd.f32 1e-05, %v7710_v43  ;;  %v7709_v36 = vmul.f32 0.020833334, %v7699_v32 }
0x23a6   :  { %v7213_v59 = vpop.xlane.xlu1 %7212 }
0x23a7   :  { %12989 = vrsqrt.f32 %v7716_v6  ;;  %v7715_v49 = vadd.f32 1e-05, %v7709_v36  ;;  %v7219_v19 = vmul.f32 0.020833334, %v7213_v59 }
0x23a8   :  { %v7696_v11 = vpop.xlane.xlu0 %7695 }
0x23a9   :  { %12991 = vrsqrt.f32 %v7715_v49  ;;  %v7225_v24 = vadd.f32 1e-05, %v7219_v19  ;;  %v7708_v58 = vmul.f32 0.020833334, %v7696_v11 }
0x23aa   :  { %v7210_v15 = vpop.xlane.xlu1 %7209 }
0x23ab   :  { %12993 = vrsqrt.f32 %v7225_v24  ;;  %v7714_v41 = vadd.f32 1e-05, %v7708_v58  ;;  %v7218_v16 = vmul.f32 0.020833334, %v7210_v15 }
0x23ac   :  { %v7693_v55 = vpop.xlane.xlu0 %7692 }
0x23ad   :  { %12995 = vrsqrt.f32 %v7714_v41  ;;  %v7224_v52 = vadd.f32 1e-05, %v7218_v16  ;;  %v7707_v4 = vmul.f32 0.020833334, %v7693_v55 }
0x23ae   :  { %v7207_v0 = vpop.xlane.xlu1 %7206 }
0x23af   :  { %12997 = vrsqrt.f32 %v7224_v52  ;;  %v7713_v42 = vadd.f32 1e-05, %v7707_v4  ;;  %v7217_v3 = vmul.f32 0.020833334, %v7207_v0 }
0x23b0   :  { %v7690_v44 = vpop.xlane.xlu0 %7689 }
0x23b1   :  { %12999 = vrsqrt.f32 %v7713_v42  ;;  %v7223_v56 = vadd.f32 1e-05, %v7217_v3  ;;  %v7706_v9 = vmul.f32 0.020833334, %v7690_v44 }
0x23b2   :  { %v12988_v25 = vpop.eup %12987  ;;  %v7204_v39 = vpop.xlane.xlu1 %7203 }
0x23b3   :  { %13001 = vrsqrt.f32 %v7223_v56  ;;  %v7712_v60 = vadd.f32 1e-05, %v7706_v9  ;;  %v7216_v8 = vmul.f32 0.020833334, %v7204_v39  ;;  %v7729_v37 = vmul.f32 %v12988_v25, %v15308_v5 }
0x23b4   :  { %v12990_v1 = vpop.eup %12989  ;;  %v7201_v30 = vpop.xlane.xlu0 %7200 }
0x23b5   :  { %13003 = vrsqrt.f32 %v7712_v60  ;;  %v7222_v13 = vadd.f32 1e-05, %v7216_v8  ;;  %v7215_v23 = vmul.f32 0.020833334, %v7201_v30  ;;  %v7745_v53 = vsel %vm536_vm2, %v7729_v37, -inf }
0x23b6   :  { %v12992_v50 = vpop.eup %12991  ;;  %7746 = vmax.xlane.f32.xlu0 %v7745_v53  ;;  %v7198_v28 = vpop.xlane.xlu1 %7197  ;;  %v7728_v31 = vmul.f32 %v12990_v1, %v15311_v10 }
0x23b7   :  { %13005 = vrsqrt.f32 %v7222_v13  ;;  %v7221_v48 = vadd.f32 1e-05, %v7215_v23  ;;  %v7214_v27 = vmul.f32 0.020833334, %v7198_v28  ;;  %v7727_v40 = vmul.f32 %v12992_v50, %v15315_v7 }
0x23b8   :  { %v12994_v21 = vpop.eup %12993  ;;  %v7742_v5 = vsel %vm536_vm2, %v7728_v31, -inf }
0x23b9   :  { %13007 = vrsqrt.f32 %v7221_v48  ;;  %v7220_v45 = vadd.f32 1e-05, %v7214_v27  ;;  %7743 = vmax.xlane.f32.xlu1 %v7742_v5  ;;  %v7739_v43 = vsel %vm536_vm2, %v7727_v40, -inf  ;;  %v7237_v32 = vmul.f32 %v12994_v21, %v15201_v62 }
0x23ba   :  { %v12996_v6 = vpop.eup %12995  ;;  %7740 = vmax.xlane.f32.xlu0 %v7739_v43 }
0x23bb   :  { %13009 = vrsqrt.f32 %v7220_v45  ;;  %v7253_v10 = vsel %vm536_vm2, %v7237_v32, -inf  ;;  %v7726_v36 = vmul.f32 %v12996_v6, %v15320_v54 }
0x23bc   :  { %v12998_v59 = vpop.eup %12997 }
0x23bd   :  { %7254 = vmax.xlane.f32.xlu1 %v7253_v10  ;;  %v7736_v7 = vsel %vm536_vm2, %v7726_v36, -inf  ;;  %v7236_v49 = vmul.f32 %v12998_v59, %v15204_v35 }
0x23be   :  { %v13000_v19 = vpop.eup %12999  ;;  %7737 = vmax.xlane.f32.xlu0 %v7736_v7 }
0x23bf   :  { %v7250_v11 = vsel %vm536_vm2, %v7236_v49, -inf  ;;  %v7725_v24 = vmul.f32 %v13000_v19, %v15325_v22 }
0x23c0   :  { %v13002_v62 = vpop.eup %13001 }
0x23c1   :  { %7251 = vmax.xlane.f32.xlu1 %v7250_v11  ;;  %v7733_v58 = vsel %vm536_vm2, %v7725_v24, -inf  ;;  %v7235_v15 = vmul.f32 %v13002_v62, %v15209_v33 }
0x23c2   :  { %v13004_v41 = vpop.eup %13003  ;;  %7734 = vmax.xlane.f32.xlu0 %v7733_v58 }
0x23c3   :  { %v7247_v54 = vsel %vm536_vm2, %v7235_v15, -inf  ;;  %v7724_v16 = vmul.f32 %v13004_v41, %v15330_v34 }
0x23c4   :  { %v13006_v55 = vpop.eup %13005 }
0x23c5   :  { %7248 = vmax.xlane.f32.xlu1 %v7247_v54  ;;  %v7730_v35 = vsel %vm536_vm2, %v7724_v16, -inf  ;;  %v7234_v52 = vmul.f32 %v13006_v55, %v15214_v14 }
0x23c6   :  { %v13008_v4 = vpop.eup %13007  ;;  %7731 = vmax.xlane.f32.xlu0 %v7730_v35 }
0x23c7   :  { %v7244_v22 = vsel %vm536_vm2, %v7234_v52, -inf  ;;  %v7233_v0 = vmul.f32 %v13008_v4, %v15219_v29 }
0x23c8   :  { %v13010_v42 = vpop.eup %13009 }
0x23c9   :  { %7245 = vmax.xlane.f32.xlu1 %v7244_v22  ;;  %v7241_v33 = vsel %vm536_vm2, %v7233_v0, -inf  ;;  %v7232_v3 = vmul.f32 %v13010_v42, %v15224_v51 }
0x23ca   :  { %7242 = vmax.xlane.f32.xlu0 %v7241_v33 }
0x23cb   :  { %v7238_v34 = vsel %vm536_vm2, %v7232_v3, -inf }
0x23cd   :  { %7239 = vmax.xlane.f32.xlu1 %v7238_v34 }
0x243f   :  { %v7747_v44 = vpop.xlane.xlu0 %7746 }
0x2440   :  { %v7753_v56 = vsub.f32 %v7729_v37, %v7747_v44 }
0x2442   :  { %v7764_v9 = vmul.f32 1.442695, %v7753_v56  ;;  %v7744_v14 = vpop.xlane.xlu1 %7743 }
0x2443   :  { %v7752_v25 = vsub.f32 %v7728_v31, %v7744_v14  ;;  %v7741_v39 = vpop.xlane.xlu0 %7740 }
0x2444   :  { %13011 = vpow2.f32 %v7764_v9  ;;  %v7751_v60 = vsub.f32 %v7727_v40, %v7741_v39 }
0x2445   :  { %v7762_v8 = vmul.f32 1.442695, %v7752_v25 }
0x2446   :  { %v7760_v29 = vmul.f32 1.442695, %v7751_v60  ;;  %v7255_v1 = vpop.xlane.xlu1 %7254 }
0x2447   :  { %13013 = vpow2.f32 %v7762_v8  ;;  %v7261_v30 = vsub.f32 %v7237_v32, %v7255_v1  ;;  %v7738_v13 = vpop.xlane.xlu0 %7737 }
0x2448   :  { %13015 = vpow2.f32 %v7760_v29  ;;  %v7750_v51 = vsub.f32 %v7726_v36, %v7738_v13 }
0x2449   :  { %v7272_v23 = vmul.f32 1.442695, %v7261_v30 }
0x244a   :  { %v7758_v53 = vmul.f32 1.442695, %v7750_v51  ;;  %v7252_v50 = vpop.xlane.xlu1 %7251 }
0x244b   :  { %13017 = vpow2.f32 %v7272_v23  ;;  %v7260_v28 = vsub.f32 %v7236_v49, %v7252_v50  ;;  %v7735_v37 = vpop.xlane.xlu0 %7734 }
0x244c   :  { %13019 = vpow2.f32 %v7758_v53  ;;  %v7749_v48 = vsub.f32 %v7725_v24, %v7735_v37 }
0x244d   :  { %v7270_v31 = vmul.f32 1.442695, %v7260_v28 }
0x244e   :  { %v7756_v27 = vmul.f32 1.442695, %v7749_v48  ;;  %v7249_v21 = vpop.xlane.xlu1 %7248 }
0x244f   :  { %13021 = vpow2.f32 %v7270_v31  ;;  %v7259_v40 = vsub.f32 %v7235_v15, %v7249_v21  ;;  %v7732_v5 = vpop.xlane.xlu0 %7731 }
0x2450   :  { %13023 = vpow2.f32 %v7756_v27  ;;  %v7748_v45 = vsub.f32 %v7724_v16, %v7732_v5 }
0x2451   :  { %v15390_v43 = vpop.eup %13011  ;;  %v7268_v32 = vmul.f32 1.442695, %v7259_v40 }
0x2452   :  { %v7754_v6 = vmul.f32 1.442695, %v7748_v45  ;;  %v7246_v10 = vpop.xlane.xlu1 %7245  ;;  %v7781_v36 = vsel %vm536_vm2, %v15390_v43, 0.0 }
0x2453   :  { %13025 = vpow2.f32 %v7268_v32  ;;  %v7258_v59 = vsub.f32 %v7234_v52, %v7246_v10  ;;  %7782 = vadd.xlane.f32.xlu0 %v7781_v36  ;;  %v7243_v7 = vpop.xlane.xlu0 %7242 }
0x2454   :  { %v15394_v49 = vpop.eup %13013  ;;  %13027 = vpow2.f32 %v7754_v6  ;;  %v7257_v19 = vsub.f32 %v7233_v0, %v7243_v7 }
0x2455   :  { %v15396_v11 = vpop.eup %13015  ;;  %v7266_v24 = vmul.f32 1.442695, %v7258_v59  ;;  %v7778_v62 = vsel %vm536_vm2, %v15394_v49, 0.0 }
0x2456   :  { %v7264_v58 = vmul.f32 1.442695, %v7257_v19  ;;  %7779 = vadd.xlane.f32.xlu1 %v7778_v62  ;;  %v7240_v15 = vpop.xlane.xlu1 %7239  ;;  %v7775_v41 = vsel %vm536_vm2, %v15396_v11, 0.0 }
0x2457   :  { %13029 = vpow2.f32 %v7266_v24  ;;  %v7256_v54 = vsub.f32 %v7232_v3, %v7240_v15  ;;  %7776 = vadd.xlane.f32.xlu0 %v7775_v41 }
0x2458   :  { %v15402_v16 = vpop.eup %13017  ;;  %13031 = vpow2.f32 %v7264_v58 }
0x2459   :  { %v15404_v55 = vpop.eup %13019  ;;  %v7262_v35 = vmul.f32 1.442695, %v7256_v54  ;;  %v7289_v52 = vsel %vm536_vm2, %v15402_v16, 0.0 }
0x245a   :  { %7290 = vadd.xlane.f32.xlu1 %v7289_v52  ;;  %v7772_v4 = vsel %vm536_vm2, %v15404_v55, 0.0 }
0x245b   :  { %13033 = vpow2.f32 %v7262_v35  ;;  %7773 = vadd.xlane.f32.xlu0 %v7772_v4  ;;  %v10646_v4 = vld [vmem:[%s14256_s6 + $0x50] sm:$0xff] }
0x245c   :  { %v15410_v22 = vpop.eup %13021 }
0x245d   :  { %v15412_v0 = vpop.eup %13023  ;;  %v7286_v42 = vsel %vm536_vm2, %v15410_v22, 0.0 }
0x245e   :  { %7287 = vadd.xlane.f32.xlu1 %v7286_v42  ;;  %v7769_v33 = vsel %vm536_vm2, %v15412_v0, 0.0  ;;  %v10643_v42 = vld [vmem:[%s14256_s6 + $0x38] sm:$0xff] }
0x245f   :  { %7770 = vadd.xlane.f32.xlu0 %v7769_v33  ;;  %v15530_v33 = vld [vmem:[%s13271_s29] sm:$0xff] }
0x2460   :  { %v15418_v3 = vpop.eup %13025 }
0x2461   :  { %v15420_v34 = vpop.eup %13027  ;;  %v7283_v44 = vsel %vm536_vm2, %v15418_v3, 0.0 }
0x2462   :  { %7284 = vadd.xlane.f32.xlu1 %v7283_v44  ;;  %v7766_v56 = vsel %vm536_vm2, %v15420_v34, 0.0 }
0x2463   :  { %7767 = vadd.xlane.f32.xlu0 %v7766_v56 }
0x2464   :  { %v15426_v9 = vpop.eup %13029 }
0x2465   :  { %v15428_v14 = vpop.eup %13031  ;;  %v7280_v25 = vsel %vm536_vm2, %v15426_v9, 0.0 }
0x2466   :  { %7281 = vadd.xlane.f32.xlu1 %v7280_v25  ;;  %v7277_v39 = vsel %vm536_vm2, %v15428_v14, 0.0 }
0x2467   :  { %7278 = vadd.xlane.f32.xlu0 %v7277_v39 }
0x2468   :  { %v15434_v60 = vpop.eup %13033 }
0x2469   :  { %v7274_v8 = vsel %vm536_vm2, %v15434_v60, 0.0 }
0x246a   :  { %7275 = vadd.xlane.f32.xlu1 %v7274_v8 }
0x24dc   :  { %v7783_v29 = vpop.xlane.xlu0 %7782 }
0x24dd   :  { %13035 = vrcp.f32 %v7783_v29 }
0x24df   :  { %v7780_v1 = vpop.xlane.xlu1 %7779 }
0x24e0   :  { %13037 = vrcp.f32 %v7780_v1  ;;  %v7777_v30 = vpop.xlane.xlu0 %7776 }
0x24e1   :  { %13039 = vrcp.f32 %v7777_v30 }
0x24e3   :  { %v7291_v13 = vpop.xlane.xlu1 %7290 }
0x24e4   :  { %13041 = vrcp.f32 %v7291_v13  ;;  %v7774_v51 = vpop.xlane.xlu0 %7773 }
0x24e5   :  { %13043 = vrcp.f32 %v7774_v51 }
0x24e7   :  { %v7288_v23 = vpop.xlane.xlu1 %7287 }
0x24e8   :  { %13045 = vrcp.f32 %v7288_v23  ;;  %v7771_v53 = vpop.xlane.xlu0 %7770 }
0x24e9   :  { %13047 = vrcp.f32 %v7771_v53 }
0x24ea   :  { %v13036_v50 = vpop.eup %13035 }
0x24eb   :  { %v7285_v28 = vpop.xlane.xlu1 %7284  ;;  %v7795_v37 = vmul.f32 %v13036_v50, %v15390_v43 }
0x24ec   :  { %13049 = vrcp.f32 %v7285_v28  ;;  %v7768_v48 = vpop.xlane.xlu0 %7767 }
0x24ed   :  { %v13038_v31 = vpop.eup %13037  ;;  %13051 = vrcp.f32 %v7768_v48  ;;  %10625 = vst.msk [vmem:[%s15007_s19 + $0xb8] sm:$0xff] %vm536_vm2, %v7795_v37  ;;  %12430 = vmatprep.subr.msk.mxu1 %vm536_vm2, %v7795_v37  ;;  %v10677_v48 = vld [vmem:[%s14317_s12 + $0x98] sm:$0xff] }
0x24ee   :  { %v13040_v27 = vpop.eup %13039  ;;  %12431 = vmatpush3.xpose.msk.msra.mxu1 %vm536_vm2, %v7795_v37  ;;  %v7793_v21 = vmul.f32 %v13038_v31, %v15394_v49  ;;  %v10676_v31 = vld [vmem:[%s14317_s12 + $0x90] sm:$0xff] }
0x24ef   :  { %v7282_v40 = vpop.xlane.xlu1 %7281  ;;  %v7791_v5 = vmul.f32 %v13040_v27, %v15396_v11  ;;  %v10675_v27 = vld [vmem:[%s14317_s12 + $0x88] sm:$0xff] }
0x24f0   :  { %13053 = vrcp.f32 %v7282_v40  ;;  %10624 = vst.msk [vmem:[%s15007_s19 + $0xb0] sm:$0xff] %vm536_vm2, %v7793_v21  ;;  %12432 = vmatprep.subr.msk.mxu1 %vm536_vm2, %v7793_v21  ;;  %v7279_v45 = vpop.xlane.xlu0 %7278  ;;  %v10673_v40 = vld [vmem:[%s14317_s12 + $0x78] sm:$0xff] }
0x24f1   :  { %v13042_v43 = vpop.eup %13041  ;;  %13055 = vrcp.f32 %v7279_v45  ;;  %10623 = vst.msk [vmem:[%s15007_s19 + $0xa8] sm:$0xff] %vm536_vm2, %v7791_v5  ;;  %v10671_v45 = vld [vmem:[%s14317_s12 + $0x68] sm:$0xff] }
0x24f2   :  { %v13044_v32 = vpop.eup %13043  ;;  %12433 = vmatpush3.xpose.msk.msra.mxu1 %vm536_vm2, %v7793_v21  ;;  %v7303_v6 = vmul.f32 %v13042_v43, %v15402_v16  ;;  %v10674_v21 = vld [vmem:[%s14317_s12 + $0x80] sm:$0xff] }
0x24f3   :  { %v7276_v10 = vpop.xlane.xlu1 %7275  ;;  %12434 = vmatprep.subr.msk.mxu1 %vm536_vm2, %v7791_v5  ;;  %v7789_v36 = vmul.f32 %v13044_v32, %v15404_v55  ;;  %v10647_v55 = vld [vmem:[%s14256_s6 + $0x58] sm:$0xff]  ;;  %v10670_v43 = vld [vmem:[%s14317_s12 + $0x60] sm:$0xff] }
0x24f4   :  { %13057 = vrcp.f32 %v7276_v10  ;;  %10601 = vst.msk [vmem:[%s15007_s19 + $0x88] sm:$0xff] %vm536_vm2, %v7303_v6  ;;  %12445 = vmatprep.subr.msk.mxu0 %vm536_vm2, %v7303_v6 }
0x24f5   :  { %v13046_v59 = vpop.eup %13045  ;;  %12446 = vmatpush3.xpose.msk.msra.mxu0 %vm536_vm2, %v7303_v6  ;;  %10622 = vst.msk [vmem:[%s15007_s19 + $0xa0] sm:$0xff] %vm536_vm2, %v7789_v36 }
0x24f6   :  { %v13048_v7 = vpop.eup %13047  ;;  %12435 = vmatpush3.xpose.msk.msra.mxu1 %vm536_vm2, %v7791_v5  ;;  %v7301_v49 = vmul.f32 %v13046_v59, %v15410_v22  ;;  %v8005_v22 = vld [vmem:[#allocation2] sm:$0xff]  ;;  %v10672_v5 = vld [vmem:[%s14317_s12 + $0x70] sm:$0xff] }
0x24f7   :  { %12436 = vmatprep.subr.msk.mxu1 %vm536_vm2, %v7789_v36  ;;  %v7787_v19 = vmul.f32 %v13048_v7, %v15412_v0  ;;  %v10645_v0 = vld [vmem:[%s14256_s6 + $0x48] sm:$0xff] }
0x24f8   :  { %10600 = vst.msk [vmem:[%s15007_s19 + $0x80] sm:$0xff] %vm536_vm2, %v7301_v49  ;;  %12447 = vmatprep.subr.msk.mxu0 %vm536_vm2, %v7301_v49 }
0x24f9   :  { %v13050_v11 = vpop.eup %13049  ;;  %12448 = vmatpush3.xpose.msk.msra.mxu0 %vm536_vm2, %v7301_v49  ;;  %10621 = vst.msk [vmem:[%s15007_s19 + $0x98] sm:$0xff] %vm536_vm2, %v7787_v19 }
0x24fa   :  { %v13052_v24 = vpop.eup %13051  ;;  %12437 = vmatpush3.xpose.msk.msra.mxu1 %vm536_vm2, %v7789_v36  ;;  %v7299_v62 = vmul.f32 %v13050_v11, %v15418_v3  ;;  %v8006_v3 = vld [vmem:[#allocation2 + $0x8] sm:$0xff] }
0x24fb   :  { %12438 = vmatprep.subr.msk.mxu1 %vm536_vm2, %v7787_v19  ;;  %v7785_v58 = vmul.f32 %v13052_v24, %v15420_v34 }
0x24fc   :  { %10599 = vst.msk [vmem:[%s15007_s19 + $0x78] sm:$0xff] %vm536_vm2, %v7299_v62  ;;  %12449 = vmatprep.subr.msk.mxu0 %vm536_vm2, %v7299_v62 }
0x24fd   :  { %v13054_v15 = vpop.eup %13053  ;;  %12450 = vmatpush3.xpose.msk.msra.mxu0 %vm536_vm2, %v7299_v62  ;;  %10620 = vst.msk [vmem:[%s15007_s19 + $0x90] sm:$0xff] %vm536_vm2, %v7785_v58 }
0x24fe   :  { %v13056_v41 = vpop.eup %13055  ;;  %12439 = vmatpush3.xpose.msk.msra.mxu1 %vm536_vm2, %v7787_v19  ;;  %v7297_v54 = vmul.f32 %v13054_v15, %v15426_v9  ;;  %v10668_v15 = vld [vmem:[%s14376_s17 + $0x1] ss:$0 sm:$0xff]  ;;  %s15783_s17 = sld [smem:[%s15876_s0 + %s13159_s13]]  }
0x24ff   :  { %12440 = vmatprep.subr.msk.mxu1 %vm536_vm2, %v7785_v58  ;;  %v7295_v16 = vmul.f32 %v13056_v41, %v15428_v14 }
0x2500   :  { %10598 = vst.msk [vmem:[%s15007_s19 + $0x70] sm:$0xff] %vm536_vm2, %v7297_v54  ;;  %12451 = vmatprep.subr.msk.mxu0 %vm536_vm2, %v7297_v54 }
0x2501   :  { %v13058_v35 = vpop.eup %13057  ;;  %12452 = vmatpush3.xpose.msk.msra.mxu0 %vm536_vm2, %v7297_v54  ;;  %10597 = vst.msk [vmem:[%s15007_s19 + $0x68] sm:$0xff] %vm536_vm2, %v7295_v16 }
0x2502   :  { %12453 = vmatprep.subr.msk.mxu0 %vm536_vm2, %v7295_v16  ;;  %12441 = vmatpush3.xpose.msk.msra.mxu1 %vm536_vm2, %v7785_v58  ;;  %v7293_v52 = vmul.f32 %v13058_v35, %v15434_v60 }
0x2503   :  { %12460 = vmatprep.subr.msk.mxu1 %vm536_vm2, %v10647_v55 }
0x2504   :  { %10596 = vst.msk [vmem:[%s15007_s19 + $0x60] sm:$0xff] %vm536_vm2, %v7293_v52  ;;  %s10135_s19 = sld [smem:[%s15876_s0 + %s13164_s7]]  }
0x2505   :  { %12454 = vmatpush3.xpose.msk.msra.mxu0 %vm536_vm2, %v7295_v16  ;;  %12443 = vmatmul.mubr.msk.f32.vlgmr.msra.gmra.mxu1 %vm536_vm2, %v14894_v12  ;;  %v10644_v12 = vld [vmem:[%s14256_s6 + $0x40] sm:$0xff] }
0x2506   :  { %12455 = vmatprep.subr.msk.mxu0 %vm536_vm2, %v7293_v52  ;;  %12461 = vmatpush3.xpose.msk.msra.mxu1 %vm536_vm2, %v10647_v55  ;;  %v10669_v55 = vld [vmem:[%s14381_s22 + $0x1] ss:$0 sm:$0xff]  ;;  %s10131_s22 = sld [smem:[%s15876_s0 + %s13160_s18]]   ;;  %s13168_s18 = smov 40  }
0x2507   :  { %12472 = vmatprep.mubr.msk.f32.mxu1 %vm536_vm2, %v8005_v22  ;;  %12462 = vmatprep.subr.msk.mxu1 %vm536_vm2, %v10646_v4  ;;  %v10705_v22 = vld [vmem:[%s14390_s28 + $0x58] sm:$0xff] }
0x2509   :  { %12456 = vmatpush3.xpose.msk.msra.mxu0 %vm536_vm2, %v7293_v52 }
0x250a   :  { %12463 = vmatpush3.xpose.msk.msra.mxu1 %vm536_vm2, %v10646_v4  ;;  %12478 = vmatprep.subr.mxu0 %v15267_v47 }
0x250b   :  { %12464 = vmatprep.subr.msk.mxu1 %vm536_vm2, %v10645_v0 }
0x250c   :  { %12458 = vmatmul.mubr.msk.f32.vlgmr.msra.gmra.mxu0 %vm536_vm2, %v14740_v61  ;;  %v10642_v61 = vld [vmem:[%s14256_s6 + $0x30] sm:$0xff]  ;;  %s13150_s6 = smov 22  }
0x250d   :  { %12479 = vmatpush3.msra.mxu0 %v15267_v47  ;;  %s10125_s14 = sld [smem:[%s15876_s0 + %s13150_s6]]   ;;  %s13167_s6 = smov 37  }
0x250e   :  { %12465 = vmatpush3.xpose.msk.msra.mxu1 %vm536_vm2, %v10645_v0  ;;  %12480 = vmatprep.subr.mxu0 %v15256_v2  ;;  %v10704_v0 = vld [vmem:[%s14390_s28 + $0x50] sm:$0xff]  ;;  %s10140_s16 = sld [smem:[%s15876_s0 + %s13167_s6]]  }
0x250f   :  { %12466 = vmatprep.subr.msk.mxu1 %vm536_vm2, %v10644_v12  ;;  %12481 = vmatpush3.msra.mxu0 %v15256_v2 }
0x2510   :  { %12482 = vmatprep.subr.mxu0 %v15251_v26 }
0x2511   :  { %12483 = vmatpush3.msra.mxu0 %v15251_v26 }
0x2512   :  { %12467 = vmatpush3.xpose.msk.msra.mxu1 %vm536_vm2, %v10644_v12  ;;  %12484 = vmatprep.subr.mxu0 %v15242_v18  ;;  %v10703_v12 = vld [vmem:[%s14390_s28 + $0x48] sm:$0xff] }
0x2513   :  { %12468 = vmatprep.subr.msk.mxu1 %vm536_vm2, %v10643_v42  ;;  %12485 = vmatpush3.msra.mxu0 %v15242_v18 }
0x2514   :  { %12486 = vmatprep.subr.mxu0 %v15235_v20 }
0x2515   :  { %12487 = vmatpush3.msra.mxu0 %v15235_v20 }
0x2516   :  { %12469 = vmatpush3.xpose.msk.msra.mxu1 %vm536_vm2, %v10643_v42  ;;  %12488 = vmatprep.subr.mxu0 %v15530_v33  ;;  %v10702_v42 = vld [vmem:[%s14390_s28 + $0x40] sm:$0xff] }
0x2517   :  { %12470 = vmatprep.subr.msk.mxu1 %vm536_vm2, %v10642_v61  ;;  %12489 = vmatpush3.msra.mxu0 %v15530_v33 }
0x2518   :  { %12496 = vmatprep.subr.mxu0 %v15267_v47 }
0x251a   :  { %12471 = vmatpush3.xpose.msk.msra.mxu1 %vm536_vm2, %v10642_v61  ;;  %v10701_v61 = vld [vmem:[%s14390_s28 + $0x38] sm:$0xff] }
0x251d   :  { %12473 = vmatmul.mubr.msk.f32.vlgmr.msra.gmra.mxu1 %vm536_vm2, %v8006_v3  ;;  %v10700_v3 = vld [vmem:[%s14390_s28 + $0x30] sm:$0xff]  ;;  %s10134_s28 = sld [smem:[%s15876_s0 + %s13161_s24]]   ;;  %s13169_s24 = smov 38  }
0x25c5   :  { %v12444_v34 = vpop.f32.mrf.mxu1 }
0x25c7   :  { %v7893_v9 = vpop.f32.mrf.mxu1 }
0x25cc   :  { %v12459_v44 = vpop.f32.mrf.mxu0 }
0x25cd   :  { %v7998_v56 = vadd.f32 %v12459_v44, %v12444_v34  ;;  %v15640_v34 = vld [vmem:[%s13271_s29 + $0x28] sm:$0xff] }
0x25ce   :  { %v7992_v14 = vpop.f32.mrf.mxu0 }
0x25cf   :  { %v8002_v25 = vmul.f32 0.5, %v7998_v56  ;;  %v7993_v39 = vadd.f32 %v7992_v14, %v7893_v9 }
0x25d1   :  { %8004 = vst.msk [vmem:[#allocation2 + $0x18] sm:$0xff] %vm536_vm2, %v8002_v25  ;;  %v8001_v60 = vmul.f32 0.5, %v7993_v39 }
0x25d3   :  { %8003 = vst.msk [vmem:[#allocation2 + $0x10] sm:$0xff] %vm536_vm2, %v8001_v60 }
0x25d8   :  { %v8008_v29 = vld [vmem:[#allocation2 + $0x18] sm:$0xff] }
0x25da   :  { %v8007_v8 = vld [vmem:[#allocation2 + $0x10] sm:$0xff] }
0x25db   :  { %12475 = vmatprep.mubr.msk.f32.mxu1 %vm536_vm2, %v8007_v8 }
0x25dc   :  { %12476 = vmatmul.mubr.msk.f32.gmra.mxu1 %vm536_vm2, %v8008_v29 }
0x25dd   :  { %v12474_v1 = vpop.f32.mrf.mxu1 }
0x25de   :  { %v15546_v51 = vadd.f32 %v12474_v1, %v14467_v38  ;;  %v10681_v38 = vld [vmem:[%s14317_s12 + $0xb8] sm:$0xff] }
0x25df   :  { %v8112_v30 = vpop.f32.mrf.mxu1  ;;  %12514 = vmatprep.subr.msk.mxu1 %vm536_vm2, %v10681_v38 }
0x25e0   :  { %v15543_v13 = vadd.f32 %v8112_v30, %v14470_v63  ;;  %v10680_v63 = vld [vmem:[%s14317_s12 + $0xb0] sm:$0xff]  ;;  %12515 = vmatpush3.xpose.msk.msra.mxu1 %vm536_vm2, %v10681_v38 }
0x25e1   :  { %12516 = vmatprep.subr.msk.mxu1 %vm536_vm2, %v10680_v63 }
0x25e2   :  { %12490 = vmatprep.mubr.msk.f32.mxu0 %vm536_vm2, %v15543_v13 }
0x25e3   :  { %12491 = vmatmul.mubr.msk.f32.vlgmr.msra.gmra.mxu0 %vm536_vm2, %v15546_v51 }
0x25e4   :  { %12497 = vmatpush3.msra.mxu0 %v15267_v47  ;;  %12517 = vmatpush3.xpose.msk.msra.mxu1 %vm536_vm2, %v10680_v63  ;;  %v15645_v63 = vld [vmem:[%s14414_s4 + $0x1] ss:$0 sm:$0xff]  ;;  %s10137_s4 = sld [smem:[%s15876_s0 + %s13162_s30]]  }
0x25e5   :  { %12498 = vmatprep.subr.mxu0 %v15256_v2 }
0x25e6   :  { %12499 = vmatpush3.msra.mxu0 %v15256_v2 }
0x25e7   :  { %12500 = vmatprep.subr.mxu0 %v15251_v26 }
0x25e8   :  { %12501 = vmatpush3.msra.mxu0 %v15251_v26  ;;  %v10679_v26 = vld [vmem:[%s14317_s12 + $0xa8] sm:$0xff] }
0x25e9   :  { %12502 = vmatprep.subr.mxu0 %v15242_v18  ;;  %12518 = vmatprep.subr.msk.mxu1 %vm536_vm2, %v10679_v26 }
0x25ea   :  { %12503 = vmatpush3.msra.mxu0 %v15242_v18  ;;  %12519 = vmatpush3.xpose.msk.msra.mxu1 %vm536_vm2, %v10679_v26 }
0x25eb   :  { %12504 = vmatprep.subr.mxu0 %v15235_v20 }
0x25ec   :  { %12505 = vmatpush3.msra.mxu0 %v15235_v20 }
0x25ed   :  { %12506 = vmatprep.subr.mxu0 %v15530_v33 }
0x25ee   :  { %12507 = vmatpush3.msra.mxu0 %v15530_v33 }
0x25ef   :  { %12544 = vmatprep.subr.msk.mxu0 %vm4520_vm4, %v10705_v22 }
0x269c   :  { %v12477_v20 = vpop.f32.mrf.mxu1 }
0x269d   :  { %v15576_v47 = vadd.f32 %v12477_v20, %v14504_v46  ;;  %v10678_v46 = vld [vmem:[%s14317_s12 + $0xa0] sm:$0xff]  ;;  %s15778_s12 = sld [smem:[%s15876_s0 + %s13158_s27]]  }
0x269e   :  { %v8122_v18 = vpop.f32.mrf.mxu1  ;;  %12520 = vmatprep.subr.msk.mxu1 %vm536_vm2, %v10678_v46 }
0x269f   :  { %v15573_v2 = vadd.f32 %v8122_v18, %v14507_v17  ;;  %12521 = vmatpush3.xpose.msk.msra.mxu1 %vm536_vm2, %v10678_v46 }
0x26a0   :  { %12522 = vmatprep.subr.msk.mxu1 %vm536_vm2, %v10677_v48 }
0x26a1   :  { %12493 = vmatprep.mubr.msk.f32.mxu0 %vm536_vm2, %v15573_v2 }
0x26a2   :  { %12494 = vmatmul.mubr.msk.f32.gmra.mxu0 %vm536_vm2, %v15576_v47 }
0x26a3   :  { %v12492_v23 = vpop.f32.mrf.mxu0  ;;  %12523 = vmatpush3.xpose.msk.msra.mxu1 %vm536_vm2, %v10677_v48 }
0x26a4   :  { %v8237_v53 = vsub.f32 %v15546_v51, %v12492_v23  ;;  %12524 = vmatprep.subr.msk.mxu1 %vm536_vm2, %v10676_v31 }
0x26a5   :  { %v8217_v50 = vpop.f32.mrf.mxu0 }
0x26a6   :  { %v8236_v28 = vsub.f32 %v15543_v13, %v8217_v50  ;;  %v8241_v17 = vmul.f32 %v8237_v53, %v8237_v53 }
0x26a7   :  { %12525 = vmatpush3.xpose.msk.msra.mxu1 %vm536_vm2, %v10676_v31 }
0x26a8   :  { %v8240_v37 = vmul.f32 %v8236_v28, %v8236_v28  ;;  %12526 = vmatprep.subr.msk.mxu1 %vm536_vm2, %v10675_v27 }
0x26aa   :  { %12508 = vmatprep.mubr.msk.f32.mxu0 %vm536_vm2, %v8240_v37 }
0x26ab   :  { %12509 = vmatmul.mubr.msk.f32.vlgmr.msra.gmra.mxu0 %vm536_vm2, %v8241_v17  ;;  %12527 = vmatpush3.xpose.msk.msra.mxu1 %vm536_vm2, %v10675_v27 }
0x26ac   :  { %12528 = vmatprep.subr.msk.mxu1 %vm536_vm2, %v10674_v21  ;;  %12545 = vmatpush3.xpose.msk.msra.mxu0 %vm4520_vm4, %v10705_v22 }
0x26ad   :  { %12546 = vmatprep.subr.msk.mxu0 %vm4520_vm4, %v10704_v0 }
0x26af   :  { %12529 = vmatpush3.xpose.msk.msra.mxu1 %vm536_vm2, %v10674_v21 }
0x26b0   :  { %12530 = vmatprep.subr.msk.mxu1 %vm536_vm2, %v10673_v40  ;;  %12547 = vmatpush3.xpose.msk.msra.mxu0 %vm4520_vm4, %v10704_v0 }
0x26b1   :  { %12548 = vmatprep.subr.msk.mxu0 %vm4520_vm4, %v10703_v12 }
0x26b3   :  { %12531 = vmatpush3.xpose.msk.msra.mxu1 %vm536_vm2, %v10673_v40 }
0x26b4   :  { %12532 = vmatprep.subr.msk.mxu1 %vm536_vm2, %v10672_v5  ;;  %12549 = vmatpush3.xpose.msk.msra.mxu0 %vm4520_vm4, %v10703_v12 }
0x26b5   :  { %12550 = vmatprep.subr.msk.mxu0 %vm4520_vm4, %v10702_v42 }
0x26b7   :  { %12533 = vmatpush3.xpose.msk.msra.mxu1 %vm536_vm2, %v10672_v5 }
0x26b8   :  { %12534 = vmatprep.subr.msk.mxu1 %vm536_vm2, %v10671_v45  ;;  %12551 = vmatpush3.xpose.msk.msra.mxu0 %vm4520_vm4, %v10702_v42 }
0x26b9   :  { %12552 = vmatprep.subr.msk.mxu0 %vm4520_vm4, %v10701_v61 }
0x26bb   :  { %12535 = vmatpush3.xpose.msk.msra.mxu1 %vm536_vm2, %v10671_v45 }
0x26bc   :  { %12536 = vmatprep.subr.msk.mxu1 %vm536_vm2, %v10670_v43  ;;  %12553 = vmatpush3.xpose.msk.msra.mxu0 %vm4520_vm4, %v10701_v61 }
0x26bd   :  { %12554 = vmatprep.subr.msk.mxu0 %vm4520_vm4, %v10700_v3 }
0x26bf   :  { %12537 = vmatpush3.xpose.msk.msra.mxu1 %vm536_vm2, %v10670_v43 }
0x26c0   :  { %12555 = vmatpush3.xpose.msk.msra.mxu0 %vm4520_vm4, %v10700_v3 }
0x26c1   :  { %12562 = vmatprep.subr.mxu0 %v15640_v34 }
0x2762   :  { %v12495_v32 = vpop.f32.mrf.mxu0 }
0x2763   :  { %v8239_v6 = vsub.f32 %v15576_v47, %v12495_v32 }
0x2764   :  { %v8227_v10 = vpop.f32.mrf.mxu0 }
0x2765   :  { %v8238_v36 = vsub.f32 %v15573_v2, %v8227_v10  ;;  %v8243_v7 = vmul.f32 %v8239_v6, %v8239_v6 }
0x2767   :  { %v8242_v59 = vmul.f32 %v8238_v36, %v8238_v36 }
0x2769   :  { %12511 = vmatprep.mubr.msk.f32.mxu0 %vm536_vm2, %v8242_v59 }
0x276a   :  { %12512 = vmatmul.mubr.msk.f32.gmra.mxu0 %vm536_vm2, %v8243_v7 }
0x276b   :  { %v12510_v49 = vpop.f32.mrf.mxu0 }
0x276c   :  { %v8328_v19 = vadd.f32 1e-06, %v12510_v49 }
0x276d   :  { %v8322_v11 = vpop.f32.mrf.mxu0 }
0x276e   :  { %13059 = vrsqrt.f32 %v8328_v19  ;;  %v8323_v24 = vadd.f32 1e-06, %v8322_v11 }
0x2770   :  { %13061 = vrsqrt.f32 %v8323_v24 }
0x277b   :  { %v13060_v62 = vpop.eup %13059 }
0x277c   :  { %v8346_v58 = vmul.f32 %v13060_v62, %v8237_v53 }
0x277d   :  { %v13062_v41 = vpop.eup %13061 }
0x277e   :  { %v8345_v54 = vmul.f32 %v13062_v41, %v8236_v28  ;;  %v8356_v16 = vmul.f32 %v10668_v15, %v8346_v58 }
0x2780   :  { %v8355_v35 = vmul.f32 %v10668_v15, %v8345_v54  ;;  %v8366_v4 = vadd.f32 %v10669_v55, %v8356_v16 }
0x2782   :  { %v8365_v52 = vadd.f32 %v10669_v55, %v8355_v35 }
0x2784   :  { %12538 = vmatprep.mubr.msk.f32.mxu1 %vm536_vm2, %v8365_v52 }
0x2785   :  { %12539 = vmatmul.mubr.msk.f32.vlgmr.msra.gmra.mxu1 %vm536_vm2, %v8366_v4 }
0x282a   :  { %v12513_v44 = vpop.f32.mrf.mxu0 }
0x282b   :  { %v8338_v56 = vadd.f32 1e-06, %v12513_v44 }
0x282c   :  { %v8332_v9 = vpop.f32.mrf.mxu0 }
0x282d   :  { %13063 = vrsqrt.f32 %v8338_v56  ;;  %v8333_v14 = vadd.f32 1e-06, %v8332_v9 }
0x282f   :  { %13065 = vrsqrt.f32 %v8333_v14 }
0x283a   :  { %v13064_v25 = vpop.eup %13063 }
0x283b   :  { %v8348_v39 = vmul.f32 %v13064_v25, %v8239_v6 }
0x283c   :  { %v13066_v60 = vpop.eup %13065 }
0x283d   :  { %v8347_v8 = vmul.f32 %v13066_v60, %v8238_v36  ;;  %v8358_v29 = vmul.f32 %v10668_v15, %v8348_v39 }
0x283f   :  { %v8357_v1 = vmul.f32 %v10668_v15, %v8347_v8  ;;  %v8368_v38 = vadd.f32 %v10669_v55, %v8358_v29 }
0x2841   :  { %v8367_v30 = vadd.f32 %v10669_v55, %v8357_v1 }
0x2843   :  { %12541 = vmatprep.mubr.msk.f32.mxu1 %vm536_vm2, %v8367_v30  ;;  %v15656_v30 = vld [vmem:[%s13271_s29 + $0x20] sm:$0xff] }
0x2844   :  { %12542 = vmatmul.mubr.msk.f32.gmra.mxu1 %vm536_vm2, %v8368_v38  ;;  %v15661_v38 = vld [vmem:[%s13271_s29 + $0x18] sm:$0xff] }
0x2845   :  { %v12540_v26 = vpop.f32.mrf.mxu1 }
0x2846   :  { %v8510_v20 = vadd.f32 %v12540_v26, %v15645_v63  ;;  %v15666_v26 = vld [vmem:[%s13271_s29 + $0x10] sm:$0xff] }
0x2847   :  { %v8504_v18 = vpop.f32.mrf.mxu1 }
0x2848   :  { %v8528_v23 = vmul.f32 0.70710677, %v8510_v20  ;;  %v8505_v53 = vadd.f32 %v15645_v63, %v8504_v18  ;;  %v8524_v8 = vmul.f32 0.5, %v8510_v20  ;;  %v15671_v20 = vld [vmem:[%s13271_s29 + $0x8] sm:$0xff]  ;;  %s13149_s29 = smov 24  }
0x2849   :  { %s10127_s2 = sld [smem:[%s15876_s0 + %s13149_s29]]   ;;  %s13165_s29 = smov 35  }
0x284a   :  { %v8540_v50 = vand.u32 2147483647, %v8528_v23  ;;  %v8527_v28 = vmul.f32 0.70710677, %v8505_v53  ;;  %vm8532_vm9 = vcmp.ge.f32.partialorder %v8528_v23, 0.0  ;;  %v8523_v39 = vmul.f32 0.5, %v8505_v53 }
0x284b   :  { %v8536_v61 = vsel %vm8532_vm9, 1.0, %v13146_v57 }
0x284c   :  { %v8544_v37 = vmul.f32 0.3275911, %v8540_v50  ;;  %v8539_v17 = vand.u32 2147483647, %v8527_v28  ;;  %v8596_v27 = vsub.f32 0.0, %v8540_v50  ;;  %vm8531_vm10 = vcmp.ge.f32.partialorder %v8527_v28, 0.0 }
0x284d   :  { %v8535_v9 = vsel %vm8531_vm10, 1.0, %v13146_v57 }
0x284e   :  { %v8548_v46 = vadd.f32 1.0, %v8544_v37  ;;  %v8543_v48 = vmul.f32 0.3275911, %v8539_v17  ;;  %v8595_v21 = vsub.f32 0.0, %v8539_v17  ;;  %v8600_v40 = vmul.f32 %v8596_v27, %v8540_v50 }
0x2850   :  { %13067 = vrcp.f32 %v8548_v46  ;;  %v8547_v31 = vadd.f32 1.0, %v8543_v48  ;;  %v8599_v45 = vmul.f32 %v8595_v21, %v8539_v17  ;;  %v8605_v32 = vmul.f32 1.442695, %v8600_v40 }
0x2852   :  { %13069 = vrcp.f32 %v8547_v31  ;;  %v8603_v59 = vmul.f32 1.442695, %v8599_v45 }
0x2853   :  { %13071 = vpow2.f32 %v8605_v32 }
0x2854   :  { %13073 = vpow2.f32 %v8603_v59 }
0x285d   :  { %v13068_v5 = vpop.eup %13067 }
0x285e   :  { %v8560_v43 = vmul.f32 1.0614054, %v13068_v5 }
0x285f   :  { %v13070_v6 = vpop.eup %13069 }
0x2860   :  { %v8564_v10 = vadd.f32 -1.4531521, %v8560_v43  ;;  %v8559_v36 = vmul.f32 1.0614054, %v13070_v6  ;;  %v13072_v52 = vpop.eup %13071 }
0x2861   :  { %v13074_v12 = vpop.eup %13073 }
0x2862   :  { %v8568_v7 = vmul.f32 %v13068_v5, %v8564_v10  ;;  %v8563_v49 = vadd.f32 -1.4531521, %v8559_v36 }
0x2864   :  { %v8572_v19 = vadd.f32 1.4214138, %v8568_v7  ;;  %v8567_v11 = vmul.f32 %v13070_v6, %v8563_v49 }
0x2866   :  { %v8576_v24 = vmul.f32 %v13068_v5, %v8572_v19  ;;  %v8571_v62 = vadd.f32 1.4214138, %v8567_v11 }
0x2868   :  { %v8580_v58 = vadd.f32 -0.28449672, %v8576_v24  ;;  %v8575_v15 = vmul.f32 %v13070_v6, %v8571_v62 }
0x286a   :  { %v8584_v41 = vmul.f32 %v13068_v5, %v8580_v58  ;;  %v8579_v54 = vadd.f32 -0.28449672, %v8575_v15 }
0x286c   :  { %v8588_v16 = vadd.f32 0.2548296, %v8584_v41  ;;  %v8583_v55 = vmul.f32 %v13070_v6, %v8579_v54 }
0x286e   :  { %v8592_v35 = vmul.f32 %v13068_v5, %v8588_v16  ;;  %v8587_v4 = vadd.f32 0.2548296, %v8583_v55 }
0x2870   :  { %v8612_v22 = vmul.f32 %v13072_v52, %v8592_v35  ;;  %v8591_v0 = vmul.f32 %v13070_v6, %v8587_v4 }
0x2872   :  { %v8616_v42 = vsub.f32 1.0, %v8612_v22  ;;  %v8611_v3 = vmul.f32 %v13074_v12, %v8591_v0 }
0x2874   :  { %v8620_v44 = vmul.f32 %v8616_v42, %v8536_v61  ;;  %v8615_v56 = vsub.f32 1.0, %v8611_v3 }
0x2876   :  { %v8619_v14 = vmul.f32 %v8615_v56, %v8535_v9  ;;  %v8624_v25 = vadd.f32 1.0, %v8620_v44 }
0x2878   :  { %v8623_v60 = vadd.f32 1.0, %v8619_v14  ;;  %v8628_v1 = vmul.f32 %v8624_v25, %v8524_v8 }
0x287a   :  { %v8627_v29 = vmul.f32 %v8623_v60, %v8523_v39 }
0x287c   :  { %12556 = vmatprep.mubr.msk.f32.mxu0 %vm4520_vm4, %v8627_v29 }
0x287d   :  { %12557 = vmatmul.mubr.msk.f32.vlgmr.msra.gmra.mxu0 %vm4520_vm4, %v8628_v1 }
0x287e   :  { %12563 = vmatpush3.msra.mxu0 %v15640_v34 }
0x287f   :  { %12564 = vmatprep.subr.mxu0 %v15656_v30 }
0x2880   :  { %12565 = vmatpush3.msra.mxu0 %v15656_v30 }
0x2881   :  { %12566 = vmatprep.subr.mxu0 %v15661_v38 }
0x2882   :  { %12567 = vmatpush3.msra.mxu0 %v15661_v38 }
0x2883   :  { %12568 = vmatprep.subr.mxu0 %v15666_v26 }
0x2884   :  { %12569 = vmatpush3.msra.mxu0 %v15666_v26 }
0x2885   :  { %12570 = vmatprep.subr.mxu0 %v15671_v20 }
0x2886   :  { %12571 = vmatpush3.msra.mxu0 %v15671_v20 }
0x2887   :  { %12572 = vmatprep.subr.mxu0 %v15530_v33 }
0x2888   :  { %12573 = vmatpush3.msra.mxu0 %v15530_v33 }
0x2889   :  { %12580 = vmatprep.subr.mxu0 %v15640_v34 }
0x2904   :  { %v12543_v18 = vpop.f32.mrf.mxu1 }
0x2905   :  { %v8520_v23 = vadd.f32 %v12543_v18, %v15645_v63 }
0x2906   :  { %v8514_v53 = vpop.f32.mrf.mxu1 }
0x2907   :  { %v8530_v50 = vmul.f32 0.70710677, %v8520_v23  ;;  %v8515_v28 = vadd.f32 %v15645_v63, %v8514_v53  ;;  %v8526_v29 = vmul.f32 0.5, %v8520_v23  ;;  %v10707_v53 = vld [vmem:[%s14461_s10 + $0x1] ss:$0 sm:$0xff]  ;;  %s10132_s10 = sld [smem:[%s15876_s0 + %s13163_s5]]  }
0x2909   :  { %v8542_v37 = vand.u32 2147483647, %v8530_v50  ;;  %v8529_v17 = vmul.f32 0.70710677, %v8515_v28  ;;  %vm8534_vm11 = vcmp.ge.f32.partialorder %v8530_v50, 0.0  ;;  %v8525_v60 = vmul.f32 0.5, %v8515_v28 }
0x290a   :  { %v8538_v3 = vsel %vm8534_vm11, 1.0, %v13146_v57 }
0x290b   :  { %v8546_v46 = vmul.f32 0.3275911, %v8542_v37  ;;  %v8541_v48 = vand.u32 2147483647, %v8529_v17  ;;  %v8598_v40 = vsub.f32 0.0, %v8542_v37  ;;  %vm8533_vm12 = vcmp.ge.f32.partialorder %v8529_v17, 0.0 }
0x290c   :  { %v8537_v14 = vsel %vm8533_vm12, 1.0, %v13146_v57 }
0x290d   :  { %v8550_v31 = vadd.f32 1.0, %v8546_v46  ;;  %v8545_v27 = vmul.f32 0.3275911, %v8541_v48  ;;  %v8597_v5 = vsub.f32 0.0, %v8541_v48  ;;  %v8602_v45 = vmul.f32 %v8598_v40, %v8542_v37 }
0x290f   :  { %13075 = vrcp.f32 %v8550_v31  ;;  %v8549_v21 = vadd.f32 1.0, %v8545_v27  ;;  %v8601_v32 = vmul.f32 %v8597_v5, %v8541_v48  ;;  %v8609_v10 = vmul.f32 1.442695, %v8602_v45 }
0x2911   :  { %13077 = vrcp.f32 %v8549_v21  ;;  %v8607_v63 = vmul.f32 1.442695, %v8601_v32 }
0x2912   :  { %13079 = vpow2.f32 %v8609_v10 }
0x2913   :  { %13081 = vpow2.f32 %v8607_v63  ;;  %v10726_v63 = vld [vmem:[%s10125_s14] ss:$0 sm:$0xff] }
0x291c   :  { %v13076_v43 = vpop.eup %13075 }
0x291d   :  { %v8562_v6 = vmul.f32 1.0614054, %v13076_v43 }
0x291e   :  { %v13078_v36 = vpop.eup %13077 }
0x291f   :  { %v8566_v59 = vadd.f32 -1.4531521, %v8562_v6  ;;  %v8561_v7 = vmul.f32 1.0614054, %v13078_v36  ;;  %v13080_v4 = vpop.eup %13079 }
0x2920   :  { %v13082_v42 = vpop.eup %13081 }
0x2921   :  { %v8570_v49 = vmul.f32 %v13076_v43, %v8566_v59  ;;  %v8565_v19 = vadd.f32 -1.4531521, %v8561_v7 }
0x2923   :  { %v8574_v11 = vadd.f32 1.4214138, %v8570_v49  ;;  %v8569_v24 = vmul.f32 %v13078_v36, %v8565_v19 }
0x2925   :  { %v8578_v62 = vmul.f32 %v13076_v43, %v8574_v11  ;;  %v8573_v58 = vadd.f32 1.4214138, %v8569_v24  ;;  %v10727_v24 = vld [vmem:[%s10126_s20] ss:$0 sm:$0xff] }
0x2927   :  { %v8582_v15 = vadd.f32 -0.28449672, %v8578_v62  ;;  %v8577_v41 = vmul.f32 %v13078_v36, %v8573_v58 }
0x2929   :  { %v8586_v54 = vmul.f32 %v13076_v43, %v8582_v15  ;;  %v8581_v16 = vadd.f32 -0.28449672, %v8577_v41  ;;  %v13153_v41 = vmov 0.0  }
0x292b   :  { %v8590_v55 = vadd.f32 0.2548296, %v8586_v54  ;;  %v8585_v35 = vmul.f32 %v13078_v36, %v8581_v16  ;;  %v9127_v54 = vld [vmem:[%s10136_s25 + $0x18] sm:$0xff]  ;;  %v9126_v16 = vld [vmem:[%s10136_s25 + $0x10] sm:$0xff] }
0x292d   :  { %v8594_v52 = vmul.f32 %v13076_v43, %v8590_v55  ;;  %v8589_v22 = vadd.f32 0.2548296, %v8585_v35  ;;  %v9125_v55 = vld [vmem:[%s10136_s25 + $0x8] sm:$0xff]  ;;  %v9124_v35 = vld [vmem:[%s10136_s25] sm:$0xff] }
0x292f   :  { %v8614_v0 = vmul.f32 %v13080_v4, %v8594_v52  ;;  %v8593_v12 = vmul.f32 %v13078_v36, %v8589_v22  ;;  %v9351_v52 = vld [vmem:[%s15736_s1 + $0x8] sm:$0xff] }
0x2931   :  { %v8618_v61 = vsub.f32 1.0, %v8614_v0  ;;  %v8613_v44 = vmul.f32 %v13082_v42, %v8593_v12 }
0x2933   :  { %v8622_v56 = vmul.f32 %v8618_v61, %v8538_v3  ;;  %v8617_v9 = vsub.f32 1.0, %v8613_v44 }
0x2935   :  { %v8621_v25 = vmul.f32 %v8617_v9, %v8537_v14  ;;  %v8626_v39 = vadd.f32 1.0, %v8622_v56 }
0x2937   :  { %v8625_v8 = vadd.f32 1.0, %v8621_v25  ;;  %v8630_v18 = vmul.f32 %v8626_v39, %v8526_v29 }
0x2939   :  { %v8629_v1 = vmul.f32 %v8625_v8, %v8525_v60  ;;  %v10733_v60 = vld [vmem:[%s10130_s8] ss:$0 sm:$0xff] }
0x293b   :  { %12559 = vmatprep.mubr.msk.f32.mxu0 %vm4520_vm4, %v8629_v1 }
0x293c   :  { %12560 = vmatmul.mubr.msk.f32.gmra.mxu0 %vm4520_vm4, %v8630_v18  ;;  %v10734_v18 = vld [vmem:[%s10133_s11] ss:$0 sm:$0xff] }
0x293d   :  { %v12558_v50 = vpop.f32.mrf.mxu0 }
0x293e   :  { %v8748_v37 = vadd.f32 %v12558_v50, %v10707_v53 }
0x293f   :  { %v8742_v17 = vpop.f32.mrf.mxu0 }
0x2940   :  { %v8743_v46 = vadd.f32 %v10707_v53, %v8742_v17  ;;  %v8762_v57 = vadd.f32 %v8748_v37, %v15546_v51 }
0x2942   :  { %v8761_v48 = vadd.f32 %v8743_v46, %v15543_v13 }
0x2944   :  { %12574 = vmatprep.mubr.msk.f32.mxu0 %vm536_vm2, %v8761_v48 }
0x2945   :  { %12575 = vmatmul.mubr.msk.f32.vlgmr.msra.gmra.mxu0 %vm536_vm2, %v8762_v57 }
0x2946   :  { %12581 = vmatpush3.msra.mxu0 %v15640_v34 }
0x2947   :  { %12582 = vmatprep.subr.mxu0 %v15656_v30 }
0x2948   :  { %12583 = vmatpush3.msra.mxu0 %v15656_v30 }
0x2949   :  { %12584 = vmatprep.subr.mxu0 %v15661_v38 }
0x294a   :  { %12585 = vmatpush3.msra.mxu0 %v15661_v38 }
0x294b   :  { %12586 = vmatprep.subr.mxu0 %v15666_v26 }
0x294c   :  { %12587 = vmatpush3.msra.mxu0 %v15666_v26 }
0x294d   :  { %12588 = vmatprep.subr.mxu0 %v15671_v20 }
0x294e   :  { %12589 = vmatpush3.msra.mxu0 %v15671_v20 }
0x294f   :  { %12590 = vmatprep.subr.mxu0 %v15530_v33 }
0x2950   :  { %12591 = vmatpush3.msra.mxu0 %v15530_v33  ;;  %v8997_v33 = vld [vmem:[%s10127_s2] sm:$0xff]  ;;  %s10138_s2 = sld [smem:[%s15876_s0 + %s13165_s29]]  }
0x2951   :  { %12598 = vmatprep.subr.msk.mxu0 %vm536_vm2, %v8997_v33  ;;  %12668 = vmatprep.subr.msk.mxu1 %vm536_vm2, %v8997_v33 }
0x2952   :  { %12669 = vmatpush3.xpose.msk.msra.mxu1 %vm536_vm2, %v8997_v33 }
0x2953   :  { %9304 = vmatprep.subr.mxu1 %v9127_v54 }
0x29fc   :  { %v12561_v13 = vpop.f32.mrf.mxu0 }
0x29fd   :  { %v8758_v51 = vadd.f32 %v12561_v13, %v10707_v53  ;;  %v9708_v13 = vld [vmem:[%s10129_s23 + $0x8] sm:$0xff] }
0x29fe   :  { %v8752_v34 = vpop.f32.mrf.mxu0 }
0x29ff   :  { %v8753_v30 = vadd.f32 %v10707_v53, %v8752_v34  ;;  %v8764_v38 = vadd.f32 %v8758_v51, %v15576_v47  ;;  %v9707_v51 = vld [vmem:[%s10129_s23] sm:$0xff] }
0x2a01   :  { %v8763_v23 = vadd.f32 %v8753_v30, %v15573_v2 }
0x2a03   :  { %12577 = vmatprep.mubr.msk.f32.mxu0 %vm536_vm2, %v8763_v23 }
0x2a04   :  { %12578 = vmatmul.mubr.msk.f32.gmra.mxu0 %vm536_vm2, %v8764_v38 }
0x2a05   :  { %v12576_v26 = vpop.f32.mrf.mxu0 }
0x2a06   :  { %v8865_v28 = vsub.f32 %v8762_v57, %v12576_v26  ;;  %v9709_v57 = vld [vmem:[%s10129_s23 + $0x10] sm:$0xff] }
0x2a07   :  { %v8845_v31 = vpop.f32.mrf.mxu0 }
0x2a08   :  { %v8864_v20 = vsub.f32 %v8761_v48, %v8845_v31  ;;  %v8869_v21 = vmul.f32 %v8865_v28, %v8865_v28  ;;  %v9350_v48 = vld [vmem:[%s15736_s1] sm:$0xff] }
0x2a0a   :  { %v8868_v27 = vmul.f32 %v8864_v20, %v8864_v20 }
0x2a0c   :  { %12592 = vmatprep.mubr.msk.f32.mxu0 %vm536_vm2, %v8868_v27  ;;  %v9128_v27 = vld [vmem:[%s15778_s12] sm:$0xff] }
0x2a0d   :  { %12593 = vmatmul.mubr.msk.f32.vlgmr.msra.gmra.mxu0 %vm536_vm2, %v8869_v21 }
0x2a0e   :  { %12599 = vmatpush3.xpose.msk.msra.mxu0 %vm536_vm2, %v8997_v33  ;;  %v9129_v33 = vld [vmem:[%s15778_s12 + $0x8] sm:$0xff] }
0x2a0f   :  { %9193 = vmatprep.subr.mxu0 %v9127_v54 }
0x2ac4   :  { %v12579_v2 = vpop.f32.mrf.mxu0 }
0x2ac5   :  { %v8867_v47 = vsub.f32 %v8764_v38, %v12579_v2 }
0x2ac6   :  { %v8855_v40 = vpop.f32.mrf.mxu0 }
0x2ac7   :  { %v8866_v5 = vsub.f32 %v8763_v23, %v8855_v40  ;;  %v8871_v43 = vmul.f32 %v8867_v47, %v8867_v47 }
0x2ac9   :  { %v8870_v45 = vmul.f32 %v8866_v5, %v8866_v5 }
0x2acb   :  { %12595 = vmatprep.mubr.msk.f32.mxu0 %vm536_vm2, %v8870_v45  ;;  %v10747_v45 = vld [vmem:[%s10131_s22] ss:$0 sm:$0xff]  ;;  %s10143_s22 = sld [smem:[%s15876_s0 + %s13168_s18]]  }
0x2acc   :  { %12596 = vmatmul.mubr.msk.f32.gmra.mxu0 %vm536_vm2, %v8871_v43 }
0x2acd   :  { %v12594_v32 = vpop.f32.mrf.mxu0 }
0x2ace   :  { %v8956_v6 = vadd.f32 1e-06, %v12594_v32 }
0x2acf   :  { %v8950_v10 = vpop.f32.mrf.mxu0 }
0x2ad0   :  { %13083 = vrsqrt.f32 %v8956_v6  ;;  %v8951_v36 = vadd.f32 1e-06, %v8950_v10 }
0x2ad2   :  { %13085 = vrsqrt.f32 %v8951_v36  ;;  %v10748_v36 = vld [vmem:[%s10134_s28] ss:$0 sm:$0xff] }
0x2add   :  { %v13084_v59 = vpop.eup %13083 }
0x2ade   :  { %v8974_v7 = vmul.f32 %v13084_v59, %v8865_v28 }
0x2adf   :  { %v13086_v49 = vpop.eup %13085 }
0x2ae0   :  { %v8973_v19 = vmul.f32 %v13086_v49, %v8864_v20  ;;  %v8984_v11 = vmul.f32 %v10726_v63, %v8974_v7  ;;  %v9469_v49 = vld [vmem:[%s10137_s4] sm:$0xff] }
0x2ae2   :  { %v8983_v62 = vmul.f32 %v10726_v63, %v8973_v19  ;;  %v15723_v15 = vadd.f32 %v10727_v24, %v8984_v11 }
0x2ae4   :  { %v15721_v58 = vadd.f32 %v10727_v24, %v8983_v62 }
0x2ae6   :  { %12600 = vmatprep.mubr.msk.f32.mxu0 %vm536_vm2, %v15721_v58 }
0x2ae7   :  { %12601 = vmatmul.mubr.msk.f32.vlgmr.msra.gmra.mxu0 %vm536_vm2, %v15723_v15 }
0x2ae8   :  { %9229 = vmatprep.mubr.f32.mxu0 %v13153_v41  ;;  %9194 = vmatpush1.msra.mxu0 %v9126_v16 }
0x2ae9   :  { %9195 = vmatprep.subr.mxu0 %v9125_v55 }
0x2aea   :  { %9196 = vmatpush1.msra.mxu0 %v9124_v35 }
0x2aeb   :  { %12606 = vmatprep.subr.msk.mxu0 %vm536_vm2, %v9351_v52 }
0x2b8c   :  { %v12597_v4 = vpop.f32.mrf.mxu0 }
0x2b8d   :  { %v8966_v22 = vadd.f32 1e-06, %v12597_v4 }
0x2b8e   :  { %v8960_v0 = vpop.f32.mrf.mxu0 }
0x2b8f   :  { %13087 = vrsqrt.f32 %v8966_v22  ;;  %v8961_v12 = vadd.f32 1e-06, %v8960_v0 }
0x2b91   :  { %13089 = vrsqrt.f32 %v8961_v12 }
0x2b9c   :  { %v13088_v42 = vpop.eup %13087 }
0x2b9d   :  { %v8976_v61 = vmul.f32 %v13088_v42, %v8867_v47  ;;  %v10765_v42 = vld [vmem:[%s10135_s19] ss:$0 sm:$0xff] }
0x2b9e   :  { %v13090_v3 = vpop.eup %13089 }
0x2b9f   :  { %v8975_v44 = vmul.f32 %v13090_v3, %v8866_v5  ;;  %v8986_v56 = vmul.f32 %v10726_v63, %v8976_v61 }
0x2ba1   :  { %v8985_v9 = vmul.f32 %v10726_v63, %v8975_v44  ;;  %v8996_v25 = vadd.f32 %v10727_v24, %v8986_v56  ;;  %v9470_v63 = vld [vmem:[%s10137_s4 + $0x8] sm:$0xff] }
0x2ba3   :  { %v8995_v14 = vadd.f32 %v10727_v24, %v8985_v9 }
0x2ba5   :  { %12603 = vmatprep.mubr.msk.f32.mxu1 %vm536_vm2, %v8995_v14 }
0x2ba6   :  { %12604 = vmatmul.mubr.msk.f32.vlgmr.msra.gmra.mxu1 %vm536_vm2, %v8996_v25 }
0x2ba7   :  { %v12602_v39 = vpop.f32.mrf.mxu0  ;;  %9305 = vmatpush1.msra.mxu1 %v9126_v16  ;;  %9340 = vmatprep.mubr.f32.mxu1 %v13153_v41 }
0x2ba8   :  { %9306 = vmatprep.subr.mxu1 %v9125_v55  ;;  %v9106_v29 = vmul.f32 %v12602_v39, %v10733_v60 }
0x2ba9   :  { %v9079_v8 = vpop.f32.mrf.mxu0  ;;  %9307 = vmatpush1.msra.mxu1 %v9124_v35 }
0x2baa   :  { %v9105_v1 = vmul.f32 %v10733_v60, %v9079_v8  ;;  %v9117_v50 = vadd.f32 %v10734_v18, %v9106_v29  ;;  %12616 = vmatprep.subr.mxu1 %v9470_v63 }
0x2bac   :  { %v9116_v53 = vadd.f32 %v10734_v18, %v9105_v1  ;;  %v9121_v17 = vmax.f32 %v9117_v50, 0.0 }
0x2bae   :  { %v9120_v37 = vmax.f32 %v9116_v53, 0.0 }
0x2bb0   :  { %9130 = vxpose.xlu0.b32.start [1/2] (short) (narrow) %v9120_v37, 8  ;;  %v9831_v37 = vld [vmem:[%s10138_s2 + $0x8] sm:$0xff] }
0x2bb4   :  { %9131 = vxpose.xlu0.b32.end [2/2] (short) (narrow) %v9121_v17, 8 }
0x2c2c   :  { %v9146_v46 = vpop.trf.xlu0 }
0x2c2d   :  { %10735 = vmatmul.mubr.msk.f32.vlgmr.msra.gmra.mxu0 %vm1555_vm3, %v9146_v46  ;;  %v9830_v46 = vld [vmem:[%s10138_s2] sm:$0xff] }
0x2c2e   :  { %12607 = vmatpush3.xpose.msk.msra.mxu0 %vm536_vm2, %v9351_v52  ;;  %12610 = vmatprep.mubr.msk.f32.mxu0 %vm536_vm2, %v15721_v58  ;;  %v10764_v52 = vld [vmem:[%s10132_s10] ss:$0 sm:$0xff] }
0x2c2f   :  { %12608 = vmatprep.subr.msk.mxu0 %vm536_vm2, %v9350_v48 }
0x2c32   :  { %12609 = vmatpush3.xpose.msk.msra.mxu0 %vm536_vm2, %v9350_v48 }
0x2c33   :  { %12630 = vmatprep.subr.msk.mxu0 %vm536_vm2, %v9709_v57 }
0x2c35   :  { %12611 = vmatmul.mubr.msk.f32.vlgmr.msra.gmra.mxu0 %vm536_vm2, %v15723_v15 }
0x2c36   :  { %12613 = vmatprep.mubr.msk.f32.mxu0 %vm536_vm2, %v8995_v14  ;;  %12631 = vmatpush3.xpose.msk.msra.mxu0 %vm536_vm2, %v9709_v57 }
0x2c37   :  { %12632 = vmatprep.subr.msk.mxu0 %vm536_vm2, %v9708_v13 }
0x2c39   :  { %12614 = vmatmul.mubr.msk.f32.gmra.mxu0 %vm536_vm2, %v8996_v25 }
0x2c3a   :  { %12633 = vmatpush3.xpose.msk.msra.mxu0 %vm536_vm2, %v9708_v13  ;;  %12636 = vmatprep.mubr.msk.f32.mxu0 %vm536_vm2, %v15721_v58 }
0x2c3b   :  { %12634 = vmatprep.subr.msk.mxu0 %vm536_vm2, %v9707_v51 }
0x2c3e   :  { %12635 = vmatpush3.xpose.msk.msra.mxu0 %vm536_vm2, %v9707_v51 }
0x2c41   :  { %12637 = vmatmul.mubr.msk.f32.vlgmr.msra.gmra.mxu0 %vm536_vm2, %v15723_v15 }
0x2c42   :  { %12639 = vmatprep.mubr.msk.f32.mxu0 %vm536_vm2, %v8995_v14 }
0x2c45   :  { %12640 = vmatmul.mubr.msk.f32.gmra.mxu0 %vm536_vm2, %v8996_v25 }
0x2c66   :  { %v12605_v34 = vpop.f32.mrf.mxu1 }
0x2c67   :  { %v9108_v23 = vmul.f32 %v12605_v34, %v10733_v60 }
0x2c68   :  { %v9089_v30 = vpop.f32.mrf.mxu1 }
0x2c69   :  { %v9107_v38 = vmul.f32 %v10733_v60, %v9089_v30  ;;  %v9119_v28 = vadd.f32 %v10734_v18, %v9108_v23  ;;  %v10736_v23 = vld [vmem:[%s15778_s12 + $0x10] sm:$0xff] }
0x2c6b   :  { %v9118_v26 = vadd.f32 %v10734_v18, %v9107_v38  ;;  %v9123_v20 = vmax.f32 %v9119_v28, 0.0 }
0x2c6d   :  { %v9122_v31 = vmax.f32 %v9118_v26, 0.0  ;;  %v10737_v26 = vld [vmem:[%s15778_s12 + $0x18] sm:$0xff]  ;;  %s15847_s12 = sld [smem:[%s15876_s0 + %s13169_s24]]  }
0x2c6f   :  { %9241 = vxpose.xlu1.b32.start [1/2] (short) (narrow) %v9122_v31, 8 }
0x2c73   :  { %9242 = vxpose.xlu1.b32.end [2/2] (short) (narrow) %v9123_v20, 8 }
0x2ceb   :  { %v9257_v10 = vpop.trf.xlu1 }
0x2cec   :  { %10738 = vmatmul.mubr.msk.f32.vlgmr.msra.gmra.mxu1 %vm1555_vm3, %v9257_v10 }
0x2ced   :  { %v9231_v21 = vpop.f32.mrf.mxu0  ;;  %12617 = vmatpush3.msra.mxu1 %v9470_v63 }
0x2cee   :  { %v9232_v2 = vadd.f32 %v9231_v21, %v9128_v27  ;;  %12618 = vmatprep.subr.mxu1 %v9469_v49  ;;  %v9471_v21 = vld [vmem:[%s10140_s16] sm:$0xff] }
0x2cef   :  { %v9233_v47 = vpop.f32.mrf.mxu0  ;;  %12619 = vmatpush3.msra.mxu1 %v9469_v49 }
0x2cf0   :  { %9236 = vst [vmem:[%s15783_s17] sm:$0xff] %v9232_v2  ;;  %v9234_v40 = vadd.f32 %v9233_v47, %v9129_v33  ;;  %12623 = vmatprep.subr.mxu1 %v9470_v63  ;;  %v10752_v47 = vld [vmem:[%s10140_s16 + $0x18] sm:$0xff] }
0x2cf2   :  { %9237 = vst [vmem:[%s15783_s17 + $0x8] sm:$0xff] %v9234_v40 }
0x2cf5   :  { %v12612_v5 = vpop.f32.mrf.mxu0 }
0x2cf6   :  { %v9451_v32 = vmul.f32 %v12612_v5, %v10747_v45 }
0x2cf7   :  { %v9424_v43 = vpop.f32.mrf.mxu0 }
0x2cf8   :  { %v9450_v6 = vmul.f32 %v10747_v45, %v9424_v43  ;;  %v9462_v11 = vadd.f32 %v10748_v36, %v9451_v32 }
0x2cf9   :  { %v12615_v59 = vpop.f32.mrf.mxu0 }
0x2cfa   :  { %v9461_v7 = vadd.f32 %v10748_v36, %v9450_v6  ;;  %v9453_v62 = vmul.f32 %v12615_v59, %v10747_v45  ;;  %v9466_v54 = vmax.f32 %v9462_v11, 0.0  ;;  %v9832_v6 = vld [vmem:[%s15847_s12] sm:$0xff] }
0x2cfb   :  { %v9434_v19 = vpop.f32.mrf.mxu0 }
0x2cfc   :  { %v9465_v24 = vmax.f32 %v9461_v7, 0.0  ;;  %v9452_v58 = vmul.f32 %v10747_v45, %v9434_v19  ;;  %v9464_v16 = vadd.f32 %v10748_v36, %v9453_v62  ;;  %v10751_v45 = vld [vmem:[%s10140_s16 + $0x10] sm:$0xff] }
0x2cfe   :  { %v9463_v15 = vadd.f32 %v10748_v36, %v9452_v58  ;;  %9473 = vxpose.xlu0.b32.start [1/2] (short) (narrow) %v9465_v24, 16  ;;  %v9468_v22 = vmax.f32 %v9464_v16, 0.0  ;;  %v9834_v24 = vld [vmem:[%s15847_s12 + $0x10] sm:$0xff] }
0x2d00   :  { %v9467_v55 = vmax.f32 %v9463_v15, 0.0 }
0x2d01   :  { %v12638_v35 = vpop.f32.mrf.mxu0 }
0x2d02   :  { %9474 = vxpose.xlu0.b32.end [2/2] (short) (narrow) %v9466_v54, 16  ;;  %9591 = vxpose.xlu1.b32.start [1/2] (short) (narrow) %v9467_v55, 16  ;;  %v9812_v0 = vmul.f32 %v12638_v35, %v10764_v52  ;;  %v10769_v54 = vld [vmem:[%s15847_s12 + $0x18] sm:$0xff] }
0x2d03   :  { %v9785_v4 = vpop.f32.mrf.mxu0 }
0x2d04   :  { %v9811_v12 = vmul.f32 %v10764_v52, %v9785_v4  ;;  %v9823_v56 = vadd.f32 %v10765_v42, %v9812_v0 }
0x2d05   :  { %v12641_v61 = vpop.f32.mrf.mxu0 }
0x2d06   :  { %v9822_v3 = vadd.f32 %v10765_v42, %v9811_v12  ;;  %9592 = vxpose.xlu1.b32.end [2/2] (short) (narrow) %v9468_v22, 16  ;;  %v9814_v14 = vmul.f32 %v12641_v61, %v10764_v52  ;;  %v9827_v60 = vmax.f32 %v9823_v56, 0.0  ;;  %v10771_v12 = vld [vmem:[%s15847_s12 + $0x28] sm:$0xff] }
0x2d07   :  { %v9795_v44 = vpop.f32.mrf.mxu0 }
0x2d08   :  { %v9826_v9 = vmax.f32 %v9822_v3, 0.0  ;;  %v9813_v25 = vmul.f32 %v10764_v52, %v9795_v44  ;;  %v9825_v8 = vadd.f32 %v10765_v42, %v9814_v14  ;;  %v10770_v52 = vld [vmem:[%s15847_s12 + $0x20] sm:$0xff] }
0x2d0a   :  { %v9824_v39 = vadd.f32 %v10765_v42, %v9813_v25  ;;  %9835 = vxpose.xlu0.b32.start [1/2] (short) (narrow) %v9826_v9, 24  ;;  %v9829_v1 = vmax.f32 %v9825_v8, 0.0 }
0x2d0c   :  { %v9828_v29 = vmax.f32 %v9824_v39, 0.0 }
0x2d0e   :  { %9836 = vxpose.xlu0.b32.end [2/2] (short) (narrow) %v9827_v60, 24  ;;  %9963 = vxpose.xlu1.b32.start [1/2] (short) (narrow) %v9828_v29, 24 }
0x2d12   :  { %9964 = vxpose.xlu1.b32.end [2/2] (short) (narrow) %v9829_v1, 24 }
0x2d7a   :  { %v9489_v18 = vpop.trf.xlu0 }
0x2d7b   :  { %12620 = vmatprep.mubr.msk.f32.mxu1 %vm1555_vm3, %v9489_v18 }
0x2d7e   :  { %v9490_v53 = vpop.trf.xlu0  ;;  %v9607_v50 = vpop.trf.xlu1 }
0x2d7f   :  { %12621 = vmatmul.mubr.msk.f32.vlgmr.msra.gmra.mxu1 %vm1555_vm3, %v9490_v53 }
0x2d80   :  { %12624 = vmatpush3.msra.mxu1 %v9470_v63  ;;  %12627 = vmatprep.mubr.msk.f32.mxu1 %vm1555_vm3, %v9607_v50  ;;  %v9833_v63 = vld [vmem:[%s15847_s12 + $0x8] sm:$0xff] }
0x2d81   :  { %12625 = vmatprep.subr.mxu1 %v9469_v49 }
0x2d82   :  { %12626 = vmatpush3.msra.mxu1 %v9469_v49  ;;  %v9608_v17 = vpop.trf.xlu1 }
0x2d83   :  { %12628 = vmatmul.mubr.msk.f32.vlgmr.msra.gmra.mxu1 %vm1555_vm3, %v9608_v17  ;;  %12642 = vmatprep.subr.mxu1 %v13153_v41 }
0x2d84   :  { %12643 = vmatpush3.msra.mxu1 %v9831_v37  ;;  %12646 = vmatprep.mubr.msk.f32.mxu1 %vm13166_vm13, %v13153_v41 }
0x2d85   :  { %12644 = vmatprep.subr.mxu1 %v13153_v41 }
0x2d86   :  { %v9851_v48 = vpop.trf.xlu0  ;;  %12645 = vmatpush3.msra.mxu1 %v9830_v46 }
0x2d87   :  { %12647 = vmatmul.mubr.msk.f32.vlgmr.msra.gmra.mxu1 %vm1555_vm3, %v9851_v48  ;;  %12655 = vmatprep.subr.mxu1 %v13153_v41 }
0x2d88   :  { %12656 = vmatpush3.msra.mxu1 %v9831_v37  ;;  %12649 = vmatprep.mubr.msk.f32.mxu1 %vm13166_vm13, %v13153_v41 }
0x2d89   :  { %12657 = vmatprep.subr.mxu1 %v13153_v41 }
0x2d8a   :  { %v9852_v57 = vpop.trf.xlu0  ;;  %12658 = vmatpush3.msra.mxu1 %v9830_v46  ;;  %v9979_v13 = vpop.trf.xlu1 }
0x2d8b   :  { %12650 = vmatmul.mubr.msk.f32.gmra.mxu1 %vm1555_vm3, %v9852_v57 }
0x2d8c   :  { %12652 = vmatprep.mubr.msk.f32.mxu1 %vm13166_vm13, %v13153_v41 }
0x2d8e   :  { %v9853_v51 = vpop.trf.xlu0  ;;  %v9980_v34 = vpop.trf.xlu1 }
0x2d8f   :  { %12653 = vmatmul.mubr.msk.f32.gmra.mxu1 %vm1555_vm3, %v9853_v51 }
0x2d90   :  { %12659 = vmatprep.mubr.msk.f32.mxu1 %vm13166_vm13, %v13153_v41 }
0x2d92   :  { %v9981_v30 = vpop.trf.xlu1 }
0x2d93   :  { %12660 = vmatmul.mubr.msk.f32.vlgmr.msra.gmra.mxu1 %vm1555_vm3, %v9979_v13 }
0x2d94   :  { %12662 = vmatprep.mubr.msk.f32.mxu1 %vm13166_vm13, %v13153_v41 }
0x2d97   :  { %12663 = vmatmul.mubr.msk.f32.gmra.mxu1 %vm1555_vm3, %v9980_v34 }
0x2d98   :  { %12665 = vmatprep.mubr.msk.f32.mxu1 %vm13166_vm13, %v13153_v41  ;;  %v9472_v41 = vld [vmem:[%s10140_s16 + $0x8] sm:$0xff] }
0x2d9b   :  { %12666 = vmatmul.mubr.msk.f32.gmra.mxu1 %vm1555_vm3, %v9981_v30 }
0x2dac   :  { %v9342_v38 = vpop.f32.mrf.mxu1 }
0x2dad   :  { %v9343_v28 = vadd.f32 %v10736_v23, %v9342_v38 }
0x2dae   :  { %v9344_v31 = vpop.f32.mrf.mxu1 }
0x2daf   :  { %10739 = vst [vmem:[%s15783_s17 + $0x10] sm:$0xff] %v9343_v28  ;;  %v9345_v20 = vadd.f32 %v10737_v26, %v9344_v31 }
0x2db1   :  { %10740 = vst [vmem:[%s15783_s17 + $0x18] sm:$0xff] %v9345_v20  ;;  %s13170_s17 = smov 41  }
0x2db2   :  { %s15853_s1 = sld [smem:[%s15876_s0 + %s13170_s17]]  }
0x2e3f   :  { %v12622_v27 = vpop.f32.mrf.mxu1 }
0x2e40   :  { %v9583_v33 = vadd.f32 %v12622_v27, %v9472_v41 }
0x2e41   :  { %v9577_v2 = vpop.f32.mrf.mxu1 }
0x2e42   :  { %9587 = vst.msk [vmem:[%s10143_s22 + $0x8] sm:$0xff] %vm195_vm0, %v9583_v33  ;;  %v9578_v40 = vadd.f32 %v9577_v2, %v9471_v21 }
0x2e43   :  { %v12629_v5 = vpop.f32.mrf.mxu1 }
0x2e44   :  { %9586 = vst.msk [vmem:[%s10143_s22] sm:$0xff] %vm195_vm0, %v9578_v40  ;;  %v9701_v43 = vadd.f32 %v12629_v5, %v10752_v47 }
0x2e45   :  { %v9695_v32 = vpop.f32.mrf.mxu1 }
0x2e46   :  { %10756 = vst.msk [vmem:[%s10143_s22 + $0x18] sm:$0xff] %vm195_vm0, %v9701_v43  ;;  %v9696_v10 = vadd.f32 %v10751_v45, %v9695_v32 }
0x2e47   :  { %v9942_v36 = vpop.f32.mrf.mxu1 }
0x2e48   :  { %10755 = vst.msk [vmem:[%s10143_s22 + $0x10] sm:$0xff] %vm195_vm0, %v9696_v10  ;;  %v9943_v59 = vadd.f32 %v9942_v36, %v9832_v6 }
0x2e49   :  { %v12648_v7 = vpop.f32.mrf.mxu1 }
0x2e4a   :  { %9956 = vst.msk [vmem:[%s15853_s1] sm:$0xff] %vm1555_vm3, %v9943_v59 }
0x2e4b   :  { %v9947_v49 = vpop.f32.mrf.mxu1 }
0x2e4c   :  { %v9948_v19 = vadd.f32 %v9947_v49, %v9833_v63 }
0x2e4d   :  { %v12651_v11 = vpop.f32.mrf.mxu1 }
0x2e4e   :  { %9957 = vst.msk [vmem:[%s15853_s1 + $0x8] sm:$0xff] %vm1555_vm3, %v9948_v19 }
0x2e4f   :  { %v9952_v62 = vpop.f32.mrf.mxu1 }
0x2e50   :  { %v9953_v58 = vadd.f32 %v9952_v62, %v9834_v24 }
0x2e51   :  { %v12654_v15 = vpop.f32.mrf.mxu1 }
0x2e52   :  { %9958 = vst.msk [vmem:[%s15853_s1 + $0x10] sm:$0xff] %vm1555_vm3, %v9953_v58 }
0x2e53   :  { %v10070_v16 = vpop.f32.mrf.mxu1 }
0x2e54   :  { %v10071_v55 = vadd.f32 %v10769_v54, %v10070_v16 }
0x2e55   :  { %v12661_v35 = vpop.f32.mrf.mxu1 }
0x2e56   :  { %10775 = vst.msk [vmem:[%s15853_s1 + $0x18] sm:$0xff] %vm1555_vm3, %v10071_v55 }
0x2e57   :  { %v10075_v4 = vpop.f32.mrf.mxu1 }
0x2e58   :  { %v10076_v22 = vadd.f32 %v10770_v52, %v10075_v4 }
0x2e59   :  { %v12664_v0 = vpop.f32.mrf.mxu1 }
0x2e5a   :  { %10776 = vst.msk [vmem:[%s15853_s1 + $0x20] sm:$0xff] %vm1555_vm3, %v10076_v22 }
0x2e5b   :  { %v10080_v42 = vpop.f32.mrf.mxu1 }
0x2e5c   :  { %v10081_v61 = vadd.f32 %v10771_v12, %v10080_v42 }
0x2e5d   :  { %v12667_v3 = vpop.f32.mrf.mxu1 }
0x2e5e   :  { %10777 = vst.msk [vmem:[%s15853_s1 + $0x28] sm:$0xff] %vm1555_vm3, %v10081_v61 }

</bundles_post_ra>
